<compile_context>
chip_gen: v5e
topology: v5e:2x2
jax: 0.10.0
libtpu: 0.0.40
codegen_flags: <defaults>
</compile_context>

<pallas_src>
import jax
import jax.numpy as jnp
from jax import lax
from jax.experimental import pallas as pl
from jax.experimental.pallas import tpu as pltpu

MID = 32              # mid_channel in ResidualStack
NUM_CLASSES = 11      # all_radio128
H_IN = 2              # I/Q axis
W_IN = 128            # signal length
LQ = 32               # lanes per sample of one phase slab (128/4 == 64/2 == 32)
POOL_OUT = 2          # AdaptiveAvgPool1d(2)
FLAT = MID * POOL_OUT  # 64
HID = 128             # dense width
C_PAD = 128           # lane-dense padded logits width


def _relu(x):
    return jnp.maximum(x, 0.0)


def _bf16(x):
    return x.astype(jnp.bfloat16)


def _dot(a, b):
    return jnp.dot(a, b, preferred_element_type=jnp.float32)


# ---------------------------------------------------------------------------
# fused kernel: whole forward pass for one batch tile (TB samples along lanes)
# ---------------------------------------------------------------------------
def fused_kernel(x_ref, w1_ref, w2_ref, w3_ref, w4_ref, w5_ref,
                 v1_ref, v2_ref, v3_ref, v4_ref, v5_ref,
                 pool_ref, wd_ref, bd_ref, wc_ref, bc_ref, o_ref):
    N = x_ref.shape[-1]                                   # TB * LQ lanes
    lane_pos = lax.broadcasted_iota(jnp.int32, (1, N), 1) % LQ
    # Hoisted edge masks (valid lanes when reading x[:, k+1] / x[:, k-1]).
    mask_next = lane_pos < (LQ - 1)
    mask_prev = lane_pos >= 1

    def shift_q(x, d):
        # out[:, k] = x[:, k + d] inside each LQ-lane sample window, 0 outside.
        y = pltpu.roll(x, (-d) % N, axis=1)
        m = mask_next if d > 0 else mask_prev
        return jnp.where(m, y, 0.0)

    def phase_shift(phases, d):
        # +/-1 shift of the full-resolution signal expressed on its phase slabs.
        if d == 0:
            return list(phases)
        if d > 0:
            return list(phases[1:]) + [shift_q(phases[0], +1)]
        return [shift_q(phases[-1], -1)] + list(phases[:-1])

    def stack_taps(phases):
        # (3*MID, N) bf16 per phase; tap order dw=0,1,2 <-> shifts -1, 0, +1.
        sm = phase_shift(phases, -1)
        sp = phase_shift(phases, +1)
        return [jnp.concatenate([_bf16(sm[r]), _bf16(phases[r]), _bf16(sp[r])],
                                axis=0)
                for r in range(len(phases))]

    def conv2d(rows, w_ref, ph):
        # rows: list over H of phase lists; w_ref: (kh=2, MID, 3*MID) merged taps.
        h_in = len(rows)
        h_out = h_in + 2 * ph - 1
        nph = len(rows[0])
        w_dh = [w_ref[0], w_ref[1]]
        outs = [[None] * nph for _ in range(h_out)]
        for hin in range(h_in):
            stk = stack_taps(rows[hin])
            for r in range(nph):
                for dh in range(2):
                    i = hin - dh + ph          # output H row using this input row
                    if 0 <= i < h_out:
                        c = _dot(w_dh[dh], stk[r])
                        outs[i][r] = c if outs[i][r] is None else outs[i][r] + c
        return outs

    def conv1d(phases, w):
        stk = stack_taps(phases)
        return [_dot(w, s) for s in stk]

    # ---- stage 1: ResidualStack(first=True): Conv2d (2,3) + MaxPool2d(2,2) ----
    x = x_ref[...]                                        # (8, N): row = phase*2 + h
    w1 = w1_ref[...]                                      # (MID, 1)
    rows = [[w1 * x[r * 2 + h:r * 2 + h + 1, :] for r in range(4)]
            for h in range(H_IN)]                         # conv1: 1x1, 1 -> 32 ch

    sc = rows
    y = conv2d(rows, w2_ref, ph=1)                        # H: 2 -> 3
    y = [[_relu(t) for t in ph] for ph in y]
    y = conv2d(y, w3_ref, ph=0)                           # H: 3 -> 2
    y = [[_relu(a + b) for a, b in zip(ya, sa)] for ya, sa in zip(y, sc)]
    sc = y
    y = conv2d(y, w4_ref, ph=1)
    y = [[_relu(t) for t in ph] for ph in y]
    y = conv2d(y, w5_ref, ph=0)
    y = [[_relu(a + b) for a, b in zip(ya, sa)] for ya, sa in zip(y, sc)]

    # MaxPool2d((2,2),(2,2)): max over the two H rows, then over W pairs.
    hm = [jnp.maximum(y[0][r], y[1][r]) for r in range(4)]
    q = [jnp.maximum(hm[0], hm[1]), jnp.maximum(hm[2], hm[3])]   # 2 phases, len-64

    # ---- stage 2: ResidualStack (Conv1d, k=3) + MaxPool1d(2) ----
    v1 = v1_ref[...]
    z = [_dot(v1, _bf16(q[r])) for r in range(2)]          # conv1: 1x1, 32 -> 32
    sc2 = z
    z = [_relu(t) for t in conv1d(z, v2_ref[...])]
    z = [_relu(a + b) for a, b in zip(conv1d(z, v3_ref[...]), sc2)]
    sc2 = z
    z = [_relu(t) for t in conv1d(z, v4_ref[...])]
    z = [_relu(a + b) for a, b in zip(conv1d(z, v5_ref[...]), sc2)]

    r32 = jnp.maximum(z[0], z[1])       # (MID, N): length-32 signal, natural order

    # ---- AdaptiveAvgPool1d(2) + dense(64->128) + classifier (padded to 128) ----
    tb = N // LQ
    feats = _dot(_bf16(r32), pool_ref[...])               # (MID, 2*tb)
    gt = jnp.concatenate([feats[:, :tb].T, feats[:, tb:].T], axis=1)  # (tb, 64)
    hidden = _dot(_bf16(gt), wd_ref[...]) + bd_ref[...]               # (tb, 128)
    # TODO(synk): nn.Dropout(p=0.3) is a no-op in eval mode; training-mode
    # stochastic masking is not implemented here.
    o_ref[...] = _dot(_bf16(hidden), wc_ref[...]) + bc_ref[...]       # (tb, 128)


# ---------------------------------------------------------------------------
# wrapper-side weight/layout preparation
# ---------------------------------------------------------------------------
def _prep_conv2d_w(w):
    # (out, in, kh=2, kw=3) -> (kh, out, kw*in); columns dw*MID + cin, bf16.
    return jnp.transpose(w, (2, 0, 3, 1)).reshape(2, MID, 3 * MID).astype(jnp.bfloat16)


def _prep_conv1d_w(w):
    # (out, in, k=3) -> (out, k*in); columns dw*MID + cin, bf16.
    return jnp.transpose(w, (0, 2, 1)).reshape(MID, 3 * MID).astype(jnp.bfloat16)


def _avgpool_matrix(tb):
    # (tb*LQ, 2*tb): column bin*tb + b averages lanes [b*LQ + bin*16, b*LQ + bin*16 + 16).
    half = LQ // POOL_OUT
    row = jnp.arange(tb * LQ)
    col = jnp.arange(POOL_OUT * tb)
    sel = ((row[:, None] // LQ) == (col[None, :] % tb)) & \
          (((row[:, None] % LQ) // half) == (col[None, :] // tb))
    return (sel.astype(jnp.float32) / half).astype(jnp.bfloat16)


def init_params(key):
    keys = jax.random.split(key, 14)

    def w(k, shape, fan_in):
        return jax.random.normal(k, shape, dtype=jnp.float32) / jnp.sqrt(float(fan_in))

    p = {}
    # first ResidualStack (Conv2d, bias=False)
    p["c1_w1"] = w(keys[0], (MID, 1, 1, 1), 1)
    p["c1_w2"] = w(keys[1], (MID, MID, 2, 3), MID * 6)
    p["c1_w3"] = w(keys[2], (MID, MID, 2, 3), MID * 6)
    p["c1_w4"] = w(keys[3], (MID, MID, 2, 3), MID * 6)
    p["c1_w5"] = w(keys[4], (MID, MID, 2, 3), MID * 6)
    # second ResidualStack (Conv1d, bias=False)
    p["c6_w1"] = w(keys[5], (MID, MID, 1), MID)
    p["c6_w2"] = w(keys[6], (MID, MID, 3), MID * 3)
    p["c6_w3"] = w(keys[7], (MID, MID, 3), MID * 3)
    p["c6_w4"] = w(keys[8], (MID, MID, 3), MID * 3)
    p["c6_w5"] = w(keys[9], (MID, MID, 3), MID * 3)
    # head
    p["dense_w"] = w(keys[10], (HID, FLAT), FLAT)
    p["dense_b"] = w(keys[11], (HID,), FLAT)
    p["cls_w"] = w(keys[12], (NUM_CLASSES, HID), HID)
    p["cls_b"] = w(keys[13], (NUM_CLASSES,), HID)
    return p


def resnet1d_kd_forward(x, params, batch_tile=None):
    f32 = jnp.float32
    B = x.shape[0]
    if batch_tile is None:
        batch_tile = min(64, ((B + 7) // 8) * 8)   # multiple of 8 -> legal tiles
    tb = batch_tile
    assert tb % 8 == 0, "batch_tile must be a multiple of 8"
    b_pad = tb * ((B + tb - 1) // tb)
    n_lanes = tb * LQ

    x = x.astype(f32)
    if b_pad != B:
        x = jnp.pad(x, ((0, b_pad - B), (0, 0), (0, 0)))
    # 4-phase split of the length-128 signal, batch packed along lanes:
    #   xp[r*2 + h, b*LQ + j] = x[b, h, 4*j + r]
    xp = x.reshape(b_pad, H_IN, LQ, 4).transpose(3, 1, 0, 2).reshape(4 * H_IN, b_pad * LQ)

    # ---- weights (reshaped / tap-merged / bf16 in the wrapper) ----
    w1 = params["c1_w1"].reshape(MID, 1).astype(f32)
    w2 = _prep_conv2d_w(params["c1_w2"].astype(f32))
    w3 = _prep_conv2d_w(params["c1_w3"].astype(f32))
    w4 = _prep_conv2d_w(params["c1_w4"].astype(f32))
    w5 = _prep_conv2d_w(params["c1_w5"].astype(f32))
    v1 = params["c6_w1"].reshape(MID, MID).astype(jnp.bfloat16)
    v2 = _prep_conv1d_w(params["c6_w2"].astype(f32))
    v3 = _prep_conv1d_w(params["c6_w3"].astype(f32))
    v4 = _prep_conv1d_w(params["c6_w4"].astype(f32))
    v5 = _prep_conv1d_w(params["c6_w5"].astype(f32))
    pool = _avgpool_matrix(tb)

    # dense: fold the torch flatten order (c*2 + bin) into the weight; the kernel
    # produces features in order bin*32 + c.
    wd = params["dense_w"].astype(f32)                     # (HID, FLAT)
    wd_perm = wd.reshape(HID, MID, POOL_OUT).transpose(0, 2, 1).reshape(HID, FLAT)
    wdT = wd_perm.T.astype(jnp.bfloat16)                   # (FLAT, HID)
    bd = params["dense_b"].reshape(1, HID).astype(f32)
    wcT = jnp.zeros((HID, C_PAD), f32).at[:, :NUM_CLASSES].set(
        params["cls_w"].astype(f32).T).astype(jnp.bfloat16)   # (HID, C_PAD)
    bc = jnp.zeros((1, C_PAD), f32).at[:, :NUM_CLASSES].set(
        params["cls_b"].astype(f32).reshape(1, NUM_CLASSES))

    def const_spec(a):
        shp = a.shape
        return pl.BlockSpec(shp, lambda t, _z=(0,) * len(shp): _z)

    grid = (b_pad // tb,)
    out = pl.pallas_call(
        fused_kernel,
        grid=grid,
        in_specs=[
            pl.BlockSpec((4 * H_IN, n_lanes), lambda t: (0, t)),
            const_spec(w1), const_spec(w2), const_spec(w3),
            const_spec(w4), const_spec(w5),
            const_spec(v1), const_spec(v2), const_spec(v3),
            const_spec(v4), const_spec(v5),
            const_spec(pool), const_spec(wdT), const_spec(bd),
            const_spec(wcT), const_spec(bc),
        ],
        out_specs=pl.BlockSpec((tb, C_PAD), lambda t: (t, 0)),
        out_shape=jax.ShapeDtypeStruct((b_pad, C_PAD), f32),
        compiler_params=pltpu.CompilerParams(
            dimension_semantics=("parallel",),
            vmem_limit_bytes=32 * 1024 * 1024,
        ),
    )(xp, w1, w2, w3, w4, w5, v1, v2, v3, v4, v5, pool, wdT, bd, wcT, bc)

    return out[:B, :NUM_CLASSES]


if __name__ == "__main__":
    key = jax.random.PRNGKey(0)
    pkey, xkey = jax.random.split(key)
    params = init_params(pkey)

    # all_radio128: input is a (B, 2, 128) I/Q signal; forward unsqueezes to NCHW.
    x = jax.random.normal(xkey, (2, H_IN, W_IN), dtype=jnp.float32)

    out = jax.jit(resnet1d_kd_forward)(x, params)
    jax.block_until_ready(out)
    assert out.shape == (2, NUM_CLASSES) and out.dtype == jnp.float32
    print("KERNEL_OK")
</pallas_src>

<mosaic_0001>
module attributes {stable_mosaic.version = 11 : i64} {
  func.func @fused_kernel(%arg0: i32, %arg1: memref<8x256xf32, #tpu.memory_space<vmem>>, %arg2: memref<32x1xf32, #tpu.memory_space<vmem>>, %arg3: memref<2x32x96xbf16, #tpu.memory_space<vmem>>, %arg4: memref<2x32x96xbf16, #tpu.memory_space<vmem>>, %arg5: memref<2x32x96xbf16, #tpu.memory_space<vmem>>, %arg6: memref<2x32x96xbf16, #tpu.memory_space<vmem>>, %arg7: memref<32x32xbf16, #tpu.memory_space<vmem>>, %arg8: memref<32x96xbf16, #tpu.memory_space<vmem>>, %arg9: memref<32x96xbf16, #tpu.memory_space<vmem>>, %arg10: memref<32x96xbf16, #tpu.memory_space<vmem>>, %arg11: memref<32x96xbf16, #tpu.memory_space<vmem>>, %arg12: memref<256x16xbf16, #tpu.memory_space<vmem>>, %arg13: memref<64x128xbf16, #tpu.memory_space<vmem>>, %arg14: memref<1x128xf32, #tpu.memory_space<vmem>>, %arg15: memref<128x128xbf16, #tpu.memory_space<vmem>>, %arg16: memref<1x128xf32, #tpu.memory_space<vmem>>, %arg17: memref<8x128xf32, #tpu.memory_space<vmem>>) attributes {dimension_semantics = [#tpu.dimension_semantics<parallel>], iteration_bounds = array<i64: 1>, scalar_prefetch = 0 : i64, scratch_operands = 0 : i64, tpu.core_type = #tpu.core_type<tc>, window_params = [{transform_indices = @transform_0, window_bounds = array<i64: 8, 256>}, {pipeline_mode = #tpu.pipeline_mode<synchronous>, transform_indices = @transform_1, window_bounds = array<i64: 32, 1>}, {pipeline_mode = #tpu.pipeline_mode<synchronous>, transform_indices = @transform_2, window_bounds = array<i64: 2, 32, 96>}, {pipeline_mode = #tpu.pipeline_mode<synchronous>, transform_indices = @transform_3, window_bounds = array<i64: 2, 32, 96>}, {pipeline_mode = #tpu.pipeline_mode<synchronous>, transform_indices = @transform_4, window_bounds = array<i64: 2, 32, 96>}, {pipeline_mode = #tpu.pipeline_mode<synchronous>, transform_indices = @transform_5, window_bounds = array<i64: 2, 32, 96>}, {pipeline_mode = #tpu.pipeline_mode<synchronous>, transform_indices = @transform_6, window_bounds = array<i64: 32, 32>}, {pipeline_mode = #tpu.pipeline_mode<synchronous>, transform_indices = @transform_7, window_bounds = array<i64: 32, 96>}, {pipeline_mode = #tpu.pipeline_mode<synchronous>, transform_indices = @transform_8, window_bounds = array<i64: 32, 96>}, {pipeline_mode = #tpu.pipeline_mode<synchronous>, transform_indices = @transform_9, window_bounds = array<i64: 32, 96>}, {pipeline_mode = #tpu.pipeline_mode<synchronous>, transform_indices = @transform_10, window_bounds = array<i64: 32, 96>}, {pipeline_mode = #tpu.pipeline_mode<synchronous>, transform_indices = @transform_11, window_bounds = array<i64: 256, 16>}, {pipeline_mode = #tpu.pipeline_mode<synchronous>, transform_indices = @transform_12, window_bounds = array<i64: 64, 128>}, {pipeline_mode = #tpu.pipeline_mode<synchronous>, transform_indices = @transform_13, window_bounds = array<i64: 1, 128>}, {pipeline_mode = #tpu.pipeline_mode<synchronous>, transform_indices = @transform_14, window_bounds = array<i64: 128, 128>}, {pipeline_mode = #tpu.pipeline_mode<synchronous>, transform_indices = @transform_15, window_bounds = array<i64: 1, 128>}, {transform_indices = @transform_16, window_bounds = array<i64: 8, 128>}]} {
    %0 = tpu.iota {dimensions = array<i32: 1>} : vector<1x256xi32>
    %c32_i32 = arith.constant 32 : i32
    %c0_i32 = arith.constant 0 : i32
    %1 = arith.cmpi eq, %c32_i32, %c0_i32 : i32
    %c1_i32 = arith.constant 1 : i32
    %2 = arith.select %1, %c1_i32, %c32_i32 : i32
    %3 = vector.broadcast %2 : i32 to vector<1x256xi32>
    %4 = arith.remsi %0, %3 : vector<1x256xi32>
    %c0_i32_0 = arith.constant 0 : i32
    %5 = vector.broadcast %c0_i32_0 : i32 to vector<1x256xi32>
    %6 = arith.cmpi ne, %4, %5 : vector<1x256xi32>
    %c0_i32_1 = arith.constant 0 : i32
    %7 = vector.broadcast %c0_i32_1 : i32 to vector<1x256xi32>
    %8 = arith.cmpi slt, %4, %7 : vector<1x256xi32>
    %c0_i32_2 = arith.constant 0 : i32
    %9 = arith.cmpi slt, %2, %c0_i32_2 : i32
    %10 = vector.broadcast %9 : i1 to vector<1x256xi1>
    %11 = vector.broadcast %10 : vector<1x256xi1> to vector<1x256xi1>
    %12 = arith.xori %8, %11 : vector<1x256xi1>
    %13 = arith.andi %12, %6 : vector<1x256xi1>
    %14 = vector.broadcast %2 : i32 to vector<1x256xi32>
    %15 = arith.addi %4, %14 : vector<1x256xi32>
    %16 = arith.select %13, %15, %4 : vector<1x256xi1>, vector<1x256xi32>
    %c31_i32 = arith.constant 31 : i32
    %17 = vector.broadcast %c31_i32 : i32 to vector<1x256xi32>
    %18 = arith.cmpi slt, %16, %17 : vector<1x256xi32>
    %c1_i32_3 = arith.constant 1 : i32
    %19 = vector.broadcast %c1_i32_3 : i32 to vector<1x256xi32>
    %20 = arith.cmpi sge, %16, %19 : vector<1x256xi32>
    %c0 = arith.constant 0 : index
    %c0_4 = arith.constant 0 : index
    %21 = vector.load %arg1[%c0, %c0_4] : memref<8x256xf32, #tpu.memory_space<vmem>>, vector<8x256xf32>
    %c0_5 = arith.constant 0 : index
    %c0_6 = arith.constant 0 : index
    %22 = vector.load %arg2[%c0_5, %c0_6] : memref<32x1xf32, #tpu.memory_space<vmem>>, vector<32x1xf32>
    %23 = vector.extract_strided_slice %21 {offsets = [0, 0], sizes = [1, 256], strides = [1, 1]} : vector<8x256xf32> to vector<1x256xf32>
    %24 = vector.broadcast %22 : vector<32x1xf32> to vector<32x256xf32>
    %25 = vector.broadcast %23 : vector<1x256xf32> to vector<32x256xf32>
    %26 = arith.mulf %24, %25 : vector<32x256xf32>
    %27 = vector.extract_strided_slice %21 {offsets = [2, 0], sizes = [1, 256], strides = [1, 1]} : vector<8x256xf32> to vector<1x256xf32>
    %28 = vector.broadcast %22 : vector<32x1xf32> to vector<32x256xf32>
    %29 = vector.broadcast %27 : vector<1x256xf32> to vector<32x256xf32>
    %30 = arith.mulf %28, %29 : vector<32x256xf32>
    %31 = vector.extract_strided_slice %21 {offsets = [4, 0], sizes = [1, 256], strides = [1, 1]} : vector<8x256xf32> to vector<1x256xf32>
    %32 = vector.broadcast %22 : vector<32x1xf32> to vector<32x256xf32>
    %33 = vector.broadcast %31 : vector<1x256xf32> to vector<32x256xf32>
    %34 = arith.mulf %32, %33 : vector<32x256xf32>
    %35 = vector.extract_strided_slice %21 {offsets = [6, 0], sizes = [1, 256], strides = [1, 1]} : vector<8x256xf32> to vector<1x256xf32>
    %36 = vector.broadcast %22 : vector<32x1xf32> to vector<32x256xf32>
    %37 = vector.broadcast %35 : vector<1x256xf32> to vector<32x256xf32>
    %38 = arith.mulf %36, %37 : vector<32x256xf32>
    %39 = vector.extract_strided_slice %21 {offsets = [1, 0], sizes = [1, 256], strides = [1, 1]} : vector<8x256xf32> to vector<1x256xf32>
    %40 = vector.broadcast %22 : vector<32x1xf32> to vector<32x256xf32>
    %41 = vector.broadcast %39 : vector<1x256xf32> to vector<32x256xf32>
    %42 = arith.mulf %40, %41 : vector<32x256xf32>
    %43 = vector.extract_strided_slice %21 {offsets = [3, 0], sizes = [1, 256], strides = [1, 1]} : vector<8x256xf32> to vector<1x256xf32>
    %44 = vector.broadcast %22 : vector<32x1xf32> to vector<32x256xf32>
    %45 = vector.broadcast %43 : vector<1x256xf32> to vector<32x256xf32>
    %46 = arith.mulf %44, %45 : vector<32x256xf32>
    %47 = vector.extract_strided_slice %21 {offsets = [5, 0], sizes = [1, 256], strides = [1, 1]} : vector<8x256xf32> to vector<1x256xf32>
    %48 = vector.broadcast %22 : vector<32x1xf32> to vector<32x256xf32>
    %49 = vector.broadcast %47 : vector<1x256xf32> to vector<32x256xf32>
    %50 = arith.mulf %48, %49 : vector<32x256xf32>
    %51 = vector.extract_strided_slice %21 {offsets = [7, 0], sizes = [1, 256], strides = [1, 1]} : vector<8x256xf32> to vector<1x256xf32>
    %52 = vector.broadcast %22 : vector<32x1xf32> to vector<32x256xf32>
    %53 = vector.broadcast %51 : vector<1x256xf32> to vector<32x256xf32>
    %54 = arith.mulf %52, %53 : vector<32x256xf32>
    %c0_7 = arith.constant 0 : index
    %c0_8 = arith.constant 0 : index
    %c0_9 = arith.constant 0 : index
    %55 = vector.load %arg3[%c0_7, %c0_8, %c0_9] : memref<2x32x96xbf16, #tpu.memory_space<vmem>>, vector<1x32x96xbf16>
    %56 = vector.shape_cast %55 : vector<1x32x96xbf16> to vector<32x96xbf16>
    %c1 = arith.constant 1 : index
    %c0_10 = arith.constant 0 : index
    %c0_11 = arith.constant 0 : index
    %57 = vector.load %arg3[%c1, %c0_10, %c0_11] : memref<2x32x96xbf16, #tpu.memory_space<vmem>>, vector<1x32x96xbf16>
    %58 = vector.shape_cast %57 : vector<1x32x96xbf16> to vector<32x96xbf16>
    %c1_i32_12 = arith.constant 1 : i32
    %59 = tpu.dynamic_rotate %38 by %c1_i32_12 dim 1 : vector<32x256xf32>, i32 -> vector<32x256xf32>
    %cst = arith.constant 0.000000e+00 : f32
    %60 = vector.shape_cast %20 : vector<1x256xi1> to vector<1x256xi1>
    %61 = vector.broadcast %60 : vector<1x256xi1> to vector<32x256xi1>
    %62 = vector.broadcast %cst : f32 to vector<32x256xf32>
    %63 = arith.select %61, %59, %62 : vector<32x256xi1>, vector<32x256xf32>
    %c255_i32 = arith.constant 255 : i32
    %64 = tpu.dynamic_rotate %26 by %c255_i32 dim 1 : vector<32x256xf32>, i32 -> vector<32x256xf32>
    %cst_13 = arith.constant 0.000000e+00 : f32
    %65 = vector.shape_cast %18 : vector<1x256xi1> to vector<1x256xi1>
    %66 = vector.broadcast %65 : vector<1x256xi1> to vector<32x256xi1>
    %67 = vector.broadcast %cst_13 : f32 to vector<32x256xf32>
    %68 = arith.select %66, %64, %67 : vector<32x256xi1>, vector<32x256xf32>
    %69 = arith.truncf %63 : vector<32x256xf32> to vector<32x256xbf16>
    %70 = arith.truncf %26 : vector<32x256xf32> to vector<32x256xbf16>
    %71 = arith.truncf %30 : vector<32x256xf32> to vector<32x256xbf16>
    %72 = tpu.concatenate %69, %70, %71 in 0 : vector<32x256xbf16>, vector<32x256xbf16>, vector<32x256xbf16> -> vector<96x256xbf16>
    %73 = arith.truncf %26 : vector<32x256xf32> to vector<32x256xbf16>
    %74 = arith.truncf %30 : vector<32x256xf32> to vector<32x256xbf16>
    %75 = arith.truncf %34 : vector<32x256xf32> to vector<32x256xbf16>
    %76 = tpu.concatenate %73, %74, %75 in 0 : vector<32x256xbf16>, vector<32x256xbf16>, vector<32x256xbf16> -> vector<96x256xbf16>
    %77 = arith.truncf %30 : vector<32x256xf32> to vector<32x256xbf16>
    %78 = arith.truncf %34 : vector<32x256xf32> to vector<32x256xbf16>
    %79 = arith.truncf %38 : vector<32x256xf32> to vector<32x256xbf16>
    %80 = tpu.concatenate %77, %78, %79 in 0 : vector<32x256xbf16>, vector<32x256xbf16>, vector<32x256xbf16> -> vector<96x256xbf16>
    %81 = arith.truncf %34 : vector<32x256xf32> to vector<32x256xbf16>
    %82 = arith.truncf %38 : vector<32x256xf32> to vector<32x256xbf16>
    %83 = arith.truncf %68 : vector<32x256xf32> to vector<32x256xbf16>
    %84 = tpu.concatenate %81, %82, %83 in 0 : vector<32x256xbf16>, vector<32x256xbf16>, vector<32x256xbf16> -> vector<96x256xbf16>
    %cst_14 = arith.constant dense<0.000000e+00> : vector<32x256xf32>
    %85 = tpu.matmul %56, %72, %cst_14 {dimension_numbers = #tpu.dot_dimension_numbers<[1], [0], [0], [1], [0, 0, 1, 1], [], []>} : vector<32x96xbf16>, vector<96x256xbf16>, vector<32x256xf32> -> vector<32x256xf32>
    %cst_15 = arith.constant dense<0.000000e+00> : vector<32x256xf32>
    %86 = tpu.matmul %58, %72, %cst_15 {dimension_numbers = #tpu.dot_dimension_numbers<[1], [0], [0], [1], [0, 0, 1, 1], [], []>} : vector<32x96xbf16>, vector<96x256xbf16>, vector<32x256xf32> -> vector<32x256xf32>
    %cst_16 = arith.constant dense<0.000000e+00> : vector<32x256xf32>
    %87 = tpu.matmul %56, %76, %cst_16 {dimension_numbers = #tpu.dot_dimension_numbers<[1], [0], [0], [1], [0, 0, 1, 1], [], []>} : vector<32x96xbf16>, vector<96x256xbf16>, vector<32x256xf32> -> vector<32x256xf32>
    %cst_17 = arith.constant dense<0.000000e+00> : vector<32x256xf32>
    %88 = tpu.matmul %58, %76, %cst_17 {dimension_numbers = #tpu.dot_dimension_numbers<[1], [0], [0], [1], [0, 0, 1, 1], [], []>} : vector<32x96xbf16>, vector<96x256xbf16>, vector<32x256xf32> -> vector<32x256xf32>
    %cst_18 = arith.constant dense<0.000000e+00> : vector<32x256xf32>
    %89 = tpu.matmul %56, %80, %cst_18 {dimension_numbers = #tpu.dot_dimension_numbers<[1], [0], [0], [1], [0, 0, 1, 1], [], []>} : vector<32x96xbf16>, vector<96x256xbf16>, vector<32x256xf32> -> vector<32x256xf32>
    %cst_19 = arith.constant dense<0.000000e+00> : vector<32x256xf32>
    %90 = tpu.matmul %58, %80, %cst_19 {dimension_numbers = #tpu.dot_dimension_numbers<[1], [0], [0], [1], [0, 0, 1, 1], [], []>} : vector<32x96xbf16>, vector<96x256xbf16>, vector<32x256xf32> -> vector<32x256xf32>
    %cst_20 = arith.constant dense<0.000000e+00> : vector<32x256xf32>
    %91 = tpu.matmul %56, %84, %cst_20 {dimension_numbers = #tpu.dot_dimension_numbers<[1], [0], [0], [1], [0, 0, 1, 1], [], []>} : vector<32x96xbf16>, vector<96x256xbf16>, vector<32x256xf32> -> vector<32x256xf32>
    %cst_21 = arith.constant dense<0.000000e+00> : vector<32x256xf32>
    %92 = tpu.matmul %58, %84, %cst_21 {dimension_numbers = #tpu.dot_dimension_numbers<[1], [0], [0], [1], [0, 0, 1, 1], [], []>} : vector<32x96xbf16>, vector<96x256xbf16>, vector<32x256xf32> -> vector<32x256xf32>
    %c1_i32_22 = arith.constant 1 : i32
    %93 = tpu.dynamic_rotate %54 by %c1_i32_22 dim 1 : vector<32x256xf32>, i32 -> vector<32x256xf32>
    %cst_23 = arith.constant 0.000000e+00 : f32
    %94 = vector.shape_cast %20 : vector<1x256xi1> to vector<1x256xi1>
    %95 = vector.broadcast %94 : vector<1x256xi1> to vector<32x256xi1>
    %96 = vector.broadcast %cst_23 : f32 to vector<32x256xf32>
    %97 = arith.select %95, %93, %96 : vector<32x256xi1>, vector<32x256xf32>
    %c255_i32_24 = arith.constant 255 : i32
    %98 = tpu.dynamic_rotate %42 by %c255_i32_24 dim 1 : vector<32x256xf32>, i32 -> vector<32x256xf32>
    %cst_25 = arith.constant 0.000000e+00 : f32
    %99 = vector.shape_cast %18 : vector<1x256xi1> to vector<1x256xi1>
    %100 = vector.broadcast %99 : vector<1x256xi1> to vector<32x256xi1>
    %101 = vector.broadcast %cst_25 : f32 to vector<32x256xf32>
    %102 = arith.select %100, %98, %101 : vector<32x256xi1>, vector<32x256xf32>
    %103 = arith.truncf %97 : vector<32x256xf32> to vector<32x256xbf16>
    %104 = arith.truncf %42 : vector<32x256xf32> to vector<32x256xbf16>
    %105 = arith.truncf %46 : vector<32x256xf32> to vector<32x256xbf16>
    %106 = tpu.concatenate %103, %104, %105 in 0 : vector<32x256xbf16>, vector<32x256xbf16>, vector<32x256xbf16> -> vector<96x256xbf16>
    %107 = arith.truncf %42 : vector<32x256xf32> to vector<32x256xbf16>
    %108 = arith.truncf %46 : vector<32x256xf32> to vector<32x256xbf16>
    %109 = arith.truncf %50 : vector<32x256xf32> to vector<32x256xbf16>
    %110 = tpu.concatenate %107, %108, %109 in 0 : vector<32x256xbf16>, vector<32x256xbf16>, vector<32x256xbf16> -> vector<96x256xbf16>
    %111 = arith.truncf %46 : vector<32x256xf32> to vector<32x256xbf16>
    %112 = arith.truncf %50 : vector<32x256xf32> to vector<32x256xbf16>
    %113 = arith.truncf %54 : vector<32x256xf32> to vector<32x256xbf16>
    %114 = tpu.concatenate %111, %112, %113 in 0 : vector<32x256xbf16>, vector<32x256xbf16>, vector<32x256xbf16> -> vector<96x256xbf16>
    %115 = arith.truncf %50 : vector<32x256xf32> to vector<32x256xbf16>
    %116 = arith.truncf %54 : vector<32x256xf32> to vector<32x256xbf16>
    %117 = arith.truncf %102 : vector<32x256xf32> to vector<32x256xbf16>
    %118 = tpu.concatenate %115, %116, %117 in 0 : vector<32x256xbf16>, vector<32x256xbf16>, vector<32x256xbf16> -> vector<96x256xbf16>
    %cst_26 = arith.constant dense<0.000000e+00> : vector<32x256xf32>
    %119 = tpu.matmul %56, %106, %cst_26 {dimension_numbers = #tpu.dot_dimension_numbers<[1], [0], [0], [1], [0, 0, 1, 1], [], []>} : vector<32x96xbf16>, vector<96x256xbf16>, vector<32x256xf32> -> vector<32x256xf32>
    %cst_27 = arith.constant dense<0.000000e+00> : vector<32x256xf32>
    %120 = tpu.matmul %58, %106, %cst_27 {dimension_numbers = #tpu.dot_dimension_numbers<[1], [0], [0], [1], [0, 0, 1, 1], [], []>} : vector<32x96xbf16>, vector<96x256xbf16>, vector<32x256xf32> -> vector<32x256xf32>
    %121 = arith.addf %85, %120 : vector<32x256xf32>
    %cst_28 = arith.constant dense<0.000000e+00> : vector<32x256xf32>
    %122 = tpu.matmul %56, %110, %cst_28 {dimension_numbers = #tpu.dot_dimension_numbers<[1], [0], [0], [1], [0, 0, 1, 1], [], []>} : vector<32x96xbf16>, vector<96x256xbf16>, vector<32x256xf32> -> vector<32x256xf32>
    %cst_29 = arith.constant dense<0.000000e+00> : vector<32x256xf32>
    %123 = tpu.matmul %58, %110, %cst_29 {dimension_numbers = #tpu.dot_dimension_numbers<[1], [0], [0], [1], [0, 0, 1, 1], [], []>} : vector<32x96xbf16>, vector<96x256xbf16>, vector<32x256xf32> -> vector<32x256xf32>
    %124 = arith.addf %87, %123 : vector<32x256xf32>
    %cst_30 = arith.constant dense<0.000000e+00> : vector<32x256xf32>
    %125 = tpu.matmul %56, %114, %cst_30 {dimension_numbers = #tpu.dot_dimension_numbers<[1], [0], [0], [1], [0, 0, 1, 1], [], []>} : vector<32x96xbf16>, vector<96x256xbf16>, vector<32x256xf32> -> vector<32x256xf32>
    %cst_31 = arith.constant dense<0.000000e+00> : vector<32x256xf32>
    %126 = tpu.matmul %58, %114, %cst_31 {dimension_numbers = #tpu.dot_dimension_numbers<[1], [0], [0], [1], [0, 0, 1, 1], [], []>} : vector<32x96xbf16>, vector<96x256xbf16>, vector<32x256xf32> -> vector<32x256xf32>
    %127 = arith.addf %89, %126 : vector<32x256xf32>
    %cst_32 = arith.constant dense<0.000000e+00> : vector<32x256xf32>
    %128 = tpu.matmul %56, %118, %cst_32 {dimension_numbers = #tpu.dot_dimension_numbers<[1], [0], [0], [1], [0, 0, 1, 1], [], []>} : vector<32x96xbf16>, vector<96x256xbf16>, vector<32x256xf32> -> vector<32x256xf32>
    %cst_33 = arith.constant dense<0.000000e+00> : vector<32x256xf32>
    %129 = tpu.matmul %58, %118, %cst_33 {dimension_numbers = #tpu.dot_dimension_numbers<[1], [0], [0], [1], [0, 0, 1, 1], [], []>} : vector<32x96xbf16>, vector<96x256xbf16>, vector<32x256xf32> -> vector<32x256xf32>
    %130 = arith.addf %91, %129 : vector<32x256xf32>
    %cst_34 = arith.constant 0.000000e+00 : f32
    %131 = vector.broadcast %cst_34 : f32 to vector<32x256xf32>
    %132 = arith.maximumf %86, %131 : vector<32x256xf32>
    %cst_35 = arith.constant 0.000000e+00 : f32
    %133 = vector.broadcast %cst_35 : f32 to vector<32x256xf32>
    %134 = arith.maximumf %88, %133 : vector<32x256xf32>
    %cst_36 = arith.constant 0.000000e+00 : f32
    %135 = vector.broadcast %cst_36 : f32 to vector<32x256xf32>
    %136 = arith.maximumf %90, %135 : vector<32x256xf32>
    %cst_37 = arith.constant 0.000000e+00 : f32
    %137 = vector.broadcast %cst_37 : f32 to vector<32x256xf32>
    %138 = arith.maximumf %92, %137 : vector<32x256xf32>
    %cst_38 = arith.constant 0.000000e+00 : f32
    %139 = vector.broadcast %cst_38 : f32 to vector<32x256xf32>
    %140 = arith.maximumf %121, %139 : vector<32x256xf32>
    %cst_39 = arith.constant 0.000000e+00 : f32
    %141 = vector.broadcast %cst_39 : f32 to vector<32x256xf32>
    %142 = arith.maximumf %124, %141 : vector<32x256xf32>
    %cst_40 = arith.constant 0.000000e+00 : f32
    %143 = vector.broadcast %cst_40 : f32 to vector<32x256xf32>
    %144 = arith.maximumf %127, %143 : vector<32x256xf32>
    %cst_41 = arith.constant 0.000000e+00 : f32
    %145 = vector.broadcast %cst_41 : f32 to vector<32x256xf32>
    %146 = arith.maximumf %130, %145 : vector<32x256xf32>
    %cst_42 = arith.constant 0.000000e+00 : f32
    %147 = vector.broadcast %cst_42 : f32 to vector<32x256xf32>
    %148 = arith.maximumf %119, %147 : vector<32x256xf32>
    %cst_43 = arith.constant 0.000000e+00 : f32
    %149 = vector.broadcast %cst_43 : f32 to vector<32x256xf32>
    %150 = arith.maximumf %122, %149 : vector<32x256xf32>
    %cst_44 = arith.constant 0.000000e+00 : f32
    %151 = vector.broadcast %cst_44 : f32 to vector<32x256xf32>
    %152 = arith.maximumf %125, %151 : vector<32x256xf32>
    %cst_45 = arith.constant 0.000000e+00 : f32
    %153 = vector.broadcast %cst_45 : f32 to vector<32x256xf32>
    %154 = arith.maximumf %128, %153 : vector<32x256xf32>
    %c0_46 = arith.constant 0 : index
    %c0_47 = arith.constant 0 : index
    %c0_48 = arith.constant 0 : index
    %155 = vector.load %arg4[%c0_46, %c0_47, %c0_48] : memref<2x32x96xbf16, #tpu.memory_space<vmem>>, vector<1x32x96xbf16>
    %156 = vector.shape_cast %155 : vector<1x32x96xbf16> to vector<32x96xbf16>
    %c1_49 = arith.constant 1 : index
    %c0_50 = arith.constant 0 : index
    %c0_51 = arith.constant 0 : index
    %157 = vector.load %arg4[%c1_49, %c0_50, %c0_51] : memref<2x32x96xbf16, #tpu.memory_space<vmem>>, vector<1x32x96xbf16>
    %158 = vector.shape_cast %157 : vector<1x32x96xbf16> to vector<32x96xbf16>
    %c1_i32_52 = arith.constant 1 : i32
    %159 = tpu.dynamic_rotate %138 by %c1_i32_52 dim 1 : vector<32x256xf32>, i32 -> vector<32x256xf32>
    %cst_53 = arith.constant 0.000000e+00 : f32
    %160 = vector.shape_cast %20 : vector<1x256xi1> to vector<1x256xi1>
    %161 = vector.broadcast %160 : vector<1x256xi1> to vector<32x256xi1>
    %162 = vector.broadcast %cst_53 : f32 to vector<32x256xf32>
    %163 = arith.select %161, %159, %162 : vector<32x256xi1>, vector<32x256xf32>
    %c255_i32_54 = arith.constant 255 : i32
    %164 = tpu.dynamic_rotate %132 by %c255_i32_54 dim 1 : vector<32x256xf32>, i32 -> vector<32x256xf32>
    %cst_55 = arith.constant 0.000000e+00 : f32
    %165 = vector.shape_cast %18 : vector<1x256xi1> to vector<1x256xi1>
    %166 = vector.broadcast %165 : vector<1x256xi1> to vector<32x256xi1>
    %167 = vector.broadcast %cst_55 : f32 to vector<32x256xf32>
    %168 = arith.select %166, %164, %167 : vector<32x256xi1>, vector<32x256xf32>
    %169 = arith.truncf %163 : vector<32x256xf32> to vector<32x256xbf16>
    %170 = arith.truncf %132 : vector<32x256xf32> to vector<32x256xbf16>
    %171 = arith.truncf %134 : vector<32x256xf32> to vector<32x256xbf16>
    %172 = tpu.concatenate %169, %170, %171 in 0 : vector<32x256xbf16>, vector<32x256xbf16>, vector<32x256xbf16> -> vector<96x256xbf16>
    %173 = arith.truncf %132 : vector<32x256xf32> to vector<32x256xbf16>
    %174 = arith.truncf %134 : vector<32x256xf32> to vector<32x256xbf16>
    %175 = arith.truncf %136 : vector<32x256xf32> to vector<32x256xbf16>
    %176 = tpu.concatenate %173, %174, %175 in 0 : vector<32x256xbf16>, vector<32x256xbf16>, vector<32x256xbf16> -> vector<96x256xbf16>
    %177 = arith.truncf %134 : vector<32x256xf32> to vector<32x256xbf16>
    %178 = arith.truncf %136 : vector<32x256xf32> to vector<32x256xbf16>
    %179 = arith.truncf %138 : vector<32x256xf32> to vector<32x256xbf16>
    %180 = tpu.concatenate %177, %178, %179 in 0 : vector<32x256xbf16>, vector<32x256xbf16>, vector<32x256xbf16> -> vector<96x256xbf16>
    %181 = arith.truncf %136 : vector<32x256xf32> to vector<32x256xbf16>
    %182 = arith.truncf %138 : vector<32x256xf32> to vector<32x256xbf16>
    %183 = arith.truncf %168 : vector<32x256xf32> to vector<32x256xbf16>
    %184 = tpu.concatenate %181, %182, %183 in 0 : vector<32x256xbf16>, vector<32x256xbf16>, vector<32x256xbf16> -> vector<96x256xbf16>
    %cst_56 = arith.constant dense<0.000000e+00> : vector<32x256xf32>
    %185 = tpu.matmul %156, %172, %cst_56 {dimension_numbers = #tpu.dot_dimension_numbers<[1], [0], [0], [1], [0, 0, 1, 1], [], []>} : vector<32x96xbf16>, vector<96x256xbf16>, vector<32x256xf32> -> vector<32x256xf32>
    %cst_57 = arith.constant dense<0.000000e+00> : vector<32x256xf32>
    %186 = tpu.matmul %156, %176, %cst_57 {dimension_numbers = #tpu.dot_dimension_numbers<[1], [0], [0], [1], [0, 0, 1, 1], [], []>} : vector<32x96xbf16>, vector<96x256xbf16>, vector<32x256xf32> -> vector<32x256xf32>
    %cst_58 = arith.constant dense<0.000000e+00> : vector<32x256xf32>
    %187 = tpu.matmul %156, %180, %cst_58 {dimension_numbers = #tpu.dot_dimension_numbers<[1], [0], [0], [1], [0, 0, 1, 1], [], []>} : vector<32x96xbf16>, vector<96x256xbf16>, vector<32x256xf32> -> vector<32x256xf32>
    %cst_59 = arith.constant dense<0.000000e+00> : vector<32x256xf32>
    %188 = tpu.matmul %156, %184, %cst_59 {dimension_numbers = #tpu.dot_dimension_numbers<[1], [0], [0], [1], [0, 0, 1, 1], [], []>} : vector<32x96xbf16>, vector<96x256xbf16>, vector<32x256xf32> -> vector<32x256xf32>
    %c1_i32_60 = arith.constant 1 : i32
    %189 = tpu.dynamic_rotate %146 by %c1_i32_60 dim 1 : vector<32x256xf32>, i32 -> vector<32x256xf32>
    %cst_61 = arith.constant 0.000000e+00 : f32
    %190 = vector.shape_cast %20 : vector<1x256xi1> to vector<1x256xi1>
    %191 = vector.broadcast %190 : vector<1x256xi1> to vector<32x256xi1>
    %192 = vector.broadcast %cst_61 : f32 to vector<32x256xf32>
    %193 = arith.select %191, %189, %192 : vector<32x256xi1>, vector<32x256xf32>
    %c255_i32_62 = arith.constant 255 : i32
    %194 = tpu.dynamic_rotate %140 by %c255_i32_62 dim 1 : vector<32x256xf32>, i32 -> vector<32x256xf32>
    %cst_63 = arith.constant 0.000000e+00 : f32
    %195 = vector.shape_cast %18 : vector<1x256xi1> to vector<1x256xi1>
    %196 = vector.broadcast %195 : vector<1x256xi1> to vector<32x256xi1>
    %197 = vector.broadcast %cst_63 : f32 to vector<32x256xf32>
    %198 = arith.select %196, %194, %197 : vector<32x256xi1>, vector<32x256xf32>
    %199 = arith.truncf %193 : vector<32x256xf32> to vector<32x256xbf16>
    %200 = arith.truncf %140 : vector<32x256xf32> to vector<32x256xbf16>
    %201 = arith.truncf %142 : vector<32x256xf32> to vector<32x256xbf16>
    %202 = tpu.concatenate %199, %200, %201 in 0 : vector<32x256xbf16>, vector<32x256xbf16>, vector<32x256xbf16> -> vector<96x256xbf16>
    %203 = arith.truncf %140 : vector<32x256xf32> to vector<32x256xbf16>
    %204 = arith.truncf %142 : vector<32x256xf32> to vector<32x256xbf16>
    %205 = arith.truncf %144 : vector<32x256xf32> to vector<32x256xbf16>
    %206 = tpu.concatenate %203, %204, %205 in 0 : vector<32x256xbf16>, vector<32x256xbf16>, vector<32x256xbf16> -> vector<96x256xbf16>
    %207 = arith.truncf %142 : vector<32x256xf32> to vector<32x256xbf16>
    %208 = arith.truncf %144 : vector<32x256xf32> to vector<32x256xbf16>
    %209 = arith.truncf %146 : vector<32x256xf32> to vector<32x256xbf16>
    %210 = tpu.concatenate %207, %208, %209 in 0 : vector<32x256xbf16>, vector<32x256xbf16>, vector<32x256xbf16> -> vector<96x256xbf16>
    %211 = arith.truncf %144 : vector<32x256xf32> to vector<32x256xbf16>
    %212 = arith.truncf %146 : vector<32x256xf32> to vector<32x256xbf16>
    %213 = arith.truncf %198 : vector<32x256xf32> to vector<32x256xbf16>
    %214 = tpu.concatenate %211, %212, %213 in 0 : vector<32x256xbf16>, vector<32x256xbf16>, vector<32x256xbf16> -> vector<96x256xbf16>
    %cst_64 = arith.constant dense<0.000000e+00> : vector<32x256xf32>
    %215 = tpu.matmul %156, %202, %cst_64 {dimension_numbers = #tpu.dot_dimension_numbers<[1], [0], [0], [1], [0, 0, 1, 1], [], []>} : vector<32x96xbf16>, vector<96x256xbf16>, vector<32x256xf32> -> vector<32x256xf32>
    %cst_65 = arith.constant dense<0.000000e+00> : vector<32x256xf32>
    %216 = tpu.matmul %158, %202, %cst_65 {dimension_numbers = #tpu.dot_dimension_numbers<[1], [0], [0], [1], [0, 0, 1, 1], [], []>} : vector<32x96xbf16>, vector<96x256xbf16>, vector<32x256xf32> -> vector<32x256xf32>
    %217 = arith.addf %185, %216 : vector<32x256xf32>
    %cst_66 = arith.constant dense<0.000000e+00> : vector<32x256xf32>
    %218 = tpu.matmul %156, %206, %cst_66 {dimension_numbers = #tpu.dot_dimension_numbers<[1], [0], [0], [1], [0, 0, 1, 1], [], []>} : vector<32x96xbf16>, vector<96x256xbf16>, vector<32x256xf32> -> vector<32x256xf32>
    %cst_67 = arith.constant dense<0.000000e+00> : vector<32x256xf32>
    %219 = tpu.matmul %158, %206, %cst_67 {dimension_numbers = #tpu.dot_dimension_numbers<[1], [0], [0], [1], [0, 0, 1, 1], [], []>} : vector<32x96xbf16>, vector<96x256xbf16>, vector<32x256xf32> -> vector<32x256xf32>
    %220 = arith.addf %186, %219 : vector<32x256xf32>
    %cst_68 = arith.constant dense<0.000000e+00> : vector<32x256xf32>
    %221 = tpu.matmul %156, %210, %cst_68 {dimension_numbers = #tpu.dot_dimension_numbers<[1], [0], [0], [1], [0, 0, 1, 1], [], []>} : vector<32x96xbf16>, vector<96x256xbf16>, vector<32x256xf32> -> vector<32x256xf32>
    %cst_69 = arith.constant dense<0.000000e+00> : vector<32x256xf32>
    %222 = tpu.matmul %158, %210, %cst_69 {dimension_numbers = #tpu.dot_dimension_numbers<[1], [0], [0], [1], [0, 0, 1, 1], [], []>} : vector<32x96xbf16>, vector<96x256xbf16>, vector<32x256xf32> -> vector<32x256xf32>
    %223 = arith.addf %187, %222 : vector<32x256xf32>
    %cst_70 = arith.constant dense<0.000000e+00> : vector<32x256xf32>
    %224 = tpu.matmul %156, %214, %cst_70 {dimension_numbers = #tpu.dot_dimension_numbers<[1], [0], [0], [1], [0, 0, 1, 1], [], []>} : vector<32x96xbf16>, vector<96x256xbf16>, vector<32x256xf32> -> vector<32x256xf32>
    %cst_71 = arith.constant dense<0.000000e+00> : vector<32x256xf32>
    %225 = tpu.matmul %158, %214, %cst_71 {dimension_numbers = #tpu.dot_dimension_numbers<[1], [0], [0], [1], [0, 0, 1, 1], [], []>} : vector<32x96xbf16>, vector<96x256xbf16>, vector<32x256xf32> -> vector<32x256xf32>
    %226 = arith.addf %188, %225 : vector<32x256xf32>
    %c1_i32_72 = arith.constant 1 : i32
    %227 = tpu.dynamic_rotate %154 by %c1_i32_72 dim 1 : vector<32x256xf32>, i32 -> vector<32x256xf32>
    %cst_73 = arith.constant 0.000000e+00 : f32
    %228 = vector.shape_cast %20 : vector<1x256xi1> to vector<1x256xi1>
    %229 = vector.broadcast %228 : vector<1x256xi1> to vector<32x256xi1>
    %230 = vector.broadcast %cst_73 : f32 to vector<32x256xf32>
    %231 = arith.select %229, %227, %230 : vector<32x256xi1>, vector<32x256xf32>
    %c255_i32_74 = arith.constant 255 : i32
    %232 = tpu.dynamic_rotate %148 by %c255_i32_74 dim 1 : vector<32x256xf32>, i32 -> vector<32x256xf32>
    %cst_75 = arith.constant 0.000000e+00 : f32
    %233 = vector.shape_cast %18 : vector<1x256xi1> to vector<1x256xi1>
    %234 = vector.broadcast %233 : vector<1x256xi1> to vector<32x256xi1>
    %235 = vector.broadcast %cst_75 : f32 to vector<32x256xf32>
    %236 = arith.select %234, %232, %235 : vector<32x256xi1>, vector<32x256xf32>
    %237 = arith.truncf %231 : vector<32x256xf32> to vector<32x256xbf16>
    %238 = arith.truncf %148 : vector<32x256xf32> to vector<32x256xbf16>
    %239 = arith.truncf %150 : vector<32x256xf32> to vector<32x256xbf16>
    %240 = tpu.concatenate %237, %238, %239 in 0 : vector<32x256xbf16>, vector<32x256xbf16>, vector<32x256xbf16> -> vector<96x256xbf16>
    %241 = arith.truncf %148 : vector<32x256xf32> to vector<32x256xbf16>
    %242 = arith.truncf %150 : vector<32x256xf32> to vector<32x256xbf16>
    %243 = arith.truncf %152 : vector<32x256xf32> to vector<32x256xbf16>
    %244 = tpu.concatenate %241, %242, %243 in 0 : vector<32x256xbf16>, vector<32x256xbf16>, vector<32x256xbf16> -> vector<96x256xbf16>
    %245 = arith.truncf %150 : vector<32x256xf32> to vector<32x256xbf16>
    %246 = arith.truncf %152 : vector<32x256xf32> to vector<32x256xbf16>
    %247 = arith.truncf %154 : vector<32x256xf32> to vector<32x256xbf16>
    %248 = tpu.concatenate %245, %246, %247 in 0 : vector<32x256xbf16>, vector<32x256xbf16>, vector<32x256xbf16> -> vector<96x256xbf16>
    %249 = arith.truncf %152 : vector<32x256xf32> to vector<32x256xbf16>
    %250 = arith.truncf %154 : vector<32x256xf32> to vector<32x256xbf16>
    %251 = arith.truncf %236 : vector<32x256xf32> to vector<32x256xbf16>
    %252 = tpu.concatenate %249, %250, %251 in 0 : vector<32x256xbf16>, vector<32x256xbf16>, vector<32x256xbf16> -> vector<96x256xbf16>
    %cst_76 = arith.constant dense<0.000000e+00> : vector<32x256xf32>
    %253 = tpu.matmul %158, %240, %cst_76 {dimension_numbers = #tpu.dot_dimension_numbers<[1], [0], [0], [1], [0, 0, 1, 1], [], []>} : vector<32x96xbf16>, vector<96x256xbf16>, vector<32x256xf32> -> vector<32x256xf32>
    %254 = arith.addf %215, %253 : vector<32x256xf32>
    %cst_77 = arith.constant dense<0.000000e+00> : vector<32x256xf32>
    %255 = tpu.matmul %158, %244, %cst_77 {dimension_numbers = #tpu.dot_dimension_numbers<[1], [0], [0], [1], [0, 0, 1, 1], [], []>} : vector<32x96xbf16>, vector<96x256xbf16>, vector<32x256xf32> -> vector<32x256xf32>
    %256 = arith.addf %218, %255 : vector<32x256xf32>
    %cst_78 = arith.constant dense<0.000000e+00> : vector<32x256xf32>
    %257 = tpu.matmul %158, %248, %cst_78 {dimension_numbers = #tpu.dot_dimension_numbers<[1], [0], [0], [1], [0, 0, 1, 1], [], []>} : vector<32x96xbf16>, vector<96x256xbf16>, vector<32x256xf32> -> vector<32x256xf32>
    %258 = arith.addf %221, %257 : vector<32x256xf32>
    %cst_79 = arith.constant dense<0.000000e+00> : vector<32x256xf32>
    %259 = tpu.matmul %158, %252, %cst_79 {dimension_numbers = #tpu.dot_dimension_numbers<[1], [0], [0], [1], [0, 0, 1, 1], [], []>} : vector<32x96xbf16>, vector<96x256xbf16>, vector<32x256xf32> -> vector<32x256xf32>
    %260 = arith.addf %224, %259 : vector<32x256xf32>
    %261 = arith.addf %217, %26 : vector<32x256xf32>
    %cst_80 = arith.constant 0.000000e+00 : f32
    %262 = vector.broadcast %cst_80 : f32 to vector<32x256xf32>
    %263 = arith.maximumf %261, %262 : vector<32x256xf32>
    %264 = arith.addf %220, %30 : vector<32x256xf32>
    %cst_81 = arith.constant 0.000000e+00 : f32
    %265 = vector.broadcast %cst_81 : f32 to vector<32x256xf32>
    %266 = arith.maximumf %264, %265 : vector<32x256xf32>
    %267 = arith.addf %223, %34 : vector<32x256xf32>
    %cst_82 = arith.constant 0.000000e+00 : f32
    %268 = vector.broadcast %cst_82 : f32 to vector<32x256xf32>
    %269 = arith.maximumf %267, %268 : vector<32x256xf32>
    %270 = arith.addf %226, %38 : vector<32x256xf32>
    %cst_83 = arith.constant 0.000000e+00 : f32
    %271 = vector.broadcast %cst_83 : f32 to vector<32x256xf32>
    %272 = arith.maximumf %270, %271 : vector<32x256xf32>
    %273 = arith.addf %254, %42 : vector<32x256xf32>
    %cst_84 = arith.constant 0.000000e+00 : f32
    %274 = vector.broadcast %cst_84 : f32 to vector<32x256xf32>
    %275 = arith.maximumf %273, %274 : vector<32x256xf32>
    %276 = arith.addf %256, %46 : vector<32x256xf32>
    %cst_85 = arith.constant 0.000000e+00 : f32
    %277 = vector.broadcast %cst_85 : f32 to vector<32x256xf32>
    %278 = arith.maximumf %276, %277 : vector<32x256xf32>
    %279 = arith.addf %258, %50 : vector<32x256xf32>
    %cst_86 = arith.constant 0.000000e+00 : f32
    %280 = vector.broadcast %cst_86 : f32 to vector<32x256xf32>
    %281 = arith.maximumf %279, %280 : vector<32x256xf32>
    %282 = arith.addf %260, %54 : vector<32x256xf32>
    %cst_87 = arith.constant 0.000000e+00 : f32
    %283 = vector.broadcast %cst_87 : f32 to vector<32x256xf32>
    %284 = arith.maximumf %282, %283 : vector<32x256xf32>
    %c0_88 = arith.constant 0 : index
    %c0_89 = arith.constant 0 : index
    %c0_90 = arith.constant 0 : index
    %285 = vector.load %arg5[%c0_88, %c0_89, %c0_90] : memref<2x32x96xbf16, #tpu.memory_space<vmem>>, vector<1x32x96xbf16>
    %286 = vector.shape_cast %285 : vector<1x32x96xbf16> to vector<32x96xbf16>
    %c1_91 = arith.constant 1 : index
    %c0_92 = arith.constant 0 : index
    %c0_93 = arith.constant 0 : index
    %287 = vector.load %arg5[%c1_91, %c0_92, %c0_93] : memref<2x32x96xbf16, #tpu.memory_space<vmem>>, vector<1x32x96xbf16>
    %288 = vector.shape_cast %287 : vector<1x32x96xbf16> to vector<32x96xbf16>
    %c1_i32_94 = arith.constant 1 : i32
    %289 = tpu.dynamic_rotate %272 by %c1_i32_94 dim 1 : vector<32x256xf32>, i32 -> vector<32x256xf32>
    %cst_95 = arith.constant 0.000000e+00 : f32
    %290 = vector.shape_cast %20 : vector<1x256xi1> to vector<1x256xi1>
    %291 = vector.broadcast %290 : vector<1x256xi1> to vector<32x256xi1>
    %292 = vector.broadcast %cst_95 : f32 to vector<32x256xf32>
    %293 = arith.select %291, %289, %292 : vector<32x256xi1>, vector<32x256xf32>
    %c255_i32_96 = arith.constant 255 : i32
    %294 = tpu.dynamic_rotate %263 by %c255_i32_96 dim 1 : vector<32x256xf32>, i32 -> vector<32x256xf32>
    %cst_97 = arith.constant 0.000000e+00 : f32
    %295 = vector.shape_cast %18 : vector<1x256xi1> to vector<1x256xi1>
    %296 = vector.broadcast %295 : vector<1x256xi1> to vector<32x256xi1>
    %297 = vector.broadcast %cst_97 : f32 to vector<32x256xf32>
    %298 = arith.select %296, %294, %297 : vector<32x256xi1>, vector<32x256xf32>
    %299 = arith.truncf %293 : vector<32x256xf32> to vector<32x256xbf16>
    %300 = arith.truncf %263 : vector<32x256xf32> to vector<32x256xbf16>
    %301 = arith.truncf %266 : vector<32x256xf32> to vector<32x256xbf16>
    %302 = tpu.concatenate %299, %300, %301 in 0 : vector<32x256xbf16>, vector<32x256xbf16>, vector<32x256xbf16> -> vector<96x256xbf16>
    %303 = arith.truncf %263 : vector<32x256xf32> to vector<32x256xbf16>
    %304 = arith.truncf %266 : vector<32x256xf32> to vector<32x256xbf16>
    %305 = arith.truncf %269 : vector<32x256xf32> to vector<32x256xbf16>
    %306 = tpu.concatenate %303, %304, %305 in 0 : vector<32x256xbf16>, vector<32x256xbf16>, vector<32x256xbf16> -> vector<96x256xbf16>
    %307 = arith.truncf %266 : vector<32x256xf32> to vector<32x256xbf16>
    %308 = arith.truncf %269 : vector<32x256xf32> to vector<32x256xbf16>
    %309 = arith.truncf %272 : vector<32x256xf32> to vector<32x256xbf16>
    %310 = tpu.concatenate %307, %308, %309 in 0 : vector<32x256xbf16>, vector<32x256xbf16>, vector<32x256xbf16> -> vector<96x256xbf16>
    %311 = arith.truncf %269 : vector<32x256xf32> to vector<32x256xbf16>
    %312 = arith.truncf %272 : vector<32x256xf32> to vector<32x256xbf16>
    %313 = arith.truncf %298 : vector<32x256xf32> to vector<32x256xbf16>
    %314 = tpu.concatenate %311, %312, %313 in 0 : vector<32x256xbf16>, vector<32x256xbf16>, vector<32x256xbf16> -> vector<96x256xbf16>
    %cst_98 = arith.constant dense<0.000000e+00> : vector<32x256xf32>
    %315 = tpu.matmul %286, %302, %cst_98 {dimension_numbers = #tpu.dot_dimension_numbers<[1], [0], [0], [1], [0, 0, 1, 1], [], []>} : vector<32x96xbf16>, vector<96x256xbf16>, vector<32x256xf32> -> vector<32x256xf32>
    %cst_99 = arith.constant dense<0.000000e+00> : vector<32x256xf32>
    %316 = tpu.matmul %288, %302, %cst_99 {dimension_numbers = #tpu.dot_dimension_numbers<[1], [0], [0], [1], [0, 0, 1, 1], [], []>} : vector<32x96xbf16>, vector<96x256xbf16>, vector<32x256xf32> -> vector<32x256xf32>
    %cst_100 = arith.constant dense<0.000000e+00> : vector<32x256xf32>
    %317 = tpu.matmul %286, %306, %cst_100 {dimension_numbers = #tpu.dot_dimension_numbers<[1], [0], [0], [1], [0, 0, 1, 1], [], []>} : vector<32x96xbf16>, vector<96x256xbf16>, vector<32x256xf32> -> vector<32x256xf32>
    %cst_101 = arith.constant dense<0.000000e+00> : vector<32x256xf32>
    %318 = tpu.matmul %288, %306, %cst_101 {dimension_numbers = #tpu.dot_dimension_numbers<[1], [0], [0], [1], [0, 0, 1, 1], [], []>} : vector<32x96xbf16>, vector<96x256xbf16>, vector<32x256xf32> -> vector<32x256xf32>
    %cst_102 = arith.constant dense<0.000000e+00> : vector<32x256xf32>
    %319 = tpu.matmul %286, %310, %cst_102 {dimension_numbers = #tpu.dot_dimension_numbers<[1], [0], [0], [1], [0, 0, 1, 1], [], []>} : vector<32x96xbf16>, vector<96x256xbf16>, vector<32x256xf32> -> vector<32x256xf32>
    %cst_103 = arith.constant dense<0.000000e+00> : vector<32x256xf32>
    %320 = tpu.matmul %288, %310, %cst_103 {dimension_numbers = #tpu.dot_dimension_numbers<[1], [0], [0], [1], [0, 0, 1, 1], [], []>} : vector<32x96xbf16>, vector<96x256xbf16>, vector<32x256xf32> -> vector<32x256xf32>
    %cst_104 = arith.constant dense<0.000000e+00> : vector<32x256xf32>
    %321 = tpu.matmul %286, %314, %cst_104 {dimension_numbers = #tpu.dot_dimension_numbers<[1], [0], [0], [1], [0, 0, 1, 1], [], []>} : vector<32x96xbf16>, vector<96x256xbf16>, vector<32x256xf32> -> vector<32x256xf32>
    %cst_105 = arith.constant dense<0.000000e+00> : vector<32x256xf32>
    %322 = tpu.matmul %288, %314, %cst_105 {dimension_numbers = #tpu.dot_dimension_numbers<[1], [0], [0], [1], [0, 0, 1, 1], [], []>} : vector<32x96xbf16>, vector<96x256xbf16>, vector<32x256xf32> -> vector<32x256xf32>
    %c1_i32_106 = arith.constant 1 : i32
    %323 = tpu.dynamic_rotate %284 by %c1_i32_106 dim 1 : vector<32x256xf32>, i32 -> vector<32x256xf32>
    %cst_107 = arith.constant 0.000000e+00 : f32
    %324 = vector.shape_cast %20 : vector<1x256xi1> to vector<1x256xi1>
    %325 = vector.broadcast %324 : vector<1x256xi1> to vector<32x256xi1>
    %326 = vector.broadcast %cst_107 : f32 to vector<32x256xf32>
    %327 = arith.select %325, %323, %326 : vector<32x256xi1>, vector<32x256xf32>
    %c255_i32_108 = arith.constant 255 : i32
    %328 = tpu.dynamic_rotate %275 by %c255_i32_108 dim 1 : vector<32x256xf32>, i32 -> vector<32x256xf32>
    %cst_109 = arith.constant 0.000000e+00 : f32
    %329 = vector.shape_cast %18 : vector<1x256xi1> to vector<1x256xi1>
    %330 = vector.broadcast %329 : vector<1x256xi1> to vector<32x256xi1>
    %331 = vector.broadcast %cst_109 : f32 to vector<32x256xf32>
    %332 = arith.select %330, %328, %331 : vector<32x256xi1>, vector<32x256xf32>
    %333 = arith.truncf %327 : vector<32x256xf32> to vector<32x256xbf16>
    %334 = arith.truncf %275 : vector<32x256xf32> to vector<32x256xbf16>
    %335 = arith.truncf %278 : vector<32x256xf32> to vector<32x256xbf16>
    %336 = tpu.concatenate %333, %334, %335 in 0 : vector<32x256xbf16>, vector<32x256xbf16>, vector<32x256xbf16> -> vector<96x256xbf16>
    %337 = arith.truncf %275 : vector<32x256xf32> to vector<32x256xbf16>
    %338 = arith.truncf %278 : vector<32x256xf32> to vector<32x256xbf16>
    %339 = arith.truncf %281 : vector<32x256xf32> to vector<32x256xbf16>
    %340 = tpu.concatenate %337, %338, %339 in 0 : vector<32x256xbf16>, vector<32x256xbf16>, vector<32x256xbf16> -> vector<96x256xbf16>
    %341 = arith.truncf %278 : vector<32x256xf32> to vector<32x256xbf16>
    %342 = arith.truncf %281 : vector<32x256xf32> to vector<32x256xbf16>
    %343 = arith.truncf %284 : vector<32x256xf32> to vector<32x256xbf16>
    %344 = tpu.concatenate %341, %342, %343 in 0 : vector<32x256xbf16>, vector<32x256xbf16>, vector<32x256xbf16> -> vector<96x256xbf16>
    %345 = arith.truncf %281 : vector<32x256xf32> to vector<32x256xbf16>
    %346 = arith.truncf %284 : vector<32x256xf32> to vector<32x256xbf16>
    %347 = arith.truncf %332 : vector<32x256xf32> to vector<32x256xbf16>
    %348 = tpu.concatenate %345, %346, %347 in 0 : vector<32x256xbf16>, vector<32x256xbf16>, vector<32x256xbf16> -> vector<96x256xbf16>
    %cst_110 = arith.constant dense<0.000000e+00> : vector<32x256xf32>
    %349 = tpu.matmul %286, %336, %cst_110 {dimension_numbers = #tpu.dot_dimension_numbers<[1], [0], [0], [1], [0, 0, 1, 1], [], []>} : vector<32x96xbf16>, vector<96x256xbf16>, vector<32x256xf32> -> vector<32x256xf32>
    %cst_111 = arith.constant dense<0.000000e+00> : vector<32x256xf32>
    %350 = tpu.matmul %288, %336, %cst_111 {dimension_numbers = #tpu.dot_dimension_numbers<[1], [0], [0], [1], [0, 0, 1, 1], [], []>} : vector<32x96xbf16>, vector<96x256xbf16>, vector<32x256xf32> -> vector<32x256xf32>
    %351 = arith.addf %315, %350 : vector<32x256xf32>
    %cst_112 = arith.constant dense<0.000000e+00> : vector<32x256xf32>
    %352 = tpu.matmul %286, %340, %cst_112 {dimension_numbers = #tpu.dot_dimension_numbers<[1], [0], [0], [1], [0, 0, 1, 1], [], []>} : vector<32x96xbf16>, vector<96x256xbf16>, vector<32x256xf32> -> vector<32x256xf32>
    %cst_113 = arith.constant dense<0.000000e+00> : vector<32x256xf32>
    %353 = tpu.matmul %288, %340, %cst_113 {dimension_numbers = #tpu.dot_dimension_numbers<[1], [0], [0], [1], [0, 0, 1, 1], [], []>} : vector<32x96xbf16>, vector<96x256xbf16>, vector<32x256xf32> -> vector<32x256xf32>
    %354 = arith.addf %317, %353 : vector<32x256xf32>
    %cst_114 = arith.constant dense<0.000000e+00> : vector<32x256xf32>
    %355 = tpu.matmul %286, %344, %cst_114 {dimension_numbers = #tpu.dot_dimension_numbers<[1], [0], [0], [1], [0, 0, 1, 1], [], []>} : vector<32x96xbf16>, vector<96x256xbf16>, vector<32x256xf32> -> vector<32x256xf32>
    %cst_115 = arith.constant dense<0.000000e+00> : vector<32x256xf32>
    %356 = tpu.matmul %288, %344, %cst_115 {dimension_numbers = #tpu.dot_dimension_numbers<[1], [0], [0], [1], [0, 0, 1, 1], [], []>} : vector<32x96xbf16>, vector<96x256xbf16>, vector<32x256xf32> -> vector<32x256xf32>
    %357 = arith.addf %319, %356 : vector<32x256xf32>
    %cst_116 = arith.constant dense<0.000000e+00> : vector<32x256xf32>
    %358 = tpu.matmul %286, %348, %cst_116 {dimension_numbers = #tpu.dot_dimension_numbers<[1], [0], [0], [1], [0, 0, 1, 1], [], []>} : vector<32x96xbf16>, vector<96x256xbf16>, vector<32x256xf32> -> vector<32x256xf32>
    %cst_117 = arith.constant dense<0.000000e+00> : vector<32x256xf32>
    %359 = tpu.matmul %288, %348, %cst_117 {dimension_numbers = #tpu.dot_dimension_numbers<[1], [0], [0], [1], [0, 0, 1, 1], [], []>} : vector<32x96xbf16>, vector<96x256xbf16>, vector<32x256xf32> -> vector<32x256xf32>
    %360 = arith.addf %321, %359 : vector<32x256xf32>
    %cst_118 = arith.constant 0.000000e+00 : f32
    %361 = vector.broadcast %cst_118 : f32 to vector<32x256xf32>
    %362 = arith.maximumf %316, %361 : vector<32x256xf32>
    %cst_119 = arith.constant 0.000000e+00 : f32
    %363 = vector.broadcast %cst_119 : f32 to vector<32x256xf32>
    %364 = arith.maximumf %318, %363 : vector<32x256xf32>
    %cst_120 = arith.constant 0.000000e+00 : f32
    %365 = vector.broadcast %cst_120 : f32 to vector<32x256xf32>
    %366 = arith.maximumf %320, %365 : vector<32x256xf32>
    %cst_121 = arith.constant 0.000000e+00 : f32
    %367 = vector.broadcast %cst_121 : f32 to vector<32x256xf32>
    %368 = arith.maximumf %322, %367 : vector<32x256xf32>
    %cst_122 = arith.constant 0.000000e+00 : f32
    %369 = vector.broadcast %cst_122 : f32 to vector<32x256xf32>
    %370 = arith.maximumf %351, %369 : vector<32x256xf32>
    %cst_123 = arith.constant 0.000000e+00 : f32
    %371 = vector.broadcast %cst_123 : f32 to vector<32x256xf32>
    %372 = arith.maximumf %354, %371 : vector<32x256xf32>
    %cst_124 = arith.constant 0.000000e+00 : f32
    %373 = vector.broadcast %cst_124 : f32 to vector<32x256xf32>
    %374 = arith.maximumf %357, %373 : vector<32x256xf32>
    %cst_125 = arith.constant 0.000000e+00 : f32
    %375 = vector.broadcast %cst_125 : f32 to vector<32x256xf32>
    %376 = arith.maximumf %360, %375 : vector<32x256xf32>
    %cst_126 = arith.constant 0.000000e+00 : f32
    %377 = vector.broadcast %cst_126 : f32 to vector<32x256xf32>
    %378 = arith.maximumf %349, %377 : vector<32x256xf32>
    %cst_127 = arith.constant 0.000000e+00 : f32
    %379 = vector.broadcast %cst_127 : f32 to vector<32x256xf32>
    %380 = arith.maximumf %352, %379 : vector<32x256xf32>
    %cst_128 = arith.constant 0.000000e+00 : f32
    %381 = vector.broadcast %cst_128 : f32 to vector<32x256xf32>
    %382 = arith.maximumf %355, %381 : vector<32x256xf32>
    %cst_129 = arith.constant 0.000000e+00 : f32
    %383 = vector.broadcast %cst_129 : f32 to vector<32x256xf32>
    %384 = arith.maximumf %358, %383 : vector<32x256xf32>
    %c0_130 = arith.constant 0 : index
    %c0_131 = arith.constant 0 : index
    %c0_132 = arith.constant 0 : index
    %385 = vector.load %arg6[%c0_130, %c0_131, %c0_132] : memref<2x32x96xbf16, #tpu.memory_space<vmem>>, vector<1x32x96xbf16>
    %386 = vector.shape_cast %385 : vector<1x32x96xbf16> to vector<32x96xbf16>
    %c1_133 = arith.constant 1 : index
    %c0_134 = arith.constant 0 : index
    %c0_135 = arith.constant 0 : index
    %387 = vector.load %arg6[%c1_133, %c0_134, %c0_135] : memref<2x32x96xbf16, #tpu.memory_space<vmem>>, vector<1x32x96xbf16>
    %388 = vector.shape_cast %387 : vector<1x32x96xbf16> to vector<32x96xbf16>
    %c1_i32_136 = arith.constant 1 : i32
    %389 = tpu.dynamic_rotate %368 by %c1_i32_136 dim 1 : vector<32x256xf32>, i32 -> vector<32x256xf32>
    %cst_137 = arith.constant 0.000000e+00 : f32
    %390 = vector.shape_cast %20 : vector<1x256xi1> to vector<1x256xi1>
    %391 = vector.broadcast %390 : vector<1x256xi1> to vector<32x256xi1>
    %392 = vector.broadcast %cst_137 : f32 to vector<32x256xf32>
    %393 = arith.select %391, %389, %392 : vector<32x256xi1>, vector<32x256xf32>
    %c255_i32_138 = arith.constant 255 : i32
    %394 = tpu.dynamic_rotate %362 by %c255_i32_138 dim 1 : vector<32x256xf32>, i32 -> vector<32x256xf32>
    %cst_139 = arith.constant 0.000000e+00 : f32
    %395 = vector.shape_cast %18 : vector<1x256xi1> to vector<1x256xi1>
    %396 = vector.broadcast %395 : vector<1x256xi1> to vector<32x256xi1>
    %397 = vector.broadcast %cst_139 : f32 to vector<32x256xf32>
    %398 = arith.select %396, %394, %397 : vector<32x256xi1>, vector<32x256xf32>
    %399 = arith.truncf %393 : vector<32x256xf32> to vector<32x256xbf16>
    %400 = arith.truncf %362 : vector<32x256xf32> to vector<32x256xbf16>
    %401 = arith.truncf %364 : vector<32x256xf32> to vector<32x256xbf16>
    %402 = tpu.concatenate %399, %400, %401 in 0 : vector<32x256xbf16>, vector<32x256xbf16>, vector<32x256xbf16> -> vector<96x256xbf16>
    %403 = arith.truncf %362 : vector<32x256xf32> to vector<32x256xbf16>
    %404 = arith.truncf %364 : vector<32x256xf32> to vector<32x256xbf16>
    %405 = arith.truncf %366 : vector<32x256xf32> to vector<32x256xbf16>
    %406 = tpu.concatenate %403, %404, %405 in 0 : vector<32x256xbf16>, vector<32x256xbf16>, vector<32x256xbf16> -> vector<96x256xbf16>
    %407 = arith.truncf %364 : vector<32x256xf32> to vector<32x256xbf16>
    %408 = arith.truncf %366 : vector<32x256xf32> to vector<32x256xbf16>
    %409 = arith.truncf %368 : vector<32x256xf32> to vector<32x256xbf16>
    %410 = tpu.concatenate %407, %408, %409 in 0 : vector<32x256xbf16>, vector<32x256xbf16>, vector<32x256xbf16> -> vector<96x256xbf16>
    %411 = arith.truncf %366 : vector<32x256xf32> to vector<32x256xbf16>
    %412 = arith.truncf %368 : vector<32x256xf32> to vector<32x256xbf16>
    %413 = arith.truncf %398 : vector<32x256xf32> to vector<32x256xbf16>
    %414 = tpu.concatenate %411, %412, %413 in 0 : vector<32x256xbf16>, vector<32x256xbf16>, vector<32x256xbf16> -> vector<96x256xbf16>
    %cst_140 = arith.constant dense<0.000000e+00> : vector<32x256xf32>
    %415 = tpu.matmul %386, %402, %cst_140 {dimension_numbers = #tpu.dot_dimension_numbers<[1], [0], [0], [1], [0, 0, 1, 1], [], []>} : vector<32x96xbf16>, vector<96x256xbf16>, vector<32x256xf32> -> vector<32x256xf32>
    %cst_141 = arith.constant dense<0.000000e+00> : vector<32x256xf32>
    %416 = tpu.matmul %386, %406, %cst_141 {dimension_numbers = #tpu.dot_dimension_numbers<[1], [0], [0], [1], [0, 0, 1, 1], [], []>} : vector<32x96xbf16>, vector<96x256xbf16>, vector<32x256xf32> -> vector<32x256xf32>
    %cst_142 = arith.constant dense<0.000000e+00> : vector<32x256xf32>
    %417 = tpu.matmul %386, %410, %cst_142 {dimension_numbers = #tpu.dot_dimension_numbers<[1], [0], [0], [1], [0, 0, 1, 1], [], []>} : vector<32x96xbf16>, vector<96x256xbf16>, vector<32x256xf32> -> vector<32x256xf32>
    %cst_143 = arith.constant dense<0.000000e+00> : vector<32x256xf32>
    %418 = tpu.matmul %386, %414, %cst_143 {dimension_numbers = #tpu.dot_dimension_numbers<[1], [0], [0], [1], [0, 0, 1, 1], [], []>} : vector<32x96xbf16>, vector<96x256xbf16>, vector<32x256xf32> -> vector<32x256xf32>
    %c1_i32_144 = arith.constant 1 : i32
    %419 = tpu.dynamic_rotate %376 by %c1_i32_144 dim 1 : vector<32x256xf32>, i32 -> vector<32x256xf32>
    %cst_145 = arith.constant 0.000000e+00 : f32
    %420 = vector.shape_cast %20 : vector<1x256xi1> to vector<1x256xi1>
    %421 = vector.broadcast %420 : vector<1x256xi1> to vector<32x256xi1>
    %422 = vector.broadcast %cst_145 : f32 to vector<32x256xf32>
    %423 = arith.select %421, %419, %422 : vector<32x256xi1>, vector<32x256xf32>
    %c255_i32_146 = arith.constant 255 : i32
    %424 = tpu.dynamic_rotate %370 by %c255_i32_146 dim 1 : vector<32x256xf32>, i32 -> vector<32x256xf32>
    %cst_147 = arith.constant 0.000000e+00 : f32
    %425 = vector.shape_cast %18 : vector<1x256xi1> to vector<1x256xi1>
    %426 = vector.broadcast %425 : vector<1x256xi1> to vector<32x256xi1>
    %427 = vector.broadcast %cst_147 : f32 to vector<32x256xf32>
    %428 = arith.select %426, %424, %427 : vector<32x256xi1>, vector<32x256xf32>
    %429 = arith.truncf %423 : vector<32x256xf32> to vector<32x256xbf16>
    %430 = arith.truncf %370 : vector<32x256xf32> to vector<32x256xbf16>
    %431 = arith.truncf %372 : vector<32x256xf32> to vector<32x256xbf16>
    %432 = tpu.concatenate %429, %430, %431 in 0 : vector<32x256xbf16>, vector<32x256xbf16>, vector<32x256xbf16> -> vector<96x256xbf16>
    %433 = arith.truncf %370 : vector<32x256xf32> to vector<32x256xbf16>
    %434 = arith.truncf %372 : vector<32x256xf32> to vector<32x256xbf16>
    %435 = arith.truncf %374 : vector<32x256xf32> to vector<32x256xbf16>
    %436 = tpu.concatenate %433, %434, %435 in 0 : vector<32x256xbf16>, vector<32x256xbf16>, vector<32x256xbf16> -> vector<96x256xbf16>
    %437 = arith.truncf %372 : vector<32x256xf32> to vector<32x256xbf16>
    %438 = arith.truncf %374 : vector<32x256xf32> to vector<32x256xbf16>
    %439 = arith.truncf %376 : vector<32x256xf32> to vector<32x256xbf16>
    %440 = tpu.concatenate %437, %438, %439 in 0 : vector<32x256xbf16>, vector<32x256xbf16>, vector<32x256xbf16> -> vector<96x256xbf16>
    %441 = arith.truncf %374 : vector<32x256xf32> to vector<32x256xbf16>
    %442 = arith.truncf %376 : vector<32x256xf32> to vector<32x256xbf16>
    %443 = arith.truncf %428 : vector<32x256xf32> to vector<32x256xbf16>
    %444 = tpu.concatenate %441, %442, %443 in 0 : vector<32x256xbf16>, vector<32x256xbf16>, vector<32x256xbf16> -> vector<96x256xbf16>
    %cst_148 = arith.constant dense<0.000000e+00> : vector<32x256xf32>
    %445 = tpu.matmul %386, %432, %cst_148 {dimension_numbers = #tpu.dot_dimension_numbers<[1], [0], [0], [1], [0, 0, 1, 1], [], []>} : vector<32x96xbf16>, vector<96x256xbf16>, vector<32x256xf32> -> vector<32x256xf32>
    %cst_149 = arith.constant dense<0.000000e+00> : vector<32x256xf32>
    %446 = tpu.matmul %388, %432, %cst_149 {dimension_numbers = #tpu.dot_dimension_numbers<[1], [0], [0], [1], [0, 0, 1, 1], [], []>} : vector<32x96xbf16>, vector<96x256xbf16>, vector<32x256xf32> -> vector<32x256xf32>
    %447 = arith.addf %415, %446 : vector<32x256xf32>
    %cst_150 = arith.constant dense<0.000000e+00> : vector<32x256xf32>
    %448 = tpu.matmul %386, %436, %cst_150 {dimension_numbers = #tpu.dot_dimension_numbers<[1], [0], [0], [1], [0, 0, 1, 1], [], []>} : vector<32x96xbf16>, vector<96x256xbf16>, vector<32x256xf32> -> vector<32x256xf32>
    %cst_151 = arith.constant dense<0.000000e+00> : vector<32x256xf32>
    %449 = tpu.matmul %388, %436, %cst_151 {dimension_numbers = #tpu.dot_dimension_numbers<[1], [0], [0], [1], [0, 0, 1, 1], [], []>} : vector<32x96xbf16>, vector<96x256xbf16>, vector<32x256xf32> -> vector<32x256xf32>
    %450 = arith.addf %416, %449 : vector<32x256xf32>
    %cst_152 = arith.constant dense<0.000000e+00> : vector<32x256xf32>
    %451 = tpu.matmul %386, %440, %cst_152 {dimension_numbers = #tpu.dot_dimension_numbers<[1], [0], [0], [1], [0, 0, 1, 1], [], []>} : vector<32x96xbf16>, vector<96x256xbf16>, vector<32x256xf32> -> vector<32x256xf32>
    %cst_153 = arith.constant dense<0.000000e+00> : vector<32x256xf32>
    %452 = tpu.matmul %388, %440, %cst_153 {dimension_numbers = #tpu.dot_dimension_numbers<[1], [0], [0], [1], [0, 0, 1, 1], [], []>} : vector<32x96xbf16>, vector<96x256xbf16>, vector<32x256xf32> -> vector<32x256xf32>
    %453 = arith.addf %417, %452 : vector<32x256xf32>
    %cst_154 = arith.constant dense<0.000000e+00> : vector<32x256xf32>
    %454 = tpu.matmul %386, %444, %cst_154 {dimension_numbers = #tpu.dot_dimension_numbers<[1], [0], [0], [1], [0, 0, 1, 1], [], []>} : vector<32x96xbf16>, vector<96x256xbf16>, vector<32x256xf32> -> vector<32x256xf32>
    %cst_155 = arith.constant dense<0.000000e+00> : vector<32x256xf32>
    %455 = tpu.matmul %388, %444, %cst_155 {dimension_numbers = #tpu.dot_dimension_numbers<[1], [0], [0], [1], [0, 0, 1, 1], [], []>} : vector<32x96xbf16>, vector<96x256xbf16>, vector<32x256xf32> -> vector<32x256xf32>
    %456 = arith.addf %418, %455 : vector<32x256xf32>
    %c1_i32_156 = arith.constant 1 : i32
    %457 = tpu.dynamic_rotate %384 by %c1_i32_156 dim 1 : vector<32x256xf32>, i32 -> vector<32x256xf32>
    %cst_157 = arith.constant 0.000000e+00 : f32
    %458 = vector.shape_cast %20 : vector<1x256xi1> to vector<1x256xi1>
    %459 = vector.broadcast %458 : vector<1x256xi1> to vector<32x256xi1>
    %460 = vector.broadcast %cst_157 : f32 to vector<32x256xf32>
    %461 = arith.select %459, %457, %460 : vector<32x256xi1>, vector<32x256xf32>
    %c255_i32_158 = arith.constant 255 : i32
    %462 = tpu.dynamic_rotate %378 by %c255_i32_158 dim 1 : vector<32x256xf32>, i32 -> vector<32x256xf32>
    %cst_159 = arith.constant 0.000000e+00 : f32
    %463 = vector.shape_cast %18 : vector<1x256xi1> to vector<1x256xi1>
    %464 = vector.broadcast %463 : vector<1x256xi1> to vector<32x256xi1>
    %465 = vector.broadcast %cst_159 : f32 to vector<32x256xf32>
    %466 = arith.select %464, %462, %465 : vector<32x256xi1>, vector<32x256xf32>
    %467 = arith.truncf %461 : vector<32x256xf32> to vector<32x256xbf16>
    %468 = arith.truncf %378 : vector<32x256xf32> to vector<32x256xbf16>
    %469 = arith.truncf %380 : vector<32x256xf32> to vector<32x256xbf16>
    %470 = tpu.concatenate %467, %468, %469 in 0 : vector<32x256xbf16>, vector<32x256xbf16>, vector<32x256xbf16> -> vector<96x256xbf16>
    %471 = arith.truncf %378 : vector<32x256xf32> to vector<32x256xbf16>
    %472 = arith.truncf %380 : vector<32x256xf32> to vector<32x256xbf16>
    %473 = arith.truncf %382 : vector<32x256xf32> to vector<32x256xbf16>
    %474 = tpu.concatenate %471, %472, %473 in 0 : vector<32x256xbf16>, vector<32x256xbf16>, vector<32x256xbf16> -> vector<96x256xbf16>
    %475 = arith.truncf %380 : vector<32x256xf32> to vector<32x256xbf16>
    %476 = arith.truncf %382 : vector<32x256xf32> to vector<32x256xbf16>
    %477 = arith.truncf %384 : vector<32x256xf32> to vector<32x256xbf16>
    %478 = tpu.concatenate %475, %476, %477 in 0 : vector<32x256xbf16>, vector<32x256xbf16>, vector<32x256xbf16> -> vector<96x256xbf16>
    %479 = arith.truncf %382 : vector<32x256xf32> to vector<32x256xbf16>
    %480 = arith.truncf %384 : vector<32x256xf32> to vector<32x256xbf16>
    %481 = arith.truncf %466 : vector<32x256xf32> to vector<32x256xbf16>
    %482 = tpu.concatenate %479, %480, %481 in 0 : vector<32x256xbf16>, vector<32x256xbf16>, vector<32x256xbf16> -> vector<96x256xbf16>
    %cst_160 = arith.constant dense<0.000000e+00> : vector<32x256xf32>
    %483 = tpu.matmul %388, %470, %cst_160 {dimension_numbers = #tpu.dot_dimension_numbers<[1], [0], [0], [1], [0, 0, 1, 1], [], []>} : vector<32x96xbf16>, vector<96x256xbf16>, vector<32x256xf32> -> vector<32x256xf32>
    %484 = arith.addf %445, %483 : vector<32x256xf32>
    %cst_161 = arith.constant dense<0.000000e+00> : vector<32x256xf32>
    %485 = tpu.matmul %388, %474, %cst_161 {dimension_numbers = #tpu.dot_dimension_numbers<[1], [0], [0], [1], [0, 0, 1, 1], [], []>} : vector<32x96xbf16>, vector<96x256xbf16>, vector<32x256xf32> -> vector<32x256xf32>
    %486 = arith.addf %448, %485 : vector<32x256xf32>
    %cst_162 = arith.constant dense<0.000000e+00> : vector<32x256xf32>
    %487 = tpu.matmul %388, %478, %cst_162 {dimension_numbers = #tpu.dot_dimension_numbers<[1], [0], [0], [1], [0, 0, 1, 1], [], []>} : vector<32x96xbf16>, vector<96x256xbf16>, vector<32x256xf32> -> vector<32x256xf32>
    %488 = arith.addf %451, %487 : vector<32x256xf32>
    %cst_163 = arith.constant dense<0.000000e+00> : vector<32x256xf32>
    %489 = tpu.matmul %388, %482, %cst_163 {dimension_numbers = #tpu.dot_dimension_numbers<[1], [0], [0], [1], [0, 0, 1, 1], [], []>} : vector<32x96xbf16>, vector<96x256xbf16>, vector<32x256xf32> -> vector<32x256xf32>
    %490 = arith.addf %454, %489 : vector<32x256xf32>
    %491 = arith.addf %447, %263 : vector<32x256xf32>
    %cst_164 = arith.constant 0.000000e+00 : f32
    %492 = vector.broadcast %cst_164 : f32 to vector<32x256xf32>
    %493 = arith.maximumf %491, %492 : vector<32x256xf32>
    %494 = arith.addf %450, %266 : vector<32x256xf32>
    %cst_165 = arith.constant 0.000000e+00 : f32
    %495 = vector.broadcast %cst_165 : f32 to vector<32x256xf32>
    %496 = arith.maximumf %494, %495 : vector<32x256xf32>
    %497 = arith.addf %453, %269 : vector<32x256xf32>
    %cst_166 = arith.constant 0.000000e+00 : f32
    %498 = vector.broadcast %cst_166 : f32 to vector<32x256xf32>
    %499 = arith.maximumf %497, %498 : vector<32x256xf32>
    %500 = arith.addf %456, %272 : vector<32x256xf32>
    %cst_167 = arith.constant 0.000000e+00 : f32
    %501 = vector.broadcast %cst_167 : f32 to vector<32x256xf32>
    %502 = arith.maximumf %500, %501 : vector<32x256xf32>
    %503 = arith.addf %484, %275 : vector<32x256xf32>
    %cst_168 = arith.constant 0.000000e+00 : f32
    %504 = vector.broadcast %cst_168 : f32 to vector<32x256xf32>
    %505 = arith.maximumf %503, %504 : vector<32x256xf32>
    %506 = arith.addf %486, %278 : vector<32x256xf32>
    %cst_169 = arith.constant 0.000000e+00 : f32
    %507 = vector.broadcast %cst_169 : f32 to vector<32x256xf32>
    %508 = arith.maximumf %506, %507 : vector<32x256xf32>
    %509 = arith.addf %488, %281 : vector<32x256xf32>
    %cst_170 = arith.constant 0.000000e+00 : f32
    %510 = vector.broadcast %cst_170 : f32 to vector<32x256xf32>
    %511 = arith.maximumf %509, %510 : vector<32x256xf32>
    %512 = arith.addf %490, %284 : vector<32x256xf32>
    %cst_171 = arith.constant 0.000000e+00 : f32
    %513 = vector.broadcast %cst_171 : f32 to vector<32x256xf32>
    %514 = arith.maximumf %512, %513 : vector<32x256xf32>
    %515 = arith.maximumf %493, %505 : vector<32x256xf32>
    %516 = arith.maximumf %496, %508 : vector<32x256xf32>
    %517 = arith.maximumf %499, %511 : vector<32x256xf32>
    %518 = arith.maximumf %502, %514 : vector<32x256xf32>
    %519 = arith.maximumf %515, %516 : vector<32x256xf32>
    %520 = arith.maximumf %517, %518 : vector<32x256xf32>
    %c0_172 = arith.constant 0 : index
    %c0_173 = arith.constant 0 : index
    %521 = vector.load %arg7[%c0_172, %c0_173] : memref<32x32xbf16, #tpu.memory_space<vmem>>, vector<32x32xbf16>
    %522 = arith.truncf %519 : vector<32x256xf32> to vector<32x256xbf16>
    %cst_174 = arith.constant dense<0.000000e+00> : vector<32x256xf32>
    %523 = tpu.matmul %521, %522, %cst_174 {dimension_numbers = #tpu.dot_dimension_numbers<[1], [0], [0], [1], [0, 0, 1, 1], [], []>} : vector<32x32xbf16>, vector<32x256xbf16>, vector<32x256xf32> -> vector<32x256xf32>
    %524 = arith.truncf %520 : vector<32x256xf32> to vector<32x256xbf16>
    %cst_175 = arith.constant dense<0.000000e+00> : vector<32x256xf32>
    %525 = tpu.matmul %521, %524, %cst_175 {dimension_numbers = #tpu.dot_dimension_numbers<[1], [0], [0], [1], [0, 0, 1, 1], [], []>} : vector<32x32xbf16>, vector<32x256xbf16>, vector<32x256xf32> -> vector<32x256xf32>
    %c0_176 = arith.constant 0 : index
    %c0_177 = arith.constant 0 : index
    %526 = vector.load %arg8[%c0_176, %c0_177] : memref<32x96xbf16, #tpu.memory_space<vmem>>, vector<32x96xbf16>
    %c1_i32_178 = arith.constant 1 : i32
    %527 = tpu.dynamic_rotate %525 by %c1_i32_178 dim 1 : vector<32x256xf32>, i32 -> vector<32x256xf32>
    %cst_179 = arith.constant 0.000000e+00 : f32
    %528 = vector.shape_cast %20 : vector<1x256xi1> to vector<1x256xi1>
    %529 = vector.broadcast %528 : vector<1x256xi1> to vector<32x256xi1>
    %530 = vector.broadcast %cst_179 : f32 to vector<32x256xf32>
    %531 = arith.select %529, %527, %530 : vector<32x256xi1>, vector<32x256xf32>
    %c255_i32_180 = arith.constant 255 : i32
    %532 = tpu.dynamic_rotate %523 by %c255_i32_180 dim 1 : vector<32x256xf32>, i32 -> vector<32x256xf32>
    %cst_181 = arith.constant 0.000000e+00 : f32
    %533 = vector.shape_cast %18 : vector<1x256xi1> to vector<1x256xi1>
    %534 = vector.broadcast %533 : vector<1x256xi1> to vector<32x256xi1>
    %535 = vector.broadcast %cst_181 : f32 to vector<32x256xf32>
    %536 = arith.select %534, %532, %535 : vector<32x256xi1>, vector<32x256xf32>
    %537 = arith.truncf %531 : vector<32x256xf32> to vector<32x256xbf16>
    %538 = arith.truncf %523 : vector<32x256xf32> to vector<32x256xbf16>
    %539 = arith.truncf %525 : vector<32x256xf32> to vector<32x256xbf16>
    %540 = tpu.concatenate %537, %538, %539 in 0 : vector<32x256xbf16>, vector<32x256xbf16>, vector<32x256xbf16> -> vector<96x256xbf16>
    %541 = arith.truncf %523 : vector<32x256xf32> to vector<32x256xbf16>
    %542 = arith.truncf %525 : vector<32x256xf32> to vector<32x256xbf16>
    %543 = arith.truncf %536 : vector<32x256xf32> to vector<32x256xbf16>
    %544 = tpu.concatenate %541, %542, %543 in 0 : vector<32x256xbf16>, vector<32x256xbf16>, vector<32x256xbf16> -> vector<96x256xbf16>
    %cst_182 = arith.constant dense<0.000000e+00> : vector<32x256xf32>
    %545 = tpu.matmul %526, %540, %cst_182 {dimension_numbers = #tpu.dot_dimension_numbers<[1], [0], [0], [1], [0, 0, 1, 1], [], []>} : vector<32x96xbf16>, vector<96x256xbf16>, vector<32x256xf32> -> vector<32x256xf32>
    %cst_183 = arith.constant dense<0.000000e+00> : vector<32x256xf32>
    %546 = tpu.matmul %526, %544, %cst_183 {dimension_numbers = #tpu.dot_dimension_numbers<[1], [0], [0], [1], [0, 0, 1, 1], [], []>} : vector<32x96xbf16>, vector<96x256xbf16>, vector<32x256xf32> -> vector<32x256xf32>
    %cst_184 = arith.constant 0.000000e+00 : f32
    %547 = vector.broadcast %cst_184 : f32 to vector<32x256xf32>
    %548 = arith.maximumf %545, %547 : vector<32x256xf32>
    %cst_185 = arith.constant 0.000000e+00 : f32
    %549 = vector.broadcast %cst_185 : f32 to vector<32x256xf32>
    %550 = arith.maximumf %546, %549 : vector<32x256xf32>
    %c0_186 = arith.constant 0 : index
    %c0_187 = arith.constant 0 : index
    %551 = vector.load %arg9[%c0_186, %c0_187] : memref<32x96xbf16, #tpu.memory_space<vmem>>, vector<32x96xbf16>
    %c1_i32_188 = arith.constant 1 : i32
    %552 = tpu.dynamic_rotate %550 by %c1_i32_188 dim 1 : vector<32x256xf32>, i32 -> vector<32x256xf32>
    %cst_189 = arith.constant 0.000000e+00 : f32
    %553 = vector.shape_cast %20 : vector<1x256xi1> to vector<1x256xi1>
    %554 = vector.broadcast %553 : vector<1x256xi1> to vector<32x256xi1>
    %555 = vector.broadcast %cst_189 : f32 to vector<32x256xf32>
    %556 = arith.select %554, %552, %555 : vector<32x256xi1>, vector<32x256xf32>
    %c255_i32_190 = arith.constant 255 : i32
    %557 = tpu.dynamic_rotate %548 by %c255_i32_190 dim 1 : vector<32x256xf32>, i32 -> vector<32x256xf32>
    %cst_191 = arith.constant 0.000000e+00 : f32
    %558 = vector.shape_cast %18 : vector<1x256xi1> to vector<1x256xi1>
    %559 = vector.broadcast %558 : vector<1x256xi1> to vector<32x256xi1>
    %560 = vector.broadcast %cst_191 : f32 to vector<32x256xf32>
    %561 = arith.select %559, %557, %560 : vector<32x256xi1>, vector<32x256xf32>
    %562 = arith.truncf %556 : vector<32x256xf32> to vector<32x256xbf16>
    %563 = arith.truncf %548 : vector<32x256xf32> to vector<32x256xbf16>
    %564 = arith.truncf %550 : vector<32x256xf32> to vector<32x256xbf16>
    %565 = tpu.concatenate %562, %563, %564 in 0 : vector<32x256xbf16>, vector<32x256xbf16>, vector<32x256xbf16> -> vector<96x256xbf16>
    %566 = arith.truncf %548 : vector<32x256xf32> to vector<32x256xbf16>
    %567 = arith.truncf %550 : vector<32x256xf32> to vector<32x256xbf16>
    %568 = arith.truncf %561 : vector<32x256xf32> to vector<32x256xbf16>
    %569 = tpu.concatenate %566, %567, %568 in 0 : vector<32x256xbf16>, vector<32x256xbf16>, vector<32x256xbf16> -> vector<96x256xbf16>
    %cst_192 = arith.constant dense<0.000000e+00> : vector<32x256xf32>
    %570 = tpu.matmul %551, %565, %cst_192 {dimension_numbers = #tpu.dot_dimension_numbers<[1], [0], [0], [1], [0, 0, 1, 1], [], []>} : vector<32x96xbf16>, vector<96x256xbf16>, vector<32x256xf32> -> vector<32x256xf32>
    %cst_193 = arith.constant dense<0.000000e+00> : vector<32x256xf32>
    %571 = tpu.matmul %551, %569, %cst_193 {dimension_numbers = #tpu.dot_dimension_numbers<[1], [0], [0], [1], [0, 0, 1, 1], [], []>} : vector<32x96xbf16>, vector<96x256xbf16>, vector<32x256xf32> -> vector<32x256xf32>
    %572 = arith.addf %570, %523 : vector<32x256xf32>
    %cst_194 = arith.constant 0.000000e+00 : f32
    %573 = vector.broadcast %cst_194 : f32 to vector<32x256xf32>
    %574 = arith.maximumf %572, %573 : vector<32x256xf32>
    %575 = arith.addf %571, %525 : vector<32x256xf32>
    %cst_195 = arith.constant 0.000000e+00 : f32
    %576 = vector.broadcast %cst_195 : f32 to vector<32x256xf32>
    %577 = arith.maximumf %575, %576 : vector<32x256xf32>
    %c0_196 = arith.constant 0 : index
    %c0_197 = arith.constant 0 : index
    %578 = vector.load %arg10[%c0_196, %c0_197] : memref<32x96xbf16, #tpu.memory_space<vmem>>, vector<32x96xbf16>
    %c1_i32_198 = arith.constant 1 : i32
    %579 = tpu.dynamic_rotate %577 by %c1_i32_198 dim 1 : vector<32x256xf32>, i32 -> vector<32x256xf32>
    %cst_199 = arith.constant 0.000000e+00 : f32
    %580 = vector.shape_cast %20 : vector<1x256xi1> to vector<1x256xi1>
    %581 = vector.broadcast %580 : vector<1x256xi1> to vector<32x256xi1>
    %582 = vector.broadcast %cst_199 : f32 to vector<32x256xf32>
    %583 = arith.select %581, %579, %582 : vector<32x256xi1>, vector<32x256xf32>
    %c255_i32_200 = arith.constant 255 : i32
    %584 = tpu.dynamic_rotate %574 by %c255_i32_200 dim 1 : vector<32x256xf32>, i32 -> vector<32x256xf32>
    %cst_201 = arith.constant 0.000000e+00 : f32
    %585 = vector.shape_cast %18 : vector<1x256xi1> to vector<1x256xi1>
    %586 = vector.broadcast %585 : vector<1x256xi1> to vector<32x256xi1>
    %587 = vector.broadcast %cst_201 : f32 to vector<32x256xf32>
    %588 = arith.select %586, %584, %587 : vector<32x256xi1>, vector<32x256xf32>
    %589 = arith.truncf %583 : vector<32x256xf32> to vector<32x256xbf16>
    %590 = arith.truncf %574 : vector<32x256xf32> to vector<32x256xbf16>
    %591 = arith.truncf %577 : vector<32x256xf32> to vector<32x256xbf16>
    %592 = tpu.concatenate %589, %590, %591 in 0 : vector<32x256xbf16>, vector<32x256xbf16>, vector<32x256xbf16> -> vector<96x256xbf16>
    %593 = arith.truncf %574 : vector<32x256xf32> to vector<32x256xbf16>
    %594 = arith.truncf %577 : vector<32x256xf32> to vector<32x256xbf16>
    %595 = arith.truncf %588 : vector<32x256xf32> to vector<32x256xbf16>
    %596 = tpu.concatenate %593, %594, %595 in 0 : vector<32x256xbf16>, vector<32x256xbf16>, vector<32x256xbf16> -> vector<96x256xbf16>
    %cst_202 = arith.constant dense<0.000000e+00> : vector<32x256xf32>
    %597 = tpu.matmul %578, %592, %cst_202 {dimension_numbers = #tpu.dot_dimension_numbers<[1], [0], [0], [1], [0, 0, 1, 1], [], []>} : vector<32x96xbf16>, vector<96x256xbf16>, vector<32x256xf32> -> vector<32x256xf32>
    %cst_203 = arith.constant dense<0.000000e+00> : vector<32x256xf32>
    %598 = tpu.matmul %578, %596, %cst_203 {dimension_numbers = #tpu.dot_dimension_numbers<[1], [0], [0], [1], [0, 0, 1, 1], [], []>} : vector<32x96xbf16>, vector<96x256xbf16>, vector<32x256xf32> -> vector<32x256xf32>
    %cst_204 = arith.constant 0.000000e+00 : f32
    %599 = vector.broadcast %cst_204 : f32 to vector<32x256xf32>
    %600 = arith.maximumf %597, %599 : vector<32x256xf32>
    %cst_205 = arith.constant 0.000000e+00 : f32
    %601 = vector.broadcast %cst_205 : f32 to vector<32x256xf32>
    %602 = arith.maximumf %598, %601 : vector<32x256xf32>
    %c0_206 = arith.constant 0 : index
    %c0_207 = arith.constant 0 : index
    %603 = vector.load %arg11[%c0_206, %c0_207] : memref<32x96xbf16, #tpu.memory_space<vmem>>, vector<32x96xbf16>
    %c1_i32_208 = arith.constant 1 : i32
    %604 = tpu.dynamic_rotate %602 by %c1_i32_208 dim 1 : vector<32x256xf32>, i32 -> vector<32x256xf32>
    %cst_209 = arith.constant 0.000000e+00 : f32
    %605 = vector.shape_cast %20 : vector<1x256xi1> to vector<1x256xi1>
    %606 = vector.broadcast %605 : vector<1x256xi1> to vector<32x256xi1>
    %607 = vector.broadcast %cst_209 : f32 to vector<32x256xf32>
    %608 = arith.select %606, %604, %607 : vector<32x256xi1>, vector<32x256xf32>
    %c255_i32_210 = arith.constant 255 : i32
    %609 = tpu.dynamic_rotate %600 by %c255_i32_210 dim 1 : vector<32x256xf32>, i32 -> vector<32x256xf32>
    %cst_211 = arith.constant 0.000000e+00 : f32
    %610 = vector.shape_cast %18 : vector<1x256xi1> to vector<1x256xi1>
    %611 = vector.broadcast %610 : vector<1x256xi1> to vector<32x256xi1>
    %612 = vector.broadcast %cst_211 : f32 to vector<32x256xf32>
    %613 = arith.select %611, %609, %612 : vector<32x256xi1>, vector<32x256xf32>
    %614 = arith.truncf %608 : vector<32x256xf32> to vector<32x256xbf16>
    %615 = arith.truncf %600 : vector<32x256xf32> to vector<32x256xbf16>
    %616 = arith.truncf %602 : vector<32x256xf32> to vector<32x256xbf16>
    %617 = tpu.concatenate %614, %615, %616 in 0 : vector<32x256xbf16>, vector<32x256xbf16>, vector<32x256xbf16> -> vector<96x256xbf16>
    %618 = arith.truncf %600 : vector<32x256xf32> to vector<32x256xbf16>
    %619 = arith.truncf %602 : vector<32x256xf32> to vector<32x256xbf16>
    %620 = arith.truncf %613 : vector<32x256xf32> to vector<32x256xbf16>
    %621 = tpu.concatenate %618, %619, %620 in 0 : vector<32x256xbf16>, vector<32x256xbf16>, vector<32x256xbf16> -> vector<96x256xbf16>
    %cst_212 = arith.constant dense<0.000000e+00> : vector<32x256xf32>
    %622 = tpu.matmul %603, %617, %cst_212 {dimension_numbers = #tpu.dot_dimension_numbers<[1], [0], [0], [1], [0, 0, 1, 1], [], []>} : vector<32x96xbf16>, vector<96x256xbf16>, vector<32x256xf32> -> vector<32x256xf32>
    %cst_213 = arith.constant dense<0.000000e+00> : vector<32x256xf32>
    %623 = tpu.matmul %603, %621, %cst_213 {dimension_numbers = #tpu.dot_dimension_numbers<[1], [0], [0], [1], [0, 0, 1, 1], [], []>} : vector<32x96xbf16>, vector<96x256xbf16>, vector<32x256xf32> -> vector<32x256xf32>
    %624 = arith.addf %622, %574 : vector<32x256xf32>
    %cst_214 = arith.constant 0.000000e+00 : f32
    %625 = vector.broadcast %cst_214 : f32 to vector<32x256xf32>
    %626 = arith.maximumf %624, %625 : vector<32x256xf32>
    %627 = arith.addf %623, %577 : vector<32x256xf32>
    %cst_215 = arith.constant 0.000000e+00 : f32
    %628 = vector.broadcast %cst_215 : f32 to vector<32x256xf32>
    %629 = arith.maximumf %627, %628 : vector<32x256xf32>
    %630 = arith.maximumf %626, %629 : vector<32x256xf32>
    %631 = arith.truncf %630 : vector<32x256xf32> to vector<32x256xbf16>
    %c0_216 = arith.constant 0 : index
    %c0_217 = arith.constant 0 : index
    %632 = vector.load %arg12[%c0_216, %c0_217] : memref<256x16xbf16, #tpu.memory_space<vmem>>, vector<256x16xbf16>
    %cst_218 = arith.constant dense<0.000000e+00> : vector<32x16xf32>
    %633 = tpu.matmul %631, %632, %cst_218 {dimension_numbers = #tpu.dot_dimension_numbers<[1], [0], [0], [1], [0, 0, 1, 1], [], []>} : vector<32x256xbf16>, vector<256x16xbf16>, vector<32x16xf32> -> vector<32x16xf32>
    %634 = vector.extract_strided_slice %633 {offsets = [0, 0], sizes = [32, 8], strides = [1, 1]} : vector<32x16xf32> to vector<32x8xf32>
    %635 = tpu.transpose %634, [1, 0] : vector<32x8xf32> -> vector<8x32xf32>
    %636 = vector.extract_strided_slice %633 {offsets = [0, 8], sizes = [32, 8], strides = [1, 1]} : vector<32x16xf32> to vector<32x8xf32>
    %637 = tpu.transpose %636, [1, 0] : vector<32x8xf32> -> vector<8x32xf32>
    %638 = tpu.concatenate %635, %637 in 1 : vector<8x32xf32>, vector<8x32xf32> -> vector<8x64xf32>
    %639 = arith.truncf %638 : vector<8x64xf32> to vector<8x64xbf16>
    %c0_219 = arith.constant 0 : index
    %c0_220 = arith.constant 0 : index
    %640 = vector.load %arg13[%c0_219, %c0_220] : memref<64x128xbf16, #tpu.memory_space<vmem>>, vector<64x128xbf16>
    %cst_221 = arith.constant dense<0.000000e+00> : vector<8x128xf32>
    %641 = tpu.matmul %639, %640, %cst_221 {dimension_numbers = #tpu.dot_dimension_numbers<[1], [0], [0], [1], [0, 0, 1, 1], [], []>} : vector<8x64xbf16>, vector<64x128xbf16>, vector<8x128xf32> -> vector<8x128xf32>
    %c0_222 = arith.constant 0 : index
    %c0_223 = arith.constant 0 : index
    %642 = vector.load %arg14[%c0_222, %c0_223] : memref<1x128xf32, #tpu.memory_space<vmem>>, vector<1x128xf32>
    %643 = vector.broadcast %642 : vector<1x128xf32> to vector<8x128xf32>
    %644 = arith.addf %641, %643 : vector<8x128xf32>
    %645 = arith.truncf %644 : vector<8x128xf32> to vector<8x128xbf16>
    %c0_224 = arith.constant 0 : index
    %c0_225 = arith.constant 0 : index
    %646 = vector.load %arg15[%c0_224, %c0_225] : memref<128x128xbf16, #tpu.memory_space<vmem>>, vector<128x128xbf16>
    %cst_226 = arith.constant dense<0.000000e+00> : vector<8x128xf32>
    %647 = tpu.matmul %645, %646, %cst_226 {dimension_numbers = #tpu.dot_dimension_numbers<[1], [0], [0], [1], [0, 0, 1, 1], [], []>} : vector<8x128xbf16>, vector<128x128xbf16>, vector<8x128xf32> -> vector<8x128xf32>
    %c0_227 = arith.constant 0 : index
    %c0_228 = arith.constant 0 : index
    %648 = vector.load %arg16[%c0_227, %c0_228] : memref<1x128xf32, #tpu.memory_space<vmem>>, vector<1x128xf32>
    %649 = vector.broadcast %648 : vector<1x128xf32> to vector<8x128xf32>
    %650 = arith.addf %647, %649 : vector<8x128xf32>
    %c0_229 = arith.constant 0 : index
    %c0_230 = arith.constant 0 : index
    %651 = vector.load %arg17[%c0_229, %c0_230] : memref<8x128xf32, #tpu.memory_space<vmem>>, vector<8x128xf32>
    tpu.vector_store %arg17[%c0_229, %c0_230], %650 {strides = array<i32>} : memref<8x128xf32, #tpu.memory_space<vmem>>, vector<8x128xf32>,
    return
  }
  func.func @transform_0(%arg0: i32) -> (i32, i32) {
    %c0_i32 = arith.constant 0 : i32
    %c0_i32_0 = arith.constant 0 : i32
    return %c0_i32, %arg0 : i32, i32
  }
  func.func @transform_1(%arg0: i32) -> (i32, i32) {
    %c0_i32 = arith.constant 0 : i32
    %c0_i32_0 = arith.constant 0 : i32
    %c0_i32_1 = arith.constant 0 : i32
    return %c0_i32, %c0_i32_0 : i32, i32
  }
  func.func @transform_2(%arg0: i32) -> (i32, i32, i32) {
    %c0_i32 = arith.constant 0 : i32
    %c0_i32_0 = arith.constant 0 : i32
    %c0_i32_1 = arith.constant 0 : i32
    %c0_i32_2 = arith.constant 0 : i32
    return %c0_i32, %c0_i32_0, %c0_i32_1 : i32, i32, i32
  }
  func.func @transform_3(%arg0: i32) -> (i32, i32, i32) {
    %c0_i32 = arith.constant 0 : i32
    %c0_i32_0 = arith.constant 0 : i32
    %c0_i32_1 = arith.constant 0 : i32
    %c0_i32_2 = arith.constant 0 : i32
    return %c0_i32, %c0_i32_0, %c0_i32_1 : i32, i32, i32
  }
  func.func @transform_4(%arg0: i32) -> (i32, i32, i32) {
    %c0_i32 = arith.constant 0 : i32
    %c0_i32_0 = arith.constant 0 : i32
    %c0_i32_1 = arith.constant 0 : i32
    %c0_i32_2 = arith.constant 0 : i32
    return %c0_i32, %c0_i32_0, %c0_i32_1 : i32, i32, i32
  }
  func.func @transform_5(%arg0: i32) -> (i32, i32, i32) {
    %c0_i32 = arith.constant 0 : i32
    %c0_i32_0 = arith.constant 0 : i32
    %c0_i32_1 = arith.constant 0 : i32
    %c0_i32_2 = arith.constant 0 : i32
    return %c0_i32, %c0_i32_0, %c0_i32_1 : i32, i32, i32
  }
  func.func @transform_6(%arg0: i32) -> (i32, i32) {
    %c0_i32 = arith.constant 0 : i32
    %c0_i32_0 = arith.constant 0 : i32
    %c0_i32_1 = arith.constant 0 : i32
    return %c0_i32, %c0_i32_0 : i32, i32
  }
  func.func @transform_7(%arg0: i32) -> (i32, i32) {
    %c0_i32 = arith.constant 0 : i32
    %c0_i32_0 = arith.constant 0 : i32
    %c0_i32_1 = arith.constant 0 : i32
    return %c0_i32, %c0_i32_0 : i32, i32
  }
  func.func @transform_8(%arg0: i32) -> (i32, i32) {
    %c0_i32 = arith.constant 0 : i32
    %c0_i32_0 = arith.constant 0 : i32
    %c0_i32_1 = arith.constant 0 : i32
    return %c0_i32, %c0_i32_0 : i32, i32
  }
  func.func @transform_9(%arg0: i32) -> (i32, i32) {
    %c0_i32 = arith.constant 0 : i32
    %c0_i32_0 = arith.constant 0 : i32
    %c0_i32_1 = arith.constant 0 : i32
    return %c0_i32, %c0_i32_0 : i32, i32
  }
  func.func @transform_10(%arg0: i32) -> (i32, i32) {
    %c0_i32 = arith.constant 0 : i32
    %c0_i32_0 = arith.constant 0 : i32
    %c0_i32_1 = arith.constant 0 : i32
    return %c0_i32, %c0_i32_0 : i32, i32
  }
  func.func @transform_11(%arg0: i32) -> (i32, i32) {
    %c0_i32 = arith.constant 0 : i32
    %c0_i32_0 = arith.constant 0 : i32
    %c0_i32_1 = arith.constant 0 : i32
    return %c0_i32, %c0_i32_0 : i32, i32
  }
  func.func @transform_12(%arg0: i32) -> (i32, i32) {
    %c0_i32 = arith.constant 0 : i32
    %c0_i32_0 = arith.constant 0 : i32
    %c0_i32_1 = arith.constant 0 : i32
    return %c0_i32, %c0_i32_0 : i32, i32
  }
  func.func @transform_13(%arg0: i32) -> (i32, i32) {
    %c0_i32 = arith.constant 0 : i32
    %c0_i32_0 = arith.constant 0 : i32
    %c0_i32_1 = arith.constant 0 : i32
    return %c0_i32, %c0_i32_0 : i32, i32
  }
  func.func @transform_14(%arg0: i32) -> (i32, i32) {
    %c0_i32 = arith.constant 0 : i32
    %c0_i32_0 = arith.constant 0 : i32
    %c0_i32_1 = arith.constant 0 : i32
    return %c0_i32, %c0_i32_0 : i32, i32
  }
  func.func @transform_15(%arg0: i32) -> (i32, i32) {
    %c0_i32 = arith.constant 0 : i32
    %c0_i32_0 = arith.constant 0 : i32
    %c0_i32_1 = arith.constant 0 : i32
    return %c0_i32, %c0_i32_0 : i32, i32
  }
  func.func @transform_16(%arg0: i32) -> (i32, i32) {
    %c0_i32 = arith.constant 0 : i32
    %c0_i32_0 = arith.constant 0 : i32
    return %arg0, %c0_i32 : i32, i32
  }
}

</mosaic_0001>

<bundles_post_ra>
// kernel: resnet1d_kd_forward.1
= control target key start
LH: loop header
LB: loop body
LE: loop exit
PB: predicated region body
PF: predicated region fallthrough
CT: control target
= control target key end

     0   :  { %v8143_v0 = vmov 0   ;;  %s8145_s19 = smov 127   ;;  %vm428_vm0 = vcmask 785408   ;;  %vm5392_vm7 = vcmask 261120   ;;  %s8147_s27 = smov 32   ;;  %vm6867_vm8 = vcmask 523264   ;;  %s13601_s1 = inlined_call_operand.vmem [shape: f32[32,1], index: 1, kind: input, shape index: {}]   ;;  %s13602_s0 = inlined_call_operand.vmem [shape: f32[8,256], index: 0, kind: input, shape index: {}]   ;;  %s13603_s2 = inlined_call_operand.vmem [shape: bf16[2,32,96], index: 2, kind: input, shape index: {}]   ;;  %s13604_s3 = inlined_call_operand.vmem [shape: bf16[2,32,96], index: 3, kind: input, shape index: {}]   ;;  %s13605_s4 = inlined_call_operand.vmem [shape: bf16[2,32,96], index: 4, kind: input, shape index: {}]   ;;  %s13606_s5 = inlined_call_operand.vmem [shape: bf16[2,32,96], index: 5, kind: input, shape index: {}]   ;;  %s13607_s6 = inlined_call_operand.vmem [shape: bf16[32,32], index: 6, kind: input, shape index: {}]   ;;  %s13608_s7 = inlined_call_operand.vmem [shape: bf16[32,96], index: 7, kind: input, shape index: {}]   ;;  %s13609_s8 = inlined_call_operand.vmem [shape: bf16[32,96], index: 8, kind: input, shape index: {}]   ;;  %s13610_s9 = inlined_call_operand.vmem [shape: bf16[32,96], index: 9, kind: input, shape index: {}]   ;;  %s13611_s10 = inlined_call_operand.vmem [shape: bf16[32,96], index: 10, kind: input, shape index: {}]   ;;  %s13612_s11 = inlined_call_operand.vmem [shape: bf16[256,16], index: 11, kind: input, shape index: {}]   ;;  %s13613_s12 = inlined_call_operand.vmem [shape: bf16[64,128], index: 12, kind: input, shape index: {}]   ;;  %s13614_s13 = inlined_call_operand.vmem [shape: f32[1,128], index: 13, kind: input, shape index: {}]   ;;  %s13615_s14 = inlined_call_operand.vmem [shape: bf16[128,128], index: 14, kind: input, shape index: {}]   ;;  %s13616_s15 = inlined_call_operand.vmem [shape: f32[1,128], index: 15, kind: input, shape index: {}]   ;;  %s13617_s16 = inlined_call_operand.vmem [shape: f32[8,128], index: 16, kind: output, shape index: {}]  }
   0x1   :  { %13954 = sst [smem:[#allocation106_spill]] %s13601_s1  ;;  %7561 = vset.pattern.permute.xlu1 %v8143_v0  ;;  %7560 = vset.pattern.permute.xlu0 %v8143_v0  ;;  %v8248_v5 = vld [vmem:[%s13602_s0 + $0x8] sm:$0xff]  ;;  %v8253_v6 = vld [vmem:[%s13602_s0] sm:$0xff]  ;;  %s8144_s0 = smov 1  }
   0x2   :  { %s13955_s23 = sld [smem:[#allocation106_spill]]  ;;  %v121_v7 = vperm.slane %v8253_v6, 2  ;;  %v122_v8 = vperm.slane %v8248_v5, 2  ;;  %v131_v11 = vperm.slane %v8253_v6, 4  ;;  %v132_v12 = vperm.slane %v8248_v5, 4 }
   0x3   :  { %v142_v13 = vperm.slane %v8248_v5, 6  ;;  %v141_v15 = vperm.slane %v8253_v6, 6  ;;  %v8284_v21 = vperm.slane %v8253_v6, 0  ;;  %v8291_v24 = vperm.slane %v8248_v5, 0 }
   0x4   :  { %v8297_v26 = vperm.slane %v8253_v6, 7  ;;  %v8300_v27 = vperm.slane %v8248_v5, 7 }
   0x8   :  { %v89_v1 = vld [vmem:[%s13955_s23 + $0x10] sm:$0xff]  ;;  %v87_v2 = vld [vmem:[%s13955_s23] sm:$0xff]  ;;  %v90_v3 = vld [vmem:[%s13955_s23 + $0x18] sm:$0xff] }
   0x9   :  { %103 = vperm.xlu0 %7560, %v89_v1   ;;  %93 = vperm.xlu1 %7561, %v87_v2   ;;  %v88_v4 = vld [vmem:[%s13955_s23 + $0x8] sm:$0xff] }
  0x11   :  { %108 = vperm.xlu0 %7560, %v90_v3   ;;  %98 = vperm.xlu1 %7561, %v88_v4  }
  0x7b   :  { %v8257_v9 = vpop.permute.xlu0 %103  ;;  %v8259_v10 = vpop.permute.xlu1 %93 }
  0x7c   :  { %v8265_v14 = vmul.f32 %v121_v7, %v8257_v9  ;;  %v8269_v16 = vmul.f32 %v122_v8, %v8257_v9  ;;  %v8272_v17 = vmul.f32 %v131_v11, %v8257_v9  ;;  %v8275_v18 = vmul.f32 %v132_v12, %v8257_v9 }
  0x7d   :  { %v8278_v19 = vmul.f32 %v121_v7, %v8259_v10  ;;  %v8281_v20 = vmul.f32 %v122_v8, %v8259_v10  ;;  %v8294_v25 = vmul.f32 %v142_v13, %v8259_v10  ;;  %v8303_v28 = vmul.f32 %v141_v15, %v8257_v9 }
  0x7e   :  { %13956 = vst [vmem:[#allocation2_spill] sm:$0xff] %v8265_v14  ;;  %v284_v22 = vpack.c.bf16 %v8269_v16, %v8265_v14  ;;  %v348_v23 = vpack.c.bf16 %v8275_v18, %v8272_v17  ;;  %v8306_v29 = vmul.f32 %v141_v15, %v8259_v10  ;;  %v8309_v30 = vmul.f32 %v142_v13, %v8257_v9 }
  0x7f   :  { %13957 = vst [vmem:[#allocation3_spill] sm:$0xff] %v8269_v16  ;;  %v8313_v31 = vmul.f32 %v8291_v24, %v8257_v9  ;;  %v8317_v32 = vpack.c.bf16 %v8281_v20, %v8278_v19  ;;  %v8320_v33 = vmul.f32 %v131_v11, %v8259_v10  ;;  %v8323_v34 = vmul.f32 %v132_v12, %v8259_v10 }
  0x80   :  { %13958 = vst [vmem:[#allocation4_spill] sm:$0xff] %v8272_v17  ;;  %v8327_v35 = vmul.f32 %v8284_v21, %v8259_v10  ;;  %v334_v38 = vunpack.c.l.b16 %v284_v22  ;;  %v335_v39 = vunpack.c.h.b16 %v284_v22  ;;  %v358_v40 = vunpack.c.l.b16 %v348_v23 }
  0x81   :  { %13959 = vst [vmem:[#allocation5_spill] sm:$0xff] %v8275_v18  ;;  %v8335_v41 = vmul.f32 %v8284_v21, %v8257_v9  ;;  %v359_v49 = vunpack.c.h.b16 %v348_v23  ;;  %v346_v53 = vpack.c.bf16 %v8323_v34, %v8320_v33  ;;  %v330_v60 = vunpack.c.l.b16 %v8317_v32 }
  0x82   :  { %13960 = vst [vmem:[#allocation6_spill] sm:$0xff] %v8278_v19 }
  0x83   :  { %13961 = vst [vmem:[#allocation7_spill] sm:$0xff] %v8281_v20  ;;  %v8329_v36 = vpop.permute.xlu0 %108  ;;  %v8331_v37 = vpop.permute.xlu1 %98  ;;  %v14019_v20 = vmov 0 }
  0x84   :  { %13962 = vst [vmem:[#allocation8_spill] sm:$0xff] %v8294_v25  ;;  %v8338_v42 = vmul.f32 %v142_v13, %v8331_v37  ;;  %v8341_v43 = vmul.f32 %v141_v15, %v8329_v36  ;;  %v8344_v44 = vmul.f32 %v141_v15, %v8331_v37  ;;  %v8347_v45 = vmul.f32 %v121_v7, %v8329_v36 }
  0x85   :  { %13963 = vst [vmem:[#allocation9_spill] sm:$0xff] %v8303_v28  ;;  %v8350_v46 = vmul.f32 %v122_v8, %v8329_v36  ;;  %v8353_v47 = vmul.f32 %v131_v11, %v8329_v36  ;;  %v8356_v48 = vmul.f32 %v132_v12, %v8329_v36  ;;  %v8371_v56 = vmul.f32 %v142_v13, %v8329_v36 }
  0x86   :  { %13964 = vst [vmem:[#allocation10_spill] sm:$0xff] %v8306_v29  ;;  %v7577_v50 = vpack.i.bf16 %v8338_v42, %v8294_v25  ;;  %v7562_v51 = vpack.i.bf16 %v8341_v43, %v8303_v28  ;;  %v7572_v52 = vpack.i.bf16 %v8344_v44, %v8306_v29  ;;  %v8374_v57 = vmul.f32 %v121_v7, %v8331_v37 }
  0x87   :  { %13965 = vst [vmem:[#allocation11_spill] sm:$0xff] %v8309_v30  ;;  %v285_v54 = vpack.c.bf16 %v8350_v46, %v8347_v45  ;;  %v349_v55 = vpack.c.bf16 %v8356_v48, %v8353_v47  ;;  %v8380_v58 = vmul.f32 %v8291_v24, %v8329_v36  ;;  %v8383_v59 = vmul.f32 %v122_v8, %v8331_v37 }
  0x88   :  { %13966 = vst [vmem:[#allocation12_spill] sm:$0xff] %v8313_v31  ;;  %7578 = vrot.lane.b32.xlu1 %v7577_v50, %s8144_s0  ;;  %7563 = vrot.lane.b32.xlu2 %v7562_v51, %s8144_s0  ;;  %v8387_v61 = vmul.f32 %v131_v11, %v8331_v37  ;;  %v8393_v3 = vmul.f32 %v132_v12, %v8331_v37  ;;  %v354_v51 = vunpack.c.l.b16 %v346_v53 }
  0x89   :  { %13967 = vst [vmem:[#allocation13_spill] sm:$0xff] %v8320_v33  ;;  %7573 = vrot.lane.b32.xlu0 %v7572_v52, %s8144_s0  ;;  %v336_v62 = vunpack.c.l.b16 %v285_v54  ;;  %v337_v63 = vunpack.c.h.b16 %v285_v54  ;;  %v360_v0 = vunpack.c.l.b16 %v349_v55  ;;  %v361_v1 = vunpack.c.h.b16 %v349_v55 }
  0x8a   :  { %13968 = vst [vmem:[#allocation14_spill] sm:$0xff] %v8323_v34  ;;  %v283_v2 = vpack.c.bf16 %v8383_v59, %v8374_v57  ;;  %v8397_v4 = vmul.f32 %v8284_v21, %v8331_v37  ;;  %v280_v7 = vpack.c.bf16 %v8313_v31, %v8335_v41  ;;  %v347_v12 = vpack.c.bf16 %v8393_v3, %v8387_v61 }
  0x8b   :  { %13969 = vst [vmem:[#allocation15_spill] sm:$0xff] %v8327_v35  ;;  %v8401_v8 = vpack.c.b16 %v336_v62, %v334_v38  ;;  %v8403_v11 = vpack.c.b16 %v337_v63, %v335_v39  ;;  %v8405_v13 = vpack.c.b16 %v360_v0, %v358_v40  ;;  %v8407_v15 = vpack.c.b16 %v361_v1, %v359_v49 }
  0x8c   :  { %13970 = vst [vmem:[#allocation16_spill] sm:$0xff] %v8335_v41  ;;  %v332_v22 = vunpack.c.l.b16 %v283_v2  ;;  %v333_v23 = vunpack.c.h.b16 %v283_v2  ;;  %v8413_v50 = vmul.f32 %v8291_v24, %v8259_v10  ;;  %v7567_v38 = vpack.i.bf16 %v8371_v56, %v8309_v30 }
  0x8d   :  { %13971 = vst [vmem:[#allocation17_spill] sm:$0xff] %v8338_v42  ;;  %437 = vmatpush.bf16.msra.mxu0 %v8401_v8  ;;  %456 = vmatpush.bf16.msra.mxu1 %v8403_v11  ;;  %v7587_v39 = vpack.i.bf16 %v8380_v58, %v8313_v31  ;;  %v331_v40 = vunpack.c.h.b16 %v8317_v32  ;;  %v8424_v49 = vmul.f32 %v8284_v21, %v8329_v36  ;;  %v356_v52 = vunpack.c.l.b16 %v347_v12 }
  0x8e   :  { %13972 = vst [vmem:[#allocation18_spill] sm:$0xff] %v8341_v43  ;;  %475 = vmatpush.bf16.msra.mxu2 %v8405_v13  ;;  %494 = vmatpush.bf16.msra.mxu3 %v8407_v15  ;;  %v357_v54 = vunpack.c.h.b16 %v347_v12  ;;  %v7592_v55 = vpack.i.bf16 %v8397_v4, %v8327_v35  ;;  %v8430_v62 = vpack.c.b16 %v332_v22, %v330_v60  ;;  %v355_v63 = vunpack.c.h.b16 %v346_v53 }
  0x8f   :  { %13973 = vst [vmem:[#allocation19_spill] sm:$0xff] %v8344_v44  ;;  %v281_v32 = vpack.c.bf16 %v8380_v58, %v8424_v49  ;;  %v314_v0 = vunpack.c.l.b16 %v280_v7  ;;  %v8435_v21 = vpack.c.b16 %v333_v23, %v331_v40  ;;  %v8437_v1 = vpack.c.b16 %v356_v52, %v354_v51 }
  0x90   :  { %13974 = vst [vmem:[#allocation20_spill] sm:$0xff] %v8347_v45  ;;  %7568 = vrot.lane.b32.xlu2 %v7567_v38, %s8144_s0  ;;  %7593 = vrot.lane.b32.xlu1 %v7592_v55, %s8145_s19  ;;  %v315_v2 = vunpack.c.h.b16 %v280_v7  ;;  %v8442_v12 = vmul.f32 %v8291_v24, %v8331_v37  ;;  %v8446_v53 = vpack.c.b16 %v357_v54, %v355_v63 }
  0x91   :  { %13975 = vst [vmem:[#allocation21_spill] sm:$0xff] %v8350_v46  ;;  %7588 = vrot.lane.b32.xlu0 %v7587_v39, %s8145_s19  ;;  %438 = vmatpush.bf16.msra.mxu0 %v8430_v62  ;;  %v316_v60 = vunpack.c.l.b16 %v281_v32  ;;  %v317_v22 = vunpack.c.h.b16 %v281_v32  ;;  %v278_v23 = vpack.c.bf16 %v8413_v50, %v8327_v35  ;;  %v8454_v7 = vmul.f32 %v8300_v27, %v8257_v9 }
  0x92   :  { %13976 = vst [vmem:[#allocation22_spill] sm:$0xff] %v8353_v47  ;;  %457 = vmatpush.bf16.msra.mxu1 %v8435_v21  ;;  %476 = vmatpush.bf16.msra.mxu2 %v8437_v1  ;;  %v8458_v24 = vmul.f32 %v8300_v27, %v8329_v36  ;;  %v279_v38 = vpack.c.bf16 %v8442_v12, %v8397_v4 }
  0x93   :  { %13977 = vst [vmem:[#allocation23_spill] sm:$0xff] %v8356_v48  ;;  %495 = vmatpush.bf16.msra.mxu3 %v8446_v53  ;;  %v8463_v39 = vpack.c.b16 %v316_v60, %v314_v0  ;;  %v8467_v40 = vmul.f32 %v8297_v26, %v8257_v9  ;;  %v8471_v51 = vmul.f32 %v8297_v26, %v8329_v36  ;;  %v310_v63 = vunpack.c.l.b16 %v278_v23 }
  0x94   :  { %13978 = vst [vmem:[#allocation24_spill] sm:$0xff] %v8371_v56  ;;  %v8473_v52 = vpack.c.b16 %v317_v22, %v315_v2  ;;  %v312_v54 = vunpack.c.l.b16 %v279_v38  ;;  %v313_v55 = vunpack.c.h.b16 %v279_v38  ;;  %v7582_v32 = vpack.i.bf16 %v8424_v49, %v8335_v41 }
  0x95   :  { %13979 = vst [vmem:[#allocation25_spill] sm:$0xff] %v8374_v57  ;;  %439 = vmatpush.bf16.msra.mxu0 %v8463_v39  ;;  %v7607_v0 = vpack.i.bf16 %v8458_v24, %v8454_v7  ;;  %v311_v60 = vunpack.c.h.b16 %v278_v23  ;;  %v7602_v2 = vpack.i.bf16 %v8471_v51, %v8467_v40  ;;  %v151_v48 = vperm.slane %v8253_v6, 1 }
  0x96   :  { %13980 = vst [vmem:[#allocation26_spill] sm:$0xff] %v8380_v58  ;;  %458 = vmatpush.bf16.msra.mxu1 %v8473_v52  ;;  %477 = vmatpush.bf16.msra.mxu2 %v8401_v8  ;;  %v8485_v22 = vpack.c.b16 %v312_v54, %v310_v63  ;;  %v8503_v63 = vperm.slane %v8253_v6, 3  ;;  %v7597_v47 = vpack.i.bf16 %v8442_v12, %v8413_v50 }
  0x97   :  { %13981 = vst [vmem:[#allocation27_spill] sm:$0xff] %v8383_v59  ;;  %496 = vmatpush.bf16.msra.mxu3 %v8403_v11  ;;  %v8489_v38 = vpack.c.b16 %v313_v55, %v311_v60  ;;  %v8497_v23 = vmul.f32 %v151_v48, %v8257_v9  ;;  %v8500_v54 = vmul.f32 %v151_v48, %v8329_v36  ;;  %v8506_v55 = vperm.slane %v8248_v5, 3 }
  0x98   :  { %13982 = vst [vmem:[#allocation28_spill] sm:$0xff] %v8387_v61  ;;  %7583 = vrot.lane.b32.xlu2 %v7582_v32, %s8145_s19  ;;  %7608 = vrot.lane.b32.xlu1 %v7607_v0, %s8144_s0  ;;  %v8511_v32 = vmul.f32 %v8300_v27, %v8331_v37  ;;  %v8515_v0 = vmul.f32 %v8503_v63, %v8257_v9  ;;  %v152_v61 = vperm.slane %v8248_v5, 1 }
  0x99   :  { %13983 = vst [vmem:[#allocation29_spill] sm:$0xff] %v8393_v3  ;;  %7603 = vrot.lane.b32.xlu0 %v7602_v2, %s8144_s0  ;;  %440 = vmatpush.bf16.msra.mxu0 %v8485_v22  ;;  %v8519_v60 = vmul.f32 %v8506_v55, %v8257_v9  ;;  %v8523_v2 = vmul.f32 %v8300_v27, %v8259_v10 }
  0x9a   :  { %13984 = vst [vmem:[#allocation30_spill] sm:$0xff] %v8397_v4  ;;  %478 = vmatpush.bf16.msra.mxu2 %v8430_v62  ;;  %459 = vmatpush.bf16.msra.mxu1 %v8489_v38  ;;  %v7622_v34 = vpack.i.bf16 %v8500_v54, %v8497_v23  ;;  %v8532_v33 = vmul.f32 %v8503_v63, %v8259_v10 }
  0x9b   :  { %13985 = vst [vmem:[#allocation31_spill] sm:$0xff] %v8413_v50  ;;  %497 = vmatpush.bf16.msra.mxu3 %v8435_v21  ;;  %v8536_v3 = vmul.f32 %v8506_v55, %v8259_v10  ;;  %v7617_v27 = vpack.i.bf16 %v8511_v32, %v8523_v2  ;;  %v8548_v18 = vmul.f32 %v8297_v26, %v8331_v37 }
  0x9c   :  { %13986 = vst [vmem:[#allocation32_spill] sm:$0xff] %v8424_v49  ;;  %v8551_v17 = vmul.f32 %v152_v61, %v8331_v37  ;;  %v8555_v50 = vmul.f32 %v151_v48, %v8331_v37  ;;  %v8568_v35 = vmul.f32 %v152_v61, %v8259_v10  ;;  %v8599_v41 = vmul.f32 %v152_v61, %v8257_v9 }
  0x9d   :  { %13987 = vst [vmem:[#allocation33_spill] sm:$0xff] %v8442_v12  ;;  %v8571_v12 = vmul.f32 %v151_v48, %v8259_v10  ;;  %v8602_v45 = vmul.f32 %v152_v61, %v8329_v36  ;;  %v14016_v49 = vmov 0 }
  0x9e   :  { %13988 = vst [vmem:[#allocation34_spill] sm:$0xff] %v8454_v7  ;;  %479 = vmatpush.bf16.msra.mxu2 %v8463_v39 }
  0x9f   :  { %13989 = vst [vmem:[#allocation35_spill] sm:$0xff] %v8458_v24  ;;  %498 = vmatpush.bf16.msra.mxu3 %v8473_v52  ;;  %v7632_v31 = vpack.i.bf16 %v8555_v50, %v8571_v12 }
  0xa0   :  { %13990 = vst [vmem:[#allocation36_spill] sm:$0xff] %v8467_v40  ;;  %7598 = vrot.lane.b32.xlu2 %v7597_v47, %s8145_s19  ;;  %7623 = vrot.lane.b32.xlu1 %v7622_v34, %s8145_s19  ;;  %v8558_v34 = vperm.slane %v8253_v6, 5  ;;  %v8561_v47 = vperm.slane %v8248_v5, 5  ;;  %v14025_v40 = vmov 0 }
  0xa1   :  { %13991 = vst [vmem:[#allocation37_spill] sm:$0xff] %v8471_v51  ;;  %7618 = vrot.lane.b32.xlu0 %v7617_v27, %s8144_s0  ;;  %v8565_v27 = vmul.f32 %v8297_v26, %v8259_v10  ;;  %v7637_v26 = vpack.i.bf16 %v8551_v17, %v8568_v35 }
  0xa2   :  { %13992 = vst [vmem:[#allocation38_spill] sm:$0xff] %v8473_v52  ;;  %480 = vmatpush.bf16.msra.mxu2 %v8485_v22  ;;  %v8575_v4 = vmul.f32 %v8558_v34, %v8257_v9  ;;  %v8579_v6 = vmul.f32 %v8561_v47, %v8257_v9  ;;  %v8591_v48 = vmul.f32 %v8558_v34, %v8259_v10 }
  0xa3   :  { %13993 = vst [vmem:[#allocation39_spill] sm:$0xff] %v8485_v22  ;;  %499 = vmatpush.bf16.msra.mxu3 %v8489_v38  ;;  %v7612_v5 = vpack.i.bf16 %v8548_v18, %v8565_v27  ;;  %v8595_v46 = vmul.f32 %v8561_v47, %v8259_v10  ;;  %v8612_v10 = vld [vmem:[%s13603_s2 + $0x10] sm:$0xff] }
  0xa4   :  { %13994 = vst [vmem:[#allocation40_spill] sm:$0xff] %v8489_v38 }
  0xa5   :  { %13995 = vst [vmem:[#allocation41_spill] sm:$0xff] %v8497_v23  ;;  %6987 = vmatmul.msk.bf16.vlgmr.msra.gmra.mxu2 %vm428_vm0, %v8612_v10 }
  0xa6   :  { %13996 = vst [vmem:[#allocation42_spill] sm:$0xff] %v8500_v54  ;;  %6989 = vmatmul.msk.bf16.vlgmr.msra.gmra.mxu3 %vm428_vm0, %v8612_v10 }
  0xa7   :  { %13997 = vst [vmem:[#allocation43_spill] sm:$0xff] %v8511_v32 }
  0xa8   :  { %13998 = vst [vmem:[#allocation44_spill] sm:$0xff] %v8515_v0  ;;  %7613 = vrot.lane.b32.xlu2 %v7612_v5, %s8144_s0  ;;  %7638 = vrot.lane.b32.xlu1 %v7637_v26, %s8145_s19  ;;  %v7627_v5 = vpack.i.bf16 %v8602_v45, %v8599_v41  ;;  %v54_v26 = vlaneseq }
  0xa9   :  { %13999 = vst [vmem:[#allocation45_spill] sm:$0xff] %v8519_v60  ;;  %7633 = vrot.lane.b32.xlu0 %v7632_v31, %s8145_s19 }
  0xaa   :  { %14000 = vst [vmem:[#allocation46_spill] sm:$0xff] %v8523_v2  ;;  %v8607_v58 = vand.u32 127, %v54_v26 }
  0xab   :  { %14001 = vst [vmem:[#allocation47_spill] sm:$0xff] %v8532_v33 }
  0xac   :  { %14002 = vst [vmem:[#allocation48_spill] sm:$0xff] %v8536_v3  ;;  %v8619_v31 = vadd.s32 128, %v8607_v58  ;;  %v13645_v61 = vand.u32 31, %v8607_v58  ;;  %vm216_vm1 = vcmp.lt.s32.totalorder %v8607_v58, 1  ;;  %vm253_vm4 = vcmp.lt.s32.totalorder %v8607_v58, 127 }
  0xad   :  { %14003 = vst [vmem:[#allocation49_spill] sm:$0xff] %v8548_v18 }
  0xae   :  { %14004 = vst [vmem:[#allocation50_spill] sm:$0xff] %v8551_v17  ;;  %vm8626_vm2 = vcmp.ge.s32.totalorder %v13645_v61, 1 }
  0xaf   :  { %14005 = vst [vmem:[#allocation51_spill] sm:$0xff] %v8555_v50  ;;  %v14017_v49 = vsel %vm8626_vm2, 4294967295, %v14016_v49 }
  0xb0   :  { %14006 = vst [vmem:[#allocation52_spill] sm:$0xff] %v8565_v27  ;;  %7628 = vrot.lane.b32.xlu2 %v7627_v5, %s8145_s19  ;;  %v13648_v5 = vand.u32 31, %v8619_v31 }
  0xb1   :  { %14007 = vst [vmem:[#allocation53_spill] sm:$0xff] %v8568_v35 }
  0xb2   :  { %14008 = vst [vmem:[#allocation54_spill] sm:$0xff] %v8571_v12  ;;  %vm8632_vm3 = vcmp.ge.s32.totalorder %v13648_v5, 1 }
  0xb3   :  { %14009 = vst [vmem:[#allocation55_spill] sm:$0xff] %v8575_v4  ;;  %v14020_v20 = vsel %vm8632_vm3, 4294967295, %v14019_v20 }
  0xb4   :  { %14010 = vst [vmem:[#allocation56_spill] sm:$0xff] %v8579_v6 }
  0xb5   :  { %14011 = vst [vmem:[#allocation57_spill] sm:$0xff] %v8591_v48 }
  0xb6   :  { %14012 = vst [vmem:[#allocation58_spill] sm:$0xff] %v8595_v46 }
  0xb7   :  { %14013 = vst [vmem:[#allocation59_spill] sm:$0xff] %v8599_v41 }
  0xb8   :  { %14014 = vst [vmem:[#allocation60_spill] sm:$0xff] %v8602_v45 }
  0xb9   :  { %14015 = vst [vmem:[#allocation61_spill] sm:$0xff] %v8607_v58 }
  0xba   :  { %14018 = vst [vmem:[#allocation62_spill] sm:$0xff] %v14017_v49  ;;  %v14257_v49 = vld [vmem:[#allocation35_spill] sm:$0xff] }
  0xbb   :  { %14021 = vst [vmem:[#allocation63_spill] sm:$0xff] %v14020_v20 }
  0xe2   :  { %v7564_v9 = vpop.permute.xlu2 %7563 }
  0xe3   :  { %v7566_v19 = vunpack.i.h.bf16 %v7564_v9  ;;  %v7565_v59 = vunpack.i.l.bf16 %v7564_v9 }
  0xea   :  { %v7569_v26 = vpop.permute.xlu2 %7568 }
  0xeb   :  { %v7571_v57 = vunpack.i.h.bf16 %v7569_v26  ;;  %v7570_v16 = vunpack.i.l.bf16 %v7569_v26 }
  0xed   :  { %v219_v14 = vsel %vm216_vm1, %v7565_v59, %v7570_v16  ;;  %v220_v2 = vsel %vm216_vm1, %v7566_v19, %v7571_v57  ;;  %v223_v61 = vsel %vm216_vm1, %v7570_v16, %v7565_v59  ;;  %v224_v27 = vsel %vm216_vm1, %v7571_v57, %v7566_v19  ;;  %v8655_v16 = vld [vmem:[%s13603_s2 + $0x18] sm:$0xff] }
  0xee   :  { %v233_v5 = vsel %vm8626_vm2, %v223_v61, 0.0  ;;  %v234_v9 = vsel %vm8632_vm3, %v219_v14, 0.0  ;;  %v235_v26 = vsel %vm8626_vm2, %v224_v27, 0.0  ;;  %v236_v32 = vsel %vm8632_vm3, %v220_v2, 0.0  ;;  %6988 = vmatmul.msk.bf16.gmra.mxu2 %vm428_vm0, %v8655_v16  ;;  %6990 = vmatmul.msk.bf16.gmra.mxu3 %vm428_vm0, %v8655_v16 }
  0xef   :  { %v276_v18 = vpack.c.bf16 %v234_v9, %v233_v5  ;;  %v277_v24 = vpack.c.bf16 %v236_v32, %v235_v26  ;;  %v372_v32 = vpack.c.bf16 %v8309_v30, %v8303_v28  ;;  %v8673_v27 = vpack.c.bf16 %v8294_v25, %v8306_v29 }
  0xf0   :  { %v8677_v5 = vpack.c.bf16 %v8338_v42, %v8344_v44 }
  0xf1   :  { %v294_v19 = vunpack.c.l.b16 %v276_v18  ;;  %v296_v57 = vunpack.c.l.b16 %v277_v24  ;;  %v295_v59 = vunpack.c.h.b16 %v276_v18  ;;  %v297_v61 = vunpack.c.h.b16 %v277_v24 }
  0xf2   :  { %v373_v18 = vpack.c.bf16 %v8371_v56, %v8341_v43  ;;  %v7584_v24 = vpop.permute.xlu2 %7583  ;;  %v382_v9 = vunpack.c.l.b16 %v372_v32  ;;  %v378_v56 = vunpack.c.l.b16 %v8673_v27  ;;  %v380_v43 = vunpack.c.l.b16 %v8677_v5 }
  0xf3   :  { %v8661_v14 = vpack.c.b16 %v296_v57, %v294_v19  ;;  %v8663_v2 = vpack.c.b16 %v297_v61, %v295_v59  ;;  %v383_v19 = vunpack.c.h.b16 %v372_v32  ;;  %v379_v42 = vunpack.c.h.b16 %v8673_v27 }
  0xf4   :  { %v384_v26 = vunpack.c.l.b16 %v373_v18  ;;  %v385_v57 = vunpack.c.h.b16 %v373_v18  ;;  %v381_v44 = vunpack.c.h.b16 %v8677_v5 }
  0xf5   :  { %14022 = vst [vmem:[#allocation64_spill] sm:$0xff] %v8661_v14  ;;  %441 = vmatpush.bf16.msra.mxu0 %v8661_v14  ;;  %460 = vmatpush.bf16.msra.mxu1 %v8663_v2 }
  0xf6   :  { %14023 = vst [vmem:[#allocation65_spill] sm:$0xff] %v8663_v2  ;;  %v8681_v25 = vpack.c.b16 %v384_v26, %v382_v9  ;;  %v8683_v29 = vpack.c.b16 %v385_v57, %v383_v19 }
  0xfa   :  { %v7579_v59 = vpop.permute.xlu1 %7578 }
  0xfb   :  { %v7581_v61 = vunpack.i.h.bf16 %v7579_v59  ;;  %v7580_v51 = vunpack.i.l.bf16 %v7579_v59  ;;  %v7574_v30 = vpop.permute.xlu0 %7573 }
  0xfc   :  { %v7576_v28 = vunpack.i.h.bf16 %v7574_v30  ;;  %v7575_v7 = vunpack.i.l.bf16 %v7574_v30 }
  0xfe   :  { %v218_v32 = vsel %vm216_vm1, %v7576_v28, %v7581_v61  ;;  %v222_v18 = vsel %vm216_vm1, %v7581_v61, %v7576_v28  ;;  %v217_v30 = vsel %vm216_vm1, %v7575_v7, %v7580_v51  ;;  %v221_v59 = vsel %vm216_vm1, %v7580_v51, %v7575_v7  ;;  %v7599_v28 = vpop.permute.xlu2 %7598 }
  0xff   :  { %v229_v9 = vsel %vm8626_vm2, %v221_v59, 0.0  ;;  %v230_v27 = vsel %vm8632_vm3, %v217_v30, 0.0  ;;  %v231_v5 = vsel %vm8626_vm2, %v222_v18, 0.0  ;;  %v232_v26 = vsel %vm8632_vm3, %v218_v32, 0.0 }
 0x100   :  { %v274_v19 = vpack.c.bf16 %v230_v27, %v229_v9  ;;  %v275_v57 = vpack.c.bf16 %v232_v26, %v231_v5  ;;  %v8704_v61 = vpack.c.b16 %v380_v43, %v378_v56  ;;  %v7586_v7 = vunpack.i.h.bf16 %v7584_v24 }
 0x101   :  { %v7585_v51 = vunpack.i.l.bf16 %v7584_v24  ;;  %v14024_v59 = vand.u32 31, %v8607_v58  ;;  %v14028_v18 = vand.u32 31, %v8619_v31  ;;  %v14029_v30 = vmov 0 }
 0x102   :  { %v7594_v32 = vpop.permute.xlu1 %7593  ;;  %v290_v2 = vunpack.c.l.b16 %v274_v19  ;;  %v292_v9 = vunpack.c.l.b16 %v275_v57  ;;  %v291_v27 = vunpack.c.h.b16 %v274_v19  ;;  %v293_v43 = vunpack.c.h.b16 %v275_v57 }
 0x103   :  { %vm8708_vm5 = vcmp.lt.s32.totalorder %v14024_v59, 31  ;;  %vm8714_vm6 = vcmp.lt.s32.totalorder %v14028_v18, 31  ;;  %v7601_v56 = vunpack.i.h.bf16 %v7599_v28  ;;  %v7600_v5 = vunpack.i.l.bf16 %v7599_v28  ;;  %v7589_v24 = vpop.permute.xlu0 %7588 }
 0x104   :  { %v14026_v40 = vsel %vm8708_vm5, 4294967295, %v14025_v40  ;;  %v14030_v30 = vsel %vm8714_vm6, 4294967295, %v14029_v30  ;;  %v7596_v26 = vunpack.i.h.bf16 %v7594_v32  ;;  %v7595_v14 = vunpack.i.l.bf16 %v7594_v32 }
 0x105   :  { %14027 = vst [vmem:[#allocation66_spill] sm:$0xff] %v14026_v40  ;;  %v7591_v59 = vunpack.i.h.bf16 %v7589_v24  ;;  %v7590_v38 = vunpack.i.l.bf16 %v7589_v24  ;;  %v8718_v22 = vpack.c.b16 %v292_v9, %v290_v2  ;;  %v8720_v52 = vpack.c.b16 %v293_v43, %v291_v27 }
 0x106   :  { %14031 = vst [vmem:[#allocation67_spill] sm:$0xff] %v14030_v30  ;;  %v255_v31 = vsel %vm253_vm4, %v7596_v26, %v7601_v56  ;;  %v259_v18 = vsel %vm253_vm4, %v7601_v56, %v7596_v26  ;;  %v254_v19 = vsel %vm253_vm4, %v7595_v14, %v7600_v5  ;;  %v258_v28 = vsel %vm253_vm4, %v7600_v5, %v7595_v14 }
 0x107   :  { %v256_v57 = vsel %vm253_vm4, %v7585_v51, %v7590_v38  ;;  %v257_v2 = vsel %vm253_vm4, %v7586_v7, %v7591_v59  ;;  %v260_v32 = vsel %vm253_vm4, %v7590_v38, %v7585_v51  ;;  %v261_v9 = vsel %vm253_vm4, %v7591_v59, %v7586_v7  ;;  %442 = vmatpush.bf16.msra.mxu0 %v8718_v22 }
 0x108   :  { %461 = vmatpush.bf16.msra.mxu1 %v8720_v52  ;;  %v270_v14 = vsel %vm8708_vm5, %v256_v57, 0.0  ;;  %v271_v27 = vsel %vm8714_vm6, %v260_v32, 0.0  ;;  %v272_v43 = vsel %vm8708_vm5, %v257_v2, 0.0  ;;  %v273_v38 = vsel %vm8714_vm6, %v261_v9, 0.0 }
 0x109   :  { %v396_v7 = vpack.c.bf16 %v271_v27, %v270_v14  ;;  %v397_v51 = vpack.c.bf16 %v273_v38, %v272_v43  ;;  %v266_v56 = vsel %vm8708_vm5, %v254_v19, 0.0  ;;  %v267_v5 = vsel %vm8714_vm6, %v258_v28, 0.0 }
 0x10a   :  { %6983 = vmatmul.msk.bf16.vlgmr.msra.gmra.mxu0 %vm428_vm0, %v8612_v10  ;;  %v8756_v24 = vpack.c.b16 %v381_v44, %v379_v42  ;;  %v268_v26 = vsel %vm8708_vm5, %v255_v31, 0.0  ;;  %v269_v59 = vsel %vm8714_vm6, %v259_v18, 0.0  ;;  %v394_v57 = vpack.c.bf16 %v267_v5, %v266_v56 }
 0x10b   :  { %513 = vmatpush.bf16.msrb.mxu0 %v8681_v25  ;;  %6985 = vmatmul.msk.bf16.vlgmr.msra.gmra.mxu1 %vm428_vm0, %v8612_v10  ;;  %v406_v2 = vunpack.c.l.b16 %v396_v7  ;;  %v408_v19 = vunpack.c.l.b16 %v397_v51  ;;  %v407_v32 = vunpack.c.h.b16 %v396_v7  ;;  %v409_v9 = vunpack.c.h.b16 %v397_v51  ;;  %v7604_v7 = vpop.permute.xlu0 %7603 }
 0x10c   :  { %532 = vmatpush.bf16.msrb.mxu1 %v8683_v29  ;;  %v395_v31 = vpack.c.bf16 %v269_v59, %v268_v26  ;;  %v402_v18 = vunpack.c.l.b16 %v394_v57  ;;  %v403_v28 = vunpack.c.h.b16 %v394_v57  ;;  %v8775_v14 = vmul.f32 %v8503_v63, %v8329_v36 }
 0x10d   :  { %v8766_v42 = vpack.c.b16 %v408_v19, %v406_v2  ;;  %v8768_v44 = vpack.c.b16 %v409_v9, %v407_v32  ;;  %v8779_v27 = vmul.f32 %v8506_v55, %v8329_v36  ;;  %v661_v5 = vpack.c.bf16 %v8519_v60, %v8515_v0  ;;  %v7609_v2 = vpop.permute.xlu1 %7608 }
 0x10e   :  { %14032 = vst [vmem:[#allocation68_spill] sm:$0xff] %v8775_v14  ;;  %v404_v43 = vunpack.c.l.b16 %v395_v31  ;;  %v405_v38 = vunpack.c.h.b16 %v395_v31  ;;  %v8793_v59 = vmul.f32 %v8503_v63, %v8331_v37  ;;  %v8797_v57 = vmul.f32 %v8506_v55, %v8331_v37 }
 0x10f   :  { %514 = vmatpush.bf16.msrb.mxu0 %v8704_v61  ;;  %551 = vmatpush.bf16.msrb.mxu2 %v8766_v42  ;;  %14033 = vst [vmem:[#allocation69_spill] sm:$0xff] %v8779_v27  ;;  %v662_v26 = vpack.c.bf16 %v8779_v27, %v8775_v14  ;;  %v711_v19 = vunpack.c.l.b16 %v661_v5  ;;  %v8804_v32 = vpack.c.bf16 %v8599_v41, %v8497_v23  ;;  %v712_v9 = vunpack.c.h.b16 %v661_v5 }
 0x110   :  { %533 = vmatpush.bf16.msrb.mxu1 %v8756_v24  ;;  %570 = vmatpush.bf16.msrb.mxu3 %v8768_v44  ;;  %v8782_v51 = vpack.c.b16 %v404_v43, %v402_v18  ;;  %v8784_v56 = vpack.c.b16 %v405_v38, %v403_v28  ;;  %14035 = vst [vmem:[#allocation71_spill] sm:$0xff] %v8793_v59  ;;  %v7606_v18 = vunpack.i.h.bf16 %v7604_v7  ;;  %v7611_v28 = vunpack.i.h.bf16 %v7609_v2 }
 0x111   :  { %14036 = vst [vmem:[#allocation72_spill] sm:$0xff] %v8797_v57  ;;  %v713_v63 = vunpack.c.l.b16 %v662_v26  ;;  %v659_v55 = vpack.c.bf16 %v8536_v3, %v8532_v33  ;;  %v660_v31 = vpack.c.bf16 %v8797_v57, %v8793_v59  ;;  %v714_v43 = vunpack.c.h.b16 %v662_v26 }
 0x112   :  { %14034 = vst [vmem:[#allocation70_spill] sm:$0xff] %v8784_v56  ;;  %v658_v38 = vpack.c.bf16 %v8602_v45, %v8500_v54  ;;  %v7605_v60 = vunpack.i.l.bf16 %v7604_v7  ;;  %v7610_v0 = vunpack.i.l.bf16 %v7609_v2  ;;  %v691_v5 = vunpack.c.l.b16 %v8804_v32  ;;  %v7614_v7 = vpop.permute.xlu2 %7613 }
 0x113   :  { %515 = vmatpush.bf16.msrb.mxu0 %v8405_v13  ;;  %552 = vmatpush.bf16.msrb.mxu2 %v8782_v51  ;;  %v7619_v3 = vpop.permute.xlu0 %7618  ;;  %v8822_v33 = vpack.c.b16 %v713_v63, %v711_v19  ;;  %v707_v26 = vunpack.c.l.b16 %v659_v55  ;;  %v709_v57 = vunpack.c.l.b16 %v660_v31  ;;  %v710_v59 = vunpack.c.h.b16 %v660_v31 }
 0x114   :  { %534 = vmatpush.bf16.msrb.mxu1 %v8407_v15  ;;  %571 = vmatpush.bf16.msrb.mxu3 %v8784_v56  ;;  %v606_v2 = vsel %vm216_vm1, %v7606_v18, %v7611_v28  ;;  %v8828_v27 = vpack.c.b16 %v714_v43, %v712_v9  ;;  %v708_v14 = vunpack.c.h.b16 %v659_v55  ;;  %v693_v23 = vunpack.c.l.b16 %v658_v38 }
 0x115   :  { %v610_v54 = vsel %vm216_vm1, %v7611_v28, %v7606_v18  ;;  %v605_v19 = vsel %vm216_vm1, %v7605_v60, %v7610_v0  ;;  %v609_v63 = vsel %vm216_vm1, %v7610_v0, %v7605_v60  ;;  %v692_v31 = vunpack.c.h.b16 %v8804_v32 }
 0x116   :  { %v7621_v41 = vunpack.i.h.bf16 %v7619_v3  ;;  %v7620_v9 = vunpack.i.l.bf16 %v7619_v3  ;;  %v694_v55 = vunpack.c.h.b16 %v658_v38  ;;  %v656_v18 = vpack.c.bf16 %v8551_v17, %v8555_v50 }
 0x117   :  { %516 = vmatpush.bf16.msrb.mxu0 %v8437_v1  ;;  %553 = vmatpush.bf16.msrb.mxu2 %v8681_v25  ;;  %v7616_v28 = vunpack.i.h.bf16 %v7614_v7  ;;  %v7615_v43 = vunpack.i.l.bf16 %v7614_v7  ;;  %v8842_v45 = vpack.c.b16 %v709_v57, %v707_v26  ;;  %v8844_v56 = vpack.c.b16 %v710_v59, %v708_v14 }
 0x118   :  { %535 = vmatpush.bf16.msrb.mxu1 %v8446_v53  ;;  %572 = vmatpush.bf16.msrb.mxu3 %v8683_v29  ;;  %v617_v0 = vsel %vm8626_vm2, %v610_v54, 0.0  ;;  %v618_v60 = vsel %vm8632_vm3, %v606_v2, 0.0  ;;  %v615_v3 = vsel %vm8626_vm2, %v609_v63, 0.0  ;;  %v616_v32 = vsel %vm8632_vm3, %v605_v19, 0.0 }
 0x119   :  { %v655_v14 = vpack.c.bf16 %v8568_v35, %v8571_v12  ;;  %v603_v54 = vsel %vm216_vm1, %v7615_v43, %v7620_v9  ;;  %v604_v59 = vsel %vm216_vm1, %v7616_v28, %v7621_v41  ;;  %v607_v57 = vsel %vm216_vm1, %v7620_v9, %v7615_v43 }
 0x11a   :  { %6984 = vmatmul.msk.bf16.gmra.mxu0 %vm428_vm0, %v8655_v16  ;;  %v608_v38 = vsel %vm216_vm1, %v7621_v41, %v7616_v28  ;;  %v653_v26 = vpack.c.bf16 %v616_v32, %v615_v3  ;;  %v654_v7 = vpack.c.bf16 %v618_v60, %v617_v0  ;;  %v8870_v2 = vpack.c.b16 %v693_v23, %v691_v5 }
 0x11b   :  { %517 = vmatpush.bf16.msrb.mxu0 %v8401_v8  ;;  %6986 = vmatmul.msk.bf16.gmra.mxu1 %vm428_vm0, %v8655_v16  ;;  %v8872_v19 = vpack.c.b16 %v694_v55, %v692_v31  ;;  %v689_v63 = vunpack.c.l.b16 %v656_v18  ;;  %v690_v35 = vunpack.c.h.b16 %v656_v18  ;;  %v611_v9 = vsel %vm8626_vm2, %v607_v57, 0.0 }
 0x11c   :  { %536 = vmatpush.bf16.msrb.mxu1 %v8403_v11  ;;  %554 = vmatpush.bf16.msrb.mxu2 %v8704_v61  ;;  %v612_v41 = vsel %vm8632_vm3, %v603_v54, 0.0  ;;  %v613_v28 = vsel %vm8626_vm2, %v608_v38, 0.0  ;;  %v614_v43 = vsel %vm8632_vm3, %v604_v59, 0.0  ;;  %v687_v23 = vunpack.c.l.b16 %v655_v14 }
 0x11d   :  { %573 = vmatpush.bf16.msrb.mxu3 %v8756_v24  ;;  %v688_v5 = vunpack.c.h.b16 %v655_v14  ;;  %v671_v31 = vunpack.c.l.b16 %v653_v26  ;;  %v673_v55 = vunpack.c.l.b16 %v654_v7  ;;  %v672_v18 = vunpack.c.h.b16 %v653_v26 }
 0x11e   :  { %v674_v0 = vunpack.c.h.b16 %v654_v7  ;;  %v8890_v60 = vpack.c.b16 %v689_v63, %v687_v23  ;;  %v651_v32 = vpack.c.bf16 %v612_v41, %v611_v9  ;;  %v652_v54 = vpack.c.bf16 %v614_v43, %v613_v28 }
 0x11f   :  { %518 = vmatpush.bf16.msrb.mxu0 %v8430_v62  ;;  %v8892_v3 = vpack.c.b16 %v690_v35, %v688_v5  ;;  %v8900_v14 = vmul.f32 %v8558_v34, %v8329_v36  ;;  %v677_v35 = vpack.c.b16 %v673_v55, %v671_v31  ;;  %v8908_v57 = vmul.f32 %v8561_v47, %v8329_v36 }
 0x120   :  { %537 = vmatpush.bf16.msrb.mxu1 %v8435_v21  ;;  %555 = vmatpush.bf16.msrb.mxu2 %v8405_v13  ;;  %v678_v59 = vpack.c.b16 %v674_v0, %v672_v18  ;;  %v667_v38 = vunpack.c.l.b16 %v651_v32  ;;  %v669_v26 = vunpack.c.l.b16 %v652_v54  ;;  %v668_v7 = vunpack.c.h.b16 %v651_v32 }
 0x121   :  { %574 = vmatpush.bf16.msrb.mxu3 %v8407_v15  ;;  %14037 = vst [vmem:[#allocation73_spill] sm:$0xff] %v8900_v14  ;;  %v670_v63 = vunpack.c.h.b16 %v652_v54  ;;  %v725_v9 = vpack.c.bf16 %v8579_v6, %v8575_v4  ;;  %v726_v41 = vpack.c.bf16 %v8908_v57, %v8900_v14  ;;  %v8918_v36 = vmul.f32 %v8558_v34, %v8331_v37 }
 0x122   :  { %14038 = vst [vmem:[#allocation74_spill] sm:$0xff] %v8908_v57  ;;  %v675_v28 = vpack.c.b16 %v669_v26, %v667_v38  ;;  %v8922_v23 = vmul.f32 %v8561_v47, %v8331_v37  ;;  %v723_v37 = vpack.c.bf16 %v8595_v46, %v8591_v48  ;;  %v14041_v38 = vld [vmem:[#allocation38_spill] sm:$0xff] }
 0x123   :  { %813 = vmatpush.bf16.msra.mxu0 %v8822_v33  ;;  %v676_v43 = vpack.c.b16 %v670_v63, %v668_v7  ;;  %14039 = vst [vmem:[#allocation75_spill] sm:$0xff] %v8918_v36  ;;  %v735_v5 = vunpack.c.l.b16 %v725_v9  ;;  %v737_v31 = vunpack.c.l.b16 %v726_v41  ;;  %v736_v55 = vunpack.c.h.b16 %v725_v9  ;;  %v14042_v63 = vld [vmem:[#allocation39_spill] sm:$0xff]  ;;  %v14043_v9 = vld [vmem:[#allocation40_spill] sm:$0xff] }
 0x124   :  { %832 = vmatpush.bf16.msra.mxu1 %v8828_v27  ;;  %556 = vmatpush.bf16.msrb.mxu2 %v8437_v1  ;;  %14040 = vst [vmem:[#allocation76_spill] sm:$0xff] %v8922_v23  ;;  %v738_v18 = vunpack.c.h.b16 %v726_v41  ;;  %v724_v34 = vpack.c.bf16 %v8922_v23, %v8918_v36  ;;  %v14044_v41 = vld [vmem:[#allocation64_spill] sm:$0xff] }
 0x125   :  { %575 = vmatpush.bf16.msrb.mxu3 %v8446_v53  ;;  %v8938_v47 = vpack.c.b16 %v737_v31, %v735_v5  ;;  %v14047_v5 = vld [vmem:[#allocation34_spill] sm:$0xff] }
 0x126   :  { %v8940_v0 = vpack.c.b16 %v738_v18, %v736_v55  ;;  %v733_v32 = vunpack.c.l.b16 %v724_v34  ;;  %v734_v54 = vunpack.c.h.b16 %v724_v34  ;;  %v14048_v55 = vld [vmem:[#allocation37_spill] sm:$0xff]  ;;  %v14049_v18 = vld [vmem:[#allocation35_spill] sm:$0xff] }
 0x127   :  { %814 = vmatpush.bf16.msra.mxu0 %v8842_v45  ;;  %6995 = vmatmul.msk.bf16.vlgmr.msrb.gmra.mxu2 %vm428_vm0, %v8612_v10  ;;  %v750_v34 = vpack.c.bf16 %v14049_v18, %v14048_v55 }
 0x128   :  { %833 = vmatpush.bf16.msra.mxu1 %v8844_v56  ;;  %851 = vmatpush.bf16.msra.mxu2 %v8822_v33 }
 0x129   :  { %870 = vmatpush.bf16.msra.mxu3 %v8828_v27 }
 0x12a   :  { %6997 = vmatmul.msk.bf16.vlgmr.msrb.gmra.mxu3 %vm428_vm0, %v8612_v10  ;;  %6991 = vmatmul.msk.bf16.vlgmr.msrb.gmra.mxu0 %vm428_vm0, %v8612_v10 }
 0x12b   :  { %815 = vmatpush.bf16.msra.mxu0 %v8870_v2  ;;  %6993 = vmatmul.msk.bf16.vlgmr.msrb.gmra.mxu1 %vm428_vm0, %v8612_v10 }
 0x12c   :  { %834 = vmatpush.bf16.msra.mxu1 %v8872_v19  ;;  %852 = vmatpush.bf16.msra.mxu2 %v8842_v45 }
 0x12d   :  { %871 = vmatpush.bf16.msra.mxu3 %v8844_v56 }
 0x12f   :  { %816 = vmatpush.bf16.msra.mxu0 %v8890_v60 }
 0x130   :  { %835 = vmatpush.bf16.msra.mxu1 %v8892_v3  ;;  %853 = vmatpush.bf16.msra.mxu2 %v8870_v2 }
 0x131   :  { %872 = vmatpush.bf16.msra.mxu3 %v8872_v19 }
 0x133   :  { %817 = vmatpush.bf16.msra.mxu0 %v677_v35 }
 0x134   :  { %836 = vmatpush.bf16.msra.mxu1 %v678_v59  ;;  %854 = vmatpush.bf16.msra.mxu2 %v8890_v60 }
 0x135   :  { %873 = vmatpush.bf16.msra.mxu3 %v8892_v3 }
 0x137   :  { %818 = vmatpush.bf16.msra.mxu0 %v675_v28  ;;  %6996 = vmatmul.msk.bf16.gmra.mxu2 %vm428_vm0, %v8655_v16 }
 0x138   :  { %837 = vmatpush.bf16.msra.mxu1 %v676_v43  ;;  %855 = vmatpush.bf16.msra.mxu2 %v677_v35  ;;  %v731_v35 = vunpack.c.l.b16 %v723_v37 }
 0x139   :  { %874 = vmatpush.bf16.msra.mxu3 %v678_v59  ;;  %v732_v59 = vunpack.c.h.b16 %v723_v37 }
 0x13a   :  { %6998 = vmatmul.msk.bf16.gmra.mxu3 %vm428_vm0, %v8655_v16  ;;  %6992 = vmatmul.msk.bf16.gmra.mxu0 %vm428_vm0, %v8655_v16  ;;  %v8950_v26 = vpack.c.b16 %v733_v32, %v731_v35  ;;  %v762_v32 = vunpack.c.h.b16 %v750_v34  ;;  %v14051_v35 = vld [vmem:[#allocation43_spill] sm:$0xff] }
 0x13b   :  { %889 = vmatpush.bf16.msrb.mxu0 %v8401_v8  ;;  %6994 = vmatmul.msk.bf16.gmra.mxu1 %vm428_vm0, %v8655_v16  ;;  %v8952_v7 = vpack.c.b16 %v734_v54, %v732_v59  ;;  %v14050_v54 = vld [vmem:[#allocation49_spill] sm:$0xff] }
 0x13c   :  { %908 = vmatpush.bf16.msrb.mxu1 %v8403_v11  ;;  %856 = vmatpush.bf16.msra.mxu2 %v675_v28  ;;  %v14045_v28 = vld [vmem:[#allocation65_spill] sm:$0xff]  ;;  %v748_v59 = vpack.c.bf16 %v14051_v35, %v14050_v54 }
 0x13d   :  { %875 = vmatpush.bf16.msra.mxu3 %v676_v43  ;;  %v8971_v43 = vld [vmem:[%s13603_s2] sm:$0xff] }
 0x13f   :  { %890 = vmatpush.bf16.msrb.mxu0 %v8430_v62 }
 0x140   :  { %909 = vmatpush.bf16.msrb.mxu1 %v8435_v21  ;;  %927 = vmatpush.bf16.msrb.mxu2 %v8938_v47 }
 0x141   :  { %946 = vmatpush.bf16.msrb.mxu3 %v8940_v0 }
 0x143   :  { %891 = vmatpush.bf16.msrb.mxu0 %v8463_v39 }
 0x144   :  { %910 = vmatpush.bf16.msrb.mxu1 %v14041_v38  ;;  %928 = vmatpush.bf16.msrb.mxu2 %v8950_v26 }
 0x145   :  { %947 = vmatpush.bf16.msrb.mxu3 %v8952_v7 }
 0x147   :  { %892 = vmatpush.bf16.msrb.mxu0 %v14042_v63  ;;  %7011 = vmatmul.msk.bf16.vlgmr.msra.gmra.mxu2 %vm428_vm0, %v8612_v10 }
 0x148   :  { %911 = vmatpush.bf16.msrb.mxu1 %v14043_v9  ;;  %929 = vmatpush.bf16.msrb.mxu2 %v8822_v33 }
 0x149   :  { %948 = vmatpush.bf16.msrb.mxu3 %v8828_v27 }
 0x14a   :  { %7013 = vmatmul.msk.bf16.vlgmr.msra.gmra.mxu3 %vm428_vm0, %v8612_v10  ;;  %7007 = vmatmul.msk.bf16.vlgmr.msra.gmra.mxu0 %vm428_vm0, %v8971_v43 }
 0x14b   :  { %893 = vmatpush.bf16.msrb.mxu0 %v14044_v41  ;;  %7009 = vmatmul.msk.bf16.vlgmr.msra.gmra.mxu1 %vm428_vm0, %v8971_v43  ;;  %v14052_v41 = vld [vmem:[#allocation52_spill] sm:$0xff] }
 0x14c   :  { %912 = vmatpush.bf16.msrb.mxu1 %v14045_v28  ;;  %930 = vmatpush.bf16.msrb.mxu2 %v8842_v45  ;;  %v14053_v28 = vld [vmem:[#allocation46_spill] sm:$0xff] }
 0x14d   :  { %949 = vmatpush.bf16.msrb.mxu3 %v8844_v56 }
 0x14f   :  { %894 = vmatpush.bf16.msrb.mxu0 %v8718_v22  ;;  %v14046_v22 = vld [vmem:[#allocation36_spill] sm:$0xff] }
 0x150   :  { %913 = vmatpush.bf16.msrb.mxu1 %v8720_v52  ;;  %931 = vmatpush.bf16.msrb.mxu2 %v8870_v2  ;;  %v9000_v52 = vld [vmem:[%s13603_s2 + $0x8] sm:$0xff]  ;;  %v749_v31 = vpack.c.bf16 %v14047_v5, %v14046_v22 }
 0x151   :  { %950 = vmatpush.bf16.msrb.mxu3 %v8872_v19 }
 0x152   :  { %v760_v37 = vunpack.c.h.b16 %v749_v31 }
 0x153   :  { %965 = vmatpush.bf16.msra.mxu0 %v8938_v47 }
 0x154   :  { %984 = vmatpush.bf16.msra.mxu1 %v8940_v0  ;;  %932 = vmatpush.bf16.msrb.mxu2 %v8890_v60 }
 0x155   :  { %951 = vmatpush.bf16.msrb.mxu3 %v8892_v3 }
 0x157   :  { %966 = vmatpush.bf16.msra.mxu0 %v8950_v26  ;;  %7012 = vmatmul.msk.bf16.gmra.mxu2 %vm428_vm0, %v8655_v16 }
 0x158   :  { %1003 = vmatpush.bf16.msra.mxu2 %v8405_v13  ;;  %985 = vmatpush.bf16.msra.mxu1 %v8952_v7 }
 0x159   :  { %1022 = vmatpush.bf16.msra.mxu3 %v8407_v15 }
 0x15a   :  { %7014 = vmatmul.msk.bf16.gmra.mxu3 %vm428_vm0, %v8655_v16  ;;  %7008 = vmatmul.msk.bf16.gmra.mxu0 %vm428_vm0, %v9000_v52 }
 0x15b   :  { %967 = vmatpush.bf16.msra.mxu0 %v8822_v33  ;;  %7010 = vmatmul.msk.bf16.gmra.mxu1 %vm428_vm0, %v9000_v52 }
 0x15c   :  { %1004 = vmatpush.bf16.msra.mxu2 %v8437_v1  ;;  %986 = vmatpush.bf16.msra.mxu1 %v8828_v27 }
 0x15d   :  { %1023 = vmatpush.bf16.msra.mxu3 %v8446_v53 }
 0x15f   :  { %968 = vmatpush.bf16.msra.mxu0 %v8842_v45 }
 0x160   :  { %987 = vmatpush.bf16.msra.mxu1 %v8844_v56  ;;  %1005 = vmatpush.bf16.msra.mxu2 %v8401_v8 }
 0x161   :  { %1024 = vmatpush.bf16.msra.mxu3 %v8403_v11 }
 0x163   :  { %969 = vmatpush.bf16.msra.mxu0 %v8870_v2  ;;  %v759_v2 = vunpack.c.l.b16 %v749_v31  ;;  %v7624_v31 = vpop.permute.xlu1 %7623 }
 0x164   :  { %988 = vmatpush.bf16.msra.mxu1 %v8872_v19  ;;  %1006 = vmatpush.bf16.msra.mxu2 %v8430_v62  ;;  %v761_v19 = vunpack.c.l.b16 %v750_v34 }
 0x165   :  { %1025 = vmatpush.bf16.msra.mxu3 %v8435_v21 }
 0x166   :  { %v9028_v6 = vpack.c.b16 %v761_v19, %v759_v2  ;;  %v7629_v19 = vpop.permute.xlu2 %7628 }
 0x167   :  { %970 = vmatpush.bf16.msra.mxu0 %v8890_v60  ;;  %v747_v60 = vpack.c.bf16 %v14053_v28, %v14052_v41  ;;  %7019 = vmatmul.msk.bf16.vlgmr.msrb.gmra.mxu2 %vm428_vm0, %v8971_v43 }
 0x168   :  { %989 = vmatpush.bf16.msra.mxu1 %v8892_v3  ;;  %1007 = vmatpush.bf16.msra.mxu2 %v8463_v39  ;;  %v9030_v3 = vpack.c.b16 %v762_v32, %v760_v37  ;;  %v757_v39 = vunpack.c.l.b16 %v748_v59  ;;  %v7625_v37 = vunpack.i.l.bf16 %v7624_v31  ;;  %v7626_v32 = vunpack.i.h.bf16 %v7624_v31 }
 0x169   :  { %1026 = vmatpush.bf16.msra.mxu3 %v14041_v38  ;;  %v758_v38 = vunpack.c.h.b16 %v748_v59  ;;  %v7630_v59 = vunpack.i.l.bf16 %v7629_v19 }
 0x16a   :  { %7021 = vmatmul.msk.bf16.vlgmr.msrb.gmra.mxu3 %vm428_vm0, %v8971_v43  ;;  %7015 = vmatmul.msk.bf16.vlgmr.msrb.gmra.mxu0 %vm428_vm0, %v8971_v43 }
 0x16b   :  { %7017 = vmatmul.msk.bf16.vlgmr.msrb.gmra.mxu1 %vm428_vm0, %v8971_v43  ;;  %1041 = vmatpush.bf16.msrb.mxu0 %v9028_v6 }
 0x16c   :  { %1008 = vmatpush.bf16.msra.mxu2 %v14042_v63  ;;  %v755_v63 = vunpack.c.l.b16 %v747_v60  ;;  %1060 = vmatpush.bf16.msrb.mxu1 %v9030_v3 }
 0x16d   :  { %1027 = vmatpush.bf16.msra.mxu3 %v14043_v9  ;;  %v756_v9 = vunpack.c.h.b16 %v747_v60  ;;  %v7634_v60 = vpop.permute.xlu0 %7633 }
 0x16e   :  { %v9042_v34 = vpack.c.b16 %v757_v39, %v755_v63  ;;  %v7639_v39 = vpop.permute.xlu1 %7638  ;;  %v637_v63 = vsel %vm253_vm4, %v7625_v37, %v7630_v59  ;;  %v7635_v57 = vunpack.i.l.bf16 %v7634_v60  ;;  %v7636_v14 = vunpack.i.h.bf16 %v7634_v60 }
 0x16f   :  { %v9044_v2 = vpack.c.b16 %v758_v38, %v756_v9  ;;  %v7631_v38 = vunpack.i.h.bf16 %v7629_v19  ;;  %v641_v9 = vsel %vm253_vm4, %v7630_v59, %v7625_v37  ;;  %v7640_v19 = vunpack.i.l.bf16 %v7639_v39 }
 0x170   :  { %1079 = vmatpush.bf16.msrb.mxu2 %v9028_v6  ;;  %1042 = vmatpush.bf16.msrb.mxu0 %v9042_v34  ;;  %v7641_v37 = vunpack.i.h.bf16 %v7639_v39  ;;  %v647_v59 = vsel %vm8708_vm5, %v637_v63, 0.0  ;;  %v648_v23 = vsel %vm8714_vm6, %v641_v9, 0.0 }
 0x171   :  { %1098 = vmatpush.bf16.msrb.mxu3 %v9030_v3  ;;  %1061 = vmatpush.bf16.msrb.mxu1 %v9044_v2  ;;  %v638_v31 = vsel %vm253_vm4, %v7626_v32, %v7631_v38  ;;  %v642_v4 = vsel %vm253_vm4, %v7631_v38, %v7626_v32  ;;  %v635_v60 = vsel %vm253_vm4, %v7635_v57, %v7640_v19 }
 0x172   :  { %v649_v32 = vsel %vm8708_vm5, %v638_v31, 0.0  ;;  %v650_v38 = vsel %vm8714_vm6, %v642_v4, 0.0  ;;  %v639_v39 = vsel %vm253_vm4, %v7640_v19, %v7635_v57  ;;  %v773_v63 = vpack.c.bf16 %v648_v23, %v647_v59 }
 0x173   :  { %v636_v4 = vsel %vm253_vm4, %v7636_v14, %v7641_v37  ;;  %v640_v9 = vsel %vm253_vm4, %v7641_v37, %v7636_v14  ;;  %v774_v31 = vpack.c.bf16 %v650_v38, %v649_v32  ;;  %v643_v46 = vsel %vm8708_vm5, %v635_v60, 0.0  ;;  %v9108_v32 = vpop.f32.mrf.mxu2  ;;  %v9110_v60 = vpop.f32.mrf.mxu3 }
 0x174   :  { %1080 = vmatpush.bf16.msrb.mxu2 %v9042_v34  ;;  %1043 = vmatpush.bf16.msrb.mxu0 %v8938_v47  ;;  %v646_v57 = vsel %vm8714_vm6, %v640_v9, 0.0  ;;  %v783_v14 = vunpack.c.l.b16 %v773_v63  ;;  %v784_v19 = vunpack.c.h.b16 %v773_v63 }
 0x175   :  { %1099 = vmatpush.bf16.msrb.mxu3 %v9044_v2  ;;  %1062 = vmatpush.bf16.msrb.mxu1 %v8940_v0  ;;  %v785_v23 = vunpack.c.l.b16 %v774_v31  ;;  %v786_v37 = vunpack.c.h.b16 %v774_v31 }
 0x177   :  { %7020 = vmatmul.msk.bf16.gmra.mxu2 %vm428_vm0, %v9000_v52 }
 0x178   :  { %1081 = vmatpush.bf16.msrb.mxu2 %v8938_v47  ;;  %1044 = vmatpush.bf16.msrb.mxu0 %v8950_v26 }
 0x179   :  { %1100 = vmatpush.bf16.msrb.mxu3 %v8940_v0  ;;  %1063 = vmatpush.bf16.msrb.mxu1 %v8952_v7 }
 0x17a   :  { %7022 = vmatmul.msk.bf16.gmra.mxu3 %vm428_vm0, %v9000_v52  ;;  %7016 = vmatmul.msk.bf16.gmra.mxu0 %vm428_vm0, %v9000_v52 }
 0x17b   :  { %7018 = vmatmul.msk.bf16.gmra.mxu1 %vm428_vm0, %v9000_v52 }
 0x17c   :  { %1082 = vmatpush.bf16.msrb.mxu2 %v8950_v26  ;;  %1045 = vmatpush.bf16.msrb.mxu0 %v8822_v33 }
 0x17d   :  { %1101 = vmatpush.bf16.msrb.mxu3 %v8952_v7  ;;  %1064 = vmatpush.bf16.msrb.mxu1 %v8828_v27 }
 0x180   :  { %1083 = vmatpush.bf16.msrb.mxu2 %v8822_v33  ;;  %v644_v33 = vsel %vm8714_vm6, %v639_v39, 0.0  ;;  %1046 = vmatpush.bf16.msrb.mxu0 %v8842_v45  ;;  %v9112_v39 = vpack.c.b16 %v785_v23, %v783_v14  ;;  %v9134_v14 = vpop.f32.mrf.mxu2  ;;  %v9138_v23 = vpop.f32.mrf.mxu3 }
 0x181   :  { %1102 = vmatpush.bf16.msrb.mxu3 %v8828_v27  ;;  %v645_v27 = vsel %vm8708_vm5, %v636_v4, 0.0  ;;  %1065 = vmatpush.bf16.msrb.mxu1 %v8844_v56  ;;  %v771_v59 = vpack.c.bf16 %v644_v33, %v643_v46  ;;  %v9114_v4 = vpack.c.b16 %v786_v37, %v784_v19 }
 0x182   :  { %v772_v38 = vpack.c.bf16 %v646_v57, %v645_v27 }
 0x183   :  { %v779_v9 = vunpack.c.l.b16 %v771_v59  ;;  %v780_v63 = vunpack.c.h.b16 %v771_v59 }
 0x184   :  { %1084 = vmatpush.bf16.msrb.mxu2 %v8842_v45  ;;  %v781_v46 = vunpack.c.l.b16 %v772_v38  ;;  %v782_v31 = vunpack.c.h.b16 %v772_v38 }
 0x185   :  { %1103 = vmatpush.bf16.msrb.mxu3 %v8844_v56 }
 0x186   :  { %v9128_v57 = vpack.c.b16 %v781_v46, %v779_v9 }
 0x187   :  { %v444_v36 = vpop.f32.mrf.mxu0  ;;  %7027 = vmatmul.msk.bf16.vlgmr.msra.gmra.mxu2 %vm428_vm0, %v8971_v43 }
 0x188   :  { %v1267_v45 = vmax.f32 %v444_v36, 0.0  ;;  %v463_v56 = vpop.f32.mrf.mxu1  ;;  %1155 = vmatpush.bf16.msra.mxu2 %v9112_v39  ;;  %v9130_v36 = vpack.c.b16 %v782_v31, %v780_v63  ;;  %v9170_v63 = vpop.f32.mrf.mxu2 }
 0x189   :  { %v1268_v33 = vmax.f32 %v463_v56, 0.0  ;;  %v9172_v31 = vpop.f32.mrf.mxu3 }
 0x18a   :  { %7029 = vmatmul.msk.bf16.vlgmr.msra.gmra.mxu3 %vm428_vm0, %v8971_v43  ;;  %7023 = vmatmul.msk.bf16.vlgmr.msra.gmra.mxu0 %vm428_vm0, %v8612_v10 }
 0x18b   :  { %1174 = vmatpush.bf16.msra.mxu3 %v9114_v4  ;;  %v9122_v27 = vpack.c.bf16 %v1268_v33, %v1267_v45  ;;  %7025 = vmatmul.msk.bf16.vlgmr.msra.gmra.mxu1 %vm428_vm0, %v8612_v10 }
 0x18c   :  { %1117 = vmatpush.bf16.msra.mxu0 %v8681_v25  ;;  %1136 = vmatpush.bf16.msra.mxu1 %v8683_v29 }
 0x18d   :  { %1156 = vmatpush.bf16.msra.mxu2 %v9128_v57 }
 0x18f   :  { %1175 = vmatpush.bf16.msra.mxu3 %v9130_v36  ;;  %v9140_v19 = vpop.f32.mrf.mxu0 }
 0x190   :  { %v13699_v37 = vmax.f32 %v9140_v19, 0.0  ;;  %v9143_v59 = vpop.f32.mrf.mxu1  ;;  %1118 = vmatpush.bf16.msra.mxu0 %v8704_v61  ;;  %1137 = vmatpush.bf16.msra.mxu1 %v8756_v24  ;;  %v9202_v28 = vpop.f32.mrf.mxu2 }
 0x191   :  { %v13698_v38 = vmax.f32 %v9143_v59, 0.0  ;;  %1157 = vmatpush.bf16.msra.mxu2 %v9028_v6  ;;  %v9204_v35 = vpop.f32.mrf.mxu3 }
 0x192   :  { %v9152_v9 = vpack.i.bf16 %v13699_v37, %v1267_v45 }
 0x193   :  { %1176 = vmatpush.bf16.msra.mxu3 %v9030_v3  ;;  %v9156_v56 = vpack.i.bf16 %v13698_v38, %v1268_v33 }
 0x194   :  { %1119 = vmatpush.bf16.msra.mxu0 %v8405_v13  ;;  %1138 = vmatpush.bf16.msra.mxu1 %v8407_v15 }
 0x195   :  { %1158 = vmatpush.bf16.msra.mxu2 %v9042_v34 }
 0x197   :  { %1177 = vmatpush.bf16.msra.mxu3 %v9044_v2  ;;  %v9162_v46 = vpop.f32.mrf.mxu0  ;;  %7028 = vmatmul.msk.bf16.gmra.mxu2 %vm428_vm0, %v9000_v52 }
 0x198   :  { %v9168_v45 = vpop.f32.mrf.mxu1  ;;  %1120 = vmatpush.bf16.msra.mxu0 %v8437_v1  ;;  %1139 = vmatpush.bf16.msra.mxu1 %v8446_v53  ;;  %v13702_v38 = vmax.f32 %v9162_v46, 0.0 }
 0x199   :  { %1159 = vmatpush.bf16.msra.mxu2 %v8938_v47  ;;  %v13704_v12 = vmax.f32 %v9168_v45, 0.0 }
 0x19a   :  { %7030 = vmatmul.msk.bf16.gmra.mxu3 %vm428_vm0, %v9000_v52  ;;  %7024 = vmatmul.msk.bf16.gmra.mxu0 %vm428_vm0, %v8655_v16 }
 0x19b   :  { %1178 = vmatpush.bf16.msra.mxu3 %v8940_v0  ;;  %7026 = vmatmul.msk.bf16.gmra.mxu1 %vm428_vm0, %v8655_v16 }
 0x19c   :  { %1121 = vmatpush.bf16.msra.mxu0 %v8401_v8  ;;  %1140 = vmatpush.bf16.msra.mxu1 %v8403_v11 }
 0x19d   :  { %1160 = vmatpush.bf16.msra.mxu2 %v8950_v26 }
 0x19f   :  { %1179 = vmatpush.bf16.msra.mxu3 %v8952_v7  ;;  %v9186_v33 = vpop.f32.mrf.mxu0 }
 0x1a0   :  { %v13703_v37 = vmax.f32 %v9186_v33, 0.0  ;;  %v9190_v48 = vpop.f32.mrf.mxu1  ;;  %1122 = vmatpush.bf16.msra.mxu0 %v8430_v62  ;;  %1141 = vmatpush.bf16.msra.mxu1 %v8435_v21 }
 0x1a1   :  { %v13705_v8 = vmax.f32 %v9190_v48, 0.0 }
 0x1a2   :  { %v9200_v11 = vpack.i.bf16 %v13703_v37, %v13702_v38 }
 0x1a3   :  { %v9210_v18 = vpack.i.bf16 %v13705_v8, %v13704_v12 }
 0x1a7   :  { %7035 = vmatmul.msk.bf16.vlgmr.msrb.gmra.mxu2 %vm428_vm0, %v8612_v10  ;;  %v520_v62 = vpop.f32.mrf.mxu0 }
 0x1a8   :  { %1231 = vmatpush.bf16.msrb.mxu2 %v8766_v42  ;;  %v539_v21 = vpop.f32.mrf.mxu1  ;;  %v1283_v38 = vmax.f32 %v520_v62, 0.0  ;;  %v14054_v42 = vld [vmem:[#allocation70_spill] sm:$0xff] }
 0x1a9   :  { %v1284_v37 = vmax.f32 %v539_v21, 0.0 }
 0x1aa   :  { %7037 = vmatmul.msk.bf16.vlgmr.msrb.gmra.mxu3 %vm428_vm0, %v8612_v10  ;;  %v558_v55 = vpop.f32.mrf.mxu2  ;;  %7031 = vmatmul.msk.bf16.vlgmr.msrb.gmra.mxu0 %vm428_vm0, %v8971_v43 }
 0x1ab   :  { %1250 = vmatpush.bf16.msrb.mxu3 %v8768_v44  ;;  %v9220_v22 = vpack.c.bf16 %v1284_v37, %v1283_v38  ;;  %v1291_v12 = vmax.f32 %v558_v55, 0.0  ;;  %7033 = vmatmul.msk.bf16.vlgmr.msrb.gmra.mxu1 %vm428_vm0, %v8971_v43 }
 0x1ac   :  { %1193 = vmatpush.bf16.msrb.mxu0 %v9112_v39  ;;  %1212 = vmatpush.bf16.msrb.mxu1 %v9114_v4 }
 0x1ad   :  { %v9218_v5 = vpop.f32.mrf.mxu3  ;;  %1232 = vmatpush.bf16.msrb.mxu2 %v8782_v51 }
 0x1ae   :  { %v1292_v8 = vmax.f32 %v9218_v5, 0.0 }
 0x1af   :  { %1251 = vmatpush.bf16.msrb.mxu3 %v14054_v42  ;;  %v522_v44 = vpop.f32.mrf.mxu0  ;;  %v1276_v42 = vmax.f32 %v9110_v60, 0.0 }
 0x1b0   :  { %v9231_v10 = vpack.c.bf16 %v1292_v8, %v1291_v12  ;;  %1194 = vmatpush.bf16.msrb.mxu0 %v9128_v57  ;;  %1213 = vmatpush.bf16.msrb.mxu1 %v9130_v36  ;;  %v541_v55 = vpop.f32.mrf.mxu1  ;;  %v1285_v39 = vmax.f32 %v522_v44, 0.0 }
 0x1b1   :  { %1233 = vmatpush.bf16.msrb.mxu2 %v8681_v25  ;;  %v1286_v4 = vmax.f32 %v541_v55, 0.0 }
 0x1b2   :  { %v560_v37 = vpop.f32.mrf.mxu2 }
 0x1b3   :  { %1252 = vmatpush.bf16.msrb.mxu3 %v8683_v29  ;;  %v9241_v62 = vpack.c.bf16 %v1286_v4, %v1285_v39  ;;  %v1293_v51 = vmax.f32 %v560_v37, 0.0  ;;  %v1279_v29 = vmax.f32 %v9170_v63, 0.0  ;;  %v1275_v63 = vmax.f32 %v9108_v32, 0.0 }
 0x1b4   :  { %1195 = vmatpush.bf16.msrb.mxu0 %v9028_v6  ;;  %1214 = vmatpush.bf16.msrb.mxu1 %v9030_v3  ;;  %v1280_v6 = vmax.f32 %v9172_v31, 0.0  ;;  %v1282_v3 = vmax.f32 %v9204_v35, 0.0 }
 0x1b5   :  { %v9239_v38 = vpop.f32.mrf.mxu3  ;;  %v7642_v57 = vpack.i.bf16 %v1293_v51, %v1291_v12  ;;  %1234 = vmatpush.bf16.msrb.mxu2 %v8704_v61  ;;  %v1444_v60 = vpack.c.bf16 %v1276_v42, %v1275_v63  ;;  %v1518_v39 = vunpack.c.l.b16 %v9241_v62 }
 0x1b6   :  { %v1294_v21 = vmax.f32 %v9239_v38, 0.0  ;;  %v1446_v35 = vpack.c.bf16 %v1280_v6, %v1279_v29  ;;  %v1516_v29 = vunpack.c.l.b16 %v9220_v22 }
 0x1b7   :  { %1253 = vmatpush.bf16.msrb.mxu3 %v8756_v24  ;;  %7036 = vmatmul.msk.bf16.gmra.mxu2 %vm428_vm0, %v8655_v16  ;;  %v525_v12 = vpop.f32.mrf.mxu0  ;;  %v1281_v24 = vmax.f32 %v9202_v28, 0.0  ;;  %v1493_v63 = vunpack.c.h.b16 %v1444_v60 }
 0x1b8   :  { %v9250_v25 = vpack.c.bf16 %v1294_v21, %v1293_v51  ;;  %1215 = vmatpush.bf16.msrb.mxu1 %v9044_v2  ;;  %7643 = vrot.lane.b32.xlu1 %v7642_v57, %s8144_s0  ;;  %v544_v61 = vpop.f32.mrf.mxu1  ;;  %v1287_v36 = vmax.f32 %v525_v12, 0.0  ;;  %v1496_v37 = vunpack.c.l.b16 %v1446_v35 }
 0x1b9   :  { %1235 = vmatpush.bf16.msrb.mxu2 %v8405_v13  ;;  %1196 = vmatpush.bf16.msrb.mxu0 %v9042_v34  ;;  %v1277_v13 = vmax.f32 %v9134_v14, 0.0  ;;  %v1447_v34 = vpack.c.bf16 %v1282_v3, %v1281_v24  ;;  %v1497_v14 = vunpack.c.h.b16 %v1446_v35 }
 0x1ba   :  { %7038 = vmatmul.msk.bf16.gmra.mxu3 %vm428_vm0, %v8655_v16  ;;  %v1288_v16 = vmax.f32 %v544_v61, 0.0  ;;  %v563_v31 = vpop.f32.mrf.mxu2  ;;  %7032 = vmatmul.msk.bf16.gmra.mxu0 %vm428_vm0, %v9000_v52  ;;  %v1542_v12 = vunpack.c.l.b16 %v9250_v25  ;;  %v1543_v61 = vunpack.c.h.b16 %v9250_v25  ;;  %v14057_v25 = vmax.f32 %v9186_v33, 0.0 }
 0x1bb   :  { %1254 = vmatpush.bf16.msrb.mxu3 %v8407_v15  ;;  %v1295_v55 = vmax.f32 %v563_v31, 0.0  ;;  %7034 = vmatmul.msk.bf16.gmra.mxu1 %vm428_vm0, %v9000_v52  ;;  %v1278_v15 = vmax.f32 %v9138_v23, 0.0  ;;  %v1519_v23 = vunpack.c.h.b16 %v9241_v62  ;;  %v1498_v57 = vunpack.c.l.b16 %v1447_v34 }
 0x1bc   :  { %v9267_v44 = vpack.c.bf16 %v1288_v16, %v1287_v36  ;;  %1216 = vmatpush.bf16.msrb.mxu1 %v8940_v0  ;;  %v9291_v16 = vpack.c.b16 %v1518_v39, %v1516_v29  ;;  %v1540_v31 = vunpack.c.l.b16 %v9231_v10  ;;  %v1492_v29 = vunpack.c.l.b16 %v1444_v60 }
 0x1bd   :  { %v582_v2 = vpop.f32.mrf.mxu3  ;;  %1236 = vmatpush.bf16.msrb.mxu2 %v8437_v1  ;;  %1197 = vmatpush.bf16.msrb.mxu0 %v8938_v47  ;;  %v1445_v4 = vpack.c.bf16 %v1278_v15, %v1277_v13  ;;  %v1517_v47 = vunpack.c.h.b16 %v9220_v22  ;;  %v9312_v33 = vpack.c.b16 %v1498_v57, %v1496_v37  ;;  %v14064_v37 = vmax.f32 %v9143_v59, 0.0 }
 0x1be   :  { %v1296_v28 = vmax.f32 %v582_v2, 0.0  ;;  %14055 = vst [vmem:[#allocation38_spill] sm:$0xff] %v9291_v16  ;;  %v1541_v2 = vunpack.c.h.b16 %v9231_v10  ;;  %v9305_v39 = vpack.c.b16 %v1542_v12, %v1540_v31 }
 0x1bf   :  { %1255 = vmatpush.bf16.msrb.mxu3 %v8446_v53  ;;  %v527_v0 = vpop.f32.mrf.mxu0  ;;  %v1499_v53 = vunpack.c.h.b16 %v1447_v34  ;;  %v9295_v22 = vpack.c.b16 %v1519_v23, %v1517_v47  ;;  %v1495_v42 = vunpack.c.h.b16 %v1445_v4  ;;  %v1494_v10 = vunpack.c.l.b16 %v1445_v4 }
 0x1c0   :  { %v9276_v32 = vpack.c.bf16 %v1296_v28, %v1295_v55  ;;  %1217 = vmatpush.bf16.msrb.mxu1 %v8952_v7  ;;  %v546_v51 = vpop.f32.mrf.mxu1  ;;  %v1289_v1 = vmax.f32 %v527_v0, 0.0 }
 0x1c1   :  { %v1290_v6 = vmax.f32 %v546_v51, 0.0  ;;  %1198 = vmatpush.bf16.msrb.mxu0 %v8950_v26  ;;  %14056 = vst [vmem:[#allocation39_spill] sm:$0xff] %v9295_v22  ;;  %v14058_v26 = vmax.f32 %v9190_v48, 0.0  ;;  %v9303_v0 = vpack.c.b16 %v1499_v53, %v1497_v14  ;;  %v9307_v51 = vpack.c.b16 %v1543_v61, %v1541_v2 }
 0x1c2   :  { %v565_v24 = vpop.f32.mrf.mxu2  ;;  %v14059_v48 = vmax.f32 %v9162_v46, 0.0  ;;  %v9337_v53 = vpack.c.b16 %v1495_v42, %v1493_v63  ;;  %v1472_v2 = vunpack.c.l.b16 %v9122_v27  ;;  %v1473_v42 = vunpack.c.h.b16 %v9122_v27 }
 0x1c3   :  { %v9289_v3 = vpack.c.bf16 %v1290_v6, %v1289_v1  ;;  %v1297_v7 = vmax.f32 %v565_v24, 0.0  ;;  %v1443_v13 = vpack.c.bf16 %v14058_v26, %v14057_v25  ;;  %v1520_v25 = vunpack.c.l.b16 %v9267_v44 }
 0x1c5   :  { %v584_v62 = vpop.f32.mrf.mxu3  ;;  %v7647_v15 = vpack.i.bf16 %v1297_v7, %v1295_v55  ;;  %v14060_v55 = vmax.f32 %v9168_v45, 0.0  ;;  %v14063_v45 = vmax.f32 %v9140_v19, 0.0  ;;  %v1479_v57 = vunpack.c.h.b16 %v1443_v13 }
 0x1c6   :  { %v1298_v36 = vmax.f32 %v584_v62, 0.0  ;;  %v1478_v47 = vunpack.c.l.b16 %v1443_v13  ;;  %v9349_v19 = vpack.c.b16 %v1494_v10, %v1492_v29  ;;  %v1522_v63 = vunpack.c.l.b16 %v9289_v3 }
 0x1c7   :  { %7043 = vmatmul.msk.bf16.vlgmr.msra.gmra.mxu2 %vm428_vm0, %v8971_v43  ;;  %v9321_v14 = vpop.f32.mrf.mxu0  ;;  %7648 = vrot.lane.b32.xlu2 %v7647_v15, %s8144_s0  ;;  %v1441_v23 = vpack.c.bf16 %v14064_v37, %v14063_v45  ;;  %v1523_v26 = vunpack.c.h.b16 %v9289_v3  ;;  %v1521_v3 = vunpack.c.h.b16 %v9267_v44 }
 0x1c8   :  { %v7657_v35 = vpack.i.bf16 %v1298_v36, %v1296_v28  ;;  %v9301_v34 = vpack.c.bf16 %v1298_v36, %v1297_v7  ;;  %v1442_v28 = vpack.c.bf16 %v14060_v55, %v14059_v48  ;;  %14061 = vst [vmem:[#allocation40_spill] sm:$0xff] %v9321_v14  ;;  %v9323_v60 = vpop.f32.mrf.mxu1  ;;  %1860 = vmatpush.bf16.msra.mxu2 %v9312_v33  ;;  %v13709_v4 = vmax.f32 %v9321_v14, 0.0 }
 0x1c9   :  { %14062 = vst [vmem:[#allocation64_spill] sm:$0xff] %v9323_v60  ;;  %v13707_v46 = vmax.f32 %v9323_v60, 0.0  ;;  %v1474_v24 = vunpack.c.l.b16 %v1441_v23  ;;  %v1475_v62 = vunpack.c.h.b16 %v1441_v23  ;;  %v7652_v36 = vpack.i.bf16 %v1294_v21, %v1292_v8 }
 0x1ca   :  { %7045 = vmatmul.msk.bf16.vlgmr.msra.gmra.mxu3 %vm428_vm0, %v8971_v43  ;;  %7658 = vrot.lane.b32.xlu0 %v7657_v35, %s8144_s0  ;;  %v9333_v1 = vpop.f32.mrf.mxu2  ;;  %v1477_v59 = vunpack.c.h.b16 %v1442_v28  ;;  %v1476_v61 = vunpack.c.l.b16 %v1442_v28  ;;  %v1546_v8 = vunpack.c.l.b16 %v9301_v34  ;;  %v1547_v38 = vunpack.c.h.b16 %v9301_v34 }
 0x1cb   :  { %1879 = vmatpush.bf16.msra.mxu3 %v9303_v0  ;;  %v9343_v12 = vpack.c.bf16 %v13707_v46, %v13709_v4  ;;  %7039 = vmatmul.msk.bf16.vlgmr.msra.gmra.mxu0 %vm428_vm0, %v8971_v43  ;;  %v9382_v29 = vpack.c.b16 %v1474_v24, %v1472_v2  ;;  %v9384_v10 = vpack.c.b16 %v1475_v62, %v1473_v42  ;;  %v1544_v34 = vunpack.c.l.b16 %v9276_v32 }
 0x1cc   :  { %7041 = vmatmul.msk.bf16.vlgmr.msra.gmra.mxu1 %vm428_vm0, %v8971_v43  ;;  %1861 = vmatpush.bf16.msra.mxu2 %v9349_v19  ;;  %v9353_v7 = vpack.c.b16 %v1479_v57, %v1477_v59  ;;  %v9360_v31 = vpack.c.b16 %v1478_v47, %v1476_v61  ;;  %v1545_v48 = vunpack.c.h.b16 %v9276_v32  ;;  %v9392_v28 = vpack.c.b16 %v1522_v63, %v1520_v25 }
 0x1cd   :  { %v9335_v6 = vpop.f32.mrf.mxu3  ;;  %v9395_v44 = vpack.c.b16 %v1523_v26, %v1521_v3  ;;  %v9398_v45 = vpack.c.b16 %v1546_v8, %v1544_v34  ;;  %v2224_v42 = vunpack.c.l.b16 %v9343_v12  ;;  %v2225_v8 = vunpack.c.h.b16 %v9343_v12 }
 0x1ce   :  { %14067 = vst [vmem:[#allocation77_spill] sm:$0xff] %v9392_v28  ;;  %v9400_v37 = vpack.c.b16 %v1547_v38, %v1545_v48 }
 0x1cf   :  { %1880 = vmatpush.bf16.msra.mxu3 %v9337_v53  ;;  %v9367_v13 = vpop.f32.mrf.mxu0  ;;  %7653 = vrot.lane.b32.xlu2 %v7652_v36, %s8144_s0  ;;  %14068 = vst [vmem:[#allocation78_spill] sm:$0xff] %v9395_v44 }
 0x1d0   :  { %14065 = vst [vmem:[#allocation65_spill] sm:$0xff] %v9367_v13  ;;  %v9369_v5 = vpop.f32.mrf.mxu1  ;;  %1862 = vmatpush.bf16.msra.mxu2 %v9360_v31  ;;  %v13708_v27 = vmax.f32 %v9367_v13, 0.0 }
 0x1d1   :  { %14066 = vst [vmem:[#allocation70_spill] sm:$0xff] %v9369_v5  ;;  %v13706_v21 = vmax.f32 %v9369_v5, 0.0 }
 0x1d2   :  { %v9378_v15 = vpop.f32.mrf.mxu2 }
 0x1d3   :  { %1881 = vmatpush.bf16.msra.mxu3 %v9353_v7  ;;  %v2193_v55 = vpack.c.bf16 %v13706_v21, %v13708_v27 }
 0x1d4   :  { %1863 = vmatpush.bf16.msra.mxu2 %v9382_v29 }
 0x1d5   :  { %v9380_v35 = vpop.f32.mrf.mxu3  ;;  %v2226_v62 = vunpack.c.l.b16 %v2193_v55  ;;  %v2227_v36 = vunpack.c.h.b16 %v2193_v55 }
 0x1d7   :  { %1882 = vmatpush.bf16.msra.mxu3 %v9384_v10  ;;  %7044 = vmatmul.msk.bf16.gmra.mxu2 %vm428_vm0, %v9000_v52  ;;  %v9406_v32 = vpop.f32.mrf.mxu0  ;;  %v9432_v48 = vpack.c.b16 %v2226_v62, %v2224_v42  ;;  %v9434_v55 = vpack.c.b16 %v2227_v36, %v2225_v8  ;;  %v8134_v36 = vld [vmem:[%s13603_s2 + $0x10] sm:$0xff] }
 0x1d8   :  { %14069 = vst [vmem:[#allocation79_spill] sm:$0xff] %v9406_v32  ;;  %v9408_v23 = vpop.f32.mrf.mxu1  ;;  %v13710_v57 = vmax.f32 %v9406_v32, 0.0 }
 0x1d9   :  { %v13711_v47 = vmax.f32 %v9408_v23, 0.0  ;;  %14072 = vst [vmem:[#allocation82_spill] sm:$0xff] %v9432_v48 }
 0x1da   :  { %7046 = vmatmul.msk.bf16.gmra.mxu3 %vm428_vm0, %v9000_v52  ;;  %v863_v59 = vpop.f32.mrf.mxu2  ;;  %14073 = vst [vmem:[#allocation83_spill] sm:$0xff] %v9434_v55 }
 0x1db   :  { %v2194_v24 = vpack.c.bf16 %v13711_v47, %v13710_v57  ;;  %7040 = vmatmul.msk.bf16.gmra.mxu0 %vm428_vm0, %v9000_v52 }
 0x1dc   :  { %7042 = vmatmul.msk.bf16.gmra.mxu1 %vm428_vm0, %v9000_v52 }
 0x1dd   :  { %v882_v61 = vpop.f32.mrf.mxu3 }
 0x1df   :  { %v9420_v63 = vpop.f32.mrf.mxu0 }
 0x1e0   :  { %14070 = vst [vmem:[#allocation80_spill] sm:$0xff] %v9420_v63  ;;  %v9422_v2 = vpop.f32.mrf.mxu1  ;;  %v13712_v25 = vmax.f32 %v9420_v63, 0.0 }
 0x1e1   :  { %14071 = vst [vmem:[#allocation81_spill] sm:$0xff] %v9422_v2  ;;  %v13713_v26 = vmax.f32 %v9422_v2, 0.0 }
 0x1e2   :  { %v865_v38 = vpop.f32.mrf.mxu2 }
 0x1e3   :  { %v2195_v34 = vpack.c.bf16 %v13713_v26, %v13712_v25 }
 0x1e5   :  { %v884_v3 = vpop.f32.mrf.mxu3 }
 0x1e7   :  { %7051 = vmatmul.msk.bf16.vlgmr.msrb.gmra.mxu2 %vm428_vm0, %v8971_v43  ;;  %v896_v21 = vpop.f32.mrf.mxu0 }
 0x1e8   :  { %v915_v46 = vpop.f32.mrf.mxu1  ;;  %v897_v12 = vadd.f32 %v896_v21, %v9333_v1  ;;  %v2230_v1 = vunpack.c.l.b16 %v2195_v34 }
 0x1e9   :  { %v916_v27 = vadd.f32 %v915_v46, %v9335_v6  ;;  %v2231_v46 = vunpack.c.h.b16 %v2195_v34 }
 0x1ea   :  { %7053 = vmatmul.msk.bf16.vlgmr.msrb.gmra.mxu3 %vm428_vm0, %v8971_v43  ;;  %v934_v4 = vpop.f32.mrf.mxu2  ;;  %v1299_v47 = vmax.f32 %v897_v12, 0.0  ;;  %v2228_v12 = vunpack.c.l.b16 %v2194_v24 }
 0x1eb   :  { %v1300_v25 = vmax.f32 %v916_v27, 0.0  ;;  %v1339_v62 = vmax.f32 %v934_v4, 0.0  ;;  %7047 = vmatmul.msk.bf16.vlgmr.msrb.gmra.mxu0 %vm428_vm0, %v8134_v36  ;;  %v2229_v27 = vunpack.c.h.b16 %v2194_v24 }
 0x1ec   :  { %7049 = vmatmul.msk.bf16.vlgmr.msrb.gmra.mxu1 %vm428_vm0, %v8134_v36  ;;  %v9455_v26 = vpack.c.b16 %v2230_v1, %v2228_v12 }
 0x1ed   :  { %v953_v57 = vpop.f32.mrf.mxu3  ;;  %v9447_v43 = vpack.c.bf16 %v1300_v25, %v1299_v47  ;;  %v9457_v17 = vpack.c.b16 %v2231_v46, %v2229_v27 }
 0x1ee   :  { %v1340_v42 = vmax.f32 %v953_v57, 0.0  ;;  %14077 = vst [vmem:[#allocation87_spill] sm:$0xff] %v9455_v26 }
 0x1ef   :  { %v898_v6 = vpop.f32.mrf.mxu0  ;;  %14078 = vst [vmem:[#allocation88_spill] sm:$0xff] %v9457_v17 }
 0x1f0   :  { %v9449_v8 = vpack.c.bf16 %v1340_v42, %v1339_v62  ;;  %v917_v21 = vpop.f32.mrf.mxu1  ;;  %v9464_v42 = vadd.f32 %v898_v6, %v9378_v15 }
 0x1f1   :  { %v9467_v24 = vadd.f32 %v917_v21, %v9380_v35 }
 0x1f2   :  { %14074 = vst [vmem:[#allocation84_spill] sm:$0xff] %v9449_v8  ;;  %v9451_v4 = vpop.f32.mrf.mxu2  ;;  %v13722_v15 = vmax.f32 %v9464_v42, 0.0 }
 0x1f3   :  { %14075 = vst [vmem:[#allocation85_spill] sm:$0xff] %v9451_v4  ;;  %v13721_v35 = vmax.f32 %v9467_v24, 0.0 }
 0x1f5   :  { %v9453_v57 = vpop.f32.mrf.mxu3  ;;  %v9482_v21 = vpack.i.bf16 %v13721_v35, %v1300_v25 }
 0x1f6   :  { %14076 = vst [vmem:[#allocation86_spill] sm:$0xff] %v9453_v57 }
 0x1f7   :  { %7052 = vmatmul.msk.bf16.gmra.mxu2 %vm428_vm0, %v9000_v52  ;;  %v901_v62 = vpop.f32.mrf.mxu0 }
 0x1f8   :  { %v920_v34 = vpop.f32.mrf.mxu1  ;;  %v902_v36 = vadd.f32 %v901_v62, %v863_v59  ;;  %v9486_v62 = vpack.i.bf16 %v13722_v15, %v1299_v47 }
 0x1f9   :  { %v921_v50 = vadd.f32 %v920_v34, %v882_v61 }
 0x1fa   :  { %7054 = vmatmul.msk.bf16.gmra.mxu3 %vm428_vm0, %v9000_v52  ;;  %v939_v1 = vpop.f32.mrf.mxu2  ;;  %v1303_v46 = vmax.f32 %v902_v36, 0.0  ;;  %v8135_v52 = vld [vmem:[%s13603_s2 + $0x18] sm:$0xff]  ;;  %14080 = vst [vmem:[#allocation90_spill] sm:$0xff] %v9486_v62 }
 0x1fb   :  { %v1304_v27 = vmax.f32 %v921_v50, 0.0  ;;  %v1343_v54 = vmax.f32 %v939_v1, 0.0  ;;  %7048 = vmatmul.msk.bf16.gmra.mxu0 %vm428_vm0, %v8135_v52 }
 0x1fc   :  { %7050 = vmatmul.msk.bf16.gmra.mxu1 %vm428_vm0, %v8135_v52 }
 0x1fd   :  { %v958_v12 = vpop.f32.mrf.mxu3  ;;  %v9476_v59 = vpack.c.bf16 %v1304_v27, %v1303_v46 }
 0x1fe   :  { %v1344_v41 = vmax.f32 %v958_v12, 0.0 }
 0x1ff   :  { %v903_v6 = vpop.f32.mrf.mxu0 }
 0x200   :  { %v9478_v61 = vpack.c.bf16 %v1344_v41, %v1343_v54  ;;  %v922_v50 = vpop.f32.mrf.mxu1  ;;  %v904_v52 = vadd.f32 %v903_v6, %v865_v38 }
 0x201   :  { %v923_v55 = vadd.f32 %v922_v50, %v884_v3 }
 0x202   :  { %14079 = vst [vmem:[#allocation89_spill] sm:$0xff] %v9478_v61  ;;  %v9488_v34 = vpop.f32.mrf.mxu2  ;;  %v1305_v48 = vmax.f32 %v904_v52, 0.0 }
 0x203   :  { %14081 = vst [vmem:[#allocation91_spill] sm:$0xff] %v9488_v34  ;;  %v1306_v17 = vmax.f32 %v923_v55, 0.0 }
 0x204   :  { %v9492_v25 = vpack.i.bf16 %v1305_v48, %v1303_v46 }
 0x205   :  { %v9490_v36 = vpop.f32.mrf.mxu3  ;;  %v9494_v35 = vpack.i.bf16 %v1306_v17, %v1304_v27 }
 0x206   :  { %14082 = vst [vmem:[#allocation92_spill] sm:$0xff] %v9490_v36 }
 0x207   :  { %v972_v1 = vpop.f32.mrf.mxu0  ;;  %14083 = vst [vmem:[#allocation93_spill] sm:$0xff] %v9494_v35 }
 0x208   :  { %v991_v12 = vpop.f32.mrf.mxu1 }
 0x20a   :  { %v1010_v54 = vpop.f32.mrf.mxu2 }
 0x20b   :  { %v1011_v6 = vadd.f32 %v1010_v54, %v972_v1 }
 0x20d   :  { %v1029_v41 = vpop.f32.mrf.mxu3  ;;  %v1307_v32 = vmax.f32 %v1011_v6, 0.0 }
 0x20e   :  { %v1030_v50 = vadd.f32 %v1029_v41, %v991_v12 }
 0x20f   :  { %v974_v26 = vpop.f32.mrf.mxu0 }
 0x210   :  { %v993_v8 = vpop.f32.mrf.mxu1  ;;  %v1308_v62 = vmax.f32 %v1030_v50, 0.0 }
 0x212   :  { %v1012_v47 = vpop.f32.mrf.mxu2 }
 0x213   :  { %v1013_v38 = vadd.f32 %v1012_v47, %v974_v26 }
 0x215   :  { %v1031_v15 = vpop.f32.mrf.mxu3  ;;  %v1309_v46 = vmax.f32 %v1013_v38, 0.0 }
 0x216   :  { %v1032_v3 = vadd.f32 %v1031_v15, %v993_v8  ;;  %v1652_v15 = vpack.c.bf16 %v1308_v62, %v1307_v32 }
 0x217   :  { %v977_v61 = vpop.f32.mrf.mxu0 }
 0x218   :  { %v996_v57 = vpop.f32.mrf.mxu1  ;;  %v1310_v60 = vmax.f32 %v1032_v3, 0.0 }
 0x21a   :  { %v1015_v4 = vpop.f32.mrf.mxu2  ;;  %v1653_v8 = vpack.c.bf16 %v1310_v60, %v1309_v46 }
 0x21b   :  { %v1016_v34 = vadd.f32 %v1015_v4, %v977_v61 }
 0x21c   :  { %v1703_v47 = vunpack.c.h.b16 %v1653_v8 }
 0x21d   :  { %v1034_v36 = vpop.f32.mrf.mxu3  ;;  %v1311_v52 = vmax.f32 %v1016_v34, 0.0 }
 0x21e   :  { %v1035_v30 = vadd.f32 %v1034_v36, %v996_v57 }
 0x21f   :  { %v979_v40 = vpop.f32.mrf.mxu0 }
 0x220   :  { %v1312_v55 = vmax.f32 %v1035_v30, 0.0  ;;  %v998_v5 = vpop.f32.mrf.mxu1 }
 0x221   :  { %v9496_v2 = vpop.permute.xlu2 %7648 }
 0x222   :  { %v1017_v27 = vpop.f32.mrf.mxu2  ;;  %v1654_v35 = vpack.c.bf16 %v1312_v55, %v1311_v52 }
 0x223   :  { %v1018_v14 = vadd.f32 %v1017_v27, %v979_v40  ;;  %v1651_v40 = vpack.c.bf16 %v1306_v17, %v1305_v48  ;;  %v14085_v17 = vmax.f32 %v9464_v42, 0.0  ;;  %v14086_v48 = vmax.f32 %v9467_v24, 0.0 }
 0x224   :  { %v1704_v61 = vunpack.c.l.b16 %v1654_v35  ;;  %v1705_v30 = vunpack.c.h.b16 %v1654_v35  ;;  %v1701_v35 = vunpack.c.h.b16 %v1652_v15 }
 0x225   :  { %v1036_v13 = vpop.f32.mrf.mxu3  ;;  %v1313_v4 = vmax.f32 %v1018_v14, 0.0  ;;  %v1649_v62 = vpack.c.bf16 %v14086_v48, %v14085_v17  ;;  %v1686_v3 = vunpack.c.l.b16 %v1651_v40  ;;  %v1687_v6 = vunpack.c.h.b16 %v1651_v40 }
 0x226   :  { %v1037_v63 = vadd.f32 %v1036_v13, %v998_v5  ;;  %v1702_v13 = vunpack.c.l.b16 %v1653_v8  ;;  %v9516_v52 = vpack.c.b16 %v1703_v47, %v1701_v35  ;;  %v1685_v8 = vunpack.c.h.b16 %v9476_v59 }
 0x227   :  { %v1048_v34 = vpop.f32.mrf.mxu0  ;;  %v1682_v42 = vunpack.c.l.b16 %v1649_v62  ;;  %v1683_v24 = vunpack.c.h.b16 %v1649_v62  ;;  %v7651_v48 = vunpack.i.h.bf16 %v9496_v2  ;;  %v7650_v62 = vunpack.i.l.bf16 %v9496_v2 }
 0x228   :  { %v1314_v26 = vmax.f32 %v1037_v63, 0.0  ;;  %v1067_v36 = vpop.f32.mrf.mxu1  ;;  %v1347_v54 = vmax.f32 %v1048_v34, 0.0  ;;  %v1700_v63 = vunpack.c.l.b16 %v1652_v15 }
 0x229   :  { %v1348_v41 = vmax.f32 %v1067_v36, 0.0  ;;  %v7654_v46 = vpop.permute.xlu2 %7653  ;;  %v9532_v36 = vpack.c.b16 %v1687_v6, %v1685_v8 }
 0x22a   :  { %v1655_v57 = vpack.c.bf16 %v1314_v26, %v1313_v4  ;;  %v9498_v5 = vpop.f32.mrf.mxu2  ;;  %v9514_v50 = vpack.c.b16 %v1702_v13, %v1700_v63  ;;  %v7644_v55 = vpop.permute.xlu1 %7643  ;;  %v1684_v26 = vunpack.c.l.b16 %v9476_v59  ;;  %v1680_v59 = vunpack.c.l.b16 %v9447_v43 }
 0x22b   :  { %v9504_v60 = vpack.c.bf16 %v1348_v41, %v1347_v54  ;;  %v7645_v15 = vunpack.i.l.bf16 %v7644_v55  ;;  %14090 = vst [vmem:[#allocation98_spill] sm:$0xff] %v9532_v36  ;;  %v1681_v54 = vunpack.c.h.b16 %v9447_v43 }
 0x22c   :  { %v1706_v1 = vunpack.c.l.b16 %v1655_v57  ;;  %v1707_v12 = vunpack.c.h.b16 %v1655_v57  ;;  %v9530_v34 = vpack.c.b16 %v1686_v3, %v1684_v26  ;;  %v9542_v13 = vpack.c.b16 %v1682_v42, %v1680_v59 }
 0x22d   :  { %14084 = vst [vmem:[#allocation94_spill] sm:$0xff] %v9504_v60  ;;  %v9506_v32 = vpop.f32.mrf.mxu3  ;;  %v9544_v47 = vpack.c.b16 %v1683_v24, %v1681_v54 }
 0x22e   :  { %v9500_v38 = vpack.c.b16 %v1706_v1, %v1704_v61  ;;  %v9502_v14 = vpack.c.b16 %v1707_v12, %v1705_v30  ;;  %v7655_v61 = vunpack.i.l.bf16 %v7654_v46  ;;  %14089 = vst [vmem:[#allocation97_spill] sm:$0xff] %v9530_v34  ;;  %v7646_v1 = vunpack.i.h.bf16 %v7644_v55 }
 0x22f   :  { %v9518_v27 = vpop.f32.mrf.mxu0  ;;  %v7656_v12 = vunpack.i.h.bf16 %v7654_v46  ;;  %14091 = vst [vmem:[#allocation99_spill] sm:$0xff] %v9542_v13 }
 0x230   :  { %1806 = vmatpush.bf16.msra.mxu0 %v9500_v38  ;;  %1825 = vmatpush.bf16.msra.mxu1 %v9502_v14  ;;  %14087 = vst [vmem:[#allocation95_spill] sm:$0xff] %v9518_v27  ;;  %v9520_v4 = vpop.f32.mrf.mxu1  ;;  %v1388_v41 = vsel %vm216_vm1, %v7645_v15, %v7655_v61  ;;  %v1392_v40 = vsel %vm216_vm1, %v7655_v61, %v7645_v15 }
 0x231   :  { %14088 = vst [vmem:[#allocation96_spill] sm:$0xff] %v9520_v4  ;;  %v1389_v63 = vsel %vm216_vm1, %v7646_v1, %v7656_v12  ;;  %v1393_v43 = vsel %vm216_vm1, %v7656_v12, %v7646_v1  ;;  %v1396_v46 = vsel %vm8626_vm2, %v1392_v40, 0.0  ;;  %v1397_v26 = vsel %vm8632_vm3, %v1388_v41, 0.0 }
 0x232   :  { %v9526_v57 = vpop.f32.mrf.mxu2  ;;  %14092 = vst [vmem:[#allocation100_spill] sm:$0xff] %v9544_v47  ;;  %v1398_v2 = vsel %vm8626_vm2, %v1393_v43, 0.0  ;;  %v1399_v15 = vsel %vm8632_vm3, %v1389_v63, 0.0  ;;  %v1436_v43 = vpack.c.bf16 %v1397_v26, %v1396_v46 }
 0x234   :  { %1807 = vmatpush.bf16.msra.mxu0 %v9514_v50  ;;  %1826 = vmatpush.bf16.msra.mxu1 %v9516_v52  ;;  %v1452_v46 = vunpack.c.l.b16 %v1436_v43 }
 0x235   :  { %v9528_v30 = vpop.f32.mrf.mxu3 }
 0x237   :  { %v1053_v35 = vpop.f32.mrf.mxu0 }
 0x238   :  { %1808 = vmatpush.bf16.msra.mxu0 %v9530_v34  ;;  %1827 = vmatpush.bf16.msra.mxu1 %v9532_v36  ;;  %v1072_v17 = vpop.f32.mrf.mxu1  ;;  %v1351_v3 = vmax.f32 %v1053_v35, 0.0 }
 0x239   :  { %v1352_v6 = vmax.f32 %v1072_v17, 0.0 }
 0x23a   :  { %v9558_v24 = vpop.f32.mrf.mxu2 }
 0x23b   :  { %v9564_v61 = vpack.c.bf16 %v1352_v6, %v1351_v3  ;;  %v1437_v6 = vpack.c.bf16 %v1399_v15, %v1398_v2 }
 0x23c   :  { %v7659_v55 = vpop.permute.xlu0 %7658  ;;  %1809 = vmatpush.bf16.msra.mxu0 %v9542_v13  ;;  %1828 = vmatpush.bf16.msra.mxu1 %v9544_v47 }
 0x23d   :  { %v7661_v8 = vunpack.i.h.bf16 %v7659_v55  ;;  %v7660_v42 = vunpack.i.l.bf16 %v7659_v55  ;;  %14093 = vst [vmem:[#allocation101_spill] sm:$0xff] %v9564_v61  ;;  %v9566_v1 = vpop.f32.mrf.mxu3  ;;  %v1454_v26 = vunpack.c.l.b16 %v1437_v6 }
 0x23f   :  { %v1390_v12 = vsel %vm216_vm1, %v7650_v62, %v7660_v42  ;;  %v1391_v59 = vsel %vm216_vm1, %v7651_v48, %v7661_v8  ;;  %v1394_v54 = vsel %vm216_vm1, %v7660_v42, %v7650_v62  ;;  %v1395_v41 = vsel %vm216_vm1, %v7661_v8, %v7651_v48  ;;  %v9584_v62 = vpop.f32.mrf.mxu0 }
 0x240   :  { %v1400_v40 = vsel %vm8626_vm2, %v1394_v54, 0.0  ;;  %v1401_v63 = vsel %vm8632_vm3, %v1390_v12, 0.0  ;;  %v1402_v35 = vsel %vm8626_vm2, %v1395_v41, 0.0  ;;  %v1403_v17 = vsel %vm8632_vm3, %v1391_v59, 0.0  ;;  %14094 = vst [vmem:[#allocation102_spill] sm:$0xff] %v9584_v62  ;;  %v9586_v42 = vpop.f32.mrf.mxu1 }
 0x241   :  { %v1438_v3 = vpack.c.bf16 %v1401_v63, %v1400_v40  ;;  %v1439_v55 = vpack.c.bf16 %v1403_v17, %v1402_v35  ;;  %14095 = vst [vmem:[#allocation103_spill] sm:$0xff] %v9586_v42  ;;  %v1453_v59 = vunpack.c.h.b16 %v1436_v43  ;;  %v1455_v40 = vunpack.c.h.b16 %v1437_v6  ;;  %v9595_v17 = vld [vmem:[%s13604_s3] sm:$0xff] }
 0x242   :  { %v9588_v61 = vpop.f32.mrf.mxu2  ;;  %v1460_v2 = vpack.c.b16 %v1454_v26, %v1452_v46 }
 0x243   :  { %v1456_v48 = vunpack.c.l.b16 %v1438_v3  ;;  %v1457_v8 = vunpack.c.h.b16 %v1438_v3  ;;  %v1458_v54 = vunpack.c.l.b16 %v1439_v55  ;;  %v1459_v60 = vunpack.c.h.b16 %v1439_v55 }
 0x244   :  { %v1461_v15 = vpack.c.b16 %v1455_v40, %v1453_v59 }
 0x245   :  { %v9590_v12 = vpop.f32.mrf.mxu3  ;;  %v1462_v41 = vpack.c.b16 %v1458_v54, %v1456_v48  ;;  %v1463_v4 = vpack.c.b16 %v1459_v60, %v1457_v8 }
 0x247   :  { %1864 = vmatpush.bf16.msra.mxu2 %v1462_v41  ;;  %1883 = vmatpush.bf16.msra.mxu3 %v1463_v4 }
 0x248   :  { %v1124_v63 = vpop.f32.mrf.mxu0 }
 0x249   :  { %v1143_v35 = vpop.f32.mrf.mxu1  ;;  %v1125_v3 = vadd.f32 %v1124_v63, %v9498_v5 }
 0x24a   :  { %v1144_v55 = vadd.f32 %v1143_v35, %v9506_v32  ;;  %v9601_v43 = vpop.f32.mrf.mxu2 }
 0x24b   :  { %1865 = vmatpush.bf16.msra.mxu2 %v1460_v2  ;;  %1884 = vmatpush.bf16.msra.mxu3 %v1461_v15  ;;  %v1315_v60 = vmax.f32 %v1125_v3, 0.0  ;;  %v13740_v48 = vmax.f32 %v9601_v43, 0.0 }
 0x24c   :  { %v1316_v4 = vmax.f32 %v1144_v55, 0.0 }
 0x24d   :  { %v9603_v6 = vpop.f32.mrf.mxu3 }
 0x24e   :  { %v13737_v8 = vmax.f32 %v9603_v6, 0.0  ;;  %7079 = vmatmul.msk.bf16.vlgmr.msra.gmra.mxu2 %vm428_vm0, %v9595_v17  ;;  %7081 = vmatmul.msk.bf16.vlgmr.msra.gmra.mxu3 %vm428_vm0, %v9595_v17  ;;  %v9611_v5 = vpack.c.bf16 %v1316_v4, %v1315_v60 }
 0x24f   :  { %1936 = vmatpush.bf16.msrb.mxu2 %v9392_v28  ;;  %1955 = vmatpush.bf16.msrb.mxu3 %v9395_v44 }
 0x250   :  { %v2284_v32 = vpack.c.bf16 %v13737_v8, %v13740_v48  ;;  %v9619_v54 = vpop.f32.mrf.mxu0 }
 0x251   :  { %v9621_v46 = vpop.f32.mrf.mxu1 }
 0x252   :  { %v9625_v26 = vpop.f32.mrf.mxu2 }
 0x253   :  { %1937 = vmatpush.bf16.msrb.mxu2 %v9291_v16  ;;  %1956 = vmatpush.bf16.msrb.mxu3 %v9295_v22  ;;  %v13739_v59 = vmax.f32 %v9625_v26, 0.0 }
 0x255   :  { %v9627_v41 = vpop.f32.mrf.mxu3 }
 0x256   :  { %v13738_v40 = vmax.f32 %v9627_v41, 0.0 }
 0x257   :  { %1938 = vmatpush.bf16.msrb.mxu2 %v9312_v33  ;;  %1957 = vmatpush.bf16.msrb.mxu3 %v9303_v0 }
 0x258   :  { %v2285_v2 = vpack.c.bf16 %v13738_v40, %v13739_v59  ;;  %v1129_v15 = vpop.f32.mrf.mxu0 }
 0x259   :  { %v1148_v63 = vpop.f32.mrf.mxu1  ;;  %v1130_v35 = vadd.f32 %v1129_v15, %v9558_v24 }
 0x25a   :  { %v1149_v3 = vadd.f32 %v1148_v63, %v9566_v1  ;;  %v9641_v4 = vpop.f32.mrf.mxu2  ;;  %v2294_v1 = vunpack.c.l.b16 %v2285_v2  ;;  %v2295_v15 = vunpack.c.h.b16 %v2285_v2  ;;  %v2292_v63 = vunpack.c.l.b16 %v2284_v32 }
 0x25b   :  { %1939 = vmatpush.bf16.msrb.mxu2 %v9349_v19  ;;  %1958 = vmatpush.bf16.msrb.mxu3 %v9337_v53  ;;  %v1319_v55 = vmax.f32 %v1130_v35, 0.0  ;;  %v13742_v40 = vmax.f32 %v9641_v4, 0.0  ;;  %v2293_v35 = vunpack.c.h.b16 %v2284_v32 }
 0x25c   :  { %v1320_v60 = vmax.f32 %v1149_v3, 0.0 }
 0x25d   :  { %v9643_v8 = vpop.f32.mrf.mxu3 }
 0x25e   :  { %v13741_v59 = vmax.f32 %v9643_v8, 0.0  ;;  %v9647_v48 = vpack.c.bf16 %v1320_v60, %v1319_v55  ;;  %v9669_v60 = vpack.c.b16 %v2294_v1, %v2292_v63 }
 0x25f   :  { %1940 = vmatpush.bf16.msrb.mxu2 %v9360_v31  ;;  %1959 = vmatpush.bf16.msrb.mxu3 %v9353_v7 }
 0x260   :  { %v2286_v24 = vpack.c.bf16 %v13741_v59, %v13742_v40  ;;  %v9657_v7 = vpop.f32.mrf.mxu0  ;;  %14096 = vst [vmem:[#allocation104_spill] sm:$0xff] %v9669_v60  ;;  %v9671_v59 = vpack.c.b16 %v2295_v15, %v2293_v35 }
 0x261   :  { %v9659_v31 = vpop.f32.mrf.mxu1 }
 0x262   :  { %v9661_v3 = vpop.f32.mrf.mxu2  ;;  %14097 = vst [vmem:[#allocation105_spill] sm:$0xff] %v9671_v59  ;;  %v2296_v47 = vunpack.c.l.b16 %v2286_v24  ;;  %v2297_v13 = vunpack.c.h.b16 %v2286_v24 }
 0x263   :  { %1941 = vmatpush.bf16.msrb.mxu2 %v9382_v29  ;;  %1960 = vmatpush.bf16.msrb.mxu3 %v9384_v10  ;;  %v13744_v29 = vmax.f32 %v9661_v3, 0.0 }
 0x265   :  { %v9663_v55 = vpop.f32.mrf.mxu3 }
 0x266   :  { %v13743_v10 = vmax.f32 %v9663_v55, 0.0 }
 0x267   :  { %2012 = vmatpush.bf16.msra.mxu2 %v9398_v45  ;;  %2031 = vmatpush.bf16.msra.mxu3 %v9400_v37 }
 0x268   :  { %v2287_v32 = vpack.c.bf16 %v13743_v10, %v13744_v29  ;;  %v1200_v2 = vpop.f32.mrf.mxu0 }
 0x269   :  { %v1219_v40 = vpop.f32.mrf.mxu1 }
 0x26a   :  { %v1238_v27 = vpop.f32.mrf.mxu2  ;;  %v2298_v60 = vunpack.c.l.b16 %v2287_v32  ;;  %v2299_v62 = vunpack.c.h.b16 %v2287_v32 }
 0x26b   :  { %2013 = vmatpush.bf16.msra.mxu2 %v9305_v39  ;;  %2032 = vmatpush.bf16.msra.mxu3 %v9307_v51  ;;  %v1239_v1 = vadd.f32 %v1238_v27, %v1200_v2 }
 0x26d   :  { %v1257_v42 = vpop.f32.mrf.mxu3  ;;  %v1323_v63 = vmax.f32 %v1239_v1, 0.0 }
 0x26e   :  { %v1258_v15 = vadd.f32 %v1257_v42, %v1219_v40  ;;  %v9685_v40 = vpack.c.b16 %v2298_v60, %v2296_v47 }
 0x26f   :  { %2014 = vmatpush.bf16.msra.mxu2 %v9392_v28  ;;  %2033 = vmatpush.bf16.msra.mxu3 %v9395_v44 }
 0x270   :  { %v1324_v35 = vmax.f32 %v1258_v15, 0.0  ;;  %v1202_v29 = vpop.f32.mrf.mxu0 }
 0x271   :  { %v1221_v59 = vpop.f32.mrf.mxu1 }
 0x272   :  { %v1740_v10 = vpack.c.bf16 %v1324_v35, %v1323_v63  ;;  %v1240_v36 = vpop.f32.mrf.mxu2 }
 0x273   :  { %2015 = vmatpush.bf16.msra.mxu2 %v9291_v16  ;;  %2034 = vmatpush.bf16.msra.mxu3 %v9295_v22  ;;  %v1241_v27 = vadd.f32 %v1240_v36, %v1202_v29 }
 0x275   :  { %v1259_v34 = vpop.f32.mrf.mxu3 }
 0x276   :  { %v1260_v42 = vadd.f32 %v1259_v34, %v1221_v59 }
 0x277   :  { %2016 = vmatpush.bf16.msra.mxu2 %v9312_v33  ;;  %2035 = vmatpush.bf16.msra.mxu3 %v9303_v0  ;;  %v9687_v33 = vpack.c.b16 %v2299_v62, %v2297_v13  ;;  %v1325_v0 = vmax.f32 %v1241_v27, 0.0  ;;  %v1748_v27 = vunpack.c.l.b16 %v1740_v10 }
 0x278   :  { %v1326_v2 = vmax.f32 %v1260_v42, 0.0  ;;  %v1205_v15 = vpop.f32.mrf.mxu0  ;;  %v1749_v42 = vunpack.c.h.b16 %v1740_v10 }
 0x279   :  { %v1224_v22 = vpop.f32.mrf.mxu1  ;;  %v7672_v32 = vpack.i.bf16 %v1325_v0, %v1323_v63 }
 0x27a   :  { %v1741_v1 = vpack.c.bf16 %v1326_v2, %v1325_v0  ;;  %v1243_v24 = vpop.f32.mrf.mxu2 }
 0x27b   :  { %2017 = vmatpush.bf16.msra.mxu2 %v9349_v19  ;;  %2036 = vmatpush.bf16.msra.mxu3 %v9337_v53  ;;  %v1244_v44 = vadd.f32 %v1243_v24, %v1205_v15 }
 0x27c   :  { %7673 = vrot.lane.b32.xlu2 %v7672_v32, %s8144_s0  ;;  %v1750_v13 = vunpack.c.l.b16 %v1741_v1  ;;  %v1751_v62 = vunpack.c.h.b16 %v1741_v1 }
 0x27d   :  { %v1262_v16 = vpop.f32.mrf.mxu3  ;;  %v1327_v28 = vmax.f32 %v1244_v44, 0.0 }
 0x27e   :  { %v1263_v19 = vadd.f32 %v1262_v16, %v1224_v22  ;;  %v9692_v15 = vpack.c.b16 %v1750_v13, %v1748_v27  ;;  %v9694_v16 = vpack.c.b16 %v1751_v62, %v1749_v42  ;;  %v14103_v13 = vld [vmem:[#allocation93_spill] sm:$0xff]  ;;  %v14107_v62 = vmax.f32 %v9643_v8, 0.0  ;;  %v9750_v8 = vld [vmem:[%s13604_s3 + $0x8] sm:$0xff] }
 0x27f   :  { %7080 = vmatmul.msk.bf16.gmra.mxu2 %vm428_vm0, %v9750_v8  ;;  %7082 = vmatmul.msk.bf16.gmra.mxu3 %vm428_vm0, %v9750_v8 }
 0x280   :  { %v1328_v53 = vmax.f32 %v1263_v19, 0.0  ;;  %v1207_v34 = vpop.f32.mrf.mxu0 }
 0x281   :  { %v1226_v47 = vpop.f32.mrf.mxu1 }
 0x282   :  { %v1742_v36 = vpack.c.bf16 %v1328_v53, %v1327_v28  ;;  %v1245_v59 = vpop.f32.mrf.mxu2 }
 0x283   :  { %v1246_v60 = vadd.f32 %v1245_v59, %v1207_v34 }
 0x284   :  { %7688 = vrot.lane.b32.xlu2 %v9210_v18, %s8145_s19  ;;  %v7677_v18 = vpack.i.bf16 %v1326_v2, %v1324_v35  ;;  %v1752_v19 = vunpack.c.l.b16 %v1742_v36 }
 0x285   :  { %v1264_v29 = vpop.f32.mrf.mxu3  ;;  %v1329_v0 = vmax.f32 %v1246_v60, 0.0 }
 0x286   :  { %v1265_v63 = vadd.f32 %v1264_v29, %v1226_v47  ;;  %v14098_v47 = vmax.f32 %v9601_v43, 0.0  ;;  %v14104_v43 = vld [vmem:[#allocation90_spill] sm:$0xff]  ;;  %v14109_v29 = vld [vmem:[#allocation79_spill] sm:$0xff] }
 0x287   :  { %v7662_v24 = vpack.i.bf16 %v1329_v0, %v1327_v28  ;;  %v1753_v28 = vunpack.c.h.b16 %v1742_v36  ;;  %v14110_v60 = vmax.f32 %v14109_v29, 0.0 }
 0x288   :  { %v1330_v32 = vmax.f32 %v1265_v63, 0.0  ;;  %v14111_v63 = vld [vmem:[#allocation80_spill] sm:$0xff] }
 0x289   :  { %7663 = vrot.lane.b32.xlu0 %v7662_v24, %s8144_s0  ;;  %v14112_v27 = vmax.f32 %v14111_v63, 0.0 }
 0x28a   :  { %v1743_v22 = vpack.c.bf16 %v1330_v32, %v1329_v0  ;;  %v7667_v44 = vpack.i.bf16 %v1330_v32, %v1328_v53  ;;  %v14113_v0 = vmax.f32 %v9603_v6, 0.0  ;;  %v14117_v32 = vld [vmem:[#allocation65_spill] sm:$0xff] }
 0x28b   :  { %v7742_v42 = vpack.i.bf16 %v14112_v27, %v14110_v60  ;;  %v1728_v27 = vunpack.c.l.b16 %v9647_v48 }
 0x28c   :  { %7668 = vrot.lane.b32.xlu1 %v7667_v44, %s8144_s0  ;;  %7703 = vrot.lane.b32.xlu2 %v9492_v25, %s8145_s19  ;;  %v1754_v10 = vunpack.c.l.b16 %v1743_v22  ;;  %v1755_v1 = vunpack.c.h.b16 %v1743_v22  ;;  %v14099_v25 = vmax.f32 %v9625_v26, 0.0  ;;  %v14106_v26 = vmax.f32 %v9661_v3, 0.0  ;;  %v14119_v44 = vld [vmem:[#allocation64_spill] sm:$0xff] }
 0x28d   :  { %v14120_v24 = vmax.f32 %v14119_v44, 0.0 }
 0x28e   :  { %v9705_v53 = vpack.c.b16 %v1754_v10, %v1752_v19  ;;  %v9707_v34 = vpack.c.b16 %v1755_v1, %v1753_v28  ;;  %v7732_v35 = vpack.i.bf16 %v14099_v25, %v14098_v47  ;;  %v1132_v19 = vadd.f32 %v9657_v7, %v9588_v61 }
 0x28f   :  { %7087 = vmatmul.msk.bf16.vlgmr.msrb.gmra.mxu2 %vm428_vm0, %v9595_v17  ;;  %7089 = vmatmul.msk.bf16.vlgmr.msrb.gmra.mxu3 %vm428_vm0, %v9595_v17  ;;  %v1151_v28 = vadd.f32 %v9659_v31, %v9590_v12  ;;  %v1127_v25 = vadd.f32 %v9619_v54, %v9526_v57 }
 0x291   :  { %7678 = vrot.lane.b32.xlu0 %v7677_v18, %s8144_s0  ;;  %v14121_v18 = vld [vmem:[#allocation70_spill] sm:$0xff] }
 0x292   :  { %v14122_v10 = vmax.f32 %v14121_v18, 0.0 }
 0x294   :  { %7683 = vrot.lane.b32.xlu1 %v9200_v11, %s8145_s19  ;;  %7718 = vrot.lane.b32.xlu2 %v9482_v21, %s8145_s19  ;;  %v14100_v11 = vmax.f32 %v9408_v23, 0.0  ;;  %v14101_v21 = vld [vmem:[#allocation81_spill] sm:$0xff]  ;;  %v14108_v23 = vmax.f32 %v9663_v55, 0.0  ;;  %v14115_v55 = vld [vmem:[#allocation40_spill] sm:$0xff]  ;;  %v7757_v1 = vpack.i.bf16 %v14122_v10, %v14120_v24 }
 0x295   :  { %v14102_v2 = vmax.f32 %v14101_v21, 0.0  ;;  %v14116_v6 = vmax.f32 %v14115_v55, 0.0  ;;  %v1322_v21 = vmax.f32 %v1151_v28, 0.0 }
 0x296   :  { %v7727_v59 = vpack.i.bf16 %v14108_v23, %v14107_v62 }
 0x297   :  { %v7747_v36 = vpack.i.bf16 %v14102_v2, %v14100_v11  ;;  %v1321_v11 = vmax.f32 %v1132_v19, 0.0 }
 0x299   :  { %7693 = vrot.lane.b32.xlu0 %v9152_v9, %s8145_s19 }
 0x29c   :  { %7698 = vrot.lane.b32.xlu1 %v9156_v56, %s8145_s19  ;;  %7733 = vrot.lane.b32.xlu2 %v7732_v35, %s8144_s0  ;;  %v14105_v56 = vmax.f32 %v9641_v4, 0.0  ;;  %v14114_v4 = vmax.f32 %v9627_v41, 0.0  ;;  %v14118_v41 = vmax.f32 %v14117_v32, 0.0  ;;  %v1146_v35 = vadd.f32 %v9621_v46, %v9528_v30 }
 0x29e   :  { %v7722_v9 = vpack.i.bf16 %v14106_v26, %v14105_v56  ;;  %v7737_v3 = vpack.i.bf16 %v14114_v4, %v14113_v0  ;;  %v7752_v22 = vpack.i.bf16 %v14118_v41, %v14116_v6  ;;  %v9792_v56 = vpack.c.bf16 %v1322_v21, %v1321_v11 }
 0x29f   :  { %7088 = vmatmul.msk.bf16.gmra.mxu2 %vm428_vm0, %v9750_v8  ;;  %7090 = vmatmul.msk.bf16.gmra.mxu3 %vm428_vm0, %v9750_v8 }
 0x2a0   :  { %v1730_v6 = vunpack.c.l.b16 %v9792_v56  ;;  %v1731_v32 = vunpack.c.h.b16 %v9792_v56 }
 0x2a1   :  { %7708 = vrot.lane.b32.xlu0 %v14103_v13, %s8145_s19  ;;  %v1317_v13 = vmax.f32 %v1127_v25, 0.0 }
 0x2a4   :  { %7713 = vrot.lane.b32.xlu1 %v14104_v43, %s8145_s19  ;;  %7748 = vrot.lane.b32.xlu2 %v7747_v36, %s8145_s19  ;;  %v1318_v43 = vmax.f32 %v1146_v35, 0.0 }
 0x2a6   :  { %v9810_v63 = vpack.c.bf16 %v1318_v43, %v1317_v13 }
 0x2a9   :  { %7723 = vrot.lane.b32.xlu0 %v7722_v9, %s8144_s0 }
 0x2ac   :  { %7728 = vrot.lane.b32.xlu1 %v7727_v59, %s8144_s0 }
 0x2af   :  { %7095 = vmatmul.msk.bf16.vlgmr.msra.gmra.mxu2 %vm428_vm0, %v9595_v17  ;;  %7097 = vmatmul.msk.bf16.vlgmr.msra.gmra.mxu3 %vm428_vm0, %v9595_v17 }
 0x2b1   :  { %7738 = vrot.lane.b32.xlu0 %v7737_v3, %s8144_s0 }
 0x2b4   :  { %7743 = vrot.lane.b32.xlu1 %v7742_v42, %s8145_s19  ;;  %v1729_v42 = vunpack.c.h.b16 %v9647_v48  ;;  %v1725_v48 = vunpack.c.h.b16 %v9611_v5 }
 0x2b9   :  { %7753 = vrot.lane.b32.xlu0 %v7752_v22, %s8145_s19 }
 0x2bc   :  { %7758 = vrot.lane.b32.xlu1 %v7757_v1, %s8145_s19 }
 0x2bf   :  { %7096 = vmatmul.msk.bf16.gmra.mxu2 %vm428_vm0, %v9750_v8  ;;  %7098 = vmatmul.msk.bf16.gmra.mxu3 %vm428_vm0, %v9750_v8 }
 0x2d6   :  { %v9782_v47 = vpop.permute.xlu2 %7673 }
 0x2d7   :  { %v7676_v41 = vunpack.i.h.bf16 %v9782_v47  ;;  %v7675_v28 = vunpack.i.l.bf16 %v9782_v47 }
 0x2de   :  { %v7689_v59 = vpop.permute.xlu2 %7688 }
 0x2df   :  { %v7691_v22 = vunpack.i.h.bf16 %v7689_v59  ;;  %v7690_v18 = vunpack.i.l.bf16 %v7689_v59 }
 0x2fb   :  { %v7664_v7 = vpop.permute.xlu0 %7663 }
 0x2fc   :  { %v7666_v31 = vunpack.i.h.bf16 %v7664_v7  ;;  %v7665_v36 = vunpack.i.l.bf16 %v7664_v7 }
 0x2fe   :  { %v7669_v61 = vpop.permute.xlu1 %7668 }
 0x2ff   :  { %v7671_v2 = vunpack.i.h.bf16 %v7669_v61  ;;  %v7670_v12 = vunpack.i.l.bf16 %v7669_v61 }
 0x301   :  { %v1599_v26 = vsel %vm216_vm1, %v7666_v31, %v7671_v2  ;;  %v1603_v57 = vsel %vm216_vm1, %v7671_v2, %v7666_v31  ;;  %v1598_v30 = vsel %vm216_vm1, %v7665_v36, %v7670_v12  ;;  %v1602_v54 = vsel %vm216_vm1, %v7670_v12, %v7665_v36 }
 0x302   :  { %v1610_v46 = vsel %vm8626_vm2, %v1603_v57, 0.0  ;;  %v1611_v9 = vsel %vm8632_vm3, %v1599_v26, 0.0  ;;  %v1608_v62 = vsel %vm8626_vm2, %v1602_v54, 0.0  ;;  %v1609_v23 = vsel %vm8632_vm3, %v1598_v30, 0.0 }
 0x303   :  { %v1646_v29 = vpack.c.bf16 %v1609_v23, %v1608_v62  ;;  %v1647_v60 = vpack.c.bf16 %v1611_v9, %v1610_v46  ;;  %v7679_v24 = vpop.permute.xlu0 %7678 }
 0x304   :  { %v7681_v19 = vunpack.i.h.bf16 %v7679_v24  ;;  %v7680_v25 = vunpack.i.l.bf16 %v7679_v24 }
 0x305   :  { %v1664_v0 = vunpack.c.l.b16 %v1646_v29  ;;  %v1666_v4 = vunpack.c.l.b16 %v1647_v60  ;;  %v1665_v3 = vunpack.c.h.b16 %v1646_v29  ;;  %v1667_v55 = vunpack.c.h.b16 %v1647_v60 }
 0x306   :  { %v7684_v44 = vpop.permute.xlu1 %7683  ;;  %v1597_v30 = vsel %vm216_vm1, %v7676_v41, %v7681_v19  ;;  %v1601_v54 = vsel %vm216_vm1, %v7681_v19, %v7676_v41  ;;  %v1596_v62 = vsel %vm216_vm1, %v7675_v28, %v7680_v25  ;;  %v1600_v23 = vsel %vm216_vm1, %v7680_v25, %v7675_v28 }
 0x307   :  { %v7686_v10 = vunpack.i.h.bf16 %v7684_v44  ;;  %v7685_v1 = vunpack.i.l.bf16 %v7684_v44  ;;  %v9818_v35 = vpack.c.b16 %v1666_v4, %v1664_v0  ;;  %v9820_v11 = vpack.c.b16 %v1667_v55, %v1665_v3 }
 0x308   :  { %v1606_v46 = vsel %vm8626_vm2, %v1601_v54, 0.0  ;;  %v1607_v9 = vsel %vm8632_vm3, %v1597_v30, 0.0  ;;  %v1604_v59 = vsel %vm8626_vm2, %v1600_v23, 0.0  ;;  %v1605_v29 = vsel %vm8632_vm3, %v1596_v62, 0.0 }
 0x309   :  { %v1422_v21 = vsel %vm253_vm4, %v7685_v1, %v7690_v18  ;;  %v1423_v61 = vsel %vm253_vm4, %v7686_v10, %v7691_v22  ;;  %v1426_v7 = vsel %vm253_vm4, %v7690_v18, %v7685_v1  ;;  %v1427_v2 = vsel %vm253_vm4, %v7691_v22, %v7686_v10  ;;  %1810 = vmatpush.bf16.msra.mxu0 %v9818_v35 }
 0x30a   :  { %v1432_v47 = vsel %vm8708_vm5, %v1422_v21, 0.0  ;;  %v1433_v36 = vsel %vm8714_vm6, %v1426_v7, 0.0  ;;  %v1434_v13 = vsel %vm8708_vm5, %v1423_v61, 0.0  ;;  %v1435_v43 = vsel %vm8714_vm6, %v1427_v2, 0.0  ;;  %1829 = vmatpush.bf16.msra.mxu1 %v9820_v11 }
 0x30b   :  { %v1558_v26 = vpack.c.bf16 %v1433_v36, %v1432_v47  ;;  %v1559_v57 = vpack.c.bf16 %v1435_v43, %v1434_v13  ;;  %v1645_v60 = vpack.c.bf16 %v1607_v9, %v1606_v46  ;;  %v7694_v3 = vpop.permute.xlu0 %7693  ;;  %v1644_v55 = vpack.c.bf16 %v1605_v29, %v1604_v59  ;;  %v9879_v9 = vld [vmem:[%s13604_s3 + $0x10] sm:$0xff] }
 0x30c   :  { %v7696_v10 = vunpack.i.h.bf16 %v7694_v3  ;;  %v7695_v1 = vunpack.i.l.bf16 %v7694_v3  ;;  %v1726_v59 = vunpack.c.l.b16 %v9810_v63  ;;  %v1727_v29 = vunpack.c.h.b16 %v9810_v63 }
 0x30d   :  { %v1568_v0 = vunpack.c.l.b16 %v1558_v26  ;;  %v1570_v41 = vunpack.c.l.b16 %v1559_v57  ;;  %v1569_v22 = vunpack.c.h.b16 %v1558_v26  ;;  %v1571_v44 = vunpack.c.h.b16 %v1559_v57 }
 0x30e   :  { %v7699_v4 = vpop.permute.xlu1 %7698  ;;  %v1660_v19 = vunpack.c.l.b16 %v1644_v55  ;;  %v1662_v28 = vunpack.c.l.b16 %v1645_v60  ;;  %v1661_v25 = vunpack.c.h.b16 %v1644_v55  ;;  %v1663_v21 = vunpack.c.h.b16 %v1645_v60 }
 0x30f   :  { %v7701_v24 = vunpack.i.h.bf16 %v7699_v4  ;;  %v7700_v18 = vunpack.i.l.bf16 %v7699_v4  ;;  %v1574_v54 = vpack.c.b16 %v1570_v41, %v1568_v0  ;;  %v1575_v46 = vpack.c.b16 %v1571_v44, %v1569_v22  ;;  %v14127_v22 = vld [vmem:[#allocation97_spill] sm:$0xff]  ;;  %v14128_v44 = vld [vmem:[#allocation98_spill] sm:$0xff] }
 0x310   :  { %v9872_v57 = vpack.c.b16 %v1662_v28, %v1660_v19  ;;  %v9874_v30 = vpack.c.b16 %v1663_v21, %v1661_v25  ;;  %v9887_v60 = vpack.c.b16 %v1730_v6, %v1728_v27  ;;  %v9893_v0 = vpack.c.b16 %v1731_v32, %v1729_v42  ;;  %v14125_v32 = vld [vmem:[#allocation77_spill] sm:$0xff] }
 0x311   :  { %v1421_v61 = vsel %vm253_vm4, %v7696_v10, %v7701_v24  ;;  %v1425_v7 = vsel %vm253_vm4, %v7701_v24, %v7696_v10  ;;  %v1420_v2 = vsel %vm253_vm4, %v7695_v1, %v7700_v18  ;;  %v1424_v47 = vsel %vm253_vm4, %v7700_v18, %v7695_v1  ;;  %2088 = vmatpush.bf16.msrb.mxu2 %v1574_v54  ;;  %v14130_v24 = vld [vmem:[#allocation39_spill] sm:$0xff]  ;;  %v14132_v1 = vld [vmem:[#allocation100_spill] sm:$0xff] }
 0x312   :  { %v1430_v36 = vsel %vm8708_vm5, %v1421_v61, 0.0  ;;  %v1431_v13 = vsel %vm8714_vm6, %v1425_v7, 0.0  ;;  %v1428_v43 = vsel %vm8708_vm5, %v1420_v2, 0.0  ;;  %v1429_v26 = vsel %vm8714_vm6, %v1424_v47, 0.0  ;;  %1811 = vmatpush.bf16.msra.mxu0 %v9872_v57  ;;  %1830 = vmatpush.bf16.msra.mxu1 %v9874_v30  ;;  %v14131_v18 = vld [vmem:[#allocation99_spill] sm:$0xff] }
 0x313   :  { %v1556_v62 = vpack.c.bf16 %v1429_v26, %v1428_v43  ;;  %v1557_v23 = vpack.c.bf16 %v1431_v13, %v1430_v36  ;;  %2107 = vmatpush.bf16.msrb.mxu3 %v1575_v46  ;;  %v1724_v41 = vunpack.c.l.b16 %v9611_v5  ;;  %v9907_v6 = vpack.c.b16 %v1727_v29, %v1725_v48  ;;  %v9922_v5 = vld [vmem:[%s13604_s3 + $0x18] sm:$0xff] }
 0x315   :  { %v1564_v4 = vunpack.c.l.b16 %v1556_v62  ;;  %v1566_v63 = vunpack.c.l.b16 %v1557_v23  ;;  %v1565_v3 = vunpack.c.h.b16 %v1556_v62  ;;  %v1567_v55 = vunpack.c.h.b16 %v1557_v23  ;;  %7067 = vmatmul.msk.bf16.vlgmr.msra.gmra.mxu0 %vm428_vm0, %v9879_v9  ;;  %7069 = vmatmul.msk.bf16.vlgmr.msra.gmra.mxu1 %vm428_vm0, %v9879_v9 }
 0x316   :  { %1898 = vmatpush.bf16.msrb.mxu0 %v9887_v60  ;;  %1917 = vmatpush.bf16.msrb.mxu1 %v9893_v0  ;;  %v9905_v42 = vpack.c.b16 %v1726_v59, %v1724_v41  ;;  %v7714_v28 = vpop.permute.xlu1 %7713 }
 0x317   :  { %v1572_v56 = vpack.c.b16 %v1566_v63, %v1564_v4  ;;  %v1573_v27 = vpack.c.b16 %v1567_v55, %v1565_v3  ;;  %v7716_v2 = vunpack.i.h.bf16 %v7714_v28  ;;  %v7715_v43 = vunpack.i.l.bf16 %v7714_v28 }
 0x319   :  { %2089 = vmatpush.bf16.msrb.mxu2 %v1572_v56  ;;  %2108 = vmatpush.bf16.msrb.mxu3 %v1573_v27 }
 0x31a   :  { %1899 = vmatpush.bf16.msrb.mxu0 %v9905_v42  ;;  %1918 = vmatpush.bf16.msrb.mxu1 %v9907_v6 }
 0x31d   :  { %2090 = vmatpush.bf16.msrb.mxu2 %v9398_v45  ;;  %2109 = vmatpush.bf16.msrb.mxu3 %v9400_v37  ;;  %v7704_v45 = vpop.permute.xlu2 %7703  ;;  %v14126_v37 = vld [vmem:[#allocation78_spill] sm:$0xff] }
 0x31e   :  { %1900 = vmatpush.bf16.msrb.mxu0 %v9500_v38  ;;  %1919 = vmatpush.bf16.msrb.mxu1 %v9502_v14  ;;  %v7705_v25 = vunpack.i.l.bf16 %v7704_v45  ;;  %v7706_v21 = vunpack.i.h.bf16 %v7704_v45 }
 0x321   :  { %2091 = vmatpush.bf16.msrb.mxu2 %v9305_v39  ;;  %2110 = vmatpush.bf16.msrb.mxu3 %v9307_v51  ;;  %v7709_v39 = vpop.permute.xlu0 %7708  ;;  %v14129_v51 = vld [vmem:[#allocation38_spill] sm:$0xff] }
 0x322   :  { %1901 = vmatpush.bf16.msrb.mxu0 %v9514_v50  ;;  %1920 = vmatpush.bf16.msrb.mxu1 %v9516_v52  ;;  %v7710_v10 = vunpack.i.l.bf16 %v7709_v39  ;;  %v7711_v19 = vunpack.i.h.bf16 %v7709_v39 }
 0x324   :  { %v1630_v7 = vsel %vm253_vm4, %v7705_v25, %v7710_v10  ;;  %v1631_v47 = vsel %vm253_vm4, %v7706_v21, %v7711_v19  ;;  %v1634_v36 = vsel %vm253_vm4, %v7710_v10, %v7705_v25  ;;  %v1635_v13 = vsel %vm253_vm4, %v7711_v19, %v7706_v21 }
 0x325   :  { %2092 = vmatpush.bf16.msrb.mxu2 %v14125_v32  ;;  %2111 = vmatpush.bf16.msrb.mxu3 %v14126_v37  ;;  %v7719_v61 = vpop.permute.xlu2 %7718  ;;  %v1640_v46 = vsel %vm8708_vm5, %v1630_v7, 0.0  ;;  %v1641_v62 = vsel %vm8714_vm6, %v1634_v36, 0.0  ;;  %v1642_v23 = vsel %vm8708_vm5, %v1631_v47, 0.0  ;;  %v1643_v59 = vsel %vm8714_vm6, %v1635_v13, 0.0  ;;  %v14135_v13 = vld [vmem:[#allocation85_spill] sm:$0xff] }
 0x326   :  { %1902 = vmatpush.bf16.msrb.mxu0 %v14127_v22  ;;  %1921 = vmatpush.bf16.msrb.mxu1 %v14128_v44  ;;  %v7721_v26 = vunpack.i.h.bf16 %v7719_v61  ;;  %v7720_v54 = vunpack.i.l.bf16 %v7719_v61  ;;  %v1766_v55 = vpack.c.bf16 %v1641_v62, %v1640_v46  ;;  %v1767_v41 = vpack.c.bf16 %v1643_v59, %v1642_v23  ;;  %v7729_v62 = vpop.permute.xlu1 %7728 }
 0x327   :  { %7068 = vmatmul.msk.bf16.gmra.mxu0 %vm428_vm0, %v9922_v5  ;;  %7070 = vmatmul.msk.bf16.gmra.mxu1 %vm428_vm0, %v9922_v5 }
 0x328   :  { %v1629_v29 = vsel %vm253_vm4, %v7716_v2, %v7721_v26  ;;  %v1633_v4 = vsel %vm253_vm4, %v7721_v26, %v7716_v2  ;;  %v1628_v63 = vsel %vm253_vm4, %v7715_v43, %v7720_v54  ;;  %v1632_v3 = vsel %vm253_vm4, %v7720_v54, %v7715_v43  ;;  %v14134_v2 = vld [vmem:[#allocation92_spill] sm:$0xff]  ;;  %v14136_v26 = vld [vmem:[#allocation86_spill] sm:$0xff] }
 0x329   :  { %2093 = vmatpush.bf16.msrb.mxu2 %v14129_v51  ;;  %2112 = vmatpush.bf16.msrb.mxu3 %v14130_v24  ;;  %v1638_v48 = vsel %vm8708_vm5, %v1629_v29, 0.0  ;;  %v1639_v56 = vsel %vm8714_vm6, %v1633_v4, 0.0  ;;  %v1636_v27 = vsel %vm8708_vm5, %v1628_v63, 0.0  ;;  %v1637_v45 = vsel %vm8714_vm6, %v1632_v3, 0.0  ;;  %v7724_v36 = vpop.permute.xlu0 %7723  ;;  %v14137_v3 = vld [vmem:[#allocation89_spill] sm:$0xff] }
 0x32a   :  { %1903 = vmatpush.bf16.msrb.mxu0 %v14131_v18  ;;  %1922 = vmatpush.bf16.msrb.mxu1 %v14132_v1  ;;  %v1776_v32 = vunpack.c.l.b16 %v1766_v55  ;;  %v1778_v37 = vunpack.c.l.b16 %v1767_v41  ;;  %v1764_v39 = vpack.c.bf16 %v1637_v45, %v1636_v27  ;;  %v1765_v51 = vpack.c.bf16 %v1639_v56, %v1638_v48 }
 0x32b   :  { %v1777_v24 = vunpack.c.h.b16 %v1766_v55  ;;  %v1779_v10 = vunpack.c.h.b16 %v1767_v41  ;;  %v1346_v47 = vmax.f32 %v14134_v2, 0.0  ;;  %v1341_v43 = vmax.f32 %v14135_v13, 0.0 }
 0x32c   :  { %7103 = vmatmul.msk.bf16.vlgmr.msrb.gmra.mxu2 %vm428_vm0, %v9595_v17  ;;  %7105 = vmatmul.msk.bf16.vlgmr.msrb.gmra.mxu3 %vm428_vm0, %v9595_v17  ;;  %v9996_v19 = vpack.c.b16 %v1778_v37, %v1776_v32  ;;  %v1772_v28 = vunpack.c.l.b16 %v1764_v39  ;;  %v1774_v25 = vunpack.c.l.b16 %v1765_v51  ;;  %v1773_v61 = vunpack.c.h.b16 %v1764_v39 }
 0x32d   :  { %2372 = vmatpush.bf16.msra.mxu2 %v9500_v38  ;;  %2391 = vmatpush.bf16.msra.mxu3 %v9502_v14  ;;  %v10001_v21 = vpack.c.b16 %v1779_v10, %v1777_v24  ;;  %v1775_v7 = vunpack.c.h.b16 %v1765_v51  ;;  %v1342_v54 = vmax.f32 %v14136_v26, 0.0  ;;  %v7726_v4 = vunpack.i.h.bf16 %v7724_v36  ;;  %v7734_v51 = vpop.permute.xlu2 %7733 }
 0x32e   :  { %1974 = vmatpush.bf16.msra.mxu0 %v9705_v53  ;;  %1993 = vmatpush.bf16.msra.mxu1 %v9707_v34  ;;  %v7731_v63 = vunpack.i.h.bf16 %v7729_v62  ;;  %v2248_v55 = vunpack.c.l.b16 %v14137_v3  ;;  %v7725_v41 = vunpack.i.l.bf16 %v7724_v36  ;;  %v7730_v48 = vunpack.i.l.bf16 %v7729_v62 }
 0x32f   :  { %v2197_v23 = vpack.c.bf16 %v1342_v54, %v1341_v43  ;;  %v2249_v56 = vunpack.c.h.b16 %v14137_v3 }
 0x330   :  { %v2143_v24 = vsel %vm216_vm1, %v7726_v4, %v7731_v63  ;;  %v2147_v10 = vsel %vm216_vm1, %v7731_v63, %v7726_v4 }
 0x331   :  { %2373 = vmatpush.bf16.msra.mxu2 %v9514_v50  ;;  %2392 = vmatpush.bf16.msra.mxu3 %v9516_v52  ;;  %v7739_v27 = vpop.permute.xlu0 %7738  ;;  %v2246_v32 = vunpack.c.l.b16 %v2197_v23  ;;  %v2155_v36 = vsel %vm8632_vm3, %v2143_v24, 0.0 }
 0x332   :  { %1975 = vmatpush.bf16.msra.mxu0 %v9692_v15  ;;  %1994 = vmatpush.bf16.msra.mxu1 %v9694_v16 }
 0x335   :  { %2374 = vmatpush.bf16.msra.mxu2 %v14127_v22  ;;  %2393 = vmatpush.bf16.msra.mxu3 %v14128_v44 }
 0x336   :  { %1976 = vmatpush.bf16.msra.mxu0 %v9887_v60  ;;  %1995 = vmatpush.bf16.msra.mxu1 %v9893_v0 }
 0x337   :  { %7083 = vmatmul.msk.bf16.vlgmr.msrb.gmra.mxu0 %vm428_vm0, %v9879_v9  ;;  %7085 = vmatmul.msk.bf16.vlgmr.msrb.gmra.mxu1 %vm428_vm0, %v9879_v9 }
 0x339   :  { %2375 = vmatpush.bf16.msra.mxu2 %v14131_v18  ;;  %2394 = vmatpush.bf16.msra.mxu3 %v14132_v1 }
 0x33a   :  { %1977 = vmatpush.bf16.msra.mxu0 %v9905_v42  ;;  %1996 = vmatpush.bf16.msra.mxu1 %v9907_v6 }
 0x33c   :  { %7104 = vmatmul.msk.bf16.gmra.mxu2 %vm428_vm0, %v9750_v8  ;;  %7106 = vmatmul.msk.bf16.gmra.mxu3 %vm428_vm0, %v9750_v8 }
 0x33d   :  { %2376 = vmatpush.bf16.msra.mxu2 %v9818_v35  ;;  %2395 = vmatpush.bf16.msra.mxu3 %v9820_v11  ;;  %v10011_v35 = vpack.c.b16 %v1774_v25, %v1772_v28  ;;  %v10014_v11 = vpack.c.b16 %v1775_v7, %v1773_v61  ;;  %v2146_v28 = vsel %vm216_vm1, %v7730_v48, %v7725_v41  ;;  %v7741_v25 = vunpack.i.h.bf16 %v7739_v27 }
 0x33e   :  { %1978 = vmatpush.bf16.msra.mxu0 %v9500_v38  ;;  %1997 = vmatpush.bf16.msra.mxu1 %v9502_v14  ;;  %v7740_v61 = vunpack.i.l.bf16 %v7739_v27  ;;  %v7736_v7 = vunpack.i.h.bf16 %v7734_v51  ;;  %v2152_v13 = vsel %vm8626_vm2, %v2146_v28, 0.0 }
 0x340   :  { %v2141_v54 = vsel %vm216_vm1, %v7736_v7, %v7741_v25  ;;  %v2145_v62 = vsel %vm216_vm1, %v7741_v25, %v7736_v7 }
 0x341   :  { %2377 = vmatpush.bf16.msra.mxu2 %v9872_v57  ;;  %2396 = vmatpush.bf16.msra.mxu3 %v9874_v30  ;;  %v14133_v57 = vld [vmem:[#allocation91_spill] sm:$0xff]  ;;  %v2150_v63 = vsel %vm8626_vm2, %v2145_v62, 0.0  ;;  %v2151_v3 = vsel %vm8632_vm3, %v2141_v54, 0.0  ;;  %v10133_v62 = vld [vmem:[%s13604_s3] sm:$0xff] }
 0x342   :  { %1979 = vmatpush.bf16.msra.mxu0 %v9514_v50  ;;  %1998 = vmatpush.bf16.msra.mxu1 %v9516_v52  ;;  %v1345_v30 = vmax.f32 %v14133_v57, 0.0  ;;  %v7735_v57 = vunpack.i.l.bf16 %v7734_v51 }
 0x344   :  { %v2199_v46 = vpack.c.bf16 %v1346_v47, %v1345_v30  ;;  %v2154_v47 = vsel %vm8626_vm2, %v2147_v10, 0.0  ;;  %v2140_v26 = vsel %vm216_vm1, %v7735_v57, %v7740_v61 }
 0x345   :  { %2448 = vmatpush.bf16.msrb.mxu2 %v9887_v60  ;;  %2467 = vmatpush.bf16.msrb.mxu3 %v9893_v0  ;;  %v2149_v4 = vsel %vm8632_vm3, %v2140_v26, 0.0  ;;  %v14146_v26 = vld [vmem:[#allocation96_spill] sm:$0xff] }
 0x346   :  { %2050 = vmatpush.bf16.msrb.mxu0 %v9996_v19  ;;  %2069 = vmatpush.bf16.msrb.mxu1 %v10001_v21  ;;  %v2250_v59 = vunpack.c.l.b16 %v2199_v46  ;;  %v2251_v29 = vunpack.c.h.b16 %v2199_v46  ;;  %v2144_v46 = vsel %vm216_vm1, %v7740_v61, %v7735_v57  ;;  %v14143_v61 = vld [vmem:[#allocation102_spill] sm:$0xff]  ;;  %v14144_v57 = vld [vmem:[#allocation103_spill] sm:$0xff]  ;;  %v1350_v54 = vmax.f32 %v14146_v26, 0.0 }
 0x347   :  { %7084 = vmatmul.msk.bf16.gmra.mxu0 %vm428_vm0, %v9922_v5  ;;  %7086 = vmatmul.msk.bf16.gmra.mxu1 %vm428_vm0, %v9922_v5  ;;  %v1353_v7 = vmax.f32 %v14143_v61, 0.0 }
 0x348   :  { %v10051_v37 = vpack.c.b16 %v2250_v59, %v2248_v55  ;;  %v2191_v59 = vpack.c.bf16 %v2155_v36, %v2154_v47  ;;  %v14139_v55 = vld [vmem:[#allocation87_spill] sm:$0xff]  ;;  %v1354_v47 = vmax.f32 %v14144_v57, 0.0 }
 0x349   :  { %2449 = vmatpush.bf16.msrb.mxu2 %v9905_v42  ;;  %2468 = vmatpush.bf16.msrb.mxu3 %v9907_v6 }
 0x34a   :  { %2051 = vmatpush.bf16.msrb.mxu0 %v10011_v35  ;;  %2070 = vmatpush.bf16.msrb.mxu1 %v10014_v11 }
 0x34c   :  { %7111 = vmatmul.msk.bf16.vlgmr.msra.gmra.mxu2 %vm428_vm0, %v9595_v17  ;;  %7113 = vmatmul.msk.bf16.vlgmr.msra.gmra.mxu3 %vm428_vm0, %v9595_v17 }
 0x34d   :  { %2450 = vmatpush.bf16.msrb.mxu2 %v9500_v38  ;;  %2469 = vmatpush.bf16.msrb.mxu3 %v9502_v14 }
 0x34e   :  { %2052 = vmatpush.bf16.msrb.mxu0 %v9705_v53  ;;  %2071 = vmatpush.bf16.msrb.mxu1 %v9707_v34 }
 0x351   :  { %2451 = vmatpush.bf16.msrb.mxu2 %v9514_v50  ;;  %2470 = vmatpush.bf16.msrb.mxu3 %v9516_v52 }
 0x352   :  { %2053 = vmatpush.bf16.msrb.mxu0 %v9692_v15  ;;  %2072 = vmatpush.bf16.msrb.mxu1 %v9694_v16 }
 0x355   :  { %2452 = vmatpush.bf16.msrb.mxu2 %v14127_v22  ;;  %2471 = vmatpush.bf16.msrb.mxu3 %v14128_v44  ;;  %v14138_v22 = vld [vmem:[#allocation84_spill] sm:$0xff]  ;;  %v2247_v44 = vunpack.c.h.b16 %v2197_v23 }
 0x356   :  { %2054 = vmatpush.bf16.msrb.mxu0 %v9887_v60  ;;  %2073 = vmatpush.bf16.msrb.mxu1 %v9893_v0  ;;  %v2244_v45 = vunpack.c.l.b16 %v14138_v22  ;;  %v2245_v39 = vunpack.c.h.b16 %v14138_v22  ;;  %v2189_v22 = vpack.c.bf16 %v2151_v3, %v2150_v63 }
 0x357   :  { %7091 = vmatmul.msk.bf16.vlgmr.msra.gmra.mxu0 %vm428_vm0, %v9879_v9  ;;  %7093 = vmatmul.msk.bf16.vlgmr.msra.gmra.mxu1 %vm428_vm0, %v9879_v9 }
 0x358   :  { %v10072_v30 = vpack.c.b16 %v2246_v32, %v2244_v45  ;;  %v10074_v2 = vpack.c.b16 %v2247_v44, %v2245_v39  ;;  %v2211_v32 = vunpack.c.h.b16 %v2191_v59  ;;  %v14141_v44 = vld [vmem:[#allocation82_spill] sm:$0xff]  ;;  %v14142_v39 = vld [vmem:[#allocation83_spill] sm:$0xff]  ;;  %v2206_v10 = vunpack.c.l.b16 %v2189_v22 }
 0x359   :  { %2453 = vmatpush.bf16.msrb.mxu2 %v14131_v18  ;;  %2472 = vmatpush.bf16.msrb.mxu3 %v14132_v1  ;;  %v10061_v18 = vpack.c.b16 %v2251_v29, %v2249_v56  ;;  %v2142_v1 = vsel %vm216_vm1, %v7725_v41, %v7730_v48  ;;  %v2148_v29 = vsel %vm8626_vm2, %v2144_v46, 0.0  ;;  %v14140_v41 = vld [vmem:[#allocation88_spill] sm:$0xff]  ;;  %v2210_v56 = vunpack.c.l.b16 %v2191_v59  ;;  %v14147_v59 = vld [vmem:[#allocation101_spill] sm:$0xff] }
 0x35a   :  { %2055 = vmatpush.bf16.msrb.mxu0 %v9905_v42  ;;  %2074 = vmatpush.bf16.msrb.mxu1 %v9907_v6  ;;  %v2153_v43 = vsel %vm8632_vm3, %v2142_v1, 0.0  ;;  %v2188_v27 = vpack.c.bf16 %v2149_v4, %v2148_v29  ;;  %v2207_v25 = vunpack.c.h.b16 %v2189_v22  ;;  %v2263_v46 = vpack.c.bf16 %v1354_v47, %v1353_v7 }
 0x35b   :  { %v2190_v23 = vpack.c.bf16 %v2153_v43, %v2152_v13  ;;  %v2273_v29 = vunpack.c.h.b16 %v14147_v59 }
 0x35c   :  { %7112 = vmatmul.msk.bf16.gmra.mxu2 %vm428_vm0, %v9750_v8  ;;  %7114 = vmatmul.msk.bf16.gmra.mxu3 %vm428_vm0, %v9750_v8  ;;  %v2204_v24 = vunpack.c.l.b16 %v2188_v27  ;;  %v2205_v28 = vunpack.c.h.b16 %v2188_v27 }
 0x35d   :  { %2524 = vmatpush.bf16.msra.mxu2 %v9705_v53  ;;  %2543 = vmatpush.bf16.msra.mxu3 %v9707_v34  ;;  %v2208_v48 = vunpack.c.l.b16 %v2190_v23  ;;  %v2209_v45 = vunpack.c.h.b16 %v2190_v23  ;;  %v2275_v23 = vunpack.c.h.b16 %v2263_v46 }
 0x35e   :  { %2334 = vmatpush.bf16.msra.mxu0 %v10051_v37  ;;  %2353 = vmatpush.bf16.msra.mxu1 %v10061_v18  ;;  %v2212_v36 = vpack.c.b16 %v2206_v10, %v2204_v24  ;;  %v2213_v13 = vpack.c.b16 %v2207_v25, %v2205_v28  ;;  %v14150_v10 = vld [vmem:[#allocation105_spill] sm:$0xff]  ;;  %v7749_v28 = vpop.permute.xlu2 %7748 }
 0x35f   :  { %v2214_v51 = vpack.c.b16 %v2210_v56, %v2208_v48  ;;  %v2215_v1 = vpack.c.b16 %v2211_v32, %v2209_v45  ;;  %v7744_v32 = vpop.permute.xlu1 %7743 }
 0x360   :  { %v7746_v25 = vunpack.i.h.bf16 %v7744_v32  ;;  %v7745_v61 = vunpack.i.l.bf16 %v7744_v32 }
 0x361   :  { %2525 = vmatpush.bf16.msra.mxu2 %v9692_v15  ;;  %2544 = vmatpush.bf16.msra.mxu3 %v9694_v16 }
 0x362   :  { %2335 = vmatpush.bf16.msra.mxu0 %v10072_v30  ;;  %2354 = vmatpush.bf16.msra.mxu1 %v10074_v2 }
 0x365   :  { %2526 = vmatpush.bf16.msra.mxu2 %v9887_v60  ;;  %2545 = vmatpush.bf16.msra.mxu3 %v9893_v0 }
 0x366   :  { %2336 = vmatpush.bf16.msra.mxu0 %v14139_v55  ;;  %2355 = vmatpush.bf16.msra.mxu1 %v14140_v41 }
 0x367   :  { %7092 = vmatmul.msk.bf16.gmra.mxu0 %vm428_vm0, %v9922_v5  ;;  %7094 = vmatmul.msk.bf16.gmra.mxu1 %vm428_vm0, %v9922_v5 }
 0x369   :  { %2527 = vmatpush.bf16.msra.mxu2 %v9905_v42  ;;  %2546 = vmatpush.bf16.msra.mxu3 %v9907_v6 }
 0x36a   :  { %2337 = vmatpush.bf16.msra.mxu0 %v14141_v44  ;;  %2356 = vmatpush.bf16.msra.mxu1 %v14142_v39 }
 0x36c   :  { %7119 = vmatmul.msk.bf16.vlgmr.msrb.gmra.mxu2 %vm428_vm0, %v9595_v17  ;;  %7121 = vmatmul.msk.bf16.vlgmr.msrb.gmra.mxu3 %vm428_vm0, %v10133_v62  ;;  %v2272_v17 = vunpack.c.l.b16 %v14147_v59 }
 0x36d   :  { %2528 = vmatpush.bf16.msra.mxu2 %v9500_v38  ;;  %2547 = vmatpush.bf16.msra.mxu3 %v9502_v14  ;;  %v14145_v38 = vld [vmem:[#allocation95_spill] sm:$0xff]  ;;  %v1867_v14 = vpop.f32.mrf.mxu2 }
 0x36e   :  { %2338 = vmatpush.bf16.msra.mxu0 %v2214_v51  ;;  %2357 = vmatpush.bf16.msra.mxu1 %v2215_v1  ;;  %v1349_v43 = vmax.f32 %v14145_v38, 0.0  ;;  %v14149_v51 = vld [vmem:[#allocation104_spill] sm:$0xff]  ;;  %v7754_v38 = vpop.permute.xlu0 %7753 }
 0x371   :  { %2529 = vmatpush.bf16.msra.mxu2 %v9514_v50  ;;  %2548 = vmatpush.bf16.msra.mxu3 %v9516_v52  ;;  %v2261_v50 = vpack.c.bf16 %v1350_v54, %v1349_v43  ;;  %v2274_v52 = vunpack.c.l.b16 %v2263_v46  ;;  %v7759_v43 = vpop.permute.xlu1 %7758 }
 0x372   :  { %2339 = vmatpush.bf16.msra.mxu0 %v2212_v36  ;;  %2358 = vmatpush.bf16.msra.mxu1 %v2213_v13  ;;  %v7751_v36 = vunpack.i.h.bf16 %v7749_v28  ;;  %v7750_v13 = vunpack.i.l.bf16 %v7749_v28  ;;  %v7760_v59 = vunpack.i.l.bf16 %v7759_v43 }
 0x373   :  { %v2270_v4 = vunpack.c.l.b16 %v2261_v50  ;;  %v10143_v63 = vpack.c.b16 %v2274_v52, %v2272_v17  ;;  %v2271_v3 = vunpack.c.h.b16 %v2261_v50  ;;  %v7756_v50 = vunpack.i.h.bf16 %v7754_v38 }
 0x374   :  { %v2175_v26 = vsel %vm253_vm4, %v7746_v25, %v7751_v36  ;;  %v2179_v54 = vsel %vm253_vm4, %v7751_v36, %v7746_v25  ;;  %v2174_v46 = vsel %vm253_vm4, %v7745_v61, %v7750_v13  ;;  %v7755_v52 = vunpack.i.l.bf16 %v7754_v38 }
 0x375   :  { %2600 = vmatpush.bf16.msrb.mxu2 %v9996_v19  ;;  %2619 = vmatpush.bf16.msrb.mxu3 %v10001_v21  ;;  %v10147_v19 = vpack.c.b16 %v2275_v23, %v2273_v29  ;;  %v14148_v21 = vld [vmem:[#allocation94_spill] sm:$0xff]  ;;  %v7761_v23 = vunpack.i.h.bf16 %v7759_v43  ;;  %v2186_v29 = vsel %vm8708_vm5, %v2175_v26, 0.0 }
 0x376   :  { %v2268_v48 = vunpack.c.l.b16 %v14148_v21  ;;  %v2269_v56 = vunpack.c.h.b16 %v14148_v21 }
 0x377   :  { %7099 = vmatmul.msk.bf16.vlgmr.msrb.gmra.mxu0 %vm428_vm0, %v9879_v9  ;;  %7101 = vmatmul.msk.bf16.vlgmr.msrb.gmra.mxu1 %vm428_vm0, %v9879_v9 }
 0x378   :  { %2410 = vmatpush.bf16.msrb.mxu0 %v10143_v63  ;;  %2429 = vmatpush.bf16.msrb.mxu1 %v10147_v19  ;;  %v10159_v27 = vpack.c.b16 %v2270_v4, %v2268_v48  ;;  %v10161_v22 = vpack.c.b16 %v2271_v3, %v2269_v56  ;;  %v2187_v4 = vsel %vm8714_vm6, %v2179_v54, 0.0  ;;  %v2184_v3 = vsel %vm8708_vm5, %v2174_v46, 0.0 }
 0x379   :  { %2601 = vmatpush.bf16.msrb.mxu2 %v10011_v35  ;;  %2620 = vmatpush.bf16.msrb.mxu3 %v10014_v11  ;;  %v10154_v35 = vpop.f32.mrf.mxu2  ;;  %v1886_v11 = vpop.f32.mrf.mxu3  ;;  %v2176_v56 = vsel %vm253_vm4, %v7760_v59, %v7755_v52 }
 0x37a   :  { %v2181_v36 = vsel %vm8714_vm6, %v2176_v56, 0.0 }
 0x37c   :  { %2411 = vmatpush.bf16.msrb.mxu0 %v10159_v27  ;;  %2430 = vmatpush.bf16.msrb.mxu1 %v10161_v22 }
 0x37d   :  { %2602 = vmatpush.bf16.msrb.mxu2 %v9705_v53  ;;  %2621 = vmatpush.bf16.msrb.mxu3 %v9707_v34 }
 0x37e   :  { %7120 = vmatmul.msk.bf16.gmra.mxu2 %vm428_vm0, %v9750_v8  ;;  %7122 = vmatmul.msk.bf16.gmra.mxu3 %vm428_vm0, %v9750_v8 }
 0x380   :  { %2412 = vmatpush.bf16.msrb.mxu0 %v10051_v37  ;;  %2431 = vmatpush.bf16.msrb.mxu1 %v10061_v18 }
 0x381   :  { %2603 = vmatpush.bf16.msrb.mxu2 %v9692_v15  ;;  %2622 = vmatpush.bf16.msrb.mxu3 %v9694_v16  ;;  %v10173_v53 = vpop.f32.mrf.mxu2  ;;  %v10175_v34 = vpop.f32.mrf.mxu3 }
 0x384   :  { %2413 = vmatpush.bf16.msrb.mxu0 %v10072_v30  ;;  %2432 = vmatpush.bf16.msrb.mxu1 %v10074_v2 }
 0x385   :  { %2604 = vmatpush.bf16.msrb.mxu2 %v9887_v60  ;;  %2623 = vmatpush.bf16.msrb.mxu3 %v9893_v0 }
 0x387   :  { %7100 = vmatmul.msk.bf16.gmra.mxu0 %vm428_vm0, %v9922_v5  ;;  %7102 = vmatmul.msk.bf16.gmra.mxu1 %vm428_vm0, %v9922_v5 }
 0x388   :  { %2414 = vmatpush.bf16.msrb.mxu0 %v14139_v55  ;;  %2433 = vmatpush.bf16.msrb.mxu1 %v14140_v41 }
 0x389   :  { %2605 = vmatpush.bf16.msrb.mxu2 %v9905_v42  ;;  %2624 = vmatpush.bf16.msrb.mxu3 %v9907_v6  ;;  %v10188_v15 = vpop.f32.mrf.mxu3  ;;  %v10191_v16 = vpop.f32.mrf.mxu2 }
 0x38c   :  { %2415 = vmatpush.bf16.msrb.mxu0 %v14141_v44  ;;  %2434 = vmatpush.bf16.msrb.mxu1 %v14142_v39 }
 0x38e   :  { %7127 = vmatmul.msk.bf16.vlgmr.msra.gmra.mxu2 %vm428_vm0, %v10133_v62  ;;  %7129 = vmatmul.msk.bf16.vlgmr.msra.gmra.mxu3 %vm428_vm0, %v10133_v62 }
 0x391   :  { %v10199_v60 = vpop.f32.mrf.mxu3  ;;  %v10205_v41 = vpop.f32.mrf.mxu2 }
 0x392   :  { %v1813_v0 = vpop.f32.mrf.mxu0  ;;  %v1832_v42 = vpop.f32.mrf.mxu1 }
 0x393   :  { %v10201_v6 = vadd.f32 %v1867_v14, %v1813_v0  ;;  %v10203_v55 = vadd.f32 %v1886_v11, %v1832_v42  ;;  %v2178_v14 = vsel %vm253_vm4, %v7750_v13, %v7745_v61  ;;  %v2172_v11 = vsel %vm253_vm4, %v7755_v52, %v7760_v59 }
 0x394   :  { %v2185_v21 = vsel %vm8714_vm6, %v2178_v14, 0.0  ;;  %v2311_v42 = vpack.c.bf16 %v2187_v4, %v2186_v29 }
 0x395   :  { %v2310_v32 = vpack.c.bf16 %v2185_v21, %v2184_v3 }
 0x396   :  { %v2322_v38 = vunpack.c.l.b16 %v2311_v42  ;;  %v2323_v46 = vunpack.c.h.b16 %v2311_v42 }
 0x397   :  { %7107 = vmatmul.msk.bf16.vlgmr.msra.gmra.mxu0 %vm428_vm0, %v9879_v9  ;;  %7109 = vmatmul.msk.bf16.vlgmr.msra.gmra.mxu1 %vm428_vm0, %v9879_v9  ;;  %v2320_v13 = vunpack.c.l.b16 %v2310_v32  ;;  %v2321_v54 = vunpack.c.h.b16 %v2310_v32 }
 0x398   :  { %2486 = vmatpush.bf16.msra.mxu0 %v9685_v40  ;;  %2505 = vmatpush.bf16.msra.mxu1 %v9687_v33 }
 0x399   :  { %v10213_v45 = vpop.f32.mrf.mxu3  ;;  %v10220_v24 = vpop.f32.mrf.mxu2  ;;  %v2326_v52 = vpack.c.b16 %v2322_v38, %v2320_v13  ;;  %v2327_v29 = vpack.c.b16 %v2323_v46, %v2321_v54 }
 0x39a   :  { %v10215_v44 = vpop.f32.mrf.mxu0  ;;  %v10217_v39 = vpop.f32.mrf.mxu1 }
 0x39c   :  { %2487 = vmatpush.bf16.msra.mxu0 %v14149_v51  ;;  %2506 = vmatpush.bf16.msra.mxu1 %v14150_v10 }
 0x39e   :  { %7128 = vmatmul.msk.bf16.gmra.mxu2 %vm428_vm0, %v9750_v8  ;;  %7130 = vmatmul.msk.bf16.gmra.mxu3 %vm428_vm0, %v9750_v8 }
 0x3a0   :  { %2488 = vmatpush.bf16.msra.mxu0 %v10143_v63  ;;  %2507 = vmatpush.bf16.msra.mxu1 %v10147_v19 }
 0x3a1   :  { %v10229_v1 = vpop.f32.mrf.mxu3  ;;  %v10236_v47 = vpop.f32.mrf.mxu2 }
 0x3a4   :  { %v10231_v7 = vpop.f32.mrf.mxu0  ;;  %2489 = vmatpush.bf16.msra.mxu0 %v10159_v27  ;;  %v10234_v57 = vpop.f32.mrf.mxu1  ;;  %2508 = vmatpush.bf16.msra.mxu1 %v10161_v22 }
 0x3a5   :  { %v1892_v46 = vadd.f32 %v10188_v15, %v10234_v57  ;;  %v1889_v57 = vadd.f32 %v10175_v34, %v10217_v39 }
 0x3a7   :  { %7108 = vmatmul.msk.bf16.gmra.mxu0 %vm428_vm0, %v9922_v5  ;;  %7110 = vmatmul.msk.bf16.gmra.mxu1 %vm428_vm0, %v9922_v5 }
 0x3a8   :  { %2490 = vmatpush.bf16.msra.mxu0 %v10051_v37  ;;  %2509 = vmatpush.bf16.msra.mxu1 %v10061_v18  ;;  %v2173_v37 = vsel %vm253_vm4, %v7756_v50, %v7761_v23  ;;  %v2177_v18 = vsel %vm253_vm4, %v7761_v23, %v7756_v50 }
 0x3a9   :  { %v1967_v17 = vpop.f32.mrf.mxu3  ;;  %v10275_v28 = vpop.f32.mrf.mxu2  ;;  %v2182_v25 = vsel %vm8708_vm5, %v2173_v37, 0.0  ;;  %v2183_v61 = vsel %vm8714_vm6, %v2177_v18, 0.0 }
 0x3aa   :  { %v2309_v26 = vpack.c.bf16 %v2183_v61, %v2182_v25 }
 0x3ac   :  { %v10261_v48 = vpop.f32.mrf.mxu0  ;;  %2491 = vmatpush.bf16.msra.mxu0 %v10072_v30  ;;  %v10272_v0 = vpop.f32.mrf.mxu1  ;;  %2510 = vmatpush.bf16.msra.mxu1 %v10074_v2  ;;  %v2180_v30 = vsel %vm8708_vm5, %v2172_v11, 0.0  ;;  %v2318_v59 = vunpack.c.l.b16 %v2309_v26  ;;  %v2319_v3 = vunpack.c.h.b16 %v2309_v26 }
 0x3ad   :  { %v2308_v43 = vpack.c.bf16 %v2181_v36, %v2180_v30  ;;  %v1875_v38 = vadd.f32 %v10191_v16, %v10261_v48  ;;  %v14161_v48 = vld [vmem:[#allocation7_spill] sm:$0xff] }
 0x3ae   :  { %7135 = vmatmul.msk.bf16.vlgmr.msrb.gmra.mxu2 %vm428_vm0, %v10133_v62  ;;  %7137 = vmatmul.msk.bf16.vlgmr.msrb.gmra.mxu3 %vm428_vm0, %v10133_v62 }
 0x3af   :  { %v2316_v23 = vunpack.c.l.b16 %v2308_v43  ;;  %v2317_v4 = vunpack.c.h.b16 %v2308_v43 }
 0x3b1   :  { %v10289_v2 = vpop.f32.mrf.mxu3  ;;  %v10295_v62 = vpop.f32.mrf.mxu2  ;;  %v2324_v37 = vpack.c.b16 %v2318_v59, %v2316_v23  ;;  %v2325_v18 = vpack.c.b16 %v2319_v3, %v2317_v4  ;;  %v14164_v59 = vld [vmem:[#allocation26_spill] sm:$0xff] }
 0x3b4   :  { %v1905_v14 = vpop.f32.mrf.mxu0  ;;  %v1924_v50 = vpop.f32.mrf.mxu1 }
 0x3b7   :  { %7115 = vmatmul.msk.bf16.vlgmr.msrb.gmra.mxu0 %vm428_vm0, %v9879_v9  ;;  %7117 = vmatmul.msk.bf16.vlgmr.msrb.gmra.mxu1 %vm428_vm0, %v9879_v9 }
 0x3b8   :  { %2562 = vmatpush.bf16.msrb.mxu0 %v2326_v52  ;;  %2581 = vmatpush.bf16.msrb.mxu1 %v2327_v29  ;;  %v14163_v52 = vld [vmem:[#allocation32_spill] sm:$0xff] }
 0x3b9   :  { %v10297_v21 = vpop.f32.mrf.mxu3  ;;  %v10304_v42 = vpop.f32.mrf.mxu2  ;;  %v2642_v23 = vadd.f32 %v1875_v38, %v14163_v52  ;;  %v14175_v38 = vld [vmem:[#allocation15_spill] sm:$0xff] }
 0x3bc   :  { %2563 = vmatpush.bf16.msrb.mxu0 %v2324_v37  ;;  %v1907_v11 = vpop.f32.mrf.mxu0  ;;  %2582 = vmatpush.bf16.msrb.mxu1 %v2325_v18  ;;  %v1926_v56 = vpop.f32.mrf.mxu1  ;;  %v14168_v37 = vld [vmem:[#allocation21_spill] sm:$0xff] }
 0x3be   :  { %7136 = vmatmul.msk.bf16.gmra.mxu2 %vm428_vm0, %v9750_v8  ;;  %7138 = vmatmul.msk.bf16.gmra.mxu3 %vm428_vm0, %v9750_v8  ;;  %v1965_v8 = vadd.f32 %v10229_v1, %v1926_v56 }
 0x3c0   :  { %2564 = vmatpush.bf16.msrb.mxu0 %v9685_v40  ;;  %2583 = vmatpush.bf16.msrb.mxu1 %v9687_v33  ;;  %v1946_v40 = vadd.f32 %v10220_v24, %v1907_v11  ;;  %v14153_v24 = vld [vmem:[#allocation3_spill] sm:$0xff]  ;;  %v14170_v11 = vld [vmem:[#allocation12_spill] sm:$0xff] }
 0x3c1   :  { %v10307_v32 = vpop.f32.mrf.mxu3  ;;  %v10319_v33 = vpop.f32.mrf.mxu2  ;;  %v2641_v34 = vadd.f32 %v1892_v46, %v14170_v11 }
 0x3c4   :  { %2565 = vmatpush.bf16.msrb.mxu0 %v14149_v51  ;;  %v1910_v25 = vpop.f32.mrf.mxu0  ;;  %2584 = vmatpush.bf16.msrb.mxu1 %v14150_v10  ;;  %v1929_v61 = vpop.f32.mrf.mxu1  ;;  %v1944_v51 = vadd.f32 %v10205_v41, %v1905_v14  ;;  %v1963_v10 = vadd.f32 %v10213_v45, %v1924_v50  ;;  %v1873_v41 = vadd.f32 %v10173_v53, %v10231_v7  ;;  %v14155_v45 = vld [vmem:[#allocation25_spill] sm:$0xff]  ;;  %v14159_v14 = vld [vmem:[#allocation6_spill] sm:$0xff] }
 0x3c5   :  { %v1949_v30 = vadd.f32 %v10236_v47, %v1910_v25  ;;  %v1968_v36 = vadd.f32 %v1967_v17, %v1929_v61  ;;  %v14151_v17 = vld [vmem:[#allocation2_spill] sm:$0xff]  ;;  %v10339_v43 = vadd.f32 %v1946_v40, %v14155_v45 }
 0x3c6   :  { %v10348_v16 = vadd.f32 %v1944_v51, %v14159_v14  ;;  %v14171_v40 = vld [vmem:[#allocation30_spill] sm:$0xff]  ;;  %v14172_v51 = vld [vmem:[#allocation33_spill] sm:$0xff] }
 0x3c7   :  { %7116 = vmatmul.msk.bf16.gmra.mxu0 %vm428_vm0, %v9922_v5  ;;  %7118 = vmatmul.msk.bf16.gmra.mxu1 %vm428_vm0, %v9922_v5  ;;  %v10327_v13 = vadd.f32 %v1949_v30, %v14151_v17  ;;  %v10330_v1 = vadd.f32 %v1968_v36, %v14153_v24  ;;  %14156 = vst [vmem:[#allocation90_spill] sm:$0xff] %v10339_v43  ;;  %v10388_v17 = vmax.f32 %v2642_v23, 0.0 }
 0x3c8   :  { %2566 = vmatpush.bf16.msrb.mxu0 %v10143_v63  ;;  %2585 = vmatpush.bf16.msrb.mxu1 %v10147_v19  ;;  %v1894_v63 = vadd.f32 %v10199_v60, %v10272_v0  ;;  %v14157_v19 = vld [vmem:[#allocation27_spill] sm:$0xff]  ;;  %14160 = vst [vmem:[#allocation80_spill] sm:$0xff] %v10348_v16  ;;  %v10351_v60 = vadd.f32 %v1963_v10, %v14161_v48  ;;  %v13774_v39 = vmax.f32 %v10348_v16, 0.0  ;;  %v10408_v48 = vmax.f32 %v2641_v34, 0.0 }
 0x3c9   :  { %v10324_v47 = vpop.f32.mrf.mxu3  ;;  %14152 = vst [vmem:[#allocation81_spill] sm:$0xff] %v10327_v13  ;;  %v10342_v26 = vadd.f32 %v1965_v8, %v14157_v19  ;;  %v1870_v0 = vadd.f32 %v10154_v35, %v10215_v44  ;;  %v13761_v50 = vmax.f32 %v10330_v1, 0.0  ;;  %v13768_v35 = vmax.f32 %v10339_v43, 0.0 }
 0x3ca   :  { %14154 = vst [vmem:[#allocation93_spill] sm:$0xff] %v10330_v1  ;;  %v2643_v29 = vadd.f32 %v1894_v63, %v14164_v59  ;;  %v13773_v56 = vmax.f32 %v10351_v60, 0.0  ;;  %v2639_v10 = vadd.f32 %v1889_v57, %v14172_v51  ;;  %v2636_v63 = vadd.f32 %v10201_v6, %v14175_v38 }
 0x3cb   :  { %14158 = vst [vmem:[#allocation79_spill] sm:$0xff] %v10342_v26  ;;  %v13765_v44 = vmax.f32 %v10342_v26, 0.0  ;;  %v2638_v8 = vadd.f32 %v1870_v0, %v14171_v40 }
 0x3cc   :  { %2567 = vmatpush.bf16.msrb.mxu0 %v10159_v27  ;;  %v1912_v54 = vpop.f32.mrf.mxu0  ;;  %14162 = vst [vmem:[#allocation40_spill] sm:$0xff] %v10351_v60  ;;  %2586 = vmatpush.bf16.msrb.mxu1 %v10161_v22  ;;  %v1931_v7 = vpop.f32.mrf.mxu1  ;;  %v13764_v27 = vmax.f32 %v10327_v13, 0.0  ;;  %v14165_v22 = vld [vmem:[#allocation20_spill] sm:$0xff]  ;;  %v10390_v24 = vmax.f32 %v2643_v29, 0.0  ;;  %v2845_v6 = vpack.c.bf16 %v13773_v56, %v13774_v39  ;;  %v10416_v23 = vmax.f32 %v2639_v10, 0.0 }
 0x3cd   :  { %v1951_v53 = vadd.f32 %v10275_v28, %v1912_v54  ;;  %v1970_v15 = vadd.f32 %v10289_v2, %v1931_v7  ;;  %v14167_v28 = vld [vmem:[#allocation16_spill] sm:$0xff]  ;;  %v10373_v2 = vpop.f32.mrf.mxu2  ;;  %14173 = vst [vmem:[#allocation70_spill] sm:$0xff] %v10388_v17  ;;  %v14176_v54 = vld [vmem:[#allocation31_spill] sm:$0xff]  ;;  %v10414_v52 = vmax.f32 %v2638_v8, 0.0 }
 0x3ce   :  { %v2640_v3 = vadd.f32 %v1873_v41, %v14167_v28  ;;  %v2847_v30 = vpack.c.bf16 %v13761_v50, %v13764_v27  ;;  %14174 = vst [vmem:[#allocation77_spill] sm:$0xff] %v10390_v24  ;;  %v2846_v41 = vpack.c.bf16 %v13765_v44, %v13768_v35  ;;  %v2637_v46 = vadd.f32 %v10203_v55, %v14176_v54 }
 0x3cf   :  { %v10365_v4 = vadd.f32 %v1951_v53, %v14165_v22  ;;  %v10371_v18 = vadd.f32 %v1970_v15, %v14168_v37  ;;  %14178 = vst [vmem:[#allocation97_spill] sm:$0xff] %v10408_v48  ;;  %v2844_v55 = vpack.c.bf16 %v10390_v24, %v10388_v17  ;;  %v10430_v37 = vmax.f32 %v2636_v63, 0.0 }
 0x3d0   :  { %v10406_v14 = vmax.f32 %v2640_v3, 0.0  ;;  %v2897_v7 = vunpack.c.l.b16 %v2847_v30  ;;  %v2898_v0 = vunpack.c.h.b16 %v2847_v30  ;;  %14179 = vst [vmem:[#allocation98_spill] sm:$0xff] %v10414_v52  ;;  %v2895_v59 = vunpack.c.l.b16 %v2846_v41 }
 0x3d1   :  { %14166 = vst [vmem:[#allocation65_spill] sm:$0xff] %v10365_v4  ;;  %v13760_v25 = vmax.f32 %v10365_v4, 0.0  ;;  %v10379_v61 = vpop.f32.mrf.mxu3  ;;  %v13759_v36 = vmax.f32 %v10371_v18, 0.0  ;;  %v2896_v29 = vunpack.c.h.b16 %v2846_v41  ;;  %v10434_v34 = vmax.f32 %v2637_v46, 0.0 }
 0x3d2   :  { %14169 = vst [vmem:[#allocation64_spill] sm:$0xff] %v10371_v18  ;;  %v2843_v30 = vpack.c.bf16 %v10408_v48, %v10406_v14  ;;  %v2893_v40 = vunpack.c.l.b16 %v2845_v6  ;;  %v2894_v8 = vunpack.c.h.b16 %v2845_v6  ;;  %v2879_v63 = vunpack.c.l.b16 %v2844_v55 }
 0x3d3   :  { %v2848_v45 = vpack.c.bf16 %v13759_v36, %v13760_v25  ;;  %14177 = vst [vmem:[#allocation78_spill] sm:$0xff] %v10406_v14  ;;  %v2880_v41 = vunpack.c.h.b16 %v2844_v55  ;;  %v2841_v54 = vpack.c.bf16 %v10434_v34, %v10430_v37 }
 0x3d4   :  { %v10402_v19 = vpop.f32.mrf.mxu0  ;;  %v2000_v53 = vpop.f32.mrf.mxu1  ;;  %14180 = vst [vmem:[#allocation38_spill] sm:$0xff] %v10416_v23  ;;  %v10442_v51 = vpack.c.b16 %v2895_v59, %v2893_v40  ;;  %v10444_v10 = vpack.c.b16 %v2896_v29, %v2894_v8  ;;  %v2877_v46 = vunpack.c.l.b16 %v2843_v30  ;;  %v2878_v6 = vunpack.c.h.b16 %v2843_v30 }
 0x3d5   :  { %v2899_v15 = vunpack.c.l.b16 %v2848_v45  ;;  %v2900_v57 = vunpack.c.h.b16 %v2848_v45  ;;  %v10428_v3 = vpop.f32.mrf.mxu2  ;;  %14183 = vst [vmem:[#allocation100_spill] sm:$0xff] %v10430_v37  ;;  %v2873_v55 = vunpack.c.l.b16 %v2841_v54  ;;  %v2874_v40 = vunpack.c.h.b16 %v2841_v54 }
 0x3d6   :  { %14184 = vst [vmem:[#allocation91_spill] sm:$0xff] %v10434_v34 }
 0x3d7   :  { %7123 = vmatmul.msk.bf16.vlgmr.msra.gmra.mxu0 %vm428_vm0, %v9879_v9  ;;  %v10422_v22 = vpack.c.b16 %v2899_v15, %v2897_v7  ;;  %v10424_v28 = vpack.c.b16 %v2900_v57, %v2898_v0  ;;  %7125 = vmatmul.msk.bf16.vlgmr.msra.gmra.mxu1 %vm428_vm0, %v9879_v9  ;;  %v2842_v9 = vpack.c.bf16 %v10416_v23, %v10414_v52 }
 0x3d8   :  { %14185 = vst [vmem:[#allocation92_spill] sm:$0xff] %v10442_v51  ;;  %v10450_v7 = vpack.c.b16 %v2879_v63, %v2877_v46  ;;  %v10452_v0 = vpack.c.b16 %v2880_v41, %v2878_v6 }
 0x3d9   :  { %14181 = vst [vmem:[#allocation39_spill] sm:$0xff] %v10422_v22  ;;  %v10432_v11 = vpop.f32.mrf.mxu3  ;;  %2999 = vmatpush.bf16.msra.mxu0 %v10422_v22  ;;  %3018 = vmatpush.bf16.msra.mxu1 %v10424_v28  ;;  %v2875_v15 = vunpack.c.l.b16 %v2842_v9  ;;  %v2876_v57 = vunpack.c.h.b16 %v2842_v9 }
 0x3da   :  { %14182 = vst [vmem:[#allocation99_spill] sm:$0xff] %v10424_v28 }
 0x3db   :  { %14186 = vst [vmem:[#allocation85_spill] sm:$0xff] %v10444_v10  ;;  %v10460_v36 = vpack.c.b16 %v2875_v15, %v2873_v55  ;;  %v10462_v30 = vpack.c.b16 %v2876_v57, %v2874_v40  ;;  %v14191_v57 = vld [vmem:[#allocation4_spill] sm:$0xff]  ;;  %v14193_v40 = vld [vmem:[#allocation5_spill] sm:$0xff] }
 0x3dc   :  { %v1983_v38 = vpop.f32.mrf.mxu0  ;;  %v2002_v45 = vpop.f32.mrf.mxu1  ;;  %14187 = vst [vmem:[#allocation86_spill] sm:$0xff] %v10450_v7 }
 0x3dd   :  { %3000 = vmatpush.bf16.msra.mxu0 %v10442_v51  ;;  %3019 = vmatpush.bf16.msra.mxu1 %v10444_v10  ;;  %14188 = vst [vmem:[#allocation89_spill] sm:$0xff] %v10452_v0  ;;  %v10454_v59 = vpop.f32.mrf.mxu2  ;;  %v2022_v46 = vadd.f32 %v10304_v42, %v1983_v38  ;;  %v2041_v54 = vadd.f32 %v10307_v32, %v2002_v45  ;;  %v14195_v42 = vld [vmem:[#allocation28_spill] sm:$0xff]  ;;  %v14197_v38 = vld [vmem:[#allocation29_spill] sm:$0xff] }
 0x3de   :  { %14189 = vst [vmem:[#allocation84_spill] sm:$0xff] %v10460_v36 }
 0x3df   :  { %14190 = vst [vmem:[#allocation87_spill] sm:$0xff] %v10462_v30  ;;  %v10488_v32 = vadd.f32 %v2022_v46, %v14195_v42  ;;  %v14205_v42 = vld [vmem:[#allocation23_spill] sm:$0xff] }
 0x3e1   :  { %v10456_v29 = vpop.f32.mrf.mxu3  ;;  %3001 = vmatpush.bf16.msra.mxu0 %v10450_v7  ;;  %3020 = vmatpush.bf16.msra.mxu1 %v10452_v0  ;;  %14196 = vst [vmem:[#allocation83_spill] sm:$0xff] %v10488_v32 }
 0x3e4   :  { %v1986_v8 = vpop.f32.mrf.mxu0  ;;  %v2005_v63 = vpop.f32.mrf.mxu1 }
 0x3e5   :  { %v2025_v41 = vadd.f32 %v10319_v33, %v1986_v8  ;;  %v2044_v9 = vadd.f32 %v10324_v47, %v2005_v63  ;;  %3002 = vmatpush.bf16.msra.mxu0 %v10460_v36  ;;  %3021 = vmatpush.bf16.msra.mxu1 %v10462_v30  ;;  %v10474_v6 = vpop.f32.mrf.mxu2  ;;  %v2020_v33 = vadd.f32 %v10295_v62, %v10402_v19  ;;  %v14199_v63 = vld [vmem:[#allocation13_spill] sm:$0xff]  ;;  %v14201_v62 = vld [vmem:[#allocation14_spill] sm:$0xff] }
 0x3e6   :  { %v2039_v47 = vadd.f32 %v10297_v21, %v2000_v53 }
 0x3e7   :  { %7124 = vmatmul.msk.bf16.gmra.mxu0 %vm428_vm0, %v9922_v5  ;;  %7126 = vmatmul.msk.bf16.gmra.mxu1 %vm428_vm0, %v9922_v5  ;;  %v10482_v55 = vadd.f32 %v2025_v41, %v14191_v57  ;;  %v10485_v8 = vadd.f32 %v2044_v9, %v14193_v40  ;;  %v10491_v5 = vadd.f32 %v2041_v54, %v14197_v38  ;;  %v14203_v57 = vld [vmem:[#allocation22_spill] sm:$0xff]  ;;  %v13767_v54 = vmax.f32 %v10488_v32, 0.0  ;;  %v14216_v32 = vld [vmem:[#allocation24_spill] sm:$0xff] }
 0x3e8   :  { %v10494_v25 = vadd.f32 %v2020_v33, %v14199_v63  ;;  %v10497_v21 = vadd.f32 %v2039_v47, %v14201_v62 }
 0x3e9   :  { %v10479_v15 = vpop.f32.mrf.mxu3  ;;  %14192 = vst [vmem:[#allocation88_spill] sm:$0xff] %v10482_v55  ;;  %v13763_v41 = vmax.f32 %v10482_v55, 0.0  ;;  %v13762_v9 = vmax.f32 %v10485_v8, 0.0  ;;  %v13766_v33 = vmax.f32 %v10491_v5, 0.0 }
 0x3ea   :  { %14194 = vst [vmem:[#allocation82_spill] sm:$0xff] %v10485_v8 }
 0x3eb   :  { %14198 = vst [vmem:[#allocation102_spill] sm:$0xff] %v10491_v5 }
 0x3ec   :  { %v1988_v45 = vpop.f32.mrf.mxu0  ;;  %14200 = vst [vmem:[#allocation103_spill] sm:$0xff] %v10494_v25  ;;  %v2007_v53 = vpop.f32.mrf.mxu1 }
 0x3ed   :  { %14202 = vst [vmem:[#allocation95_spill] sm:$0xff] %v10497_v21  ;;  %v2027_v19 = vadd.f32 %v10373_v2, %v1988_v45  ;;  %v2046_v46 = vadd.f32 %v10379_v61, %v2007_v53  ;;  %v10511_v47 = vpop.f32.mrf.mxu2  ;;  %v13772_v2 = vmax.f32 %v10494_v25, 0.0  ;;  %v13771_v45 = vmax.f32 %v10497_v21, 0.0 }
 0x3ee   :  { %v2911_v61 = vpack.c.bf16 %v13762_v9, %v13763_v41  ;;  %v2910_v53 = vpack.c.bf16 %v13766_v33, %v13767_v54  ;;  %v8137_v33 = vld [vmem:[%s13604_s3 + $0x10] sm:$0xff] }
 0x3ef   :  { %v10504_v40 = vadd.f32 %v2027_v19, %v14203_v57  ;;  %v10509_v38 = vadd.f32 %v2046_v46, %v14205_v42  ;;  %v2909_v42 = vpack.c.bf16 %v13771_v45, %v13772_v2 }
 0x3f0   :  { %v2921_v9 = vunpack.c.l.b16 %v2911_v61  ;;  %v2922_v41 = vunpack.c.h.b16 %v2911_v61  ;;  %v2919_v54 = vunpack.c.l.b16 %v2910_v53  ;;  %v2920_v35 = vunpack.c.h.b16 %v2910_v53 }
 0x3f1   :  { %14204 = vst [vmem:[#allocation96_spill] sm:$0xff] %v10504_v40  ;;  %v13770_v63 = vmax.f32 %v10504_v40, 0.0  ;;  %v10516_v62 = vpop.f32.mrf.mxu3  ;;  %v13769_v19 = vmax.f32 %v10509_v38, 0.0  ;;  %v2918_v56 = vunpack.c.h.b16 %v2909_v42 }
 0x3f2   :  { %14206 = vst [vmem:[#allocation101_spill] sm:$0xff] %v10509_v38 }
 0x3f3   :  { %v2912_v46 = vpack.c.bf16 %v13769_v19, %v13770_v63  ;;  %v10551_v53 = vpack.c.b16 %v2920_v35, %v2918_v56 }
 0x3f4   :  { %v2057_v57 = vpop.f32.mrf.mxu0  ;;  %v2076_v50 = vpop.f32.mrf.mxu1 }
 0x3f5   :  { %v2923_v27 = vunpack.c.l.b16 %v2912_v46  ;;  %v2924_v44 = vunpack.c.h.b16 %v2912_v46  ;;  %v2379_v45 = vpop.f32.mrf.mxu2  ;;  %v2096_v2 = vadd.f32 %v10428_v3, %v2057_v57  ;;  %v2917_v46 = vunpack.c.l.b16 %v2909_v42  ;;  %14208 = vst [vmem:[#allocation104_spill] sm:$0xff] %v10551_v53  ;;  %v14210_v3 = vld [vmem:[#allocation19_spill] sm:$0xff] }
 0x3f7   :  { %7131 = vmatmul.msk.bf16.vlgmr.msrb.gmra.mxu0 %vm428_vm0, %v8137_v33  ;;  %v10539_v19 = vpack.c.b16 %v2923_v27, %v2921_v9  ;;  %v10541_v63 = vpack.c.b16 %v2924_v44, %v2922_v41  ;;  %7133 = vmatmul.msk.bf16.vlgmr.msrb.gmra.mxu1 %vm428_vm0, %v8137_v33  ;;  %v10549_v39 = vpack.c.b16 %v2919_v54, %v2917_v46  ;;  %v14209_v44 = vld [vmem:[#allocation10_spill] sm:$0xff]  ;;  %v8138_v46 = vld [vmem:[%s13604_s3 + $0x18] sm:$0xff] }
 0x3f8   :  { %v2684_v41 = vadd.f32 %v2096_v2, %v14209_v44 }
 0x3f9   :  { %v10545_v61 = vpop.f32.mrf.mxu3  ;;  %3037 = vmatpush.bf16.msra.mxu2 %v10539_v19  ;;  %3056 = vmatpush.bf16.msra.mxu3 %v10541_v63  ;;  %14207 = vst [vmem:[#allocation94_spill] sm:$0xff] %v10549_v39 }
 0x3fa   :  { %v10560_v38 = vmax.f32 %v2684_v41, 0.0 }
 0x3fc   :  { %v2059_v27 = vpop.f32.mrf.mxu0  ;;  %v2078_v33 = vpop.f32.mrf.mxu1  ;;  %14211 = vst [vmem:[#allocation105_spill] sm:$0xff] %v10560_v38 }
 0x3fd   :  { %v2098_v9 = vadd.f32 %v10454_v59, %v2059_v27  ;;  %3038 = vmatpush.bf16.msra.mxu2 %v10549_v39  ;;  %3057 = vmatpush.bf16.msra.mxu3 %v10551_v53  ;;  %v10558_v42 = vpop.f32.mrf.mxu2 }
 0x3ff   :  { %v2686_v57 = vadd.f32 %v2098_v9, %v14210_v3  ;;  %v7787_v3 = vpack.i.bf16 %v10390_v24, %v10408_v48 }
 0x401   :  { %v10562_v54 = vmax.f32 %v2686_v57, 0.0  ;;  %v10564_v35 = vpop.f32.mrf.mxu3  ;;  %3039 = vmatpush.bf16.msra.mxu2 %v10422_v22  ;;  %3058 = vmatpush.bf16.msra.mxu3 %v10424_v28 }
 0x403   :  { %14212 = vst [vmem:[#allocation2_spill] sm:$0xff] %v10562_v54  ;;  %v7762_v56 = vpack.i.bf16 %v10562_v54, %v10560_v38 }
 0x404   :  { %v2062_v59 = vpop.f32.mrf.mxu0  ;;  %v2081_v2 = vpop.f32.mrf.mxu1 }
 0x405   :  { %7763 = vrot.lane.b32.xlu1 %v7762_v56, %s8144_s0  ;;  %3040 = vmatpush.bf16.msra.mxu2 %v10442_v51  ;;  %v2101_v27 = vadd.f32 %v10474_v6, %v2062_v59  ;;  %v2120_v41 = vadd.f32 %v10479_v15, %v2081_v2  ;;  %v2384_v9 = vpop.f32.mrf.mxu2  ;;  %v14213_v56 = vld [vmem:[#allocation9_spill] sm:$0xff]  ;;  %v14214_v6 = vld [vmem:[#allocation11_spill] sm:$0xff]  ;;  %v2117_v2 = vadd.f32 %v10456_v29, %v2078_v33 }
 0x406   :  { %3059 = vmatpush.bf16.msra.mxu3 %v10444_v10 }
 0x407   :  { %7132 = vmatmul.msk.bf16.gmra.mxu0 %vm428_vm0, %v8138_v46  ;;  %7134 = vmatmul.msk.bf16.gmra.mxu1 %vm428_vm0, %v8138_v46  ;;  %v2688_v40 = vadd.f32 %v2101_v27, %v14213_v56  ;;  %v2689_v59 = vadd.f32 %v2120_v41, %v14214_v6  ;;  %v14215_v46 = vld [vmem:[#allocation18_spill] sm:$0xff]  ;;  %v2115_v27 = vadd.f32 %v10432_v11, %v2076_v50  ;;  %v14222_v11 = vld [vmem:[#allocation8_spill] sm:$0xff] }
 0x409   :  { %v2403_v44 = vpop.f32.mrf.mxu3  ;;  %3041 = vmatpush.bf16.msra.mxu2 %v10450_v7 }
 0x40a   :  { %3060 = vmatpush.bf16.msra.mxu3 %v10452_v0 }
 0x40c   :  { %v2064_v57 = vpop.f32.mrf.mxu0  ;;  %v2083_v8 = vpop.f32.mrf.mxu1 }
 0x40d   :  { %v2103_v5 = vadd.f32 %v10511_v47, %v2064_v57  ;;  %7788 = vrot.lane.b32.xlu1 %v7787_v3, %s8145_s19  ;;  %v2122_v15 = vadd.f32 %v10516_v62, %v2083_v8  ;;  %3042 = vmatpush.bf16.msra.mxu2 %v10460_v36  ;;  %v10595_v47 = vmax.f32 %v2688_v40, 0.0  ;;  %v10599_v3 = vmax.f32 %v2689_v59, 0.0  ;;  %v14221_v8 = vld [vmem:[#allocation17_spill] sm:$0xff]  ;;  %v10610_v50 = vpop.f32.mrf.mxu2 }
 0x40e   :  { %3061 = vmatpush.bf16.msra.mxu3 %v10462_v30  ;;  %v2687_v62 = vadd.f32 %v2117_v2, %v14221_v8  ;;  %v7792_v8 = vpack.i.bf16 %v10414_v52, %v10430_v37 }
 0x40f   :  { %v2690_v55 = vadd.f32 %v2103_v5, %v14215_v46  ;;  %v2691_v21 = vadd.f32 %v2122_v15, %v14216_v32  ;;  %14217 = vst [vmem:[#allocation3_spill] sm:$0xff] %v10595_v47 }
 0x410   :  { %14219 = vst [vmem:[#allocation27_spill] sm:$0xff] %v10599_v3  ;;  %v10620_v6 = vmax.f32 %v2687_v62, 0.0 }
 0x411   :  { %v10597_v57 = vmax.f32 %v2690_v55, 0.0  ;;  %v10601_v41 = vmax.f32 %v2691_v21, 0.0  ;;  %v10606_v29 = vpop.f32.mrf.mxu3  ;;  %v2685_v55 = vadd.f32 %v2115_v27, %v14222_v11 }
 0x412   :  { %14223 = vst [vmem:[#allocation7_spill] sm:$0xff] %v10620_v6 }
 0x413   :  { %14218 = vst [vmem:[#allocation25_spill] sm:$0xff] %v10597_v57  ;;  %v7767_v56 = vpack.i.bf16 %v10597_v57, %v10595_v47  ;;  %v7777_v32 = vpack.i.bf16 %v10601_v41, %v10599_v3  ;;  %v10622_v59 = vmax.f32 %v2685_v55, 0.0 }
 0x414   :  { %14220 = vst [vmem:[#allocation6_spill] sm:$0xff] %v10601_v41  ;;  %v2341_v5 = vpop.f32.mrf.mxu0  ;;  %v2360_v33 = vpop.f32.mrf.mxu1 }
 0x415   :  { %v10613_v40 = vadd.f32 %v2379_v45, %v2341_v5  ;;  %7768 = vrot.lane.b32.xlu2 %v7767_v56, %s8144_s0  ;;  %v10617_v21 = vadd.f32 %v10545_v61, %v2360_v33  ;;  %7778 = vrot.lane.b32.xlu0 %v7777_v32, %s8144_s0  ;;  %14224 = vst [vmem:[#allocation32_spill] sm:$0xff] %v10622_v59  ;;  %v2455_v27 = vpop.f32.mrf.mxu2 }
 0x416   :  { %v7772_v15 = vpack.i.bf16 %v10620_v6, %v10622_v59  ;;  %v7782_v45 = vpack.i.bf16 %v10388_v17, %v10406_v14  ;;  %v7797_v56 = vpack.i.bf16 %v10416_v23, %v10434_v34 }
 0x419   :  { %v2474_v61 = vpop.f32.mrf.mxu3 }
 0x41c   :  { %v10626_v2 = vpop.f32.mrf.mxu0  ;;  %v10630_v46 = vpop.f32.mrf.mxu1 }
 0x41d   :  { %7773 = vrot.lane.b32.xlu2 %v7772_v15, %s8144_s0  ;;  %7783 = vrot.lane.b32.xlu0 %v7782_v45, %s8145_s19  ;;  %v10646_v33 = vpop.f32.mrf.mxu2 }
 0x421   :  { %v10644_v55 = vpop.f32.mrf.mxu3 }
 0x424   :  { %v2346_v62 = vpop.f32.mrf.mxu0  ;;  %v2365_v32 = vpop.f32.mrf.mxu1 }
 0x425   :  { %v10638_v5 = vadd.f32 %v2384_v9, %v2346_v62  ;;  %7793 = vrot.lane.b32.xlu2 %v7792_v8, %s8145_s19  ;;  %v10641_v11 = vadd.f32 %v2403_v44, %v2365_v32  ;;  %7798 = vrot.lane.b32.xlu0 %v7797_v56, %s8145_s19  ;;  %v2460_v18 = vpop.f32.mrf.mxu2 }
 0x429   :  { %v2479_v25 = vpop.f32.mrf.mxu3 }
 0x42c   :  { %v2348_v15 = vpop.f32.mrf.mxu0  ;;  %v2367_v45 = vpop.f32.mrf.mxu1 }
 0x42d   :  { %v10656_v8 = vpop.f32.mrf.mxu2 }
 0x431   :  { %v10652_v17 = vpop.f32.mrf.mxu3 }
 0x434   :  { %v2417_v24 = vpop.f32.mrf.mxu0  ;;  %v2436_v9 = vpop.f32.mrf.mxu1 }
 0x435   :  { %v10648_v4 = vadd.f32 %v2455_v27, %v2417_v24  ;;  %v10650_v62 = vadd.f32 %v2474_v61, %v2436_v9  ;;  %v2531_v24 = vpop.f32.mrf.mxu2 }
 0x439   :  { %v2550_v13 = vpop.f32.mrf.mxu3 }
 0x43c   :  { %v10654_v44 = vpop.f32.mrf.mxu0  ;;  %v10658_v56 = vpop.f32.mrf.mxu1 }
 0x43d   :  { %v10670_v26 = vpop.f32.mrf.mxu2 }
 0x43e   :  { %14226 = vst [vmem:[#allocation20_spill] sm:$0xff] %v10670_v26 }
 0x441   :  { %v10668_v9 = vpop.f32.mrf.mxu3 }
 0x442   :  { %14225 = vst [vmem:[#allocation26_spill] sm:$0xff] %v10668_v9 }
 0x444   :  { %v2422_v32 = vpop.f32.mrf.mxu0  ;;  %v2441_v48 = vpop.f32.mrf.mxu1 }
 0x445   :  { %v10660_v1 = vadd.f32 %v2460_v18, %v2422_v32  ;;  %v10662_v14 = vadd.f32 %v2479_v25, %v2441_v48  ;;  %v2536_v32 = vpop.f32.mrf.mxu2 }
 0x449   :  { %v2555_v18 = vpop.f32.mrf.mxu3 }
 0x44c   :  { %v10664_v27 = vpop.f32.mrf.mxu0  ;;  %v10666_v61 = vpop.f32.mrf.mxu1 }
 0x44d   :  { %v10682_v37 = vpop.f32.mrf.mxu2 }
 0x44e   :  { %14232 = vst [vmem:[#allocation15_spill] sm:$0xff] %v10682_v37  ;;  %v2935_v37 = vpack.c.bf16 %v10599_v3, %v10595_v47 }
 0x450   :  { %v2945_v22 = vunpack.c.l.b16 %v2935_v37 }
 0x451   :  { %v10680_v48 = vpop.f32.mrf.mxu3 }
 0x452   :  { %14231 = vst [vmem:[#allocation33_spill] sm:$0xff] %v10680_v48 }
 0x454   :  { %v2493_v23 = vpop.f32.mrf.mxu0  ;;  %v2512_v52 = vpop.f32.mrf.mxu1 }
 0x455   :  { %v10672_v43 = vadd.f32 %v2531_v24, %v2493_v23  ;;  %v10674_v60 = vadd.f32 %v2550_v13, %v2512_v52  ;;  %v2607_v24 = vpop.f32.mrf.mxu2 }
 0x457   :  { %14227 = vst [vmem:[#allocation16_spill] sm:$0xff] %v10672_v43 }
 0x458   :  { %14228 = vst [vmem:[#allocation21_spill] sm:$0xff] %v10674_v60 }
 0x459   :  { %v10692_v52 = vpop.f32.mrf.mxu3 }
 0x45c   :  { %v10676_v34 = vpop.f32.mrf.mxu0  ;;  %v10678_v25 = vpop.f32.mrf.mxu1 }
 0x45d   :  { %14229 = vst [vmem:[#allocation12_spill] sm:$0xff] %v10676_v34 }
 0x45e   :  { %14230 = vst [vmem:[#allocation30_spill] sm:$0xff] %v10678_v25  ;;  %v14237_v25 = vld [vmem:[#allocation52_spill] sm:$0xff] }
 0x461   :  { %v10698_v48 = vpop.f32.mrf.mxu3 }
 0x464   :  { %v2498_v16 = vpop.f32.mrf.mxu0  ;;  %v2517_v36 = vpop.f32.mrf.mxu1 }
 0x465   :  { %v10684_v30 = vadd.f32 %v2536_v32, %v2498_v16  ;;  %v10686_v0 = vadd.f32 %v2555_v18, %v2517_v36  ;;  %v10703_v16 = vld [vmem:[%s13605_s4 + $0x10] sm:$0xff]  ;;  %v2609_v36 = vpop.f32.mrf.mxu2  ;;  %v2933_v18 = vpack.c.bf16 %v10622_v59, %v10560_v38  ;;  %v2936_v59 = vpack.c.bf16 %v10601_v41, %v10597_v57  ;;  %v14240_v41 = vld [vmem:[#allocation42_spill] sm:$0xff] }
 0x466   :  { %7155 = vmatmul.msk.bf16.vlgmr.msra.gmra.mxu2 %vm428_vm0, %v10703_v16  ;;  %7157 = vmatmul.msk.bf16.vlgmr.msra.gmra.mxu3 %vm428_vm0, %v10703_v16 }
 0x467   :  { %14233 = vst [vmem:[#allocation31_spill] sm:$0xff] %v10684_v30  ;;  %v2941_v51 = vunpack.c.l.b16 %v2933_v18  ;;  %v2942_v28 = vunpack.c.h.b16 %v2933_v18  ;;  %v2947_v53 = vunpack.c.l.b16 %v2936_v59 }
 0x468   :  { %14234 = vst [vmem:[#allocation4_spill] sm:$0xff] %v10686_v0 }
 0x46c   :  { %v10688_v23 = vpop.f32.mrf.mxu0  ;;  %v10690_v13 = vpop.f32.mrf.mxu1 }
 0x46d   :  { %14235 = vst [vmem:[#allocation5_spill] sm:$0xff] %v10688_v23  ;;  %v2406_v23 = vadd.f32 %v10606_v29, %v2367_v45  ;;  %v14239_v29 = vld [vmem:[#allocation59_spill] sm:$0xff] }
 0x46e   :  { %14236 = vst [vmem:[#allocation28_spill] sm:$0xff] %v10690_v13  ;;  %v2934_v13 = vpack.c.bf16 %v10620_v6, %v10562_v54  ;;  %v14238_v6 = vld [vmem:[#allocation60_spill] sm:$0xff]  ;;  %v2705_v45 = vadd.f32 %v10641_v11, %v14239_v29  ;;  %v2631_v11 = vpop.f32.mrf.mxu3 }
 0x46f   :  { %v10694_v7 = vpop.permute.xlu2 %7768  ;;  %v2707_v54 = vadd.f32 %v2406_v23, %v14238_v6  ;;  %v14242_v6 = vld [vmem:[#allocation41_spill] sm:$0xff] }
 0x470   :  { %v2943_v3 = vunpack.c.l.b16 %v2934_v13  ;;  %v2944_v47 = vunpack.c.h.b16 %v2934_v13  ;;  %v2704_v23 = vadd.f32 %v10638_v5, %v14242_v6 }
 0x474   :  { %v2569_v60 = vpop.f32.mrf.mxu0  ;;  %v10696_v43 = vpop.f32.mrf.mxu1 }
 0x475   :  { %v2608_v32 = vadd.f32 %v2607_v24, %v2569_v60  ;;  %v2387_v60 = vadd.f32 %v10610_v50, %v2348_v15  ;;  %v14241_v50 = vld [vmem:[#allocation49_spill] sm:$0xff]  ;;  %v10799_v6 = vadd.f32 %v10692_v52, %v10696_v43 }
 0x477   :  { %v7764_v0 = vpop.permute.xlu1 %7763  ;;  %v7774_v30 = vpop.permute.xlu2 %7773  ;;  %v2748_v26 = vadd.f32 %v2608_v32, %v14237_v25  ;;  %v2706_v57 = vadd.f32 %v2387_v60, %v14240_v41  ;;  %v2948_v41 = vunpack.c.h.b16 %v2936_v59  ;;  %v10739_v32 = vmax.f32 %v2707_v54, 0.0 }
 0x478   :  { %v7766_v24 = vunpack.i.h.bf16 %v7764_v0  ;;  %v7776_v38 = vunpack.i.h.bf16 %v7774_v30  ;;  %v7765_v39 = vunpack.i.l.bf16 %v7764_v0  ;;  %v2401_v0 = vadd.f32 %v10564_v35, %v10630_v46  ;;  %v2612_v60 = vpop.f32.mrf.mxu2 }
 0x479   :  { %v10731_v13 = vmax.f32 %v2748_v26, 0.0  ;;  %14245 = vst [vmem:[#allocation14_spill] sm:$0xff] %v10739_v32  ;;  %v10755_v35 = vpack.c.b16 %v2943_v3, %v2941_v51  ;;  %v10760_v46 = vpack.c.b16 %v2947_v53, %v2945_v22  ;;  %v10778_v3 = vadd.f32 %v10656_v8, %v10664_v27 }
 0x47a   :  { %v2794_v25 = vsel %vm216_vm1, %v7776_v38, %v7766_v24  ;;  %v7771_v8 = vunpack.i.h.bf16 %v10694_v7  ;;  %v7770_v27 = vunpack.i.l.bf16 %v10694_v7 }
 0x47b   :  { %14243 = vst [vmem:[#allocation29_spill] sm:$0xff] %v10731_v13  ;;  %v2799_v26 = vsel %vm8626_vm2, %v2794_v25, 0.0 }
 0x47c   :  { %v2571_v9 = vpop.f32.mrf.mxu0  ;;  %v2590_v10 = vpop.f32.mrf.mxu1  ;;  %14248 = vst [vmem:[#allocation10_spill] sm:$0xff] %v10755_v35 }
 0x47d   :  { %v2610_v34 = vadd.f32 %v2609_v36, %v2571_v9  ;;  %v2790_v9 = vsel %vm216_vm1, %v7766_v24, %v7776_v38  ;;  %v7775_v36 = vunpack.i.l.bf16 %v7774_v30  ;;  %v2946_v38 = vunpack.c.h.b16 %v2935_v37  ;;  %14250 = vst [vmem:[#allocation9_spill] sm:$0xff] %v10760_v46 }
 0x47e   :  { %v10741_v30 = vmax.f32 %v2706_v57, 0.0  ;;  %v2800_v5 = vsel %vm8632_vm3, %v2790_v9, 0.0  ;;  %v10749_v24 = vmax.f32 %v2705_v45, 0.0  ;;  %v10757_v57 = vmax.f32 %v2704_v23, 0.0  ;;  %v14253_v9 = vld [vmem:[#allocation50_spill] sm:$0xff] }
 0x47f   :  { %v2750_v15 = vadd.f32 %v2610_v34, %v14241_v50  ;;  %v2382_v34 = vadd.f32 %v10558_v42, %v10626_v2  ;;  %v2789_v42 = vsel %vm216_vm1, %v7765_v39, %v7775_v36  ;;  %v2793_v54 = vsel %vm216_vm1, %v7775_v36, %v7765_v39  ;;  %v14252_v50 = vld [vmem:[#allocation51_spill] sm:$0xff] }
 0x480   :  { %14246 = vst [vmem:[#allocation22_spill] sm:$0xff] %v10741_v30  ;;  %v10762_v29 = vpack.c.b16 %v2948_v41, %v2946_v38  ;;  %v10764_v45 = vpack.c.b16 %v2944_v47, %v2942_v28  ;;  %v10770_v25 = vadd.f32 %v2401_v0, %v14253_v9  ;;  %v7827_v39 = vpack.i.bf16 %v10739_v32, %v10749_v24  ;;  %v10789_v47 = vld [vmem:[%s13605_s4 + $0x18] sm:$0xff] }
 0x481   :  { %v10733_v18 = vmax.f32 %v2750_v15, 0.0  ;;  %14247 = vst [vmem:[#allocation23_spill] sm:$0xff] %v10749_v24  ;;  %v10767_v15 = vadd.f32 %v2382_v34, %v14252_v50  ;;  %v10774_v51 = vpack.c.bf16 %v2800_v5, %v2799_v26  ;;  %v2797_v22 = vsel %vm8626_vm2, %v2793_v54, 0.0  ;;  %v7789_v34 = vpop.permute.xlu1 %7788  ;;  %7156 = vmatmul.msk.bf16.gmra.mxu2 %vm428_vm0, %v10789_v47  ;;  %7158 = vmatmul.msk.bf16.gmra.mxu3 %vm428_vm0, %v10789_v47  ;;  %v2633_v5 = vpop.f32.mrf.mxu3  ;;  %v14254_v50 = vld [vmem:[#allocation36_spill] sm:$0xff] }
 0x482   :  { %14249 = vst [vmem:[#allocation19_spill] sm:$0xff] %v10757_v57  ;;  %v2798_v28 = vsel %vm8632_vm3, %v2789_v42, 0.0  ;;  %v10793_v36 = vadd.f32 %v10652_v17, %v10666_v61  ;;  %v2629_v41 = vadd.f32 %v10698_v48, %v2590_v10 }
 0x483   :  { %14244 = vst [vmem:[#allocation13_spill] sm:$0xff] %v10733_v18  ;;  %v7812_v59 = vpack.i.bf16 %v10733_v18, %v10731_v13  ;;  %v2837_v61 = vpack.c.bf16 %v2798_v28, %v2797_v22  ;;  %v2855_v7 = vunpack.c.l.b16 %v10774_v51  ;;  %v2856_v43 = vunpack.c.h.b16 %v10774_v51 }
 0x484   :  { %v2574_v37 = vpop.f32.mrf.mxu0  ;;  %v2593_v2 = vpop.f32.mrf.mxu1  ;;  %14251 = vst [vmem:[#allocation11_spill] sm:$0xff] %v10764_v45 }
 0x485   :  { %7813 = vrot.lane.b32.xlu0 %v7812_v59, %s8144_s0  ;;  %v2613_v0 = vadd.f32 %v2612_v60, %v2574_v37  ;;  %v2632_v17 = vadd.f32 %v2631_v11, %v2593_v2  ;;  %v7791_v59 = vunpack.i.h.bf16 %v7789_v34  ;;  %v2614_v11 = vpop.f32.mrf.mxu2  ;;  %v2853_v18 = vunpack.c.l.b16 %v2837_v61 }
 0x487   :  { %v7779_v23 = vpop.permute.xlu0 %7778  ;;  %v2752_v9 = vadd.f32 %v2613_v0, %v14254_v50 }
 0x488   :  { %v7781_v38 = vunpack.i.h.bf16 %v7779_v23  ;;  %v7780_v26 = vunpack.i.l.bf16 %v7779_v23  ;;  %v14255_v23 = vld [vmem:[#allocation34_spill] sm:$0xff] }
 0x48a   :  { %v2791_v52 = vsel %vm216_vm1, %v7770_v27, %v7780_v26  ;;  %v2792_v10 = vsel %vm216_vm1, %v7771_v8, %v7781_v38  ;;  %v2795_v48 = vsel %vm216_vm1, %v7780_v26, %v7770_v27  ;;  %v2796_v60 = vsel %vm216_vm1, %v7781_v38, %v7771_v8 }
 0x48b   :  { %v2801_v42 = vsel %vm8626_vm2, %v2795_v48, 0.0  ;;  %v2802_v54 = vsel %vm8632_vm3, %v2791_v52, 0.0  ;;  %v2803_v37 = vsel %vm8626_vm2, %v2796_v60, 0.0  ;;  %v2804_v51 = vsel %vm8632_vm3, %v2792_v10, 0.0  ;;  %v14256_v52 = vld [vmem:[#allocation37_spill] sm:$0xff] }
 0x48c   :  { %v2576_v2 = vpop.f32.mrf.mxu0  ;;  %v2595_v28 = vpop.f32.mrf.mxu1  ;;  %v2839_v8 = vpack.c.bf16 %v2802_v54, %v2801_v42  ;;  %v7790_v27 = vunpack.i.l.bf16 %v7789_v34  ;;  %v2753_v38 = vadd.f32 %v2632_v17, %v14255_v23  ;;  %v2840_v48 = vpack.c.bf16 %v2804_v51, %v2803_v37  ;;  %v14262_v51 = vld [vmem:[#allocation43_spill] sm:$0xff] }
 0x48d   :  { %v2615_v22 = vadd.f32 %v2614_v11, %v2576_v2  ;;  %7828 = vrot.lane.b32.xlu0 %v7827_v39, %s8145_s19  ;;  %v2634_v26 = vadd.f32 %v2633_v5, %v2595_v28  ;;  %v2854_v11 = vunpack.c.h.b16 %v2837_v61  ;;  %v10829_v2 = vmax.f32 %v2752_v9, 0.0 }
 0x48e   :  { %v2857_v13 = vunpack.c.l.b16 %v2839_v8  ;;  %v2858_v60 = vunpack.c.h.b16 %v2839_v8  ;;  %v2859_v20 = vunpack.c.l.b16 %v2840_v48  ;;  %v2860_v10 = vunpack.c.h.b16 %v2840_v48 }
 0x48f   :  { %v2754_v53 = vadd.f32 %v2615_v22, %v14256_v52  ;;  %v2755_v0 = vadd.f32 %v2634_v26, %v14257_v49  ;;  %v7784_v50 = vpop.permute.xlu0 %7783  ;;  %14258 = vst [vmem:[#allocation18_spill] sm:$0xff] %v10829_v2  ;;  %v10833_v17 = vmax.f32 %v2753_v38, 0.0  ;;  %v2751_v22 = vadd.f32 %v2629_v41, %v14262_v51  ;;  %v14263_v38 = vld [vmem:[#allocation46_spill] sm:$0xff] }
 0x490   :  { %v7786_v34 = vunpack.i.h.bf16 %v7784_v50  ;;  %v7785_v42 = vunpack.i.l.bf16 %v7784_v50  ;;  %v10837_v54 = vpack.c.b16 %v2859_v20, %v2857_v13  ;;  %v10839_v37 = vpack.c.b16 %v2860_v10, %v2858_v60 }
 0x491   :  { %v10831_v39 = vmax.f32 %v2754_v53, 0.0  ;;  %14260 = vst [vmem:[#allocation17_spill] sm:$0xff] %v10833_v17  ;;  %v10835_v5 = vmax.f32 %v2755_v0, 0.0  ;;  %v2749_v26 = vadd.f32 %v10799_v6, %v14263_v38  ;;  %v10866_v52 = vpack.c.b16 %v2855_v7, %v2853_v18  ;;  %v14272_v38 = vld [vmem:[#allocation54_spill] sm:$0xff] }
 0x492   :  { %v2824_v49 = vsel %vm253_vm4, %v7786_v34, %v7791_v59  ;;  %v2828_v61 = vsel %vm253_vm4, %v7791_v59, %v7786_v34  ;;  %v2823_v53 = vsel %vm253_vm4, %v7785_v42, %v7790_v27  ;;  %v2827_v9 = vsel %vm253_vm4, %v7790_v27, %v7785_v42  ;;  %3003 = vmatpush.bf16.msra.mxu0 %v10837_v54  ;;  %v7794_v59 = vpop.permute.xlu2 %7793  ;;  %v14264_v42 = vld [vmem:[#allocation68_spill] sm:$0xff] }
 0x493   :  { %14259 = vst [vmem:[#allocation24_spill] sm:$0xff] %v10831_v39  ;;  %v2835_v20 = vsel %vm8708_vm5, %v2824_v49, 0.0  ;;  %v2836_v13 = vsel %vm8714_vm6, %v2828_v61, 0.0  ;;  %v2833_v28 = vsel %vm8708_vm5, %v2823_v53, 0.0  ;;  %3022 = vmatpush.bf16.msra.mxu1 %v10839_v37  ;;  %v2834_v27 = vsel %vm8714_vm6, %v2827_v9, 0.0  ;;  %v14267_v49 = vld [vmem:[#allocation69_spill] sm:$0xff] }
 0x494   :  { %14261 = vst [vmem:[#allocation8_spill] sm:$0xff] %v10835_v5  ;;  %v2960_v8 = vpack.c.bf16 %v2836_v13, %v2835_v20  ;;  %v7802_v41 = vpack.i.bf16 %v10831_v39, %v10829_v2  ;;  %v7807_v23 = vpack.i.bf16 %v10835_v5, %v10833_v17  ;;  %v2959_v48 = vpack.c.bf16 %v2834_v27, %v2833_v28 }
 0x495   :  { %v10868_v60 = vpack.c.b16 %v2856_v43, %v2854_v11  ;;  %v2458_v0 = vadd.f32 %v10646_v33, %v10654_v44  ;;  %v2477_v50 = vadd.f32 %v10644_v55, %v10658_v56  ;;  %v10878_v6 = vadd.f32 %v10778_v3, %v14264_v42 }
 0x496   :  { %7803 = vrot.lane.b32.xlu1 %v7802_v41, %s8144_s0  ;;  %7808 = vrot.lane.b32.xlu2 %v7807_v23, %s8144_s0  ;;  %v2971_v10 = vunpack.c.l.b16 %v2960_v8  ;;  %v2972_v34 = vunpack.c.h.b16 %v2960_v8  ;;  %v7796_v18 = vunpack.i.h.bf16 %v7794_v59  ;;  %v2969_v33 = vunpack.c.l.b16 %v2959_v48 }
 0x497   :  { %14265 = vst [vmem:[#allocation52_spill] sm:$0xff] %v10878_v6  ;;  %3004 = vmatpush.bf16.msra.mxu0 %v10866_v52  ;;  %3023 = vmatpush.bf16.msra.mxu1 %v10868_v60  ;;  %v7799_v7 = vpop.permute.xlu0 %7798  ;;  %v2970_v44 = vunpack.c.h.b16 %v2959_v48  ;;  %v10882_v43 = vmax.f32 %v2751_v22, 0.0  ;;  %v7795_v55 = vunpack.i.l.bf16 %v7794_v59  ;;  %v10888_v3 = vadd.f32 %v10793_v36, %v14267_v49  ;;  %v14273_v48 = vld [vmem:[#allocation53_spill] sm:$0xff] }
 0x498   :  { %v7801_v56 = vunpack.i.h.bf16 %v7799_v7  ;;  %v7800_v11 = vunpack.i.l.bf16 %v7799_v7  ;;  %v10890_v61 = vmax.f32 %v2749_v26, 0.0  ;;  %v10892_v53 = vpack.c.b16 %v2971_v10, %v2969_v33 }
 0x499   :  { %14266 = vst [vmem:[#allocation60_spill] sm:$0xff] %v10882_v43  ;;  %v10894_v9 = vpack.c.b16 %v2972_v34, %v2970_v44  ;;  %v2700_v26 = vadd.f32 %v10613_v40, %v14272_v38  ;;  %v2701_v10 = vadd.f32 %v10617_v21, %v14273_v48  ;;  %v14274_v34 = vld [vmem:[#allocation44_spill] sm:$0xff]  ;;  %v14278_v40 = vpack.i.bf16 %v10741_v30, %v10757_v57 }
 0x49a   :  { %14268 = vst [vmem:[#allocation59_spill] sm:$0xff] %v10888_v3  ;;  %v2822_v51 = vsel %vm253_vm4, %v7796_v18, %v7801_v56  ;;  %v2826_v22 = vsel %vm253_vm4, %v7801_v56, %v7796_v18  ;;  %v2821_v20 = vsel %vm253_vm4, %v7795_v55, %v7800_v11  ;;  %v2825_v13 = vsel %vm253_vm4, %v7800_v11, %v7795_v55  ;;  %v14276_v18 = vld [vmem:[#allocation45_spill] sm:$0xff]  ;;  %v14281_v11 = vld [vmem:[#allocation72_spill] sm:$0xff] }
 0x49b   :  { %3075 = vmatpush.bf16.msrb.mxu0 %v10760_v46  ;;  %3094 = vmatpush.bf16.msrb.mxu1 %v10762_v29  ;;  %14269 = vst [vmem:[#allocation42_spill] sm:$0xff] %v10890_v61  ;;  %v2831_v36 = vsel %vm8708_vm5, %v2822_v51, 0.0  ;;  %v2832_v28 = vsel %vm8714_vm6, %v2826_v22, 0.0  ;;  %v2829_v59 = vsel %vm8708_vm5, %v2821_v20, 0.0  ;;  %v2830_v8 = vsel %vm8714_vm6, %v2825_v13, 0.0  ;;  %v14294_v38 = vld [vmem:[#allocation104_spill] sm:$0xff] }
 0x49c   :  { %14270 = vst [vmem:[#allocation49_spill] sm:$0xff] %v10892_v53  ;;  %7151 = vmatmul.msk.bf16.vlgmr.msra.gmra.mxu0 %vm428_vm0, %v10703_v16  ;;  %3113 = vmatpush.bf16.msrb.mxu2 %v10892_v53  ;;  %v7817_v27 = vpack.i.bf16 %v10882_v43, %v10890_v61  ;;  %v2957_v41 = vpack.c.bf16 %v2830_v8, %v2829_v59  ;;  %v13836_v49 = vmax.f32 %v10878_v6, 0.0  ;;  %v13835_v51 = vmax.f32 %v10888_v3, 0.0  ;;  %v14303_v3 = vld [vmem:[#allocation30_spill] sm:$0xff] }
 0x49d   :  { %14271 = vst [vmem:[#allocation41_spill] sm:$0xff] %v10894_v9  ;;  %3132 = vmatpush.bf16.msrb.mxu3 %v10894_v9  ;;  %v2958_v23 = vpack.c.bf16 %v2832_v28, %v2831_v36  ;;  %v10926_v42 = vadd.f32 %v10660_v1, %v14274_v34  ;;  %v10930_v7 = vadd.f32 %v10662_v14, %v14276_v18  ;;  %v14279_v1 = vld [vmem:[#allocation71_spill] sm:$0xff]  ;;  %v10948_v22 = vmax.f32 %v10767_v15, 0.0  ;;  %v14289_v28 = vld [vmem:[#allocation48_spill] sm:$0xff]  ;;  %v14304_v6 = vld [vmem:[#allocation26_spill] sm:$0xff] }
 0x49e   :  { %7153 = vmatmul.msk.bf16.vlgmr.msra.gmra.mxu1 %vm428_vm0, %v10703_v16  ;;  %7818 = vrot.lane.b32.xlu1 %v7817_v27, %s8144_s0  ;;  %v2965_v33 = vunpack.c.l.b16 %v2957_v41  ;;  %v2966_v44 = vunpack.c.h.b16 %v2957_v41  ;;  %v10940_v56 = vadd.f32 %v2458_v0, %v14279_v1  ;;  %v10943_v14 = vadd.f32 %v2477_v50, %v14281_v11  ;;  %v14287_v50 = vld [vmem:[#allocation47_spill] sm:$0xff] }
 0x49f   :  { %3076 = vmatpush.bf16.msrb.mxu0 %v10755_v35  ;;  %3095 = vmatpush.bf16.msrb.mxu1 %v10764_v45  ;;  %14275 = vst [vmem:[#allocation51_spill] sm:$0xff] %v10926_v42  ;;  %v2967_v21 = vunpack.c.l.b16 %v2958_v23  ;;  %v2968_v55 = vunpack.c.h.b16 %v2958_v23  ;;  %v10951_v20 = vmax.f32 %v10770_v25, 0.0  ;;  %v10961_v36 = vadd.f32 %v10648_v4, %v14287_v50  ;;  %v14293_v23 = vld [vmem:[#allocation94_spill] sm:$0xff] }
 0x4a0   :  { %14277 = vst [vmem:[#allocation50_spill] sm:$0xff] %v10930_v7  ;;  %7823 = vrot.lane.b32.xlu2 %v14278_v40, %s8145_s19  ;;  %v10965_v59 = vadd.f32 %v10650_v62, %v14289_v28  ;;  %v13838_v15 = vmax.f32 %v10926_v42, 0.0  ;;  %v13837_v25 = vmax.f32 %v10930_v7, 0.0  ;;  %v10969_v8 = vmax.f32 %v2700_v26, 0.0  ;;  %v14306_v7 = vld [vmem:[#allocation15_spill] sm:$0xff] }
 0x4a1   :  { %14280 = vst [vmem:[#allocation36_spill] sm:$0xff] %v10940_v56  ;;  %v10955_v13 = vpack.c.b16 %v2967_v21, %v2965_v33  ;;  %v10957_v0 = vpack.c.b16 %v2968_v55, %v2966_v44  ;;  %v10971_v27 = vmax.f32 %v2701_v10, 0.0  ;;  %v13840_v41 = vmax.f32 %v10940_v56, 0.0  ;;  %v14295_v44 = vld [vmem:[#allocation39_spill] sm:$0xff] }
 0x4a2   :  { %14282 = vst [vmem:[#allocation34_spill] sm:$0xff] %v10943_v14  ;;  %v13839_v4 = vmax.f32 %v10943_v14, 0.0  ;;  %v3224_v62 = vpack.c.bf16 %v13835_v51, %v13836_v49  ;;  %v7832_v26 = vpack.i.bf16 %v10948_v22, %v10969_v8  ;;  %v13842_v10 = vmax.f32 %v10961_v36, 0.0  ;;  %v14296_v55 = vld [vmem:[#allocation99_spill] sm:$0xff]  ;;  %v14297_v49 = vld [vmem:[#allocation92_spill] sm:$0xff] }
 0x4a3   :  { %14283 = vst [vmem:[#allocation37_spill] sm:$0xff] %v10948_v22  ;;  %3077 = vmatpush.bf16.msrb.mxu0 %v10539_v19  ;;  %3096 = vmatpush.bf16.msrb.mxu1 %v10541_v63  ;;  %v7837_v48 = vpack.i.bf16 %v10951_v20, %v10971_v27  ;;  %v13841_v34 = vmax.f32 %v10965_v59, 0.0  ;;  %v3223_v18 = vpack.c.bf16 %v13837_v25, %v13838_v15  ;;  %v14298_v25 = vld [vmem:[#allocation85_spill] sm:$0xff] }
 0x4a4   :  { %14284 = vst [vmem:[#allocation35_spill] sm:$0xff] %v10951_v20  ;;  %3114 = vmatpush.bf16.msrb.mxu2 %v10955_v13  ;;  %3133 = vmatpush.bf16.msrb.mxu3 %v10957_v0  ;;  %v3222_v40 = vpack.c.bf16 %v13839_v4, %v13840_v41  ;;  %v3275_v33 = vunpack.c.l.b16 %v3224_v62  ;;  %v3276_v21 = vunpack.c.h.b16 %v3224_v62  ;;  %v3220_v28 = vpack.c.bf16 %v10739_v32, %v10741_v30  ;;  %v14305_v30 = vld [vmem:[#allocation5_spill] sm:$0xff] }
 0x4a5   :  { %14285 = vst [vmem:[#allocation43_spill] sm:$0xff] %v10955_v13  ;;  %v3221_v1 = vpack.c.bf16 %v13841_v34, %v13842_v10  ;;  %v3273_v11 = vunpack.c.l.b16 %v3223_v18  ;;  %v3274_v50 = vunpack.c.h.b16 %v3223_v18  ;;  %v3219_v18 = vpack.c.bf16 %v10749_v24, %v10757_v57  ;;  %v14307_v24 = vld [vmem:[#allocation28_spill] sm:$0xff]  ;;  %v14308_v57 = vld [vmem:[#allocation33_spill] sm:$0xff] }
 0x4a6   :  { %14286 = vst [vmem:[#allocation46_spill] sm:$0xff] %v10957_v0  ;;  %7833 = vrot.lane.b32.xlu1 %v7832_v26, %s8145_s19  ;;  %v3271_v62 = vunpack.c.l.b16 %v3222_v40  ;;  %v3272_v26 = vunpack.c.h.b16 %v3222_v40  ;;  %v3218_v40 = vpack.c.bf16 %v10951_v20, %v10948_v22  ;;  %v2553_v32 = vadd.f32 %v14304_v6, %v14303_v3  ;;  %v14313_v20 = vld [vmem:[#allocation75_spill] sm:$0xff] }
 0x4a7   :  { %14288 = vst [vmem:[#allocation68_spill] sm:$0xff] %v10961_v36  ;;  %3078 = vmatpush.bf16.msrb.mxu0 %v14293_v23  ;;  %3097 = vmatpush.bf16.msrb.mxu1 %v14294_v38  ;;  %v11013_v51 = vpack.c.b16 %v3276_v21, %v3274_v50  ;;  %v3269_v15 = vunpack.c.l.b16 %v3221_v1  ;;  %v3270_v4 = vunpack.c.h.b16 %v3221_v1  ;;  %v3256_v1 = vunpack.c.h.b16 %v3220_v28  ;;  %v14315_v36 = vld [vmem:[#allocation58_spill] sm:$0xff] }
 0x4a8   :  { %14290 = vst [vmem:[#allocation69_spill] sm:$0xff] %v10965_v59  ;;  %7838 = vrot.lane.b32.xlu2 %v7837_v48, %s8145_s19  ;;  %3115 = vmatpush.bf16.msrb.mxu2 %v10760_v46  ;;  %v11011_v48 = vpack.c.b16 %v3275_v33, %v3273_v11  ;;  %v3255_v11 = vunpack.c.l.b16 %v3220_v28  ;;  %v3217_v50 = vpack.c.bf16 %v10971_v27, %v10969_v8  ;;  %v3253_v41 = vunpack.c.l.b16 %v3219_v18 }
 0x4a9   :  { %14291 = vst [vmem:[#allocation54_spill] sm:$0xff] %v10969_v8  ;;  %3134 = vmatpush.bf16.msrb.mxu3 %v10762_v29  ;;  %v11027_v33 = vpack.c.b16 %v3271_v62, %v3269_v15  ;;  %v11029_v21 = vpack.c.b16 %v3272_v26, %v3270_v4  ;;  %v3254_v34 = vunpack.c.h.b16 %v3219_v18  ;;  %v3251_v62 = vunpack.c.l.b16 %v3218_v40 }
 0x4aa   :  { %14292 = vst [vmem:[#allocation53_spill] sm:$0xff] %v10971_v27  ;;  %v11039_v15 = vpack.c.b16 %v3255_v11, %v3253_v41  ;;  %v3252_v26 = vunpack.c.h.b16 %v3218_v40  ;;  %v3249_v28 = vunpack.c.l.b16 %v3217_v50  ;;  %v3250_v18 = vunpack.c.h.b16 %v3217_v50  ;;  %v14320_v27 = vld [vmem:[#allocation73_spill] sm:$0xff] }
 0x4ab   :  { %3079 = vmatpush.bf16.msrb.mxu0 %v14295_v44  ;;  %3098 = vmatpush.bf16.msrb.mxu1 %v14296_v55  ;;  %v11041_v4 = vpack.c.b16 %v3256_v1, %v3254_v34  ;;  %v2539_v42 = vadd.f32 %v14306_v7, %v14305_v30  ;;  %v2558_v14 = vadd.f32 %v14308_v57, %v14307_v24  ;;  %v14316_v30 = vld [vmem:[#allocation21_spill] sm:$0xff]  ;;  %v14318_v24 = vld [vmem:[#allocation76_spill] sm:$0xff] }
 0x4ac   :  { %7152 = vmatmul.msk.bf16.gmra.mxu0 %vm428_vm0, %v10789_v47  ;;  %3116 = vmatpush.bf16.msrb.mxu2 %v10755_v35  ;;  %v11051_v41 = vpack.c.b16 %v3251_v62, %v3249_v28  ;;  %v11053_v34 = vpack.c.b16 %v3252_v26, %v3250_v18  ;;  %v14300_v26 = vld [vmem:[#allocation12_spill] sm:$0xff]  ;;  %v11098_v7 = vadd.f32 %v14316_v30, %v14315_v36 }
 0x4ad   :  { %3135 = vmatpush.bf16.msrb.mxu3 %v10764_v45  ;;  %v14301_v28 = vld [vmem:[#allocation20_spill] sm:$0xff]  ;;  %v11101_v57 = vadd.f32 %v2553_v32, %v14318_v24  ;;  %v11104_v8 = vadd.f32 %v2539_v42, %v14320_v27 }
 0x4ae   :  { %7154 = vmatmul.msk.bf16.gmra.mxu1 %vm428_vm0, %v10789_v47  ;;  %v2534_v18 = vadd.f32 %v14301_v28, %v14300_v26  ;;  %14317 = vst [vmem:[#allocation48_spill] sm:$0xff] %v11098_v7 }
 0x4af   :  { %3080 = vmatpush.bf16.msrb.mxu0 %v14297_v49  ;;  %3099 = vmatpush.bf16.msrb.mxu1 %v14298_v25  ;;  %14319 = vst [vmem:[#allocation94_spill] sm:$0xff] %v11101_v57 }
 0x4b0   :  { %3117 = vmatpush.bf16.msrb.mxu2 %v10539_v19  ;;  %v11094_v26 = vadd.f32 %v2534_v18, %v14313_v20  ;;  %14321 = vst [vmem:[#allocation104_spill] sm:$0xff] %v11104_v8  ;;  %v14466_v58 = vld [vmem:[#allocation54_spill] sm:$0xff] }
 0x4b1   :  { %3136 = vmatpush.bf16.msrb.mxu3 %v10541_v63 }
 0x4b2   :  { %14314 = vst [vmem:[#allocation47_spill] sm:$0xff] %v11094_v26 }
 0x4b3   :  { %3375 = vmatpush.bf16.msra.mxu0 %v11011_v48  ;;  %3394 = vmatpush.bf16.msra.mxu1 %v11013_v51 }
 0x4b4   :  { %3118 = vmatpush.bf16.msrb.mxu2 %v14293_v23 }
 0x4b5   :  { %3137 = vmatpush.bf16.msrb.mxu3 %v14294_v38 }
 0x4b7   :  { %3376 = vmatpush.bf16.msra.mxu0 %v11027_v33  ;;  %3395 = vmatpush.bf16.msra.mxu1 %v11029_v21 }
 0x4b8   :  { %3413 = vmatpush.bf16.msra.mxu2 %v11011_v48  ;;  %7165 = vmatmul.msk.bf16.vlgmr.msrb.gmra.mxu3 %vm428_vm0, %v10703_v16 }
 0x4b9   :  { %3432 = vmatpush.bf16.msra.mxu3 %v11013_v51  ;;  %7163 = vmatmul.msk.bf16.vlgmr.msrb.gmra.mxu2 %vm428_vm0, %v10703_v16 }
 0x4bb   :  { %3377 = vmatpush.bf16.msra.mxu0 %v11039_v15  ;;  %3396 = vmatpush.bf16.msra.mxu1 %v11041_v4 }
 0x4bc   :  { %3414 = vmatpush.bf16.msra.mxu2 %v11027_v33  ;;  %7159 = vmatmul.msk.bf16.vlgmr.msrb.gmra.mxu0 %vm428_vm0, %v10703_v16 }
 0x4bd   :  { %3433 = vmatpush.bf16.msra.mxu3 %v11029_v21 }
 0x4be   :  { %7161 = vmatmul.msk.bf16.vlgmr.msrb.gmra.mxu1 %vm428_vm0, %v10703_v16 }
 0x4bf   :  { %3378 = vmatpush.bf16.msra.mxu0 %v11051_v41  ;;  %3397 = vmatpush.bf16.msra.mxu1 %v11053_v34 }
 0x4c0   :  { %3415 = vmatpush.bf16.msra.mxu2 %v11039_v15 }
 0x4c1   :  { %3434 = vmatpush.bf16.msra.mxu3 %v11041_v4 }
 0x4c4   :  { %3416 = vmatpush.bf16.msra.mxu2 %v11051_v41 }
 0x4c5   :  { %3435 = vmatpush.bf16.msra.mxu3 %v11053_v34 }
 0x4c8   :  { %7166 = vmatmul.msk.bf16.gmra.mxu3 %vm428_vm0, %v10789_v47 }
 0x4c9   :  { %7164 = vmatmul.msk.bf16.gmra.mxu2 %vm428_vm0, %v10789_v47 }
 0x4cc   :  { %7160 = vmatmul.msk.bf16.gmra.mxu0 %vm428_vm0, %v10789_v47 }
 0x4ce   :  { %7162 = vmatmul.msk.bf16.gmra.mxu1 %vm428_vm0, %v10789_v47 }
 0x4e9   :  { %v3044_v40 = vpop.f32.mrf.mxu2  ;;  %v3063_v1 = vpop.f32.mrf.mxu3 }
 0x4ea   :  { %v3837_v11 = vmax.f32 %v3044_v40, 0.0  ;;  %v3838_v50 = vmax.f32 %v3063_v1, 0.0  ;;  %v14310_v1 = vld [vmem:[#allocation57_spill] sm:$0xff] }
 0x4ec   :  { %v11075_v62 = vpack.c.bf16 %v3838_v50, %v3837_v11  ;;  %v14311_v11 = vld [vmem:[#allocation16_spill] sm:$0xff] }
 0x4ed   :  { %v11091_v50 = vadd.f32 %v14311_v11, %v14310_v1  ;;  %v14322_v1 = vld [vmem:[#allocation74_spill] sm:$0xff] }
 0x4ee   :  { %14299 = vst [vmem:[#allocation44_spill] sm:$0xff] %v11075_v62  ;;  %v11107_v11 = vadd.f32 %v2558_v14, %v14322_v1  ;;  %v14326_v1 = vld [vmem:[#allocation55_spill] sm:$0xff] }
 0x4ef   :  { %14312 = vst [vmem:[#allocation72_spill] sm:$0xff] %v11091_v50  ;;  %v14327_v62 = vld [vmem:[#allocation31_spill] sm:$0xff] }
 0x4f0   :  { %v7809_v56 = vpop.permute.xlu2 %7808  ;;  %14323 = vst [vmem:[#allocation39_spill] sm:$0xff] %v11107_v11 }
 0x4f1   :  { %v11079_v10 = vpop.f32.mrf.mxu2  ;;  %v11087_v40 = vpop.f32.mrf.mxu3  ;;  %v7811_v22 = vunpack.i.h.bf16 %v7809_v56  ;;  %v7810_v59 = vunpack.i.l.bf16 %v7809_v56 }
 0x4f2   :  { %14302 = vst [vmem:[#allocation45_spill] sm:$0xff] %v11079_v10  ;;  %v14330_v10 = vld [vmem:[#allocation4_spill] sm:$0xff] }
 0x4f3   :  { %14309 = vst [vmem:[#allocation71_spill] sm:$0xff] %v11087_v40 }
 0x504   :  { %v3049_v40 = vpop.f32.mrf.mxu2  ;;  %v3068_v35 = vpop.f32.mrf.mxu3 }
 0x505   :  { %v3841_v13 = vmax.f32 %v3049_v40, 0.0  ;;  %v14332_v40 = vmax.f32 %v11104_v8, 0.0 }
 0x508   :  { %v7804_v28 = vpop.permute.xlu1 %7803 }
 0x509   :  { %v7806_v6 = vunpack.i.h.bf16 %v7804_v28  ;;  %v7805_v3 = vunpack.i.l.bf16 %v7804_v28 }
 0x50b   :  { %v3167_v20 = vsel %vm216_vm1, %v7805_v3, %v7810_v59  ;;  %v3168_v56 = vsel %vm216_vm1, %v7806_v6, %v7811_v22  ;;  %v3171_v18 = vsel %vm216_vm1, %v7810_v59, %v7805_v3  ;;  %v3172_v36 = vsel %vm216_vm1, %v7811_v22, %v7806_v6  ;;  %v7814_v3 = vpop.permute.xlu0 %7813 }
 0x50c   :  { %v3177_v28 = vsel %vm8626_vm2, %v3171_v18, 0.0  ;;  %v3178_v27 = vsel %vm8632_vm3, %v3167_v20, 0.0  ;;  %v3179_v14 = vsel %vm8626_vm2, %v3172_v36, 0.0  ;;  %v3180_v30 = vsel %vm8632_vm3, %v3168_v56, 0.0  ;;  %v14329_v18 = vld [vmem:[#allocation56_spill] sm:$0xff] }
 0x50d   :  { %v11128_v59 = vadd.f32 %v14327_v62, %v14326_v1  ;;  %v3215_v22 = vpack.c.bf16 %v3178_v27, %v3177_v28  ;;  %v3216_v6 = vpack.c.bf16 %v3180_v30, %v3179_v14  ;;  %v11132_v0 = vadd.f32 %v14330_v10, %v14329_v18 }
 0x50e   :  { %v13872_v62 = vmax.f32 %v11101_v57, 0.0  ;;  %v7816_v1 = vunpack.i.h.bf16 %v7814_v3  ;;  %v7815_v28 = vunpack.i.l.bf16 %v7814_v3  ;;  %v3842_v14 = vmax.f32 %v3068_v35, 0.0  ;;  %v14340_v57 = vld [vmem:[#allocation29_spill] sm:$0xff] }
 0x50f   :  { %14328 = vst [vmem:[#allocation99_spill] sm:$0xff] %v11128_v59  ;;  %v3233_v56 = vunpack.c.l.b16 %v3215_v22  ;;  %v3235_v9 = vunpack.c.l.b16 %v3216_v6  ;;  %v3234_v24 = vunpack.c.h.b16 %v3215_v22  ;;  %v3236_v53 = vunpack.c.h.b16 %v3216_v6 }
 0x510   :  { %14331 = vst [vmem:[#allocation92_spill] sm:$0xff] %v11132_v0  ;;  %v7819_v27 = vpop.permute.xlu1 %7818  ;;  %v13871_v20 = vmax.f32 %v11128_v59, 0.0  ;;  %v13870_v36 = vmax.f32 %v11132_v0, 0.0  ;;  %v14333_v22 = vmax.f32 %v11107_v11, 0.0  ;;  %v11143_v46 = vpack.c.bf16 %v3842_v14, %v3841_v13 }
 0x511   :  { %v7821_v30 = vunpack.i.h.bf16 %v7819_v27  ;;  %v7820_v45 = vunpack.i.l.bf16 %v7819_v27  ;;  %v3239_v10 = vpack.c.b16 %v3235_v9, %v3233_v56  ;;  %v3240_v18 = vpack.c.b16 %v3236_v53, %v3234_v24 }
 0x512   :  { %v3288_v6 = vpack.c.bf16 %v14333_v22, %v14332_v40  ;;  %v13873_v14 = vmax.f32 %v11098_v7, 0.0  ;;  %v3309_v11 = vpack.c.bf16 %v10890_v61, %v14340_v57 }
 0x513   :  { %v3165_v3 = vsel %vm216_vm1, %v7815_v28, %v7820_v45  ;;  %v3166_v35 = vsel %vm216_vm1, %v7816_v1, %v7821_v30  ;;  %v3169_v53 = vsel %vm216_vm1, %v7820_v45, %v7815_v28  ;;  %v3170_v9 = vsel %vm216_vm1, %v7821_v30, %v7816_v1  ;;  %3379 = vmatpush.bf16.msra.mxu0 %v3239_v10 }
 0x514   :  { %v3173_v24 = vsel %vm8626_vm2, %v3169_v53, 0.0  ;;  %v3174_v13 = vsel %vm8632_vm3, %v3165_v3, 0.0  ;;  %v3175_v56 = vsel %vm8626_vm2, %v3170_v9, 0.0  ;;  %v3176_v27 = vsel %vm8632_vm3, %v3166_v35, 0.0  ;;  %3398 = vmatpush.bf16.msra.mxu1 %v3240_v18  ;;  %3417 = vmatpush.bf16.msra.mxu2 %v3239_v10 }
 0x515   :  { %3436 = vmatpush.bf16.msra.mxu3 %v3240_v18  ;;  %v3213_v45 = vpack.c.bf16 %v3174_v13, %v3173_v24  ;;  %v3214_v28 = vpack.c.bf16 %v3176_v27, %v3175_v56  ;;  %v13874_v1 = vmax.f32 %v11091_v50, 0.0  ;;  %v3287_v30 = vpack.c.bf16 %v13870_v36, %v13871_v20 }
 0x516   :  { %v14334_v35 = vmax.f32 %v11094_v26, 0.0  ;;  %v3299_v18 = vunpack.c.l.b16 %v3288_v6  ;;  %v3300_v9 = vunpack.c.h.b16 %v3288_v6 }
 0x517   :  { %v3229_v40 = vunpack.c.l.b16 %v3213_v45  ;;  %v3231_v22 = vunpack.c.l.b16 %v3214_v28  ;;  %v3230_v3 = vunpack.c.h.b16 %v3213_v45  ;;  %v3232_v53 = vunpack.c.h.b16 %v3214_v28  ;;  %v11178_v45 = vld [vmem:[%s13605_s4] sm:$0xff] }
 0x518   :  { %v3286_v10 = vpack.c.bf16 %v13872_v62, %v14334_v35  ;;  %v3285_v56 = vpack.c.bf16 %v13873_v14, %v13874_v1  ;;  %v3297_v27 = vunpack.c.l.b16 %v3287_v30  ;;  %v3298_v36 = vunpack.c.h.b16 %v3287_v30  ;;  %v14336_v35 = vld [vmem:[#allocation89_spill] sm:$0xff] }
 0x519   :  { %v3237_v24 = vpack.c.b16 %v3231_v22, %v3229_v40  ;;  %v3238_v13 = vpack.c.b16 %v3232_v53, %v3230_v3  ;;  %v14335_v53 = vld [vmem:[#allocation86_spill] sm:$0xff]  ;;  %v14339_v14 = vld [vmem:[#allocation13_spill] sm:$0xff] }
 0x51a   :  { %v3295_v28 = vunpack.c.l.b16 %v3286_v10  ;;  %v11180_v20 = vpack.c.b16 %v3299_v18, %v3297_v27  ;;  %v3296_v6 = vunpack.c.h.b16 %v3286_v10  ;;  %v11182_v40 = vpack.c.b16 %v3300_v9, %v3298_v36  ;;  %v14337_v10 = vld [vmem:[#allocation84_spill] sm:$0xff]  ;;  %v14338_v18 = vld [vmem:[#allocation87_spill] sm:$0xff]  ;;  %v11223_v9 = vpop.f32.mrf.mxu2 }
 0x51b   :  { %3380 = vmatpush.bf16.msra.mxu0 %v3237_v24  ;;  %3399 = vmatpush.bf16.msra.mxu1 %v3238_v13  ;;  %v3293_v22 = vunpack.c.l.b16 %v3285_v56  ;;  %v3294_v30 = vunpack.c.h.b16 %v3285_v56  ;;  %v3025_v56 = vpop.f32.mrf.mxu1  ;;  %v3310_v1 = vpack.c.bf16 %v10882_v43, %v14339_v14 }
 0x51c   :  { %3418 = vmatpush.bf16.msra.mxu2 %v3237_v24  ;;  %3437 = vmatpush.bf16.msra.mxu3 %v3238_v13  ;;  %v11225_v24 = vpop.f32.mrf.mxu3  ;;  %v3006_v13 = vpop.f32.mrf.mxu0 }
 0x51d   :  { %v11190_v3 = vpack.c.b16 %v3295_v28, %v3293_v22  ;;  %v11196_v36 = vpack.c.b16 %v3296_v6, %v3294_v30  ;;  %v3829_v27 = vmax.f32 %v3006_v13, 0.0  ;;  %v3830_v28 = vmax.f32 %v3025_v56, 0.0 }
 0x51e   :  { %7175 = vmatmul.msk.bf16.vlgmr.msra.gmra.mxu0 %vm428_vm0, %v11178_v45  ;;  %7177 = vmatmul.msk.bf16.vlgmr.msra.gmra.mxu1 %vm428_vm0, %v11178_v45  ;;  %v3312_v6 = vpack.c.bf16 %v10835_v5, %v10831_v39  ;;  %v3311_v30 = vpack.c.bf16 %v10833_v17, %v10829_v2 }
 0x51f   :  { %3451 = vmatpush.bf16.msrb.mxu0 %v14295_v44  ;;  %3470 = vmatpush.bf16.msrb.mxu1 %v14296_v55  ;;  %v11261_v22 = vpack.c.bf16 %v3830_v28, %v3829_v27 }
 0x520   :  { %3489 = vmatpush.bf16.msrb.mxu2 %v11180_v20  ;;  %3508 = vmatpush.bf16.msrb.mxu3 %v11182_v40  ;;  %v3321_v43 = vunpack.c.l.b16 %v3311_v30  ;;  %v3322_v14 = vunpack.c.h.b16 %v3311_v30 }
 0x521   :  { %7179 = vmatmul.msk.bf16.vlgmr.msra.gmra.mxu2 %vm428_vm0, %v10703_v16  ;;  %7181 = vmatmul.msk.bf16.vlgmr.msra.gmra.mxu3 %vm428_vm0, %v10703_v16  ;;  %v11215_v16 = vld [vmem:[%s13605_s4 + $0x8] sm:$0xff] }
 0x523   :  { %3452 = vmatpush.bf16.msrb.mxu0 %v14297_v49  ;;  %3471 = vmatpush.bf16.msrb.mxu1 %v14298_v25 }
 0x524   :  { %3490 = vmatpush.bf16.msrb.mxu2 %v11190_v3  ;;  %3509 = vmatpush.bf16.msrb.mxu3 %v11196_v36  ;;  %v11289_v26 = vpop.f32.mrf.mxu0 }
 0x527   :  { %3453 = vmatpush.bf16.msrb.mxu0 %v14335_v53  ;;  %3472 = vmatpush.bf16.msrb.mxu1 %v14336_v35 }
 0x528   :  { %3491 = vmatpush.bf16.msrb.mxu2 %v11011_v48  ;;  %3510 = vmatpush.bf16.msrb.mxu3 %v11013_v51 }
 0x52b   :  { %3454 = vmatpush.bf16.msrb.mxu0 %v14337_v10  ;;  %3473 = vmatpush.bf16.msrb.mxu1 %v14338_v18 }
 0x52c   :  { %3492 = vmatpush.bf16.msrb.mxu2 %v11027_v33  ;;  %3511 = vmatpush.bf16.msrb.mxu3 %v11029_v21 }
 0x52e   :  { %7176 = vmatmul.msk.bf16.gmra.mxu0 %vm428_vm0, %v11215_v16  ;;  %7178 = vmatmul.msk.bf16.gmra.mxu1 %vm428_vm0, %v11215_v16 }
 0x52f   :  { %3455 = vmatpush.bf16.msrb.mxu0 %v10837_v54  ;;  %3474 = vmatpush.bf16.msrb.mxu1 %v10839_v37 }
 0x530   :  { %3493 = vmatpush.bf16.msrb.mxu2 %v11039_v15  ;;  %3512 = vmatpush.bf16.msrb.mxu3 %v11041_v4 }
 0x531   :  { %7180 = vmatmul.msk.bf16.gmra.mxu2 %vm428_vm0, %v10789_v47  ;;  %7182 = vmatmul.msk.bf16.gmra.mxu3 %vm428_vm0, %v10789_v47 }
 0x533   :  { %3456 = vmatpush.bf16.msrb.mxu0 %v10866_v52  ;;  %3475 = vmatpush.bf16.msrb.mxu1 %v10868_v60 }
 0x534   :  { %3494 = vmatpush.bf16.msrb.mxu2 %v11051_v41  ;;  %3513 = vmatpush.bf16.msrb.mxu3 %v11053_v34 }
 0x537   :  { %3527 = vmatpush.bf16.msra.mxu0 %v11180_v20  ;;  %3546 = vmatpush.bf16.msra.mxu1 %v11182_v40 }
 0x538   :  { %3565 = vmatpush.bf16.msra.mxu2 %v10539_v19  ;;  %3584 = vmatpush.bf16.msra.mxu3 %v10541_v63 }
 0x53b   :  { %3528 = vmatpush.bf16.msra.mxu0 %v11190_v3  ;;  %3547 = vmatpush.bf16.msra.mxu1 %v11196_v36  ;;  %v11245_v54 = vpop.f32.mrf.mxu3 }
 0x53c   :  { %3566 = vmatpush.bf16.msra.mxu2 %v14293_v23  ;;  %3585 = vmatpush.bf16.msra.mxu3 %v14294_v38  ;;  %v3120_v47 = vpop.f32.mrf.mxu2  ;;  %v13875_v52 = vmax.f32 %v11245_v54, 0.0 }
 0x53d   :  { %v3853_v37 = vmax.f32 %v3120_v47, 0.0 }
 0x53e   :  { %7183 = vmatmul.msk.bf16.vlgmr.msrb.gmra.mxu0 %vm428_vm0, %v11178_v45  ;;  %7185 = vmatmul.msk.bf16.vlgmr.msrb.gmra.mxu1 %vm428_vm0, %v11178_v45 }
 0x53f   :  { %3529 = vmatpush.bf16.msra.mxu0 %v11011_v48  ;;  %3548 = vmatpush.bf16.msra.mxu1 %v11013_v51  ;;  %v11253_v60 = vpack.c.bf16 %v13875_v52, %v3853_v37  ;;  %v3323_v52 = vunpack.c.l.b16 %v3312_v6 }
 0x540   :  { %3567 = vmatpush.bf16.msra.mxu2 %v14295_v44  ;;  %3586 = vmatpush.bf16.msra.mxu3 %v14296_v55 }
 0x541   :  { %7187 = vmatmul.msk.bf16.vlgmr.msrb.gmra.mxu2 %vm428_vm0, %v11178_v45  ;;  %7189 = vmatmul.msk.bf16.vlgmr.msrb.gmra.mxu3 %vm428_vm0, %v11178_v45 }
 0x543   :  { %3530 = vmatpush.bf16.msra.mxu0 %v11027_v33  ;;  %3549 = vmatpush.bf16.msra.mxu1 %v11029_v21  ;;  %v11268_v13 = vpop.f32.mrf.mxu3 }
 0x544   :  { %3568 = vmatpush.bf16.msra.mxu2 %v14297_v49  ;;  %3587 = vmatpush.bf16.msra.mxu3 %v14298_v25  ;;  %v3122_v47 = vpop.f32.mrf.mxu2  ;;  %v13882_v62 = vmax.f32 %v11268_v13, 0.0 }
 0x545   :  { %v3855_v56 = vmax.f32 %v3122_v47, 0.0  ;;  %v3324_v47 = vunpack.c.h.b16 %v3312_v6  ;;  %v11297_v6 = vpack.c.b16 %v3323_v52, %v3321_v43  ;;  %v3317_v43 = vunpack.c.l.b16 %v3309_v11 }
 0x547   :  { %3531 = vmatpush.bf16.msra.mxu0 %v11039_v15  ;;  %v7842_v5 = vpack.i.bf16 %v3855_v56, %v3853_v37  ;;  %3550 = vmatpush.bf16.msra.mxu1 %v11041_v4  ;;  %v11284_v39 = vpack.c.bf16 %v13882_v62, %v3855_v56  ;;  %v11291_v15 = vpop.f32.mrf.mxu1  ;;  %v7824_v37 = vpop.permute.xlu2 %7823  ;;  %v13885_v4 = vmax.f32 %v11289_v26, 0.0  ;;  %v3319_v56 = vunpack.c.l.b16 %v3310_v1 }
 0x548   :  { %3569 = vmatpush.bf16.msra.mxu2 %v14335_v53  ;;  %3588 = vmatpush.bf16.msra.mxu3 %v14336_v35  ;;  %v13884_v53 = vmax.f32 %v11291_v15, 0.0  ;;  %v11301_v35 = vpack.c.b16 %v3324_v47, %v3322_v14  ;;  %v3320_v62 = vunpack.c.h.b16 %v3310_v1  ;;  %v3318_v14 = vunpack.c.h.b16 %v3309_v11  ;;  %v11323_v47 = vpop.f32.mrf.mxu0 }
 0x549   :  { %7843 = vrot.lane.b32.xlu2 %v7842_v5, %s8144_s0  ;;  %v11305_v30 = vpack.i.bf16 %v13885_v4, %v3829_v27  ;;  %v11316_v52 = vpack.c.b16 %v3319_v56, %v3317_v43  ;;  %v7826_v11 = vunpack.i.h.bf16 %v7824_v37  ;;  %v7825_v56 = vunpack.i.l.bf16 %v7824_v37 }
 0x54a   :  { %v11309_v8 = vpack.i.bf16 %v13884_v53, %v3830_v28  ;;  %v11318_v27 = vpack.c.b16 %v3320_v62, %v3318_v14 }
 0x54b   :  { %3532 = vmatpush.bf16.msra.mxu0 %v11051_v41  ;;  %3551 = vmatpush.bf16.msra.mxu1 %v11053_v34  ;;  %14341 = vst [vmem:[#allocation85_spill] sm:$0xff] %v11305_v30  ;;  %v3144_v41 = vpop.f32.mrf.mxu3  ;;  %v7829_v34 = vpop.permute.xlu0 %7828 }
 0x54c   :  { %3570 = vmatpush.bf16.msra.mxu2 %v14337_v10  ;;  %14342 = vst [vmem:[#allocation12_spill] sm:$0xff] %v11309_v8  ;;  %3589 = vmatpush.bf16.msra.mxu3 %v14338_v18  ;;  %v3125_v5 = vpop.f32.mrf.mxu2  ;;  %v3858_v10 = vmax.f32 %v3144_v41, 0.0  ;;  %v7831_v28 = vunpack.i.h.bf16 %v7829_v34  ;;  %v7830_v4 = vunpack.i.l.bf16 %v7829_v34 }
 0x54d   :  { %v3857_v1 = vmax.f32 %v3125_v5, 0.0  ;;  %v7834_v5 = vpop.permute.xlu1 %7833 }
 0x54e   :  { %v3200_v43 = vsel %vm253_vm4, %v7826_v11, %v7831_v28  ;;  %7184 = vmatmul.msk.bf16.gmra.mxu0 %vm428_vm0, %v11215_v16  ;;  %v3204_v34 = vsel %vm253_vm4, %v7831_v28, %v7826_v11  ;;  %v3199_v17 = vsel %vm253_vm4, %v7825_v56, %v7830_v4  ;;  %7186 = vmatmul.msk.bf16.gmra.mxu1 %vm428_vm0, %v11215_v16  ;;  %v7836_v61 = vunpack.i.h.bf16 %v7834_v5 }
 0x54f   :  { %3603 = vmatpush.bf16.msrb.mxu0 %v11297_v6  ;;  %3622 = vmatpush.bf16.msrb.mxu1 %v11301_v35  ;;  %v11320_v18 = vpack.c.bf16 %v3858_v10, %v3857_v1  ;;  %v11325_v53 = vpop.f32.mrf.mxu1  ;;  %v7839_v62 = vpop.permute.xlu2 %7838  ;;  %v3203_v59 = vsel %vm253_vm4, %v7830_v4, %v7825_v56  ;;  %v7835_v57 = vunpack.i.l.bf16 %v7834_v5  ;;  %v3211_v4 = vsel %vm8708_vm5, %v3200_v43, 0.0 }
 0x550   :  { %3641 = vmatpush.bf16.msrb.mxu2 %v11297_v6  ;;  %3660 = vmatpush.bf16.msrb.mxu3 %v11301_v35  ;;  %v7841_v0 = vunpack.i.h.bf16 %v7839_v62  ;;  %v3212_v56 = vsel %vm8714_vm6, %v3204_v34, 0.0  ;;  %v3209_v5 = vsel %vm8708_vm5, %v3199_v17, 0.0  ;;  %v11359_v50 = vpop.f32.mrf.mxu0 }
 0x551   :  { %7188 = vmatmul.msk.bf16.gmra.mxu2 %vm428_vm0, %v11215_v16  ;;  %7190 = vmatmul.msk.bf16.gmra.mxu3 %vm428_vm0, %v11215_v16 }
 0x552   :  { %v3198_v34 = vsel %vm253_vm4, %v7836_v61, %v7841_v0 }
 0x553   :  { %3604 = vmatpush.bf16.msrb.mxu0 %v11316_v52  ;;  %3623 = vmatpush.bf16.msrb.mxu1 %v11318_v27  ;;  %v3146_v14 = vpop.f32.mrf.mxu3 }
 0x554   :  { %3642 = vmatpush.bf16.msrb.mxu2 %v11316_v52  ;;  %3661 = vmatpush.bf16.msrb.mxu3 %v11318_v27  ;;  %v3127_v41 = vpop.f32.mrf.mxu2  ;;  %v3860_v2 = vmax.f32 %v3146_v14, 0.0  ;;  %v7840_v14 = vunpack.i.l.bf16 %v7839_v62  ;;  %v13893_v62 = vmax.f32 %v11359_v50, 0.0 }
 0x555   :  { %v3859_v37 = vmax.f32 %v3127_v41, 0.0  ;;  %v13894_v41 = vmax.f32 %v11323_v47, 0.0 }
 0x556   :  { %v7857_v11 = vpack.i.bf16 %v3860_v2, %v3858_v10  ;;  %v3834_v10 = vmax.f32 %v11325_v53, 0.0  ;;  %v3197_v17 = vsel %vm253_vm4, %v7835_v57, %v7840_v14  ;;  %v14359_v53 = vmax.f32 %v11289_v26, 0.0 }
 0x557   :  { %3605 = vmatpush.bf16.msrb.mxu0 %v11180_v20  ;;  %3624 = vmatpush.bf16.msrb.mxu1 %v11182_v40  ;;  %v7847_v28 = vpack.i.bf16 %v3859_v37, %v3857_v1  ;;  %v11349_v7 = vpack.c.bf16 %v3860_v2, %v3859_v37  ;;  %v11361_v1 = vpop.f32.mrf.mxu1  ;;  %v3210_v2 = vsel %vm8714_vm6, %v3203_v59, 0.0  ;;  %v3201_v37 = vsel %vm253_vm4, %v7840_v14, %v7835_v57 }
 0x558   :  { %3643 = vmatpush.bf16.msrb.mxu2 %v11180_v20  ;;  %3662 = vmatpush.bf16.msrb.mxu3 %v11182_v40  ;;  %v3836_v43 = vmax.f32 %v11361_v1, 0.0  ;;  %v3202_v59 = vsel %vm253_vm4, %v7841_v0, %v7836_v61  ;;  %v3335_v14 = vpack.c.bf16 %v3210_v2, %v3209_v5  ;;  %v14343_v61 = vmax.f32 %v11245_v54, 0.0  ;;  %v3082_v2 = vpop.f32.mrf.mxu0 }
 0x559   :  { %7848 = vrot.lane.b32.xlu0 %v7847_v28, %s8144_s0  ;;  %7858 = vrot.lane.b32.xlu1 %v7857_v11, %s8144_s0  ;;  %v11385_v28 = vpack.i.bf16 %v13893_v62, %v13894_v41  ;;  %v3336_v11 = vpack.c.bf16 %v3212_v56, %v3211_v4  ;;  %v14344_v0 = vmax.f32 %v11268_v13, 0.0  ;;  %v3205_v8 = vsel %vm8708_vm5, %v3197_v17, 0.0 }
 0x55a   :  { %v11391_v57 = vpack.i.bf16 %v3836_v43, %v3834_v10  ;;  %v3206_v62 = vsel %vm8714_vm6, %v3201_v37, 0.0  ;;  %v3207_v41 = vsel %vm8708_vm5, %v3198_v34, 0.0  ;;  %v3208_v4 = vsel %vm8714_vm6, %v3202_v59, 0.0 }
 0x55b   :  { %3606 = vmatpush.bf16.msrb.mxu0 %v11190_v3  ;;  %3625 = vmatpush.bf16.msrb.mxu1 %v11196_v36  ;;  %v7852_v30 = vpack.i.bf16 %v14344_v0, %v14343_v61  ;;  %v3345_v54 = vunpack.c.l.b16 %v3335_v14  ;;  %v3347_v13 = vunpack.c.l.b16 %v3336_v11  ;;  %v3346_v56 = vunpack.c.h.b16 %v3335_v14 }
 0x55c   :  { %3644 = vmatpush.bf16.msrb.mxu2 %v11190_v3  ;;  %3663 = vmatpush.bf16.msrb.mxu3 %v11196_v36  ;;  %v3348_v5 = vunpack.c.h.b16 %v3336_v11  ;;  %v3333_v34 = vpack.c.bf16 %v3206_v62, %v3205_v8  ;;  %v3334_v37 = vpack.c.bf16 %v3208_v4, %v3207_v41  ;;  %v3845_v61 = vmax.f32 %v3082_v2, 0.0  ;;  %v14345_v62 = vld [vmem:[#allocation9_spill] sm:$0xff] }
 0x55e   :  { %v3352_v11 = vpack.c.b16 %v3348_v5, %v3346_v56  ;;  %v3341_v8 = vunpack.c.l.b16 %v3333_v34  ;;  %v3342_v41 = vunpack.c.h.b16 %v3333_v34  ;;  %v14347_v56 = vld [vmem:[#allocation10_spill] sm:$0xff] }
 0x55f   :  { %3607 = vmatpush.bf16.msrb.mxu0 %v11011_v48  ;;  %3626 = vmatpush.bf16.msrb.mxu1 %v11013_v51  ;;  %v3101_v17 = vpop.f32.mrf.mxu1 }
 0x560   :  { %3645 = vmatpush.bf16.msrb.mxu2 %v11011_v48  ;;  %3664 = vmatpush.bf16.msrb.mxu3 %v11013_v51  ;;  %v3846_v59 = vmax.f32 %v3101_v17, 0.0  ;;  %v3351_v51 = vpack.c.b16 %v3347_v13, %v3345_v54  ;;  %v11432_v14 = vpop.f32.mrf.mxu0  ;;  %v14346_v13 = vld [vmem:[#allocation11_spill] sm:$0xff] }
 0x561   :  { %7853 = vrot.lane.b32.xlu0 %v7852_v30, %s8144_s0  ;;  %v11420_v30 = vld [vmem:[%s13605_s4 + $0x10] sm:$0xff]  ;;  %7195 = vmatmul.msk.bf16.vlgmr.msra.gmra.mxu2 %vm428_vm0, %v11178_v45 }
 0x562   :  { %v11414_v48 = vpack.c.bf16 %v3846_v59, %v3845_v61  ;;  %7191 = vmatmul.msk.bf16.vlgmr.msra.gmra.mxu0 %vm428_vm0, %v11420_v30  ;;  %7193 = vmatmul.msk.bf16.vlgmr.msra.gmra.mxu1 %vm428_vm0, %v11420_v30  ;;  %v11451_v61 = vld [vmem:[%s13605_s4 + $0x18] sm:$0xff]  ;;  %v4103_v59 = vunpack.c.h.b16 %v11253_v60 }
 0x563   :  { %3608 = vmatpush.bf16.msrb.mxu0 %v11027_v33  ;;  %3627 = vmatpush.bf16.msrb.mxu1 %v11029_v21 }
 0x564   :  { %3646 = vmatpush.bf16.msrb.mxu2 %v11027_v33  ;;  %3665 = vmatpush.bf16.msrb.mxu3 %v11029_v21  ;;  %v3343_v33 = vunpack.c.l.b16 %v3334_v37  ;;  %v3344_v21 = vunpack.c.h.b16 %v3334_v37 }
 0x565   :  { %7197 = vmatmul.msk.bf16.vlgmr.msra.gmra.mxu3 %vm428_vm0, %v11178_v45 }
 0x566   :  { %v3349_v4 = vpack.c.b16 %v3343_v33, %v3341_v8  ;;  %v3350_v54 = vpack.c.b16 %v3344_v21, %v3342_v41  ;;  %v4105_v8 = vunpack.c.h.b16 %v11284_v39  ;;  %v14350_v33 = vld [vmem:[#allocation43_spill] sm:$0xff]  ;;  %v14351_v41 = vld [vmem:[#allocation46_spill] sm:$0xff] }
 0x567   :  { %3698 = vmatpush.bf16.msra.mxu1 %v10762_v29  ;;  %3679 = vmatpush.bf16.msra.mxu0 %v14345_v62  ;;  %v11434_v0 = vpop.f32.mrf.mxu1 }
 0x568   :  { %3717 = vmatpush.bf16.msra.mxu2 %v3351_v51  ;;  %3736 = vmatpush.bf16.msra.mxu3 %v3352_v11  ;;  %v3087_v5 = vpop.f32.mrf.mxu0 }
 0x569   :  { %v3849_v17 = vmax.f32 %v3087_v5, 0.0  ;;  %v14356_v5 = vld [vmem:[#allocation44_spill] sm:$0xff] }
 0x56b   :  { %3699 = vmatpush.bf16.msra.mxu1 %v14346_v13  ;;  %3680 = vmatpush.bf16.msra.mxu0 %v14347_v56 }
 0x56c   :  { %3718 = vmatpush.bf16.msra.mxu2 %v3349_v4  ;;  %3737 = vmatpush.bf16.msra.mxu3 %v3350_v54 }
 0x56f   :  { %3700 = vmatpush.bf16.msra.mxu1 %v10541_v63  ;;  %3681 = vmatpush.bf16.msra.mxu0 %v10539_v19  ;;  %v3106_v2 = vpop.f32.mrf.mxu1 }
 0x570   :  { %3719 = vmatpush.bf16.msra.mxu2 %v11297_v6  ;;  %3738 = vmatpush.bf16.msra.mxu3 %v11301_v35  ;;  %v3850_v34 = vmax.f32 %v3106_v2, 0.0  ;;  %v4054_v2 = vunpack.c.l.b16 %v14356_v5 }
 0x571   :  { %7196 = vmatmul.msk.bf16.gmra.mxu2 %vm428_vm0, %v11215_v16 }
 0x572   :  { %v11445_v37 = vpack.c.bf16 %v3850_v34, %v3849_v17  ;;  %7192 = vmatmul.msk.bf16.gmra.mxu0 %vm428_vm0, %v11451_v61  ;;  %7194 = vmatmul.msk.bf16.gmra.mxu1 %vm428_vm0, %v11451_v61  ;;  %v4055_v17 = vunpack.c.h.b16 %v14356_v5  ;;  %v14357_v34 = vmax.f32 %v11323_v47, 0.0  ;;  %v14360_v47 = vmax.f32 %v11291_v15, 0.0 }
 0x573   :  { %3701 = vmatpush.bf16.msra.mxu1 %v14294_v38  ;;  %3682 = vmatpush.bf16.msra.mxu0 %v14293_v23 }
 0x574   :  { %3720 = vmatpush.bf16.msra.mxu2 %v11316_v52  ;;  %3739 = vmatpush.bf16.msra.mxu3 %v11318_v27  ;;  %v4003_v1 = vpack.c.bf16 %v14360_v47, %v14359_v53 }
 0x575   :  { %7198 = vmatmul.msk.bf16.gmra.mxu3 %vm428_vm0, %v11215_v16 }
 0x577   :  { %3702 = vmatpush.bf16.msra.mxu1 %v14296_v55  ;;  %3683 = vmatpush.bf16.msra.mxu0 %v14295_v44  ;;  %v14349_v44 = vld [vmem:[#allocation41_spill] sm:$0xff]  ;;  %v4104_v55 = vunpack.c.l.b16 %v11284_v39  ;;  %v11511_v39 = vpop.f32.mrf.mxu1 }
 0x578   :  { %3721 = vmatpush.bf16.msra.mxu2 %v11180_v20  ;;  %3740 = vmatpush.bf16.msra.mxu3 %v11182_v40 }
 0x57b   :  { %3703 = vmatpush.bf16.msra.mxu1 %v14298_v25  ;;  %3684 = vmatpush.bf16.msra.mxu0 %v14297_v49  ;;  %v14348_v25 = vld [vmem:[#allocation49_spill] sm:$0xff]  ;;  %v4102_v49 = vunpack.c.l.b16 %v11253_v60  ;;  %v3843_v60 = vmax.f32 %v11223_v9, 0.0 }
 0x57c   :  { %3722 = vmatpush.bf16.msra.mxu2 %v11190_v3  ;;  %3741 = vmatpush.bf16.msra.mxu3 %v11196_v36 }
 0x581   :  { %7203 = vmatmul.msk.bf16.vlgmr.msrb.gmra.mxu2 %vm428_vm0, %v11420_v30 }
 0x582   :  { %7199 = vmatmul.msk.bf16.vlgmr.msrb.gmra.mxu0 %vm428_vm0, %v11178_v45  ;;  %7201 = vmatmul.msk.bf16.vlgmr.msrb.gmra.mxu1 %vm428_vm0, %v11178_v45 }
 0x583   :  { %3755 = vmatpush.bf16.msrb.mxu0 %v3351_v51  ;;  %3774 = vmatpush.bf16.msrb.mxu1 %v3352_v11  ;;  %v11487_v51 = vpack.c.b16 %v4104_v55, %v4102_v49  ;;  %v11491_v11 = vpack.c.b16 %v4105_v8, %v4103_v59 }
 0x584   :  { %3793 = vmatpush.bf16.msrb.mxu2 %v14348_v25  ;;  %v4004_v25 = vpack.c.bf16 %v3834_v10, %v14357_v34 }
 0x585   :  { %7205 = vmatmul.msk.bf16.vlgmr.msrb.gmra.mxu3 %vm428_vm0, %v11420_v30  ;;  %14352 = vst [vmem:[#allocation20_spill] sm:$0xff] %v11487_v51 }
 0x586   :  { %3812 = vmatpush.bf16.msrb.mxu3 %v14349_v44  ;;  %14353 = vst [vmem:[#allocation30_spill] sm:$0xff] %v11491_v11 }
 0x587   :  { %3756 = vmatpush.bf16.msrb.mxu0 %v3349_v4  ;;  %3775 = vmatpush.bf16.msrb.mxu1 %v3350_v54  ;;  %v4059_v54 = vunpack.c.h.b16 %v11143_v46 }
 0x588   :  { %3794 = vmatpush.bf16.msrb.mxu2 %v14350_v33  ;;  %v4038_v33 = vunpack.c.l.b16 %v4004_v25 }
 0x58a   :  { %3813 = vmatpush.bf16.msrb.mxu3 %v14351_v41  ;;  %v4039_v41 = vunpack.c.h.b16 %v4004_v25 }
 0x58b   :  { %3757 = vmatpush.bf16.msrb.mxu0 %v11297_v6  ;;  %3776 = vmatpush.bf16.msrb.mxu1 %v11301_v35  ;;  %v3844_v6 = vmax.f32 %v11225_v24, 0.0  ;;  %v4106_v35 = vunpack.c.l.b16 %v11320_v18 }
 0x58c   :  { %3795 = vmatpush.bf16.msrb.mxu2 %v14345_v62 }
 0x58d   :  { %v4009_v9 = vpack.c.bf16 %v3844_v6, %v3843_v60 }
 0x58e   :  { %3814 = vmatpush.bf16.msrb.mxu3 %v10762_v29  ;;  %v11507_v29 = vpop.f32.mrf.mxu0 }
 0x58f   :  { %3758 = vmatpush.bf16.msrb.mxu0 %v11316_v52  ;;  %3777 = vmatpush.bf16.msrb.mxu1 %v11318_v27  ;;  %v4107_v52 = vunpack.c.h.b16 %v11320_v18  ;;  %v14355_v27 = vld [vmem:[#allocation71_spill] sm:$0xff] }
 0x590   :  { %3796 = vmatpush.bf16.msrb.mxu2 %v14347_v56  ;;  %v3840_v21 = vmax.f32 %v14355_v27, 0.0  ;;  %v4036_v27 = vunpack.c.l.b16 %v4003_v1 }
 0x591   :  { %7204 = vmatmul.msk.bf16.gmra.mxu2 %vm428_vm0, %v11451_v61 }
 0x592   :  { %3815 = vmatpush.bf16.msrb.mxu3 %v14346_v13  ;;  %7200 = vmatmul.msk.bf16.gmra.mxu0 %vm428_vm0, %v11215_v16  ;;  %v4060_v13 = vunpack.c.l.b16 %v4009_v9 }
 0x593   :  { %7202 = vmatmul.msk.bf16.gmra.mxu1 %vm428_vm0, %v11215_v16  ;;  %3759 = vmatpush.bf16.msrb.mxu0 %v11180_v20  ;;  %v4108_v20 = vunpack.c.l.b16 %v11349_v7 }
 0x594   :  { %3778 = vmatpush.bf16.msrb.mxu1 %v11182_v40  ;;  %3797 = vmatpush.bf16.msrb.mxu2 %v10539_v19  ;;  %v4109_v40 = vunpack.c.h.b16 %v11349_v7  ;;  %v14354_v19 = vld [vmem:[#allocation45_spill] sm:$0xff] }
 0x595   :  { %7206 = vmatmul.msk.bf16.gmra.mxu3 %vm428_vm0, %v11451_v61  ;;  %v11527_v18 = vpack.c.b16 %v4108_v20, %v4106_v35 }
 0x596   :  { %3816 = vmatpush.bf16.msrb.mxu3 %v10541_v63  ;;  %v3839_v63 = vmax.f32 %v14354_v19, 0.0  ;;  %v11529_v62 = vpack.c.b16 %v4109_v40, %v4107_v52  ;;  %v4034_v19 = vunpack.c.l.b16 %v11261_v22 }
 0x597   :  { %3760 = vmatpush.bf16.msrb.mxu0 %v11190_v3  ;;  %v4058_v3 = vunpack.c.l.b16 %v11143_v46  ;;  %v14358_v46 = vmax.f32 %v11359_v50, 0.0 }
 0x598   :  { %3779 = vmatpush.bf16.msrb.mxu1 %v11196_v36  ;;  %3798 = vmatpush.bf16.msrb.mxu2 %v14293_v23  ;;  %v4007_v7 = vpack.c.bf16 %v3840_v21, %v3839_v63  ;;  %v4061_v23 = vunpack.c.h.b16 %v4009_v9  ;;  %v4035_v63 = vunpack.c.h.b16 %v11261_v22  ;;  %v4037_v21 = vunpack.c.h.b16 %v4003_v1 }
 0x599   :  { %v4005_v44 = vpack.c.bf16 %v3836_v43, %v14358_v46  ;;  %v11555_v59 = vpack.c.b16 %v4060_v13, %v4058_v3  ;;  %v11597_v34 = vpack.c.b16 %v4036_v27, %v4034_v19 }
 0x59a   :  { %3817 = vmatpush.bf16.msrb.mxu3 %v14294_v38  ;;  %v4056_v49 = vunpack.c.l.b16 %v4007_v7  ;;  %v4057_v55 = vunpack.c.h.b16 %v4007_v7  ;;  %v11557_v8 = vpack.c.b16 %v4061_v23, %v4059_v54  ;;  %v11602_v46 = vpack.c.b16 %v4037_v21, %v4035_v63 }
 0x59b   :  { %v11525_v24 = vpop.f32.mrf.mxu0  ;;  %v11533_v4 = vpop.f32.mrf.mxu1  ;;  %v4040_v60 = vunpack.c.l.b16 %v4005_v44  ;;  %v4041_v52 = vunpack.c.h.b16 %v4005_v44 }
 0x59c   :  { %v13898_v36 = vmax.f32 %v11525_v24, 0.0  ;;  %v13896_v38 = vmax.f32 %v11533_v4, 0.0  ;;  %v11576_v20 = vpack.c.b16 %v4056_v49, %v4054_v2  ;;  %v11578_v26 = vpack.c.b16 %v4057_v55, %v4055_v17 }
 0x59d   :  { %v11589_v3 = vpack.c.b16 %v4040_v60, %v4038_v33  ;;  %v11591_v54 = vpack.c.b16 %v4041_v52, %v4039_v41 }
 0x59e   :  { %v4754_v56 = vpack.c.bf16 %v13896_v38, %v13898_v36 }
 0x5a0   :  { %v4786_v23 = vunpack.c.l.b16 %v4754_v56  ;;  %v4787_v5 = vunpack.c.h.b16 %v4754_v56 }
 0x5a1   :  { %7211 = vmatmul.msk.bf16.vlgmr.msra.gmra.mxu2 %vm428_vm0, %v11178_v45 }
 0x5a2   :  { %7207 = vmatmul.msk.bf16.vlgmr.msra.gmra.mxu0 %vm428_vm0, %v11178_v45  ;;  %4422 = vmatpush.bf16.msra.mxu2 %v11555_v59 }
 0x5a3   :  { %7209 = vmatmul.msk.bf16.vlgmr.msra.gmra.mxu1 %vm428_vm0, %v11178_v45  ;;  %v11571_v43 = vpop.f32.mrf.mxu0  ;;  %v11574_v35 = vpop.f32.mrf.mxu1 }
 0x5a4   :  { %v11563_v50 = vpop.f32.mrf.mxu2  ;;  %v3439_v10 = vpop.f32.mrf.mxu3  ;;  %v13897_v6 = vmax.f32 %v11571_v43, 0.0  ;;  %14361 = vst [vmem:[#allocation26_spill] sm:$0xff] %v11574_v35  ;;  %v13895_v15 = vmax.f32 %v11574_v35, 0.0 }
 0x5a5   :  { %7213 = vmatmul.msk.bf16.vlgmr.msra.gmra.mxu3 %vm428_vm0, %v11178_v45 }
 0x5a6   :  { %4441 = vmatpush.bf16.msra.mxu3 %v11557_v8  ;;  %4423 = vmatpush.bf16.msra.mxu2 %v11576_v20  ;;  %v4755_v40 = vpack.c.bf16 %v13895_v15, %v13897_v6 }
 0x5a8   :  { %v4788_v9 = vunpack.c.l.b16 %v4755_v40  ;;  %v4789_v7 = vunpack.c.h.b16 %v4755_v40 }
 0x5aa   :  { %4442 = vmatpush.bf16.msra.mxu3 %v11578_v26  ;;  %4424 = vmatpush.bf16.msra.mxu2 %v11589_v3  ;;  %v11605_v49 = vpack.c.b16 %v4788_v9, %v4786_v23  ;;  %v11607_v56 = vpack.c.b16 %v4789_v7, %v4787_v5 }
 0x5ab   :  { %v11595_v17 = vpop.f32.mrf.mxu0  ;;  %v11600_v25 = vpop.f32.mrf.mxu1 }
 0x5ac   :  { %v3422_v13 = vpop.f32.mrf.mxu2  ;;  %v3441_v2 = vpop.f32.mrf.mxu3  ;;  %v13900_v22 = vmax.f32 %v11595_v17, 0.0  ;;  %v13902_v44 = vmax.f32 %v11600_v25, 0.0  ;;  %14362 = vst [vmem:[#allocation5_spill] sm:$0xff] %v11605_v49  ;;  %v3852_v49 = vmax.f32 %v11511_v39, 0.0 }
 0x5ad   :  { %14363 = vst [vmem:[#allocation15_spill] sm:$0xff] %v11607_v56 }
 0x5ae   :  { %4443 = vmatpush.bf16.msra.mxu3 %v11591_v54  ;;  %4425 = vmatpush.bf16.msra.mxu2 %v11597_v34  ;;  %v4756_v55 = vpack.c.bf16 %v13902_v44, %v13900_v22 }
 0x5b0   :  { %v4790_v27 = vunpack.c.l.b16 %v4756_v55  ;;  %v4791_v21 = vunpack.c.h.b16 %v4756_v55 }
 0x5b1   :  { %7212 = vmatmul.msk.bf16.gmra.mxu2 %vm428_vm0, %v11215_v16 }
 0x5b2   :  { %4444 = vmatpush.bf16.msra.mxu3 %v11602_v46  ;;  %7208 = vmatmul.msk.bf16.gmra.mxu0 %vm428_vm0, %v11215_v16 }
 0x5b3   :  { %7210 = vmatmul.msk.bf16.gmra.mxu1 %vm428_vm0, %v11215_v16  ;;  %v11627_v1 = vpop.f32.mrf.mxu0  ;;  %v11630_v41 = vpop.f32.mrf.mxu1 }
 0x5b4   :  { %v11623_v53 = vpop.f32.mrf.mxu2  ;;  %v11625_v47 = vpop.f32.mrf.mxu3  ;;  %v13899_v33 = vmax.f32 %v11627_v1, 0.0  ;;  %v13901_v60 = vmax.f32 %v11630_v41, 0.0 }
 0x5b5   :  { %7214 = vmatmul.msk.bf16.gmra.mxu3 %vm428_vm0, %v11215_v16 }
 0x5b6   :  { %v4757_v52 = vpack.c.bf16 %v13901_v60, %v13899_v33 }
 0x5b8   :  { %v4792_v40 = vunpack.c.l.b16 %v4757_v52  ;;  %v4793_v19 = vunpack.c.h.b16 %v4757_v52 }
 0x5ba   :  { %v11641_v23 = vpack.c.b16 %v4792_v40, %v4790_v27  ;;  %v11643_v5 = vpack.c.b16 %v4793_v19, %v4791_v21  ;;  %v11661_v27 = vpop.permute.xlu2 %7843 }
 0x5bb   :  { %v3458_v7 = vpop.f32.mrf.mxu0  ;;  %v3477_v38 = vpop.f32.mrf.mxu1 }
 0x5bc   :  { %v11637_v63 = vpop.f32.mrf.mxu2  ;;  %v11639_v9 = vpop.f32.mrf.mxu3  ;;  %14364 = vst [vmem:[#allocation28_spill] sm:$0xff] %v11641_v23  ;;  %v11646_v15 = vadd.f32 %v3458_v7, %v11563_v50  ;;  %v3478_v6 = vadd.f32 %v3477_v38, %v3439_v10 }
 0x5bd   :  { %14365 = vst [vmem:[#allocation33_spill] sm:$0xff] %v11643_v5 }
 0x5be   :  { %v13903_v36 = vmax.f32 %v11646_v15, 0.0  ;;  %v3862_v33 = vmax.f32 %v3478_v6, 0.0 }
 0x5c0   :  { %v4210_v50 = vpack.c.bf16 %v3862_v33, %v13903_v36 }
 0x5c1   :  { %7219 = vmatmul.msk.bf16.vlgmr.msrb.gmra.mxu2 %vm428_vm0, %v11178_v45 }
 0x5c2   :  { %7215 = vmatmul.msk.bf16.vlgmr.msrb.gmra.mxu0 %vm428_vm0, %v11420_v30  ;;  %v4242_v5 = vunpack.c.l.b16 %v4210_v50 }
 0x5c3   :  { %7217 = vmatmul.msk.bf16.vlgmr.msrb.gmra.mxu1 %vm428_vm0, %v11420_v30  ;;  %v3460_v52 = vpop.f32.mrf.mxu0  ;;  %v3479_v19 = vpop.f32.mrf.mxu1  ;;  %v3847_v30 = vmax.f32 %v11432_v14, 0.0  ;;  %v7846_v14 = vunpack.i.h.bf16 %v11661_v27 }
 0x5c4   :  { %v3496_v55 = vpop.f32.mrf.mxu2  ;;  %v3515_v10 = vpop.f32.mrf.mxu3  ;;  %v11659_v40 = vadd.f32 %v3460_v52, %v3422_v13  ;;  %v3480_v21 = vadd.f32 %v3479_v19, %v3441_v2  ;;  %v3851_v52 = vmax.f32 %v11507_v29, 0.0 }
 0x5c5   :  { %7221 = vmatmul.msk.bf16.vlgmr.msrb.gmra.mxu3 %vm428_vm0, %v11178_v45  ;;  %v3901_v38 = vmax.f32 %v3496_v55, 0.0  ;;  %v3902_v6 = vmax.f32 %v3515_v10, 0.0  ;;  %v3848_v55 = vmax.f32 %v11434_v0, 0.0 }
 0x5c6   :  { %v13907_v45 = vmax.f32 %v11659_v40, 0.0  ;;  %v3864_v56 = vmax.f32 %v3480_v21, 0.0  ;;  %v4073_v35 = vpack.c.bf16 %v3852_v49, %v3851_v52 }
 0x5c7   :  { %v11664_v60 = vpack.c.bf16 %v3902_v6, %v3901_v38  ;;  %v11706_v12 = vpack.c.bf16 %v3848_v55, %v3847_v30 }
 0x5c8   :  { %v4211_v2 = vpack.c.bf16 %v3864_v56, %v13907_v45 }
 0x5c9   :  { %14366 = vst [vmem:[#allocation57_spill] sm:$0xff] %v11664_v60 }
 0x5ca   :  { %v4244_v45 = vunpack.c.l.b16 %v4211_v2  ;;  %v4245_v23 = vunpack.c.h.b16 %v4211_v2 }
 0x5cb   :  { %v7849_v7 = vpop.permute.xlu0 %7848  ;;  %v7859_v22 = vpop.permute.xlu1 %7858 }
 0x5cc   :  { %v7851_v44 = vunpack.i.h.bf16 %v7849_v7  ;;  %v7850_v36 = vunpack.i.l.bf16 %v7849_v7  ;;  %v7861_v10 = vunpack.i.h.bf16 %v7859_v22  ;;  %v7860_v13 = vunpack.i.l.bf16 %v7859_v22  ;;  %v11679_v22 = vpop.f32.mrf.mxu2  ;;  %v11689_v60 = vpop.f32.mrf.mxu3 }
 0x5cd   :  { %14367 = vst [vmem:[#allocation16_spill] sm:$0xff] %v11679_v22  ;;  %v4243_v7 = vunpack.c.h.b16 %v4210_v50 }
 0x5ce   :  { %v3952_v38 = vsel %vm216_vm1, %v7850_v36, %v7860_v13  ;;  %v3953_v6 = vsel %vm216_vm1, %v7851_v44, %v7861_v10  ;;  %v3956_v0 = vsel %vm216_vm1, %v7860_v13, %v7850_v36  ;;  %v3957_v29 = vsel %vm216_vm1, %v7861_v10, %v7851_v44  ;;  %14368 = vst [vmem:[#allocation75_spill] sm:$0xff] %v11689_v60  ;;  %v3463_v36 = vpop.f32.mrf.mxu0  ;;  %v3482_v10 = vpop.f32.mrf.mxu1 }
 0x5cf   :  { %v3962_v39 = vsel %vm8626_vm2, %v3956_v0, 0.0  ;;  %v3963_v19 = vsel %vm8632_vm3, %v3952_v38, 0.0  ;;  %v3965_v21 = vsel %vm8632_vm3, %v3953_v6, 0.0  ;;  %v3964_v13 = vsel %vm8626_vm2, %v3957_v29, 0.0 }
 0x5d0   :  { %v11694_v44 = vadd.f32 %v3463_v36, %v11623_v53  ;;  %v7845_v0 = vunpack.i.l.bf16 %v11661_v27  ;;  %v4000_v22 = vpack.c.bf16 %v3963_v19, %v3962_v39  ;;  %v4001_v38 = vpack.c.bf16 %v3965_v21, %v3964_v13 }
 0x5d1   :  { %v11698_v31 = vadd.f32 %v3482_v10, %v11625_v47  ;;  %v11700_v6 = vpack.c.b16 %v4244_v45, %v4242_v5  ;;  %v11702_v2 = vpack.c.b16 %v4245_v23, %v4243_v7  ;;  %v11704_v60 = vpack.i.bf16 %v3864_v56, %v3862_v33  ;;  %7220 = vmatmul.msk.bf16.gmra.mxu2 %vm428_vm0, %v11215_v16 }
 0x5d2   :  { %v3865_v53 = vmax.f32 %v11694_v44, 0.0  ;;  %7216 = vmatmul.msk.bf16.gmra.mxu0 %vm428_vm0, %v11451_v61  ;;  %v4018_v47 = vunpack.c.l.b16 %v4000_v22  ;;  %v4020_v23 = vunpack.c.l.b16 %v4001_v38  ;;  %v4082_v56 = vunpack.c.l.b16 %v11445_v37 }
 0x5d3   :  { %v7854_v50 = vpop.permute.xlu0 %7853  ;;  %14369 = vst [vmem:[#allocation58_spill] sm:$0xff] %v11700_v6  ;;  %v3866_v27 = vmax.f32 %v11698_v31, 0.0  ;;  %7218 = vmatmul.msk.bf16.gmra.mxu1 %vm428_vm0, %v11451_v61  ;;  %v4019_v33 = vunpack.c.h.b16 %v4000_v22  ;;  %v4021_v22 = vunpack.c.h.b16 %v4001_v38  ;;  %v4083_v39 = vunpack.c.h.b16 %v11445_v37 }
 0x5d4   :  { %14370 = vst [vmem:[#allocation21_spill] sm:$0xff] %v11702_v2  ;;  %v7856_v29 = vunpack.i.h.bf16 %v7854_v50  ;;  %v7855_v36 = vunpack.i.l.bf16 %v7854_v50  ;;  %v3501_v52 = vpop.f32.mrf.mxu2  ;;  %v4084_v19 = vunpack.c.l.b16 %v4073_v35  ;;  %v3520_v13 = vpop.f32.mrf.mxu3 }
 0x5d5   :  { %7222 = vmatmul.msk.bf16.gmra.mxu3 %vm428_vm0, %v11215_v16  ;;  %v11723_v5 = vpack.c.bf16 %v3866_v27, %v3865_v53  ;;  %v3905_v7 = vmax.f32 %v3501_v52, 0.0  ;;  %v3906_v10 = vmax.f32 %v3520_v13, 0.0 }
 0x5d6   :  { %v3951_v49 = vsel %vm216_vm1, %v7846_v14, %v7856_v29  ;;  %v3955_v31 = vsel %vm216_vm1, %v7856_v29, %v7846_v14  ;;  %v3950_v45 = vsel %vm216_vm1, %v7845_v0, %v7855_v36  ;;  %v3954_v16 = vsel %vm216_vm1, %v7855_v36, %v7845_v0  ;;  %v3465_v44 = vpop.f32.mrf.mxu0  ;;  %v3484_v0 = vpop.f32.mrf.mxu1 }
 0x5d7   :  { %v3960_v61 = vsel %vm8626_vm2, %v3955_v31, 0.0  ;;  %v3961_v30 = vsel %vm8632_vm3, %v3951_v49, 0.0  ;;  %v3959_v55 = vsel %vm8632_vm3, %v3950_v45, 0.0  ;;  %v4024_v14 = vpack.c.b16 %v4020_v23, %v4018_v47 }
 0x5d8   :  { %v3958_v21 = vsel %vm8626_vm2, %v3954_v16, 0.0  ;;  %v11739_v50 = vadd.f32 %v3465_v44, %v11637_v63  ;;  %v4025_v29 = vpack.c.b16 %v4021_v22, %v4019_v33  ;;  %v4085_v49 = vunpack.c.h.b16 %v4073_v35 }
 0x5d9   :  { %4426 = vmatpush.bf16.msra.mxu2 %v4024_v14  ;;  %v3998_v36 = vpack.c.bf16 %v3959_v55, %v3958_v21  ;;  %v11742_v38 = vadd.f32 %v3484_v0, %v11639_v9  ;;  %v3999_v37 = vpack.c.bf16 %v3961_v30, %v3960_v61  ;;  %v14371_v47 = vmax.f32 %v11646_v15, 0.0 }
 0x5da   :  { %v14372_v23 = vmax.f32 %v11659_v40, 0.0  ;;  %v11750_v45 = vpack.c.bf16 %v3906_v10, %v3905_v7  ;;  %v13914_v63 = vmax.f32 %v11739_v50, 0.0  ;;  %4445 = vmatpush.bf16.msra.mxu3 %v4025_v29  ;;  %v4078_v9 = vunpack.c.l.b16 %v11414_v48 }
 0x5db   :  { %v4014_v16 = vunpack.c.l.b16 %v3998_v36  ;;  %v4015_v52 = vunpack.c.h.b16 %v3998_v36  ;;  %v13913_v33 = vmax.f32 %v11742_v38, 0.0  ;;  %v4016_v35 = vunpack.c.l.b16 %v3999_v37 }
 0x5dc   :  { %v11748_v31 = vpack.i.bf16 %v14372_v23, %v14371_v47  ;;  %14373 = vst [vmem:[#allocation76_spill] sm:$0xff] %v11750_v45  ;;  %v4017_v55 = vunpack.c.h.b16 %v3999_v37  ;;  %v4079_v61 = vunpack.c.h.b16 %v11414_v48  ;;  %v4080_v15 = vunpack.c.l.b16 %v11706_v12  ;;  %v11762_v21 = vpop.f32.mrf.mxu2  ;;  %v11772_v48 = vpop.f32.mrf.mxu3 }
 0x5dd   :  { %v4022_v40 = vpack.c.b16 %v4016_v35, %v4014_v16  ;;  %v11759_v14 = vpack.i.bf16 %v13914_v63, %v3865_v53  ;;  %v4081_v22 = vunpack.c.h.b16 %v11706_v12  ;;  %14374 = vst [vmem:[#allocation73_spill] sm:$0xff] %v11762_v21  ;;  %v11764_v7 = vpack.c.b16 %v4084_v19, %v4082_v56  ;;  %v11779_v12 = vld [vmem:[%s13606_s5] sm:$0xff] }
 0x5de   :  { %v4023_v30 = vpack.c.b16 %v4017_v55, %v4015_v52  ;;  %v11766_v13 = vpack.c.b16 %v4085_v49, %v4083_v39  ;;  %v11770_v44 = vpack.i.bf16 %v13913_v33, %v3866_v27  ;;  %14377 = vst [vmem:[#allocation31_spill] sm:$0xff] %v11772_v48  ;;  %v11781_v53 = vpack.c.b16 %v4080_v15, %v4078_v9 }
 0x5df   :  { %14375 = vst [vmem:[#allocation74_spill] sm:$0xff] %v11764_v7  ;;  %v3534_v10 = vpop.f32.mrf.mxu0  ;;  %4427 = vmatpush.bf16.msra.mxu2 %v4022_v40  ;;  %v3553_v0 = vpop.f32.mrf.mxu1  ;;  %v11783_v56 = vpack.c.b16 %v4081_v22, %v4079_v61 }
 0x5e0   :  { %14376 = vst [vmem:[#allocation55_spill] sm:$0xff] %v11766_v13  ;;  %4446 = vmatpush.bf16.msra.mxu3 %v4023_v30 }
 0x5e1   :  { %14378 = vst [vmem:[#allocation56_spill] sm:$0xff] %v11781_v53 }
 0x5e2   :  { %14379 = vst [vmem:[#allocation4_spill] sm:$0xff] %v11783_v56  ;;  %7247 = vmatmul.msk.bf16.vlgmr.msra.gmra.mxu2 %vm428_vm0, %v11779_v12 }
 0x5e3   :  { %4498 = vmatpush.bf16.msrb.mxu2 %v11764_v7 }
 0x5e4   :  { %4517 = vmatpush.bf16.msrb.mxu3 %v11766_v13  ;;  %v3572_v27 = vpop.f32.mrf.mxu2 }
 0x5e5   :  { %7249 = vmatmul.msk.bf16.vlgmr.msra.gmra.mxu3 %vm428_vm0, %v11779_v12  ;;  %v3573_v61 = vadd.f32 %v3572_v27, %v3534_v10 }
 0x5e7   :  { %4499 = vmatpush.bf16.msrb.mxu2 %v11781_v53  ;;  %v3536_v19 = vpop.f32.mrf.mxu0  ;;  %v3555_v29 = vpop.f32.mrf.mxu1 }
 0x5e8   :  { %4518 = vmatpush.bf16.msrb.mxu3 %v11783_v56  ;;  %v3591_v39 = vpop.f32.mrf.mxu3 }
 0x5eb   :  { %4500 = vmatpush.bf16.msrb.mxu2 %v11555_v59 }
 0x5ec   :  { %4519 = vmatpush.bf16.msrb.mxu3 %v11557_v8  ;;  %v3574_v36 = vpop.f32.mrf.mxu2 }
 0x5ed   :  { %v3575_v9 = vadd.f32 %v3574_v36, %v3536_v19 }
 0x5ef   :  { %4501 = vmatpush.bf16.msrb.mxu2 %v11576_v20  ;;  %v3539_v37 = vpop.f32.mrf.mxu0  ;;  %v3558_v47 = vpop.f32.mrf.mxu1  ;;  %v3871_v22 = vmax.f32 %v3575_v9, 0.0 }
 0x5f0   :  { %4520 = vmatpush.bf16.msrb.mxu3 %v11578_v26  ;;  %v3593_v49 = vpop.f32.mrf.mxu3 }
 0x5f3   :  { %4502 = vmatpush.bf16.msrb.mxu2 %v11589_v3 }
 0x5f4   :  { %4521 = vmatpush.bf16.msrb.mxu3 %v11591_v54  ;;  %v3577_v23 = vpop.f32.mrf.mxu2  ;;  %v3594_v54 = vadd.f32 %v3593_v49, %v3555_v29 }
 0x5f5   :  { %v3578_v55 = vadd.f32 %v3577_v23, %v3539_v37  ;;  %v3869_v37 = vmax.f32 %v3573_v61, 0.0 }
 0x5f6   :  { %v3872_v33 = vmax.f32 %v3594_v54, 0.0 }
 0x5f7   :  { %4503 = vmatpush.bf16.msrb.mxu2 %v11597_v34  ;;  %v3541_v52 = vpop.f32.mrf.mxu0  ;;  %v3560_v35 = vpop.f32.mrf.mxu1  ;;  %v3592_v34 = vadd.f32 %v3591_v39, %v3553_v0 }
 0x5f8   :  { %4522 = vmatpush.bf16.msrb.mxu3 %v11602_v46  ;;  %v3596_v16 = vpop.f32.mrf.mxu3  ;;  %v3873_v46 = vmax.f32 %v3578_v55, 0.0  ;;  %v4215_v36 = vpack.c.bf16 %v3872_v33, %v3871_v22  ;;  %v14382_v55 = vmax.f32 %v11742_v38, 0.0  ;;  %v4247_v22 = vunpack.c.h.b16 %v11723_v5 }
 0x5f9   :  { %v3597_v3 = vadd.f32 %v3596_v16, %v3558_v47  ;;  %v3870_v47 = vmax.f32 %v3592_v34, 0.0 }
 0x5fa   :  { %v4264_v9 = vunpack.c.l.b16 %v4215_v36  ;;  %v4265_v54 = vunpack.c.h.b16 %v4215_v36 }
 0x5fb   :  { %4574 = vmatpush.bf16.msra.mxu2 %v11527_v18  ;;  %v3874_v15 = vmax.f32 %v3597_v3, 0.0  ;;  %v4214_v23 = vpack.c.bf16 %v3870_v47, %v3869_v37 }
 0x5fc   :  { %4593 = vmatpush.bf16.msra.mxu3 %v11529_v62  ;;  %v3579_v40 = vpop.f32.mrf.mxu2 }
 0x5fd   :  { %v3580_v63 = vadd.f32 %v3579_v40, %v3541_v52  ;;  %v4216_v10 = vpack.c.bf16 %v3874_v15, %v3873_v46  ;;  %v4263_v34 = vunpack.c.h.b16 %v4214_v23 }
 0x5ff   :  { %4575 = vmatpush.bf16.msra.mxu2 %v11487_v51  ;;  %v3610_v48 = vpop.f32.mrf.mxu0  ;;  %v3629_v21 = vpop.f32.mrf.mxu1  ;;  %v3875_v0 = vmax.f32 %v3580_v63, 0.0  ;;  %v4266_v16 = vunpack.c.l.b16 %v4216_v10  ;;  %v4267_v52 = vunpack.c.h.b16 %v4216_v10  ;;  %v11829_v40 = vpack.c.b16 %v4265_v54, %v4263_v34 }
 0x600   :  { %4594 = vmatpush.bf16.msra.mxu3 %v11491_v11  ;;  %v3598_v30 = vpop.f32.mrf.mxu3  ;;  %v3909_v19 = vmax.f32 %v3610_v48, 0.0  ;;  %v3910_v29 = vmax.f32 %v3629_v21, 0.0 }
 0x601   :  { %v3599_v45 = vadd.f32 %v3598_v30, %v3560_v35  ;;  %v14381_v35 = vmax.f32 %v11739_v50, 0.0  ;;  %v4262_v50 = vunpack.c.l.b16 %v4214_v23  ;;  %14386 = vst [vmem:[#allocation9_spill] sm:$0xff] %v11829_v40  ;;  %v4246_v30 = vunpack.c.l.b16 %v11723_v5 }
 0x602   :  { %v11807_v39 = vpack.c.bf16 %v3910_v29, %v3909_v19 }
 0x603   :  { %4576 = vmatpush.bf16.msra.mxu2 %v11764_v7  ;;  %v3876_v27 = vmax.f32 %v3599_v45, 0.0  ;;  %v4213_v3 = vpack.c.bf16 %v14382_v55, %v14381_v35  ;;  %v11827_v15 = vpack.c.b16 %v4264_v9, %v4262_v50 }
 0x604   :  { %4595 = vmatpush.bf16.msra.mxu3 %v11766_v13  ;;  %14380 = vst [vmem:[#allocation86_spill] sm:$0xff] %v11807_v39  ;;  %v3648_v63 = vpop.f32.mrf.mxu2 }
 0x605   :  { %v4217_v49 = vpack.c.bf16 %v3876_v27, %v3875_v0  ;;  %v4248_v38 = vunpack.c.l.b16 %v4213_v3  ;;  %v4249_v46 = vunpack.c.h.b16 %v4213_v3  ;;  %14385 = vst [vmem:[#allocation87_spill] sm:$0xff] %v11827_v15 }
 0x607   :  { %4577 = vmatpush.bf16.msra.mxu2 %v11781_v53  ;;  %v4268_v48 = vunpack.c.l.b16 %v4217_v49  ;;  %v4269_v21 = vunpack.c.h.b16 %v4217_v49  ;;  %v11839_v19 = vpack.c.b16 %v4248_v38, %v4246_v30  ;;  %v11841_v29 = vpack.c.b16 %v4249_v46, %v4247_v22 }
 0x608   :  { %4596 = vmatpush.bf16.msra.mxu3 %v11783_v56  ;;  %v3667_v45 = vpop.f32.mrf.mxu3 }
 0x609   :  { %v11815_v33 = vpack.c.b16 %v4268_v48, %v4266_v16  ;;  %v11817_v61 = vpack.c.b16 %v4269_v21, %v4267_v52  ;;  %14387 = vst [vmem:[#allocation11_spill] sm:$0xff] %v11839_v19 }
 0x60a   :  { %14388 = vst [vmem:[#allocation10_spill] sm:$0xff] %v11841_v29 }
 0x60b   :  { %4578 = vmatpush.bf16.msra.mxu2 %v11555_v59  ;;  %v11819_v59 = vpop.f32.mrf.mxu0  ;;  %4368 = vmatpush.bf16.msra.mxu0 %v11815_v33 }
 0x60c   :  { %4597 = vmatpush.bf16.msra.mxu3 %v11557_v8  ;;  %14383 = vst [vmem:[#allocation89_spill] sm:$0xff] %v11819_v59  ;;  %v11821_v8 = vpop.f32.mrf.mxu1  ;;  %4387 = vmatpush.bf16.msra.mxu1 %v11817_v61 }
 0x60d   :  { %14384 = vst [vmem:[#allocation84_spill] sm:$0xff] %v11821_v8 }
 0x60f   :  { %4579 = vmatpush.bf16.msra.mxu2 %v11576_v20  ;;  %4369 = vmatpush.bf16.msra.mxu0 %v11827_v15  ;;  %v11835_v20 = vpop.f32.mrf.mxu2 }
 0x610   :  { %4598 = vmatpush.bf16.msra.mxu3 %v11578_v26  ;;  %4388 = vmatpush.bf16.msra.mxu1 %v11829_v40  ;;  %v11837_v26 = vpop.f32.mrf.mxu3 }
 0x613   :  { %v3615_v37 = vpop.f32.mrf.mxu0  ;;  %4370 = vmatpush.bf16.msra.mxu0 %v11839_v19 }
 0x614   :  { %v3634_v47 = vpop.f32.mrf.mxu1  ;;  %v3913_v10 = vmax.f32 %v3615_v37, 0.0  ;;  %4389 = vmatpush.bf16.msra.mxu1 %v11841_v29 }
 0x615   :  { %v3914_v0 = vmax.f32 %v3634_v47, 0.0 }
 0x617   :  { %v11845_v5 = vpack.c.bf16 %v3914_v0, %v3913_v10  ;;  %4371 = vmatpush.bf16.msra.mxu0 %v11700_v6  ;;  %v3653_v27 = vpop.f32.mrf.mxu2 }
 0x618   :  { %4390 = vmatpush.bf16.msra.mxu1 %v11702_v2  ;;  %v3672_v36 = vpop.f32.mrf.mxu3 }
 0x619   :  { %14389 = vst [vmem:[#allocation49_spill] sm:$0xff] %v11845_v5 }
 0x61b   :  { %v11849_v49 = vpop.f32.mrf.mxu0 }
 0x61c   :  { %14390 = vst [vmem:[#allocation41_spill] sm:$0xff] %v11849_v49  ;;  %v11851_v23 = vpop.f32.mrf.mxu1 }
 0x61d   :  { %14391 = vst [vmem:[#allocation43_spill] sm:$0xff] %v11851_v23 }
 0x61f   :  { %v11853_v16 = vpop.f32.mrf.mxu2 }
 0x620   :  { %v11855_v52 = vpop.f32.mrf.mxu3 }
 0x623   :  { %v3686_v48 = vpop.f32.mrf.mxu0 }
 0x624   :  { %v3705_v21 = vpop.f32.mrf.mxu1  ;;  %v3687_v35 = vadd.f32 %v3686_v48, %v3648_v63 }
 0x625   :  { %v3706_v55 = vadd.f32 %v3705_v21, %v3667_v45 }
 0x626   :  { %v3877_v3 = vmax.f32 %v3687_v35, 0.0 }
 0x627   :  { %v3878_v9 = vmax.f32 %v3706_v55, 0.0  ;;  %v11859_v50 = vpop.f32.mrf.mxu2 }
 0x628   :  { %v11861_v34 = vpop.f32.mrf.mxu3  ;;  %v13917_v38 = vmax.f32 %v11859_v50, 0.0 }
 0x629   :  { %v11857_v54 = vpack.c.bf16 %v3878_v9, %v3877_v3  ;;  %v13916_v46 = vmax.f32 %v11861_v34, 0.0 }
 0x62b   :  { %v11865_v30 = vpop.f32.mrf.mxu0  ;;  %v4846_v63 = vpack.c.bf16 %v13916_v46, %v13917_v38 }
 0x62c   :  { %v11867_v22 = vpop.f32.mrf.mxu1 }
 0x62d   :  { %v4854_v46 = vunpack.c.l.b16 %v4846_v63  ;;  %v4855_v38 = vunpack.c.h.b16 %v4846_v63 }
 0x62f   :  { %v11873_v45 = vpop.f32.mrf.mxu2 }
 0x630   :  { %v11875_v37 = vpop.f32.mrf.mxu3  ;;  %v13921_v47 = vmax.f32 %v11873_v45, 0.0 }
 0x631   :  { %v13920_v10 = vmax.f32 %v11875_v37, 0.0 }
 0x633   :  { %v3691_v0 = vpop.f32.mrf.mxu0  ;;  %v4847_v55 = vpack.c.bf16 %v13920_v10, %v13921_v47 }
 0x634   :  { %v3710_v48 = vpop.f32.mrf.mxu1  ;;  %v3692_v21 = vadd.f32 %v3691_v0, %v3653_v27 }
 0x635   :  { %v3711_v35 = vadd.f32 %v3710_v48, %v3672_v36  ;;  %v4856_v39 = vunpack.c.l.b16 %v4847_v55  ;;  %v4857_v5 = vunpack.c.h.b16 %v4847_v55 }
 0x636   :  { %v3881_v3 = vmax.f32 %v3692_v21, 0.0 }
 0x637   :  { %v3882_v9 = vmax.f32 %v3711_v35, 0.0  ;;  %v11885_v59 = vpack.c.b16 %v4856_v39, %v4854_v46  ;;  %v11887_v23 = vpack.c.b16 %v4857_v5, %v4855_v38  ;;  %v11889_v49 = vpop.f32.mrf.mxu2 }
 0x638   :  { %v11891_v27 = vpop.f32.mrf.mxu3  ;;  %v13924_v36 = vmax.f32 %v11889_v49, 0.0 }
 0x639   :  { %v11883_v8 = vpack.c.bf16 %v3882_v9, %v3881_v3  ;;  %14392 = vst [vmem:[#allocation46_spill] sm:$0xff] %v11885_v59  ;;  %v13923_v0 = vmax.f32 %v11891_v27, 0.0 }
 0x63a   :  { %14393 = vst [vmem:[#allocation45_spill] sm:$0xff] %v11887_v23 }
 0x63b   :  { %v11895_v48 = vpop.f32.mrf.mxu0  ;;  %v4848_v39 = vpack.c.bf16 %v13923_v0, %v13924_v36 }
 0x63c   :  { %v11897_v21 = vpop.f32.mrf.mxu1 }
 0x63d   :  { %v4858_v9 = vunpack.c.l.b16 %v4848_v39  ;;  %v4859_v10 = vunpack.c.h.b16 %v4848_v39 }
 0x63f   :  { %v11903_v46 = vpop.f32.mrf.mxu2 }
 0x640   :  { %v11905_v5 = vpop.f32.mrf.mxu3  ;;  %v13942_v38 = vmax.f32 %v11903_v46, 0.0 }
 0x641   :  { %v13941_v63 = vmax.f32 %v11905_v5, 0.0 }
 0x643   :  { %v3762_v35 = vpop.f32.mrf.mxu0  ;;  %v4849_v3 = vpack.c.bf16 %v13941_v63, %v13942_v38 }
 0x644   :  { %v3781_v55 = vpop.f32.mrf.mxu1 }
 0x645   :  { %v4860_v47 = vunpack.c.l.b16 %v4849_v3  ;;  %v4861_v23 = vunpack.c.h.b16 %v4849_v3 }
 0x647   :  { %v11913_v0 = vpack.c.b16 %v4860_v47, %v4858_v9  ;;  %v11915_v36 = vpack.c.b16 %v4861_v23, %v4859_v10  ;;  %v3800_v59 = vpop.f32.mrf.mxu2 }
 0x648   :  { %v3819_v56 = vpop.f32.mrf.mxu3  ;;  %v3801_v2 = vadd.f32 %v3800_v59, %v3762_v35 }
 0x649   :  { %14394 = vst [vmem:[#allocation71_spill] sm:$0xff] %v11913_v0  ;;  %v3820_v53 = vadd.f32 %v3819_v56, %v3781_v55 }
 0x64a   :  { %14395 = vst [vmem:[#allocation44_spill] sm:$0xff] %v11915_v36  ;;  %v3885_v13 = vmax.f32 %v3801_v2, 0.0 }
 0x64b   :  { %v3886_v29 = vmax.f32 %v3820_v53, 0.0  ;;  %v3764_v7 = vpop.f32.mrf.mxu0 }
 0x64c   :  { %v3783_v6 = vpop.f32.mrf.mxu1 }
 0x64d   :  { %v4302_v19 = vpack.c.bf16 %v3886_v29, %v3885_v13 }
 0x64f   :  { %v3802_v11 = vpop.f32.mrf.mxu2  ;;  %v4310_v10 = vunpack.c.l.b16 %v4302_v19  ;;  %v4311_v36 = vunpack.c.h.b16 %v4302_v19 }
 0x650   :  { %v3821_v40 = vpop.f32.mrf.mxu3  ;;  %v3803_v63 = vadd.f32 %v3802_v11, %v3764_v7 }
 0x651   :  { %v3822_v38 = vadd.f32 %v3821_v40, %v3783_v6 }
 0x652   :  { %v3887_v39 = vmax.f32 %v3803_v63, 0.0 }
 0x653   :  { %v3888_v51 = vmax.f32 %v3822_v38, 0.0  ;;  %v3767_v9 = vpop.f32.mrf.mxu0 }
 0x654   :  { %v3786_v3 = vpop.f32.mrf.mxu1  ;;  %v7872_v23 = vpack.i.bf16 %v3887_v39, %v3885_v13 }
 0x655   :  { %v4303_v47 = vpack.c.bf16 %v3888_v51, %v3887_v39 }
 0x656   :  { %7873 = vrot.lane.b32.xlu0 %v7872_v23, %s8144_s0 }
 0x657   :  { %v4312_v0 = vunpack.c.l.b16 %v4303_v47  ;;  %v4313_v59 = vunpack.c.h.b16 %v4303_v47  ;;  %v3805_v2 = vpop.f32.mrf.mxu2 }
 0x658   :  { %v3824_v53 = vpop.f32.mrf.mxu3  ;;  %v3806_v56 = vadd.f32 %v3805_v2, %v3767_v9 }
 0x659   :  { %v3825_v35 = vadd.f32 %v3824_v53, %v3786_v3  ;;  %v11918_v55 = vpack.c.b16 %v4312_v0, %v4310_v10  ;;  %v11920_v11 = vpack.c.b16 %v4313_v59, %v4311_v36 }
 0x65a   :  { %v3889_v6 = vmax.f32 %v3806_v56, 0.0  ;;  %v7877_v56 = vpack.i.bf16 %v3888_v51, %v3886_v29  ;;  %v14400_v51 = vmax.f32 %v11600_v25, 0.0  ;;  %v14405_v25 = vmax.f32 %v11905_v5, 0.0 }
 0x65b   :  { %v3890_v7 = vmax.f32 %v3825_v35, 0.0  ;;  %v3769_v63 = vpop.f32.mrf.mxu0  ;;  %v14397_v35 = vmax.f32 %v11873_v45, 0.0  ;;  %v14403_v45 = vmax.f32 %v11903_v46, 0.0  ;;  %v14410_v5 = vmax.f32 %v11525_v24, 0.0 }
 0x65c   :  { %v3788_v38 = vpop.f32.mrf.mxu1 }
 0x65d   :  { %v4304_v40 = vpack.c.bf16 %v3890_v7, %v3889_v6 }
 0x65e   :  { %7888 = vrot.lane.b32.xlu0 %v11391_v57, %s8145_s19 }
 0x65f   :  { %v3807_v13 = vpop.f32.mrf.mxu2  ;;  %v4314_v10 = vunpack.c.l.b16 %v4304_v40  ;;  %v4315_v36 = vunpack.c.h.b16 %v4304_v40 }
 0x660   :  { %v3826_v19 = vpop.f32.mrf.mxu3  ;;  %v3808_v39 = vadd.f32 %v3807_v13, %v3769_v63  ;;  %v14411_v13 = vmax.f32 %v11571_v43, 0.0 }
 0x661   :  { %v3827_v47 = vadd.f32 %v3826_v19, %v3788_v38  ;;  %v14404_v38 = vmax.f32 %v11891_v27, 0.0  ;;  %v14409_v27 = vmax.f32 %v11875_v37, 0.0 }
 0x662   :  { %v3891_v23 = vmax.f32 %v3808_v39, 0.0  ;;  %v7952_v19 = vpack.i.bf16 %v14411_v13, %v14410_v5  ;;  %v14412_v39 = vmax.f32 %v11533_v4, 0.0 }
 0x663   :  { %v3892_v15 = vmax.f32 %v3827_v47, 0.0  ;;  %v7927_v63 = vpack.i.bf16 %v14405_v25, %v14404_v38 }
 0x664   :  { %v7862_v0 = vpack.i.bf16 %v3891_v23, %v3889_v6 }
 0x665   :  { %v4305_v9 = vpack.c.bf16 %v3892_v15, %v3891_v23  ;;  %v7867_v3 = vpack.i.bf16 %v3892_v15, %v3890_v7  ;;  %v14396_v15 = vmax.f32 %v11859_v50, 0.0  ;;  %v14399_v7 = vld [vmem:[#allocation85_spill] sm:$0xff]  ;;  %v14402_v50 = vmax.f32 %v11889_v49, 0.0 }
 0x666   :  { %7863 = vrot.lane.b32.xlu1 %v7862_v0, %s8144_s0  ;;  %7903 = vrot.lane.b32.xlu0 %v11759_v14, %s8145_s19  ;;  %v14398_v14 = vld [vmem:[#allocation12_spill] sm:$0xff]  ;;  %v14408_v49 = vmax.f32 %v11861_v34, 0.0 }
 0x667   :  { %v4316_v59 = vunpack.c.l.b16 %v4305_v9  ;;  %v4317_v2 = vunpack.c.h.b16 %v4305_v9  ;;  %7868 = vrot.lane.b32.xlu2 %v7867_v3, %s8144_s0  ;;  %v7932_v6 = vpack.i.bf16 %v14397_v35, %v14396_v15  ;;  %v7922_v40 = vpack.i.bf16 %v14403_v45, %v14402_v50 }
 0x668   :  { %v7937_v46 = vpack.i.bf16 %v14409_v27, %v14408_v49 }
 0x669   :  { %v11928_v57 = vpack.c.b16 %v4316_v59, %v4314_v10  ;;  %v11930_v53 = vpack.c.b16 %v4317_v2, %v4315_v36 }
 0x66e   :  { %7878 = vrot.lane.b32.xlu1 %v7877_v56, %s8144_s0  ;;  %7918 = vrot.lane.b32.xlu0 %v11704_v60, %s8145_s19  ;;  %v14401_v60 = vmax.f32 %v11630_v41, 0.0  ;;  %v14406_v41 = vmax.f32 %v11595_v17, 0.0  ;;  %v14413_v17 = vld [vmem:[#allocation26_spill] sm:$0xff] }
 0x66f   :  { %7883 = vrot.lane.b32.xlu2 %v11385_v28, %s8145_s19  ;;  %v11948_v28 = vld [vmem:[%s13606_s5 + $0x8] sm:$0xff]  ;;  %v14414_v47 = vmax.f32 %v14413_v17, 0.0 }
 0x670   :  { %7248 = vmatmul.msk.bf16.gmra.mxu2 %vm428_vm0, %v11948_v28  ;;  %7250 = vmatmul.msk.bf16.gmra.mxu3 %vm428_vm0, %v11948_v28  ;;  %v7947_v29 = vpack.i.bf16 %v14401_v60, %v14400_v51 }
 0x676   :  { %7893 = vrot.lane.b32.xlu1 %v14399_v7, %s8145_s19  ;;  %7933 = vrot.lane.b32.xlu0 %v7932_v6, %s8144_s0 }
 0x677   :  { %7898 = vrot.lane.b32.xlu2 %v14398_v14, %s8145_s19 }
 0x67e   :  { %7908 = vrot.lane.b32.xlu1 %v11770_v44, %s8145_s19  ;;  %7948 = vrot.lane.b32.xlu0 %v7947_v29, %s8145_s19 }
 0x67f   :  { %7913 = vrot.lane.b32.xlu2 %v11748_v31, %s8145_s19  ;;  %v14407_v31 = vmax.f32 %v11627_v1, 0.0  ;;  %v7957_v1 = vpack.i.bf16 %v14414_v47, %v14412_v39  ;;  %v3694_v47 = vadd.f32 %v11895_v48, %v11853_v16 }
 0x680   :  { %7255 = vmatmul.msk.bf16.vlgmr.msrb.gmra.mxu2 %vm428_vm0, %v11779_v12  ;;  %7257 = vmatmul.msk.bf16.vlgmr.msrb.gmra.mxu3 %vm428_vm0, %v11779_v12 }
 0x681   :  { %v7942_v44 = vpack.i.bf16 %v14407_v31, %v14406_v41  ;;  %v3689_v31 = vadd.f32 %v11865_v30, %v11835_v20 }
 0x686   :  { %7923 = vrot.lane.b32.xlu1 %v7922_v40, %s8144_s0 }
 0x687   :  { %7928 = vrot.lane.b32.xlu2 %v7927_v63, %s8144_s0 }
 0x68e   :  { %7938 = vrot.lane.b32.xlu1 %v7937_v46, %s8144_s0 }
 0x68f   :  { %7943 = vrot.lane.b32.xlu2 %v7942_v44, %s8145_s19  ;;  %v3708_v44 = vadd.f32 %v11867_v22, %v11837_v26 }
 0x690   :  { %7256 = vmatmul.msk.bf16.gmra.mxu2 %vm428_vm0, %v11948_v28  ;;  %7258 = vmatmul.msk.bf16.gmra.mxu3 %vm428_vm0, %v11948_v28 }
 0x696   :  { %7953 = vrot.lane.b32.xlu1 %v7952_v19, %s8145_s19 }
 0x697   :  { %7958 = vrot.lane.b32.xlu2 %v7957_v1, %s8145_s19  ;;  %v3713_v1 = vadd.f32 %v11897_v21, %v11855_v52 }
 0x6a0   :  { %7263 = vmatmul.msk.bf16.vlgmr.msra.gmra.mxu2 %vm428_vm0, %v11779_v12  ;;  %7265 = vmatmul.msk.bf16.vlgmr.msra.gmra.mxu3 %vm428_vm0, %v11779_v12 }
 0x6b0   :  { %7264 = vmatmul.msk.bf16.gmra.mxu2 %vm428_vm0, %v11948_v28  ;;  %7266 = vmatmul.msk.bf16.gmra.mxu3 %vm428_vm0, %v11948_v28 }
 0x6c1   :  { %v7869_v24 = vpop.permute.xlu2 %7868 }
 0x6c2   :  { %v7871_v38 = vunpack.i.h.bf16 %v7869_v24  ;;  %v7870_v25 = vunpack.i.l.bf16 %v7869_v24 }
 0x6c8   :  { %v12010_v4 = vpop.permute.xlu0 %7873 }
 0x6c9   :  { %v7884_v43 = vpop.permute.xlu2 %7883 }
 0x6ca   :  { %v7886_v37 = vunpack.i.h.bf16 %v7884_v43  ;;  %v7885_v23 = vunpack.i.l.bf16 %v7884_v43 }
 0x6d0   :  { %v7889_v34 = vpop.permute.xlu0 %7888 }
 0x6d1   :  { %v7891_v9 = vunpack.i.h.bf16 %v7889_v34  ;;  %v7890_v3 = vunpack.i.l.bf16 %v7889_v34 }
 0x6d3   :  { %v3985_v0 = vsel %vm253_vm4, %v7886_v37, %v7891_v9  ;;  %v3989_v10 = vsel %vm253_vm4, %v7891_v9, %v7886_v37  ;;  %v3984_v36 = vsel %vm253_vm4, %v7885_v23, %v7890_v3  ;;  %v3988_v59 = vsel %vm253_vm4, %v7890_v3, %v7885_v23 }
 0x6d4   :  { %v3996_v56 = vsel %vm8708_vm5, %v3985_v0, 0.0  ;;  %v3997_v35 = vsel %vm8714_vm6, %v3989_v10, 0.0  ;;  %v3994_v6 = vsel %vm8708_vm5, %v3984_v36, 0.0  ;;  %v3995_v14 = vsel %vm8714_vm6, %v3988_v59, 0.0 }
 0x6d5   :  { %v4121_v7 = vpack.c.bf16 %v3997_v35, %v3996_v56  ;;  %v4120_v51 = vpack.c.bf16 %v3995_v14, %v3994_v6  ;;  %v3879_v23 = vmax.f32 %v3689_v31, 0.0  ;;  %v3880_v9 = vmax.f32 %v3708_v44, 0.0 }
 0x6d6   :  { %v7876_v0 = vunpack.i.h.bf16 %v12010_v4  ;;  %v7875_v10 = vunpack.i.l.bf16 %v12010_v4  ;;  %v3883_v56 = vmax.f32 %v3694_v47, 0.0  ;;  %v3884_v35 = vmax.f32 %v3713_v1, 0.0 }
 0x6d7   :  { %v4130_v60 = vunpack.c.l.b16 %v4120_v51  ;;  %v4132_v29 = vunpack.c.l.b16 %v4121_v7  ;;  %v4131_v50 = vunpack.c.h.b16 %v4120_v51  ;;  %v4133_v45 = vunpack.c.h.b16 %v4121_v7 }
 0x6d8   :  { %v7864_v40 = vpop.permute.xlu1 %7863 }
 0x6d9   :  { %v7866_v63 = vunpack.i.h.bf16 %v7864_v40  ;;  %v7865_v41 = vunpack.i.l.bf16 %v7864_v40  ;;  %v4136_v49 = vpack.c.b16 %v4132_v29, %v4130_v60  ;;  %v4137_v27 = vpack.c.b16 %v4133_v45, %v4131_v50  ;;  %v7899_v50 = vpop.permute.xlu2 %7898 }
 0x6da   :  { %v4281_v29 = vpack.c.bf16 %v3884_v35, %v3883_v56  ;;  %v7900_v31 = vunpack.i.l.bf16 %v7899_v50 }
 0x6db   :  { %v4161_v46 = vsel %vm216_vm1, %v7866_v63, %v7871_v38  ;;  %v4165_v5 = vsel %vm216_vm1, %v7871_v38, %v7866_v63  ;;  %v4160_v13 = vsel %vm216_vm1, %v7865_v41, %v7870_v25  ;;  %v4164_v19 = vsel %vm216_vm1, %v7870_v25, %v7865_v41  ;;  %4650 = vmatpush.bf16.msrb.mxu2 %v4136_v49 }
 0x6dc   :  { %v4172_v20 = vsel %vm8626_vm2, %v4165_v5, 0.0  ;;  %v4173_v26 = vsel %vm8632_vm3, %v4161_v46, 0.0  ;;  %v4170_v30 = vsel %vm8626_vm2, %v4164_v19, 0.0  ;;  %v4171_v22 = vsel %vm8632_vm3, %v4160_v13, 0.0  ;;  %4669 = vmatpush.bf16.msrb.mxu3 %v4137_v27 }
 0x6dd   :  { %v4208_v39 = vpack.c.bf16 %v4171_v22, %v4170_v30  ;;  %v4209_v17 = vpack.c.bf16 %v4173_v26, %v4172_v20  ;;  %v4279_v38 = vpack.c.bf16 %v3880_v9, %v3879_v23  ;;  %v4290_v25 = vunpack.c.l.b16 %v11883_v8 }
 0x6de   :  { %v7901_v41 = vunpack.i.h.bf16 %v7899_v50  ;;  %v4292_v27 = vunpack.c.l.b16 %v4281_v29  ;;  %v4293_v46 = vunpack.c.h.b16 %v4281_v29  ;;  %v4291_v23 = vunpack.c.h.b16 %v11883_v8  ;;  %v14418_v29 = vld [vmem:[#allocation20_spill] sm:$0xff]  ;;  %v14419_v50 = vld [vmem:[#allocation9_spill] sm:$0xff] }
 0x6df   :  { %v4226_v24 = vunpack.c.l.b16 %v4208_v39  ;;  %v4228_v43 = vunpack.c.l.b16 %v4209_v17  ;;  %v4227_v34 = vunpack.c.h.b16 %v4208_v39  ;;  %v4229_v37 = vunpack.c.h.b16 %v4209_v17 }
 0x6e0   :  { %v7879_v3 = vpop.permute.xlu1 %7878  ;;  %v12096_v9 = vpack.c.b16 %v4292_v27, %v4290_v25  ;;  %v4289_v35 = vunpack.c.h.b16 %v4279_v38 }
 0x6e1   :  { %v7881_v36 = vunpack.i.h.bf16 %v7879_v3  ;;  %v7880_v59 = vunpack.i.l.bf16 %v7879_v3  ;;  %v12054_v6 = vpack.c.b16 %v4228_v43, %v4226_v24  ;;  %v12056_v16 = vpack.c.b16 %v4229_v37, %v4227_v34  ;;  %v12101_v3 = vld [vmem:[%s13606_s5 + $0x10] sm:$0xff] }
 0x6e2   :  { %v4288_v37 = vunpack.c.l.b16 %v4279_v38  ;;  %v14421_v38 = vld [vmem:[#allocation11_spill] sm:$0xff] }
 0x6e3   :  { %v4159_v52 = vsel %vm216_vm1, %v7876_v0, %v7881_v36  ;;  %v4163_v48 = vsel %vm216_vm1, %v7881_v36, %v7876_v0  ;;  %v4158_v21 = vsel %vm216_vm1, %v7875_v10, %v7880_v59  ;;  %v4162_v4 = vsel %vm216_vm1, %v7880_v59, %v7875_v10  ;;  %4372 = vmatpush.bf16.msra.mxu0 %v12054_v6 }
 0x6e4   :  { %v4168_v14 = vsel %vm8626_vm2, %v4163_v48, 0.0  ;;  %v4169_v7 = vsel %vm8632_vm3, %v4159_v52, 0.0  ;;  %v4166_v51 = vsel %vm8626_vm2, %v4162_v4, 0.0  ;;  %v4167_v60 = vsel %vm8632_vm3, %v4158_v21, 0.0  ;;  %4391 = vmatpush.bf16.msra.mxu1 %v12056_v16 }
 0x6e5   :  { %v4206_v45 = vpack.c.bf16 %v4167_v60, %v4166_v51  ;;  %v4207_v40 = vpack.c.bf16 %v4169_v7, %v4168_v14  ;;  %v4286_v10 = vunpack.c.l.b16 %v11857_v54  ;;  %v12107_v52 = vpack.c.b16 %v4293_v46, %v4291_v23  ;;  %v14417_v60 = vld [vmem:[#allocation87_spill] sm:$0xff]  ;;  %v14427_v46 = vld [vmem:[#allocation21_spill] sm:$0xff] }
 0x6e6   :  { %v4287_v21 = vunpack.c.h.b16 %v11857_v54  ;;  %v7904_v54 = vpop.permute.xlu0 %7903 }
 0x6e7   :  { %v4222_v5 = vunpack.c.l.b16 %v4206_v45  ;;  %v4224_v13 = vunpack.c.l.b16 %v4207_v40  ;;  %v4223_v24 = vunpack.c.h.b16 %v4206_v45  ;;  %v4225_v43 = vunpack.c.h.b16 %v4207_v40  ;;  %v14420_v45 = vld [vmem:[#allocation30_spill] sm:$0xff]  ;;  %v12134_v40 = vld [vmem:[%s13606_s5 + $0x18] sm:$0xff] }
 0x6e8   :  { %v7894_v63 = vpop.permute.xlu1 %7893  ;;  %v12112_v4 = vpack.c.b16 %v4288_v37, %v4286_v10  ;;  %v12117_v51 = vpack.c.b16 %v4289_v35, %v4287_v21 }
 0x6e9   :  { %v7896_v44 = vunpack.i.h.bf16 %v7894_v63  ;;  %v7895_v49 = vunpack.i.l.bf16 %v7894_v63  ;;  %v12093_v1 = vpack.c.b16 %v4224_v13, %v4222_v5  ;;  %v12105_v36 = vpack.c.b16 %v4225_v43, %v4223_v24  ;;  %v14424_v63 = vld [vmem:[#allocation55_spill] sm:$0xff]  ;;  %v14428_v13 = vld [vmem:[#allocation4_spill] sm:$0xff] }
 0x6ea   :  { %v7905_v5 = vunpack.i.l.bf16 %v7904_v54 }
 0x6eb   :  { %v3983_v19 = vsel %vm253_vm4, %v7896_v44, %v7901_v41  ;;  %v3987_v20 = vsel %vm253_vm4, %v7901_v41, %v7896_v44  ;;  %v3982_v26 = vsel %vm253_vm4, %v7895_v49, %v7900_v31  ;;  %v3986_v30 = vsel %vm253_vm4, %v7900_v31, %v7895_v49  ;;  %4373 = vmatpush.bf16.msra.mxu0 %v12093_v1  ;;  %v14425_v41 = vld [vmem:[#allocation58_spill] sm:$0xff]  ;;  %v14426_v44 = vld [vmem:[#allocation56_spill] sm:$0xff] }
 0x6ec   :  { %v3992_v22 = vsel %vm8708_vm5, %v3983_v19, 0.0  ;;  %v3993_v39 = vsel %vm8714_vm6, %v3987_v20, 0.0  ;;  %v3990_v17 = vsel %vm8708_vm5, %v3982_v26, 0.0  ;;  %v3991_v47 = vsel %vm8714_vm6, %v3986_v30, 0.0  ;;  %4392 = vmatpush.bf16.msra.mxu1 %v12105_v36  ;;  %v7914_v20 = vpop.permute.xlu2 %7913 }
 0x6ed   :  { %v4118_v34 = vpack.c.bf16 %v3991_v47, %v3990_v17  ;;  %v4119_v0 = vpack.c.bf16 %v3993_v39, %v3992_v22  ;;  %v7906_v19 = vunpack.i.h.bf16 %v7904_v54  ;;  %v7916_v24 = vunpack.i.h.bf16 %v7914_v20 }
 0x6ee   :  { %7235 = vmatmul.msk.bf16.vlgmr.msra.gmra.mxu0 %vm428_vm0, %v12101_v3  ;;  %v7919_v49 = vpop.permute.xlu0 %7918  ;;  %v7915_v43 = vunpack.i.l.bf16 %v7914_v20  ;;  %v14430_v20 = vld [vmem:[#allocation31_spill] sm:$0xff] }
 0x6ef   :  { %v4126_v59 = vunpack.c.l.b16 %v4118_v34  ;;  %v4127_v56 = vunpack.c.h.b16 %v4118_v34  ;;  %4460 = vmatpush.bf16.msrb.mxu0 %v12096_v9  ;;  %v4128_v8 = vunpack.c.l.b16 %v4119_v0  ;;  %v4129_v48 = vunpack.c.h.b16 %v4119_v0  ;;  %7237 = vmatmul.msk.bf16.vlgmr.msra.gmra.mxu1 %vm428_vm0, %v12101_v3 }
 0x6f0   :  { %4479 = vmatpush.bf16.msrb.mxu1 %v12107_v52  ;;  %v7909_v25 = vpop.permute.xlu1 %7908  ;;  %v7921_v26 = vunpack.i.h.bf16 %v7919_v49  ;;  %v7920_v22 = vunpack.i.l.bf16 %v7919_v49 }
 0x6f1   :  { %v4134_v14 = vpack.c.b16 %v4128_v8, %v4126_v59  ;;  %v4135_v7 = vpack.c.b16 %v4129_v48, %v4127_v56  ;;  %v7910_v31 = vunpack.i.l.bf16 %v7909_v25  ;;  %v7911_v27 = vunpack.i.h.bf16 %v7909_v25 }
 0x6f2   :  { %v4190_v10 = vsel %vm253_vm4, %v7915_v43, %v7920_v22  ;;  %v4191_v59 = vsel %vm253_vm4, %v7916_v24, %v7921_v26  ;;  %v4194_v56 = vsel %vm253_vm4, %v7920_v22, %v7915_v43  ;;  %v4195_v35 = vsel %vm253_vm4, %v7921_v26, %v7916_v24  ;;  %v14431_v22 = vld [vmem:[#allocation16_spill] sm:$0xff] }
 0x6f3   :  { %4461 = vmatpush.bf16.msrb.mxu0 %v12112_v4  ;;  %4651 = vmatpush.bf16.msrb.mxu2 %v4134_v14  ;;  %v4192_v30 = vsel %vm253_vm4, %v7905_v5, %v7910_v31  ;;  %v4193_v39 = vsel %vm253_vm4, %v7906_v19, %v7911_v27  ;;  %v4196_v17 = vsel %vm253_vm4, %v7910_v31, %v7905_v5  ;;  %v4198_v21 = vsel %vm8708_vm5, %v4190_v10, 0.0  ;;  %v14433_v10 = vld [vmem:[#allocation76_spill] sm:$0xff] }
 0x6f4   :  { %4480 = vmatpush.bf16.msrb.mxu1 %v12117_v51  ;;  %4670 = vmatpush.bf16.msrb.mxu3 %v4135_v7  ;;  %v4197_v47 = vsel %vm253_vm4, %v7911_v27, %v7906_v19  ;;  %v4202_v34 = vsel %vm8708_vm5, %v4192_v30, 0.0  ;;  %v4203_v37 = vsel %vm8714_vm6, %v4196_v17, 0.0  ;;  %v4204_v23 = vsel %vm8708_vm5, %v4193_v39, 0.0  ;;  %v14432_v17 = vld [vmem:[#allocation75_spill] sm:$0xff] }
 0x6f5   :  { %v4205_v0 = vsel %vm8714_vm6, %v4197_v47, 0.0  ;;  %v4328_v8 = vpack.c.bf16 %v4203_v37, %v4202_v34  ;;  %v4199_v14 = vsel %vm8714_vm6, %v4194_v56, 0.0  ;;  %v4200_v7 = vsel %vm8708_vm5, %v4191_v59, 0.0  ;;  %v7929_v37 = vpop.permute.xlu2 %7928 }
 0x6f6   :  { %v4329_v48 = vpack.c.bf16 %v4205_v0, %v4204_v23  ;;  %v4201_v54 = vsel %vm8714_vm6, %v4195_v35, 0.0  ;;  %v3908_v26 = vmax.f32 %v14430_v20, 0.0  ;;  %v3903_v39 = vmax.f32 %v14431_v22, 0.0 }
 0x6f7   :  { %4462 = vmatpush.bf16.msrb.mxu0 %v11815_v33  ;;  %4652 = vmatpush.bf16.msrb.mxu2 %v11527_v18  ;;  %v14422_v18 = vld [vmem:[#allocation74_spill] sm:$0xff]  ;;  %v4327_v25 = vpack.c.bf16 %v4201_v54, %v4200_v7  ;;  %v3904_v47 = vmax.f32 %v14432_v17, 0.0  ;;  %v4810_v59 = vunpack.c.l.b16 %v14433_v10  ;;  %v7931_v54 = vunpack.i.h.bf16 %v7929_v37 }
 0x6f8   :  { %4481 = vmatpush.bf16.msrb.mxu1 %v11817_v61  ;;  %4671 = vmatpush.bf16.msrb.mxu3 %v11529_v62  ;;  %v14423_v62 = vld [vmem:[#allocation10_spill] sm:$0xff]  ;;  %v4341_v31 = vunpack.c.h.b16 %v4329_v48  ;;  %v7924_v30 = vpop.permute.xlu1 %7923 }
 0x6f9   :  { %v4336_v27 = vunpack.c.l.b16 %v4327_v25  ;;  %v4759_v43 = vpack.c.bf16 %v3904_v47, %v3903_v39  ;;  %v7925_v0 = vunpack.i.l.bf16 %v7924_v30  ;;  %v7926_v56 = vunpack.i.h.bf16 %v7924_v30 }
 0x6fb   :  { %4463 = vmatpush.bf16.msrb.mxu0 %v14417_v60  ;;  %4653 = vmatpush.bf16.msrb.mxu2 %v14418_v29  ;;  %v4338_v29 = vunpack.c.l.b16 %v4328_v8  ;;  %v4809_v7 = vunpack.c.h.b16 %v4759_v43 }
 0x6fc   :  { %4482 = vmatpush.bf16.msrb.mxu1 %v14419_v50  ;;  %4672 = vmatpush.bf16.msrb.mxu3 %v14420_v45  ;;  %v4340_v45 = vunpack.c.l.b16 %v4329_v48 }
 0x6fe   :  { %7236 = vmatmul.msk.bf16.gmra.mxu0 %vm428_vm0, %v12134_v40 }
 0x6ff   :  { %4464 = vmatpush.bf16.msrb.mxu0 %v14421_v38  ;;  %4654 = vmatpush.bf16.msrb.mxu2 %v14422_v18  ;;  %v4326_v18 = vpack.c.bf16 %v4199_v14, %v4198_v21  ;;  %v7930_v21 = vunpack.i.l.bf16 %v7929_v37  ;;  %v4808_v14 = vunpack.c.l.b16 %v4759_v43 }
 0x700   :  { %4483 = vmatpush.bf16.msrb.mxu1 %v14423_v62  ;;  %4673 = vmatpush.bf16.msrb.mxu3 %v14424_v63  ;;  %v4339_v63 = vunpack.c.h.b16 %v4328_v8  ;;  %v7939_v35 = vpop.permute.xlu1 %7938  ;;  %v14434_v8 = vld [vmem:[#allocation57_spill] sm:$0xff] }
 0x701   :  { %7238 = vmatmul.msk.bf16.gmra.mxu1 %vm428_vm0, %v12134_v40  ;;  %v4334_v49 = vunpack.c.l.b16 %v4326_v18  ;;  %v4806_v48 = vunpack.c.l.b16 %v14434_v8 }
 0x702   :  { %v12214_v5 = vpack.c.b16 %v4341_v31, %v4339_v63  ;;  %v4704_v63 = vsel %vm216_vm1, %v7925_v0, %v7930_v21  ;;  %v4709_v31 = vsel %vm216_vm1, %v7931_v54, %v7926_v56 }
 0x703   :  { %4465 = vmatpush.bf16.msrb.mxu0 %v14425_v41  ;;  %4655 = vmatpush.bf16.msrb.mxu2 %v14426_v44  ;;  %v12208_v44 = vpack.c.b16 %v4340_v45, %v4338_v29  ;;  %v7934_v29 = vpop.permute.xlu0 %7933  ;;  %v4708_v45 = vsel %vm216_vm1, %v7930_v21, %v7925_v0  ;;  %v4716_v20 = vsel %vm8626_vm2, %v4709_v31, 0.0  ;;  %v14435_v0 = vld [vmem:[#allocation28_spill] sm:$0xff]  ;;  %v14440_v31 = vld [vmem:[#allocation43_spill] sm:$0xff] }
 0x704   :  { %4484 = vmatpush.bf16.msrb.mxu1 %v14427_v46  ;;  %4674 = vmatpush.bf16.msrb.mxu3 %v14428_v13  ;;  %v4337_v13 = vunpack.c.h.b16 %v4327_v25 }
 0x706   :  { %7271 = vmatmul.msk.bf16.vlgmr.msrb.gmra.mxu2 %vm428_vm0, %v11779_v12 }
 0x707   :  { %4536 = vmatpush.bf16.msra.mxu0 %v11928_v57  ;;  %4934 = vmatpush.bf16.msra.mxu2 %v11815_v33 }
 0x708   :  { %4555 = vmatpush.bf16.msra.mxu1 %v11930_v53  ;;  %4953 = vmatpush.bf16.msra.mxu3 %v11817_v61 }
 0x709   :  { %7273 = vmatmul.msk.bf16.vlgmr.msrb.gmra.mxu3 %vm428_vm0, %v11779_v12 }
 0x70b   :  { %4537 = vmatpush.bf16.msra.mxu0 %v11918_v55  ;;  %4935 = vmatpush.bf16.msra.mxu2 %v14417_v60 }
 0x70c   :  { %4556 = vmatpush.bf16.msra.mxu1 %v11920_v11  ;;  %4954 = vmatpush.bf16.msra.mxu3 %v14419_v50 }
 0x70e   :  { %7251 = vmatmul.msk.bf16.vlgmr.msrb.gmra.mxu0 %vm428_vm0, %v12101_v3 }
 0x70f   :  { %4538 = vmatpush.bf16.msra.mxu0 %v12096_v9  ;;  %4936 = vmatpush.bf16.msra.mxu2 %v14421_v38 }
 0x710   :  { %4557 = vmatpush.bf16.msra.mxu1 %v12107_v52  ;;  %4955 = vmatpush.bf16.msra.mxu3 %v14423_v62 }
 0x711   :  { %7253 = vmatmul.msk.bf16.vlgmr.msrb.gmra.mxu1 %vm428_vm0, %v12101_v3 }
 0x713   :  { %4539 = vmatpush.bf16.msra.mxu0 %v12112_v4  ;;  %4937 = vmatpush.bf16.msra.mxu2 %v14425_v41 }
 0x714   :  { %4558 = vmatpush.bf16.msra.mxu1 %v12117_v51  ;;  %4956 = vmatpush.bf16.msra.mxu3 %v14427_v46 }
 0x716   :  { %7272 = vmatmul.msk.bf16.gmra.mxu2 %vm428_vm0, %v11948_v28 }
 0x717   :  { %4540 = vmatpush.bf16.msra.mxu0 %v11815_v33  ;;  %4938 = vmatpush.bf16.msra.mxu2 %v12054_v6  ;;  %v4335_v6 = vunpack.c.h.b16 %v4326_v18  ;;  %v7940_v18 = vunpack.i.l.bf16 %v7939_v35 }
 0x718   :  { %4559 = vmatpush.bf16.msra.mxu1 %v11817_v61  ;;  %4957 = vmatpush.bf16.msra.mxu3 %v12056_v16  ;;  %v12222_v16 = vpack.c.b16 %v4336_v27, %v4334_v49  ;;  %v7941_v49 = vunpack.i.h.bf16 %v7939_v35  ;;  %v7936_v27 = vunpack.i.h.bf16 %v7934_v29 }
 0x719   :  { %7274 = vmatmul.msk.bf16.gmra.mxu3 %vm428_vm0, %v11948_v28  ;;  %v12227_v19 = vpack.c.b16 %v4337_v13, %v4335_v6  ;;  %v4714_v6 = vsel %vm8626_vm2, %v4708_v45, 0.0  ;;  %v12286_v13 = vpack.c.b16 %v4808_v14, %v4806_v48  ;;  %v14437_v48 = vld [vmem:[#allocation5_spill] sm:$0xff]  ;;  %v14438_v14 = vld [vmem:[#allocation15_spill] sm:$0xff] }
 0x71a   :  { %v4703_v22 = vsel %vm216_vm1, %v7936_v27, %v7941_v49  ;;  %v4707_v17 = vsel %vm216_vm1, %v7941_v49, %v7936_v27  ;;  %v3916_v49 = vmax.f32 %v14440_v31, 0.0 }
 0x71b   :  { %4541 = vmatpush.bf16.msra.mxu0 %v14417_v60  ;;  %4939 = vmatpush.bf16.msra.mxu2 %v12093_v1  ;;  %v14429_v1 = vld [vmem:[#allocation73_spill] sm:$0xff]  ;;  %v4712_v37 = vsel %vm8626_vm2, %v4707_v17, 0.0 }
 0x71c   :  { %4560 = vmatpush.bf16.msra.mxu1 %v14419_v50  ;;  %4958 = vmatpush.bf16.msra.mxu3 %v12105_v36  ;;  %v3907_v36 = vmax.f32 %v14429_v1, 0.0 }
 0x71e   :  { %7252 = vmatmul.msk.bf16.gmra.mxu0 %vm428_vm0, %v12134_v40  ;;  %v4761_v24 = vpack.c.bf16 %v3908_v26, %v3907_v36  ;;  %v4715_v36 = vsel %vm8632_vm3, %v4704_v63, 0.0  ;;  %v14439_v63 = vld [vmem:[#allocation41_spill] sm:$0xff] }
 0x71f   :  { %4612 = vmatpush.bf16.msrb.mxu0 %v12208_v44  ;;  %5010 = vmatpush.bf16.msrb.mxu2 %v12096_v9  ;;  %v4752_v47 = vpack.c.bf16 %v4715_v36, %v4714_v6  ;;  %v14441_v6 = vld [vmem:[#allocation89_spill] sm:$0xff] }
 0x720   :  { %4631 = vmatpush.bf16.msrb.mxu1 %v12214_v5  ;;  %5029 = vmatpush.bf16.msrb.mxu3 %v12107_v52  ;;  %v4812_v34 = vunpack.c.l.b16 %v4761_v24  ;;  %v4813_v23 = vunpack.c.h.b16 %v4761_v24  ;;  %v3911_v36 = vmax.f32 %v14441_v6, 0.0 }
 0x721   :  { %7254 = vmatmul.msk.bf16.gmra.mxu1 %vm428_vm0, %v12134_v40 }
 0x723   :  { %4613 = vmatpush.bf16.msrb.mxu0 %v12222_v16  ;;  %5011 = vmatpush.bf16.msrb.mxu2 %v12112_v4 }
 0x724   :  { %4632 = vmatpush.bf16.msrb.mxu1 %v12227_v19  ;;  %5030 = vmatpush.bf16.msrb.mxu3 %v12117_v51 }
 0x726   :  { %7279 = vmatmul.msk.bf16.vlgmr.msra.gmra.mxu2 %vm428_vm0, %v11779_v12 }
 0x727   :  { %4614 = vmatpush.bf16.msrb.mxu0 %v11928_v57  ;;  %5012 = vmatpush.bf16.msrb.mxu2 %v11815_v33 }
 0x728   :  { %4633 = vmatpush.bf16.msrb.mxu1 %v11930_v53  ;;  %5031 = vmatpush.bf16.msrb.mxu3 %v11817_v61 }
 0x729   :  { %7281 = vmatmul.msk.bf16.vlgmr.msra.gmra.mxu3 %vm428_vm0, %v11779_v12  ;;  %v4811_v12 = vunpack.c.h.b16 %v14433_v10  ;;  %v14436_v10 = vld [vmem:[#allocation33_spill] sm:$0xff] }
 0x72b   :  { %4615 = vmatpush.bf16.msrb.mxu0 %v11918_v55  ;;  %5013 = vmatpush.bf16.msrb.mxu2 %v14417_v60  ;;  %v12270_v25 = vpack.c.b16 %v4813_v23, %v4811_v12  ;;  %v4713_v23 = vsel %vm8632_vm3, %v4703_v22, 0.0  ;;  %v4771_v12 = vunpack.c.h.b16 %v4752_v47 }
 0x72c   :  { %4634 = vmatpush.bf16.msrb.mxu1 %v11920_v11  ;;  %5032 = vmatpush.bf16.msrb.mxu3 %v14419_v50 }
 0x72e   :  { %7259 = vmatmul.msk.bf16.vlgmr.msra.gmra.mxu0 %vm428_vm0, %v12101_v3 }
 0x72f   :  { %4616 = vmatpush.bf16.msrb.mxu0 %v12096_v9  ;;  %5014 = vmatpush.bf16.msrb.mxu2 %v14421_v38  ;;  %v12262_v38 = vpack.c.b16 %v4812_v34, %v4810_v59  ;;  %v4770_v59 = vunpack.c.l.b16 %v4752_v47 }
 0x730   :  { %4635 = vmatpush.bf16.msrb.mxu1 %v12107_v52  ;;  %5033 = vmatpush.bf16.msrb.mxu3 %v14423_v62  ;;  %v4807_v62 = vunpack.c.h.b16 %v14434_v8  ;;  %v4751_v8 = vpack.c.bf16 %v4713_v23, %v4712_v37 }
 0x731   :  { %7261 = vmatmul.msk.bf16.vlgmr.msra.gmra.mxu1 %vm428_vm0, %v12101_v3 }
 0x732   :  { %v12288_v1 = vpack.c.b16 %v4809_v7, %v4807_v62 }
 0x733   :  { %4617 = vmatpush.bf16.msrb.mxu0 %v12112_v4  ;;  %5015 = vmatpush.bf16.msrb.mxu2 %v14425_v41  ;;  %v4705_v41 = vsel %vm216_vm1, %v7926_v56, %v7931_v54 }
 0x734   :  { %4636 = vmatpush.bf16.msrb.mxu1 %v12117_v51  ;;  %5034 = vmatpush.bf16.msrb.mxu3 %v14427_v46  ;;  %v7935_v46 = vunpack.i.l.bf16 %v7934_v29  ;;  %v4717_v26 = vsel %vm8632_vm3, %v4705_v41, 0.0  ;;  %v4768_v29 = vunpack.c.l.b16 %v4751_v8  ;;  %v3915_v41 = vmax.f32 %v14439_v63, 0.0  ;;  %v7949_v63 = vpop.permute.xlu0 %7948 }
 0x735   :  { %v4753_v24 = vpack.c.bf16 %v4717_v26, %v4716_v20  ;;  %v14442_v20 = vld [vmem:[#allocation84_spill] sm:$0xff] }
 0x736   :  { %v4702_v30 = vsel %vm216_vm1, %v7935_v46, %v7940_v18  ;;  %v4706_v39 = vsel %vm216_vm1, %v7940_v18, %v7935_v46  ;;  %7280 = vmatmul.msk.bf16.gmra.mxu2 %vm428_vm0, %v11948_v28  ;;  %v4769_v18 = vunpack.c.h.b16 %v4751_v8  ;;  %v3912_v26 = vmax.f32 %v14442_v20, 0.0  ;;  %v14445_v8 = vld [vmem:[#allocation71_spill] sm:$0xff] }
 0x737   :  { %4896 = vmatpush.bf16.msra.mxu0 %v12262_v38  ;;  %5086 = vmatpush.bf16.msra.mxu2 %v11928_v57  ;;  %v4710_v43 = vsel %vm8626_vm2, %v4706_v39, 0.0  ;;  %v4711_v34 = vsel %vm8632_vm3, %v4702_v30, 0.0  ;;  %v4772_v56 = vunpack.c.l.b16 %v4753_v24  ;;  %v4773_v21 = vunpack.c.h.b16 %v4753_v24 }
 0x738   :  { %5105 = vmatpush.bf16.msra.mxu3 %v11930_v53  ;;  %4915 = vmatpush.bf16.msra.mxu1 %v12270_v25  ;;  %v4750_v35 = vpack.c.bf16 %v4711_v34, %v4710_v43  ;;  %v4825_v30 = vpack.c.bf16 %v3916_v49, %v3915_v41  ;;  %v4823_v22 = vpack.c.bf16 %v3912_v26, %v3911_v36  ;;  %v7950_v41 = vunpack.i.l.bf16 %v7949_v63 }
 0x739   :  { %7282 = vmatmul.msk.bf16.gmra.mxu3 %vm428_vm0, %v11948_v28  ;;  %v4776_v7 = vpack.c.b16 %v4772_v56, %v4770_v59  ;;  %v4777_v62 = vpack.c.b16 %v4773_v21, %v4771_v12 }
 0x73a   :  { %v4766_v54 = vunpack.c.l.b16 %v4750_v35  ;;  %v4767_v45 = vunpack.c.h.b16 %v4750_v35  ;;  %v4836_v39 = vunpack.c.l.b16 %v4825_v30  ;;  %v4837_v47 = vunpack.c.h.b16 %v4825_v30 }
 0x73b   :  { %4897 = vmatpush.bf16.msra.mxu0 %v12286_v13  ;;  %5087 = vmatpush.bf16.msra.mxu2 %v11918_v55  ;;  %v4832_v24 = vunpack.c.l.b16 %v4823_v22  ;;  %v4833_v37 = vunpack.c.h.b16 %v4823_v22 }
 0x73c   :  { %5106 = vmatpush.bf16.msra.mxu3 %v11920_v11  ;;  %4916 = vmatpush.bf16.msra.mxu1 %v12288_v1  ;;  %v4774_v46 = vpack.c.b16 %v4768_v29, %v4766_v54  ;;  %v4775_v27 = vpack.c.b16 %v4769_v18, %v4767_v45 }
 0x73e   :  { %7260 = vmatmul.msk.bf16.gmra.mxu0 %vm428_vm0, %v12134_v40 }
 0x73f   :  { %4898 = vmatpush.bf16.msra.mxu0 %v14435_v0  ;;  %5088 = vmatpush.bf16.msra.mxu2 %v12096_v9 }
 0x740   :  { %5107 = vmatpush.bf16.msra.mxu3 %v12107_v52  ;;  %4917 = vmatpush.bf16.msra.mxu1 %v14436_v10 }
 0x741   :  { %7262 = vmatmul.msk.bf16.gmra.mxu1 %vm428_vm0, %v12134_v40 }
 0x743   :  { %4899 = vmatpush.bf16.msra.mxu0 %v14437_v48  ;;  %5089 = vmatpush.bf16.msra.mxu2 %v12112_v4 }
 0x744   :  { %5108 = vmatpush.bf16.msra.mxu3 %v12117_v51  ;;  %4918 = vmatpush.bf16.msra.mxu1 %v14438_v14 }
 0x747   :  { %4900 = vmatpush.bf16.msra.mxu0 %v4776_v7  ;;  %5090 = vmatpush.bf16.msra.mxu2 %v11815_v33  ;;  %v12343_v33 = vld [vmem:[%s13606_s5] sm:$0xff] }
 0x748   :  { %4919 = vmatpush.bf16.msra.mxu1 %v4777_v62  ;;  %5109 = vmatpush.bf16.msra.mxu3 %v11817_v61  ;;  %v4429_v61 = vpop.f32.mrf.mxu2  ;;  %v14447_v7 = vld [vmem:[#allocation46_spill] sm:$0xff]  ;;  %v14448_v62 = vld [vmem:[#allocation45_spill] sm:$0xff] }
 0x749   :  { %7287 = vmatmul.msk.bf16.vlgmr.msrb.gmra.mxu2 %vm428_vm0, %v12343_v33  ;;  %7289 = vmatmul.msk.bf16.vlgmr.msrb.gmra.mxu3 %vm428_vm0, %v12343_v33 }
 0x74b   :  { %4901 = vmatpush.bf16.msra.mxu0 %v4774_v46  ;;  %5091 = vmatpush.bf16.msra.mxu2 %v14417_v60  ;;  %v4448_v60 = vpop.f32.mrf.mxu3  ;;  %v7951_v46 = vunpack.i.h.bf16 %v7949_v63 }
 0x74c   :  { %4920 = vmatpush.bf16.msra.mxu1 %v4775_v27  ;;  %5110 = vmatpush.bf16.msra.mxu3 %v14419_v50  ;;  %v14443_v50 = vld [vmem:[#allocation49_spill] sm:$0xff]  ;;  %v7954_v27 = vpop.permute.xlu1 %7953 }
 0x74d   :  { %v4834_v17 = vunpack.c.l.b16 %v14443_v50  ;;  %v4835_v43 = vunpack.c.h.b16 %v14443_v50 }
 0x74e   :  { %7267 = vmatmul.msk.bf16.vlgmr.msrb.gmra.mxu0 %vm428_vm0, %v12101_v3 }
 0x74f   :  { %5162 = vmatpush.bf16.msrb.mxu2 %v12208_v44  ;;  %v12355_v34 = vpack.c.b16 %v4836_v39, %v4834_v17  ;;  %v14444_v44 = vld [vmem:[#allocation86_spill] sm:$0xff]  ;;  %v12361_v23 = vpack.c.b16 %v4837_v47, %v4835_v43  ;;  %v7956_v47 = vunpack.i.h.bf16 %v7954_v27 }
 0x750   :  { %5181 = vmatpush.bf16.msrb.mxu3 %v12214_v5  ;;  %v4830_v5 = vunpack.c.l.b16 %v14444_v44  ;;  %v4431_v59 = vpop.f32.mrf.mxu2 }
 0x751   :  { %4972 = vmatpush.bf16.msrb.mxu0 %v12355_v34  ;;  %7269 = vmatmul.msk.bf16.vlgmr.msrb.gmra.mxu1 %vm428_vm0, %v12101_v3 }
 0x752   :  { %4991 = vmatpush.bf16.msrb.mxu1 %v12361_v23 }
 0x753   :  { %5163 = vmatpush.bf16.msrb.mxu2 %v12222_v16  ;;  %v4831_v16 = vunpack.c.h.b16 %v14444_v44  ;;  %v4450_v56 = vpop.f32.mrf.mxu3 }
 0x754   :  { %5182 = vmatpush.bf16.msrb.mxu3 %v12227_v19  ;;  %v12369_v19 = vpack.c.b16 %v4832_v24, %v4830_v5 }
 0x755   :  { %v12372_v35 = vpack.c.b16 %v4833_v37, %v4831_v16 }
 0x756   :  { %4973 = vmatpush.bf16.msrb.mxu0 %v12369_v19 }
 0x757   :  { %5164 = vmatpush.bf16.msrb.mxu2 %v11928_v57  ;;  %4992 = vmatpush.bf16.msrb.mxu1 %v12372_v35 }
 0x758   :  { %5183 = vmatpush.bf16.msrb.mxu3 %v11930_v53  ;;  %v4434_v57 = vpop.f32.mrf.mxu2 }
 0x759   :  { %7288 = vmatmul.msk.bf16.gmra.mxu2 %vm428_vm0, %v11948_v28  ;;  %7290 = vmatmul.msk.bf16.gmra.mxu3 %vm428_vm0, %v11948_v28 }
 0x75a   :  { %4974 = vmatpush.bf16.msrb.mxu0 %v12262_v38 }
 0x75b   :  { %5165 = vmatpush.bf16.msrb.mxu2 %v11918_v55  ;;  %4993 = vmatpush.bf16.msrb.mxu1 %v12270_v25  ;;  %v4453_v55 = vpop.f32.mrf.mxu3 }
 0x75c   :  { %5184 = vmatpush.bf16.msrb.mxu3 %v11920_v11 }
 0x75e   :  { %4975 = vmatpush.bf16.msrb.mxu0 %v12286_v13 }
 0x75f   :  { %5166 = vmatpush.bf16.msrb.mxu2 %v12096_v9  ;;  %4994 = vmatpush.bf16.msrb.mxu1 %v12288_v1 }
 0x760   :  { %5185 = vmatpush.bf16.msrb.mxu3 %v12107_v52  ;;  %7268 = vmatmul.msk.bf16.gmra.mxu0 %vm428_vm0, %v12134_v40  ;;  %v12395_v11 = vpop.f32.mrf.mxu2 }
 0x761   :  { %7270 = vmatmul.msk.bf16.gmra.mxu1 %vm428_vm0, %v12134_v40 }
 0x762   :  { %4976 = vmatpush.bf16.msrb.mxu0 %v14435_v0 }
 0x763   :  { %5167 = vmatpush.bf16.msrb.mxu2 %v12112_v4  ;;  %4995 = vmatpush.bf16.msrb.mxu1 %v14436_v10  ;;  %v12397_v53 = vpop.f32.mrf.mxu3 }
 0x764   :  { %5186 = vmatpush.bf16.msrb.mxu3 %v12117_v51 }
 0x766   :  { %4977 = vmatpush.bf16.msrb.mxu0 %v14437_v48  ;;  %v14446_v48 = vld [vmem:[#allocation44_spill] sm:$0xff] }
 0x767   :  { %4996 = vmatpush.bf16.msrb.mxu1 %v14438_v14  ;;  %v7944_v14 = vpop.permute.xlu2 %7943 }
 0x768   :  { %v12405_v9 = vpop.f32.mrf.mxu2  ;;  %v7945_v36 = vunpack.i.l.bf16 %v7944_v14  ;;  %v7946_v26 = vunpack.i.h.bf16 %v7944_v14 }
 0x769   :  { %7295 = vmatmul.msk.bf16.vlgmr.msra.gmra.mxu2 %vm428_vm0, %v12343_v33  ;;  %7297 = vmatmul.msk.bf16.vlgmr.msra.gmra.mxu3 %vm428_vm0, %v12343_v33 }
 0x76a   :  { %v4737_v39 = vsel %vm253_vm4, %v7946_v26, %v7951_v46  ;;  %v4740_v50 = vsel %vm253_vm4, %v7950_v41, %v7945_v36  ;;  %v4741_v17 = vsel %vm253_vm4, %v7951_v46, %v7946_v26 }
 0x76b   :  { %v12407_v52 = vpop.f32.mrf.mxu3  ;;  %v4375_v4 = vpop.f32.mrf.mxu0  ;;  %v4747_v5 = vsel %vm8714_vm6, %v4740_v50, 0.0  ;;  %v4748_v37 = vsel %vm8708_vm5, %v4737_v39, 0.0  ;;  %v4749_v16 = vsel %vm8714_vm6, %v4741_v17, 0.0 }
 0x76c   :  { %v12409_v51 = vadd.f32 %v4429_v61, %v4375_v4  ;;  %v4394_v0 = vpop.f32.mrf.mxu1 }
 0x76d   :  { %v12411_v10 = vadd.f32 %v4448_v60, %v4394_v0  ;;  %v7955_v60 = vunpack.i.l.bf16 %v7954_v27 }
 0x76f   :  { %v7959_v30 = vpop.permute.xlu2 %7958 }
 0x770   :  { %7275 = vmatmul.msk.bf16.vlgmr.msra.gmra.mxu0 %vm428_vm0, %v12101_v3  ;;  %v12419_v12 = vpop.f32.mrf.mxu2  ;;  %v7960_v24 = vunpack.i.l.bf16 %v7959_v30  ;;  %v7961_v44 = vunpack.i.h.bf16 %v7959_v30 }
 0x771   :  { %5048 = vmatpush.bf16.msra.mxu0 %v14445_v8  ;;  %7277 = vmatmul.msk.bf16.vlgmr.msra.gmra.mxu1 %vm428_vm0, %v12101_v3 }
 0x772   :  { %5067 = vmatpush.bf16.msra.mxu1 %v14446_v48 }
 0x773   :  { %v12421_v21 = vpop.f32.mrf.mxu3  ;;  %v4377_v54 = vpop.f32.mrf.mxu0 }
 0x774   :  { %v12424_v29 = vadd.f32 %v4431_v59, %v4377_v54  ;;  %v4396_v45 = vpop.f32.mrf.mxu1  ;;  %v4873_v54 = vpack.c.bf16 %v4749_v16, %v4748_v37 }
 0x775   :  { %5049 = vmatpush.bf16.msra.mxu0 %v14447_v7  ;;  %v12427_v18 = vadd.f32 %v4450_v56, %v4396_v45 }
 0x776   :  { %5068 = vmatpush.bf16.msra.mxu1 %v14448_v62 }
 0x778   :  { %v12435_v31 = vpop.f32.mrf.mxu2 }
 0x779   :  { %7296 = vmatmul.msk.bf16.gmra.mxu2 %vm428_vm0, %v11948_v28  ;;  %5050 = vmatpush.bf16.msra.mxu0 %v12355_v34 }
 0x77a   :  { %5069 = vmatpush.bf16.msra.mxu1 %v12361_v23  ;;  %7298 = vmatmul.msk.bf16.gmra.mxu3 %vm428_vm0, %v11948_v28  ;;  %v4736_v28 = vsel %vm253_vm4, %v7945_v36, %v7950_v41 }
 0x77b   :  { %v12437_v49 = vpop.f32.mrf.mxu3  ;;  %v4380_v6 = vpop.f32.mrf.mxu0  ;;  %v4746_v43 = vsel %vm8708_vm5, %v4736_v28, 0.0 }
 0x77c   :  { %v12440_v20 = vadd.f32 %v4434_v57, %v4380_v6  ;;  %v4735_v57 = vsel %vm253_vm4, %v7956_v47, %v7961_v44  ;;  %v4872_v14 = vpack.c.bf16 %v4747_v5, %v4746_v43  ;;  %v4884_v6 = vunpack.c.l.b16 %v4873_v54 }
 0x77d   :  { %5051 = vmatpush.bf16.msra.mxu0 %v12369_v19  ;;  %v4744_v46 = vsel %vm8708_vm5, %v4735_v57, 0.0 }
 0x77e   :  { %5070 = vmatpush.bf16.msra.mxu1 %v12372_v35  ;;  %v4399_v61 = vpop.f32.mrf.mxu1  ;;  %v4882_v27 = vunpack.c.l.b16 %v4872_v14  ;;  %v4883_v28 = vunpack.c.h.b16 %v4872_v14 }
 0x77f   :  { %v12445_v22 = vadd.f32 %v4453_v55, %v4399_v61  ;;  %v4739_v55 = vsel %vm253_vm4, %v7961_v44, %v7956_v47 }
 0x780   :  { %7276 = vmatmul.msk.bf16.gmra.mxu0 %vm428_vm0, %v12134_v40  ;;  %v12469_v59 = vpop.f32.mrf.mxu2  ;;  %v4888_v50 = vpack.c.b16 %v4884_v6, %v4882_v27 }
 0x781   :  { %5052 = vmatpush.bf16.msra.mxu0 %v12262_v38  ;;  %7278 = vmatmul.msk.bf16.gmra.mxu1 %vm428_vm0, %v12134_v40  ;;  %v4734_v38 = vsel %vm253_vm4, %v7955_v60, %v7960_v24 }
 0x782   :  { %5071 = vmatpush.bf16.msra.mxu1 %v12270_v25  ;;  %v4738_v25 = vsel %vm253_vm4, %v7960_v24, %v7955_v60  ;;  %v4742_v45 = vsel %vm8708_vm5, %v4734_v38, 0.0  ;;  %v4885_v60 = vunpack.c.h.b16 %v4873_v54 }
 0x783   :  { %v12471_v56 = vpop.f32.mrf.mxu3  ;;  %v4382_v4 = vpop.f32.mrf.mxu0  ;;  %v4743_v41 = vsel %vm8714_vm6, %v4738_v25, 0.0 }
 0x784   :  { %v12481_v0 = vadd.f32 %v12395_v11, %v4382_v4  ;;  %v4870_v36 = vpack.c.bf16 %v4743_v41, %v4742_v45 }
 0x785   :  { %5053 = vmatpush.bf16.msra.mxu0 %v12286_v13  ;;  %v4745_v13 = vsel %vm8714_vm6, %v4739_v55, 0.0  ;;  %v8142_v55 = vld [vmem:[%s13606_s5 + $0x8] sm:$0xff] }
 0x786   :  { %5072 = vmatpush.bf16.msra.mxu1 %v12288_v1  ;;  %v4401_v63 = vpop.f32.mrf.mxu1  ;;  %v4871_v1 = vpack.c.bf16 %v4745_v13, %v4744_v46  ;;  %v4878_v17 = vunpack.c.l.b16 %v4870_v36  ;;  %v4879_v43 = vunpack.c.h.b16 %v4870_v36 }
 0x787   :  { %v12493_v11 = vadd.f32 %v12397_v53, %v4401_v63 }
 0x788   :  { %v4581_v26 = vpop.f32.mrf.mxu2  ;;  %v4880_v47 = vunpack.c.l.b16 %v4871_v1  ;;  %v4881_v44 = vunpack.c.h.b16 %v4871_v1 }
 0x789   :  { %7303 = vmatmul.msk.bf16.vlgmr.msrb.gmra.mxu2 %vm428_vm0, %v12343_v33 }
 0x78a   :  { %7305 = vmatmul.msk.bf16.vlgmr.msrb.gmra.mxu3 %vm428_vm0, %v12343_v33  ;;  %v4889_v33 = vpack.c.b16 %v4885_v60, %v4883_v28  ;;  %v4887_v16 = vpack.c.b16 %v4881_v44, %v4879_v43 }
 0x78b   :  { %v4600_v30 = vpop.f32.mrf.mxu3  ;;  %v4467_v61 = vpop.f32.mrf.mxu0 }
 0x78c   :  { %v12500_v39 = vadd.f32 %v12405_v9, %v4467_v61  ;;  %v4886_v9 = vpack.c.b16 %v4880_v47, %v4878_v17 }
 0x78e   :  { %v4486_v53 = vpop.f32.mrf.mxu1 }
 0x78f   :  { %v12503_v24 = vadd.f32 %v12407_v52, %v4486_v53 }
 0x790   :  { %7283 = vmatmul.msk.bf16.vlgmr.msrb.gmra.mxu0 %vm428_vm0, %v12101_v3  ;;  %v12509_v5 = vpop.f32.mrf.mxu2 }
 0x791   :  { %5124 = vmatpush.bf16.msrb.mxu0 %v4888_v50  ;;  %7285 = vmatmul.msk.bf16.vlgmr.msrb.gmra.mxu1 %vm428_vm0, %v12101_v3 }
 0x792   :  { %5143 = vmatpush.bf16.msrb.mxu1 %v4889_v33 }
 0x793   :  { %v12511_v37 = vpop.f32.mrf.mxu3  ;;  %v4469_v52 = vpop.f32.mrf.mxu0 }
 0x794   :  { %14449 = vst [vmem:[#allocation12_spill] sm:$0xff] %v12511_v37  ;;  %v12514_v38 = vadd.f32 %v12419_v12, %v4469_v52  ;;  %v14478_v37 = vld [vmem:[#allocation37_spill] sm:$0xff] }
 0x795   :  { %5125 = vmatpush.bf16.msrb.mxu0 %v4886_v9 }
 0x796   :  { %5144 = vmatpush.bf16.msrb.mxu1 %v4887_v16  ;;  %v4488_v57 = vpop.f32.mrf.mxu1 }
 0x797   :  { %v12517_v25 = vadd.f32 %v12421_v21, %v4488_v57 }
 0x798   :  { %v4586_v4 = vpop.f32.mrf.mxu2 }
 0x799   :  { %7304 = vmatmul.msk.bf16.gmra.mxu2 %vm428_vm0, %v8142_v55  ;;  %5126 = vmatpush.bf16.msrb.mxu0 %v14445_v8 }
 0x79a   :  { %5145 = vmatpush.bf16.msrb.mxu1 %v14446_v48  ;;  %7306 = vmatmul.msk.bf16.gmra.mxu3 %vm428_vm0, %v8142_v55 }
 0x79b   :  { %v4605_v12 = vpop.f32.mrf.mxu3  ;;  %v4472_v14 = vpop.f32.mrf.mxu0 }
 0x79c   :  { %v12528_v21 = vadd.f32 %v12435_v31, %v4472_v14 }
 0x79d   :  { %5127 = vmatpush.bf16.msrb.mxu0 %v14447_v7 }
 0x79e   :  { %5146 = vmatpush.bf16.msrb.mxu1 %v14448_v62  ;;  %v4491_v54 = vpop.f32.mrf.mxu1 }
 0x79f   :  { %v12532_v45 = vadd.f32 %v12437_v49, %v4491_v54 }
 0x7a0   :  { %7284 = vmatmul.msk.bf16.gmra.mxu0 %vm428_vm0, %v12134_v40  ;;  %v12540_v8 = vpop.f32.mrf.mxu2 }
 0x7a1   :  { %5128 = vmatpush.bf16.msrb.mxu0 %v12355_v34  ;;  %7286 = vmatmul.msk.bf16.gmra.mxu1 %vm428_vm0, %v12134_v40  ;;  %14450 = vst [vmem:[#allocation85_spill] sm:$0xff] %v12540_v8 }
 0x7a2   :  { %5147 = vmatpush.bf16.msrb.mxu1 %v12361_v23 }
 0x7a3   :  { %v12542_v48 = vpop.f32.mrf.mxu3  ;;  %v4474_v7 = vpop.f32.mrf.mxu0 }
 0x7a4   :  { %14451 = vst [vmem:[#allocation26_spill] sm:$0xff] %v12542_v48  ;;  %v12546_v62 = vadd.f32 %v12469_v59, %v4474_v7 }
 0x7a5   :  { %5129 = vmatpush.bf16.msrb.mxu0 %v12369_v19 }
 0x7a6   :  { %5148 = vmatpush.bf16.msrb.mxu1 %v12372_v35  ;;  %v4493_v31 = vpop.f32.mrf.mxu1 }
 0x7a7   :  { %v12550_v34 = vadd.f32 %v12471_v56, %v4493_v31 }
 0x7a8   :  { %v4657_v49 = vpop.f32.mrf.mxu2 }
 0x7ab   :  { %v4676_v63 = vpop.f32.mrf.mxu3  ;;  %v4543_v41 = vpop.f32.mrf.mxu0 }
 0x7ac   :  { %v12552_v23 = vadd.f32 %v4581_v26, %v4543_v41 }
 0x7ae   :  { %v4562_v46 = vpop.f32.mrf.mxu1 }
 0x7af   :  { %v12554_v13 = vadd.f32 %v4600_v30, %v4562_v46 }
 0x7b0   :  { %7291 = vmatmul.msk.bf16.vlgmr.msra.gmra.mxu0 %vm428_vm0, %v12101_v3  ;;  %v12560_v19 = vpop.f32.mrf.mxu2 }
 0x7b1   :  { %7293 = vmatmul.msk.bf16.vlgmr.msra.gmra.mxu1 %vm428_vm0, %v12101_v3  ;;  %14452 = vst [vmem:[#allocation87_spill] sm:$0xff] %v12560_v19 }
 0x7b3   :  { %v12562_v35 = vpop.f32.mrf.mxu3  ;;  %v12564_v59 = vpop.f32.mrf.mxu0 }
 0x7b4   :  { %14453 = vst [vmem:[#allocation20_spill] sm:$0xff] %v12562_v35 }
 0x7b6   :  { %v12566_v56 = vpop.f32.mrf.mxu1 }
 0x7b8   :  { %v4662_v27 = vpop.f32.mrf.mxu2 }
 0x7bb   :  { %v4548_v6 = vpop.f32.mrf.mxu0  ;;  %v4681_v36 = vpop.f32.mrf.mxu3 }
 0x7bc   :  { %v12568_v1 = vadd.f32 %v4586_v4, %v4548_v6 }
 0x7be   :  { %14454 = vst [vmem:[#allocation9_spill] sm:$0xff] %v12568_v1  ;;  %v4567_v26 = vpop.f32.mrf.mxu1 }
 0x7bf   :  { %v12570_v30 = vadd.f32 %v4605_v12, %v4567_v26 }
 0x7c0   :  { %7292 = vmatmul.msk.bf16.gmra.mxu0 %vm428_vm0, %v12134_v40  ;;  %v12578_v28 = vpop.f32.mrf.mxu2 }
 0x7c1   :  { %14455 = vst [vmem:[#allocation30_spill] sm:$0xff] %v12570_v30  ;;  %7294 = vmatmul.msk.bf16.gmra.mxu1 %vm428_vm0, %v12134_v40 }
 0x7c2   :  { %14457 = vst [vmem:[#allocation74_spill] sm:$0xff] %v12578_v28 }
 0x7c3   :  { %v12576_v61 = vpop.f32.mrf.mxu0  ;;  %v12582_v53 = vpop.f32.mrf.mxu3 }
 0x7c4   :  { %14456 = vst [vmem:[#allocation11_spill] sm:$0xff] %v12576_v61 }
 0x7c5   :  { %14459 = vst [vmem:[#allocation55_spill] sm:$0xff] %v12582_v53 }
 0x7c6   :  { %v12580_v60 = vpop.f32.mrf.mxu1 }
 0x7c7   :  { %14458 = vst [vmem:[#allocation10_spill] sm:$0xff] %v12580_v60  ;;  %v14471_v60 = vld [vmem:[#allocation91_spill] sm:$0xff] }
 0x7c8   :  { %v4941_v33 = vpop.f32.mrf.mxu2 }
 0x7cb   :  { %v4619_v50 = vpop.f32.mrf.mxu0  ;;  %v4960_v44 = vpop.f32.mrf.mxu3 }
 0x7cc   :  { %v12584_v17 = vadd.f32 %v4657_v49, %v4619_v50 }
 0x7ce   :  { %v4638_v47 = vpop.f32.mrf.mxu1 }
 0x7cf   :  { %v12586_v43 = vadd.f32 %v4676_v63, %v4638_v47 }
 0x7d0   :  { %7299 = vmatmul.msk.bf16.vlgmr.msrb.gmra.mxu0 %vm428_vm0, %v12101_v3  ;;  %v4943_v52 = vpop.f32.mrf.mxu2 }
 0x7d1   :  { %7301 = vmatmul.msk.bf16.vlgmr.msrb.gmra.mxu1 %vm428_vm0, %v12101_v3 }
 0x7d3   :  { %v12592_v9 = vpop.f32.mrf.mxu0  ;;  %v4962_v57 = vpop.f32.mrf.mxu3 }
 0x7d4   :  { %14460 = vst [vmem:[#allocation58_spill] sm:$0xff] %v12592_v9 }
 0x7d6   :  { %v12594_v16 = vpop.f32.mrf.mxu1 }
 0x7d7   :  { %14461 = vst [vmem:[#allocation56_spill] sm:$0xff] %v12594_v16 }
 0x7d8   :  { %v4946_v54 = vpop.f32.mrf.mxu2 }
 0x7db   :  { %v12606_v7 = vpop.f32.mrf.mxu3 }
 0x7dd   :  { %v4624_v55 = vpop.f32.mrf.mxu0 }
 0x7de   :  { %v12596_v4 = vadd.f32 %v4662_v27, %v4624_v55  ;;  %v4643_v12 = vpop.f32.mrf.mxu1 }
 0x7df   :  { %v12598_v14 = vadd.f32 %v4681_v36, %v4643_v12 }
 0x7e0   :  { %14462 = vst [vmem:[#allocation21_spill] sm:$0xff] %v12596_v4  ;;  %7300 = vmatmul.msk.bf16.gmra.mxu0 %vm428_vm0, %v12134_v40  ;;  %v12610_v63 = vpop.f32.mrf.mxu2  ;;  %v14469_v4 = vld [vmem:[#allocation80_spill] sm:$0xff] }
 0x7e1   :  { %14463 = vst [vmem:[#allocation4_spill] sm:$0xff] %v12598_v14  ;;  %7302 = vmatmul.msk.bf16.gmra.mxu1 %vm428_vm0, %v12134_v40  ;;  %v14470_v19 = vmax.f32 %v14469_v4, 0.0 }
 0x7e3   :  { %v12612_v46 = vpop.f32.mrf.mxu3  ;;  %v5214_v9 = vadd.f32 %v12500_v39, %v14470_v19  ;;  %v14476_v19 = vld [vmem:[#allocation69_spill] sm:$0xff] }
 0x7e5   :  { %v12604_v3 = vpop.f32.mrf.mxu0  ;;  %v5222_v4 = vmax.f32 %v5214_v9, 0.0 }
 0x7e6   :  { %14464 = vst [vmem:[#allocation73_spill] sm:$0xff] %v12604_v3  ;;  %v12608_v31 = vpop.f32.mrf.mxu1  ;;  %v14468_v3 = vld [vmem:[#allocation53_spill] sm:$0xff] }
 0x7e7   :  { %14465 = vst [vmem:[#allocation31_spill] sm:$0xff] %v12608_v31  ;;  %v14467_v31 = vld [vmem:[#allocation100_spill] sm:$0xff] }
 0x7e8   :  { %v5017_v36 = vpop.f32.mrf.mxu2  ;;  %v5198_v28 = vadd.f32 %v12409_v51, %v14467_v31  ;;  %v14474_v31 = vld [vmem:[#allocation68_spill] sm:$0xff] }
 0x7ea   :  { %v5206_v61 = vmax.f32 %v5198_v28, 0.0 }
 0x7eb   :  { %v5036_v26 = vpop.f32.mrf.mxu3 }
 0x7ed   :  { %v4903_v49 = vpop.f32.mrf.mxu0 }
 0x7ee   :  { %v4922_v41 = vpop.f32.mrf.mxu1  ;;  %v4942_v32 = vadd.f32 %v4941_v33, %v4903_v49  ;;  %v5199_v33 = vadd.f32 %v12411_v10, %v14471_v60 }
 0x7ef   :  { %v4961_v15 = vadd.f32 %v4960_v44, %v4922_v41  ;;  %v14472_v44 = vld [vmem:[#allocation40_spill] sm:$0xff] }
 0x7f0   :  { %v5019_v40 = vpop.f32.mrf.mxu2  ;;  %v5262_v53 = vadd.f32 %v4942_v32, %v14466_v58  ;;  %v14473_v49 = vmax.f32 %v14472_v44, 0.0  ;;  %v5207_v10 = vmax.f32 %v5199_v33, 0.0 }
 0x7f1   :  { %v5263_v14 = vadd.f32 %v4961_v15, %v14468_v3  ;;  %v14475_v15 = vmax.f32 %v14474_v31, 0.0 }
 0x7f2   :  { %v5215_v58 = vadd.f32 %v12503_v24, %v14473_v49  ;;  %v5270_v41 = vmax.f32 %v5262_v53, 0.0 }
 0x7f3   :  { %v5038_v55 = vpop.f32.mrf.mxu3  ;;  %v5271_v30 = vmax.f32 %v5263_v14, 0.0 }
 0x7f4   :  { %v5223_v60 = vmax.f32 %v5215_v58, 0.0  ;;  %v5326_v44 = vmax.f32 %v5206_v61, %v5270_v41  ;;  %v14484_v41 = vld [vmem:[#allocation79_spill] sm:$0xff] }
 0x7f5   :  { %v4905_v27 = vpop.f32.mrf.mxu0  ;;  %v5327_v9 = vmax.f32 %v5207_v10, %v5271_v30  ;;  %v14486_v30 = vld [vmem:[#allocation36_spill] sm:$0xff] }
 0x7f6   :  { %v4924_v6 = vpop.f32.mrf.mxu1  ;;  %v4944_v51 = vadd.f32 %v4943_v52, %v4905_v27  ;;  %v14479_v52 = vld [vmem:[#allocation98_spill] sm:$0xff] }
 0x7f7   :  { %v4963_v1 = vadd.f32 %v4962_v57, %v4924_v6  ;;  %v5200_v27 = vadd.f32 %v12424_v29, %v14479_v52  ;;  %v14482_v6 = vld [vmem:[#allocation35_spill] sm:$0xff] }
 0x7f8   :  { %v12618_v2 = vpop.f32.mrf.mxu2  ;;  %v5264_v24 = vadd.f32 %v4944_v51, %v14478_v37  ;;  %v14485_v51 = vmax.f32 %v14484_v41, 0.0  ;;  %v14496_v41 = vld [vmem:[#allocation93_spill] sm:$0xff] }
 0x7fa   :  { %v5217_v29 = vadd.f32 %v12517_v25, %v14485_v51  ;;  %v14497_v51 = vmax.f32 %v14496_v41, 0.0 }
 0x7fb   :  { %v12624_v16 = vpop.f32.mrf.mxu3 }
 0x7fd   :  { %v4908_v50 = vpop.f32.mrf.mxu0 }
 0x7fe   :  { %v4927_v47 = vpop.f32.mrf.mxu1  ;;  %v4947_v31 = vadd.f32 %v4946_v54, %v4908_v50  ;;  %v14490_v54 = vld [vmem:[#allocation19_spill] sm:$0xff] }
 0x800   :  { %v12644_v14 = vpop.f32.mrf.mxu2  ;;  %v5266_v50 = vadd.f32 %v4947_v31, %v14490_v54  ;;  %v14502_v54 = vld [vmem:[#allocation22_spill] sm:$0xff] }
 0x805   :  { %v12614_v12 = vpop.f32.mrf.mxu0 }
 0x806   :  { %v12616_v42 = vpop.f32.mrf.mxu1  ;;  %v4949_v31 = vadd.f32 %v12610_v63, %v12614_v12  ;;  %v14500_v63 = vld [vmem:[#allocation50_spill] sm:$0xff] }
 0x807   :  { %v14501_v12 = vmax.f32 %v14500_v63, 0.0 }
 0x80d   :  { %v4979_v35 = vpop.f32.mrf.mxu0 }
 0x80e   :  { %v5018_v48 = vadd.f32 %v5017_v36, %v4979_v35  ;;  %v4998_v32 = vpop.f32.mrf.mxu1  ;;  %v14477_v35 = vmax.f32 %v14476_v19, 0.0 }
 0x80f   :  { %v5037_v8 = vadd.f32 %v5036_v26, %v4998_v32  ;;  %v14483_v32 = vld [vmem:[#allocation38_spill] sm:$0xff] }
 0x810   :  { %v5278_v3 = vadd.f32 %v5018_v48, %v14475_v15  ;;  %v14480_v48 = vld [vmem:[#allocation90_spill] sm:$0xff]  ;;  %v5201_v37 = vadd.f32 %v12427_v18, %v14483_v32  ;;  %v14495_v32 = vld [vmem:[#allocation97_spill] sm:$0xff] }
 0x811   :  { %v5279_v36 = vadd.f32 %v5037_v8, %v14477_v35  ;;  %v14481_v26 = vmax.f32 %v14480_v48, 0.0  ;;  %v5265_v8 = vadd.f32 %v4963_v1, %v14482_v6  ;;  %v5208_v35 = vmax.f32 %v5200_v27, 0.0 }
 0x812   :  { %v5286_v39 = vmax.f32 %v5278_v3, 0.0  ;;  %v12652_v3 = vpop.f32.mrf.mxu3  ;;  %v5209_v25 = vmax.f32 %v5201_v37, 0.0  ;;  %v5203_v37 = vadd.f32 %v12445_v22, %v14495_v32  ;;  %v14510_v32 = vld [vmem:[#allocation52_spill] sm:$0xff] }
 0x813   :  { %v5287_v53 = vmax.f32 %v5279_v36, 0.0  ;;  %v5216_v28 = vadd.f32 %v12514_v38, %v14481_v26  ;;  %v5272_v38 = vmax.f32 %v5264_v24, 0.0  ;;  %v5273_v10 = vmax.f32 %v5265_v8, 0.0  ;;  %v14491_v26 = vld [vmem:[#allocation78_spill] sm:$0xff] }
 0x814   :  { %v5334_v49 = vmax.f32 %v5222_v4, %v5286_v39  ;;  %v14487_v4 = vmax.f32 %v14486_v30, 0.0 }
 0x815   :  { %v4981_v57 = vpop.f32.mrf.mxu0  ;;  %v5335_v33 = vmax.f32 %v5223_v60, %v5287_v53  ;;  %v5224_v36 = vmax.f32 %v5216_v28, 0.0  ;;  %v14488_v60 = vld [vmem:[#allocation34_spill] sm:$0xff]  ;;  %v5225_v53 = vmax.f32 %v5217_v29, 0.0  ;;  %v5328_v52 = vmax.f32 %v5208_v35, %v5272_v38  ;;  %v14498_v38 = vld [vmem:[#allocation51_spill] sm:$0xff] }
 0x816   :  { %v5020_v58 = vadd.f32 %v5019_v40, %v4981_v57  ;;  %v5358_v61 = vmax.f32 %v5326_v44, %v5334_v49  ;;  %v5000_v15 = vpop.f32.mrf.mxu1  ;;  %v4966_v40 = vadd.f32 %v12606_v7, %v4927_v47  ;;  %v14489_v44 = vmax.f32 %v14488_v60, 0.0  ;;  %v14494_v47 = vld [vmem:[#allocation23_spill] sm:$0xff] }
 0x817   :  { %v5039_v19 = vadd.f32 %v5038_v55, %v5000_v15  ;;  %v5359_v1 = vmax.f32 %v5327_v9, %v5335_v33  ;;  %v5202_v55 = vadd.f32 %v12440_v20, %v14491_v26  ;;  %v14492_v9 = vld [vmem:[#allocation81_spill] sm:$0xff]  ;;  %v5329_v6 = vmax.f32 %v5209_v25, %v5273_v10  ;;  %v12674_v15 = vpop.f32.mrf.mxu2 }
 0x818   :  { %v5280_v39 = vadd.f32 %v5020_v58, %v14487_v4  ;;  %v14493_v27 = vmax.f32 %v14492_v9, 0.0  ;;  %v5267_v28 = vadd.f32 %v4966_v40, %v14494_v47  ;;  %v5219_v29 = vadd.f32 %v12532_v45, %v14497_v51  ;;  %v14507_v47 = vld [vmem:[#allocation77_spill] sm:$0xff] }
 0x819   :  { %v5281_v49 = vadd.f32 %v5039_v19, %v14489_v44  ;;  %v5274_v20 = vmax.f32 %v5266_v50, 0.0  ;;  %v14499_v30 = vmax.f32 %v14498_v38, 0.0  ;;  %v5210_v35 = vmax.f32 %v5202_v55, 0.0  ;;  %v14506_v55 = vld [vmem:[#allocation14_spill] sm:$0xff] }
 0x81a   :  { %v5288_v18 = vmax.f32 %v5280_v39, 0.0  ;;  %v5218_v7 = vadd.f32 %v12528_v21, %v14493_v27  ;;  %v5275_v40 = vmax.f32 %v5267_v28, 0.0  ;;  %v4968_v45 = vadd.f32 %v12612_v46, %v12616_v42 }
 0x81b   :  { %v5289_v48 = vmax.f32 %v5281_v49, 0.0  ;;  %v5211_v44 = vmax.f32 %v5203_v37, 0.0  ;;  %v5227_v49 = vmax.f32 %v5219_v29, 0.0  ;;  %v5330_v25 = vmax.f32 %v5210_v35, %v5274_v20 }
 0x81c   :  { %v5336_v24 = vmax.f32 %v5224_v36, %v5288_v18  ;;  %v5226_v22 = vmax.f32 %v5218_v7, 0.0  ;;  %v12679_v36 = vpop.f32.mrf.mxu3  ;;  %v5269_v9 = vadd.f32 %v4968_v45, %v14506_v55  ;;  %v5205_v28 = vadd.f32 %v12493_v11, %v14507_v47  ;;  %v14518_v47 = vld [vmem:[#allocation105_spill] sm:$0xff] }
 0x81d   :  { %v4984_v57 = vpop.f32.mrf.mxu0  ;;  %v5337_v8 = vmax.f32 %v5225_v53, %v5289_v48  ;;  %v14503_v53 = vld [vmem:[#allocation70_spill] sm:$0xff]  ;;  %v5331_v42 = vmax.f32 %v5211_v44, %v5275_v40 }
 0x81e   :  { %v5023_v33 = vadd.f32 %v12618_v2, %v4984_v57  ;;  %v5360_v58 = vmax.f32 %v5328_v52, %v5336_v24  ;;  %v5003_v21 = vpop.f32.mrf.mxu1  ;;  %v5204_v52 = vadd.f32 %v12481_v0, %v14503_v53  ;;  %v14504_v24 = vld [vmem:[#allocation65_spill] sm:$0xff]  ;;  %v14508_v57 = vld [vmem:[#allocation64_spill] sm:$0xff] }
 0x81f   :  { %v5042_v2 = vadd.f32 %v12624_v16, %v5003_v21  ;;  %v5361_v19 = vmax.f32 %v5329_v6, %v5337_v8  ;;  %v5268_v16 = vadd.f32 %v4949_v31, %v14502_v54  ;;  %v14505_v48 = vmax.f32 %v14504_v24, 0.0  ;;  %v12701_v29 = vpop.f32.mrf.mxu2  ;;  %v14512_v21 = vld [vmem:[#allocation59_spill] sm:$0xff] }
 0x820   :  { %v5282_v4 = vadd.f32 %v5023_v33, %v14499_v30  ;;  %v5378_v39 = vpack.c.bf16 %v5360_v58, %v5358_v61  ;;  %v14509_v6 = vmax.f32 %v14508_v57, 0.0  ;;  %v5212_v51 = vmax.f32 %v5204_v52, 0.0  ;;  %v14519_v57 = vld [vmem:[#allocation48_spill] sm:$0xff] }
 0x821   :  { %v5283_v18 = vadd.f32 %v5042_v2, %v14501_v12  ;;  %v5379_v60 = vpack.c.bf16 %v5361_v19, %v5359_v1  ;;  %v5220_v26 = vadd.f32 %v12546_v62, %v14505_v48  ;;  %v5276_v33 = vmax.f32 %v5268_v16, 0.0 }
 0x822   :  { %v5290_v10 = vmax.f32 %v5282_v4, 0.0  ;;  %v5221_v8 = vadd.f32 %v12550_v34, %v14509_v6  ;;  %v14511_v62 = vmax.f32 %v14510_v32, 0.0  ;;  %v14513_v11 = vmax.f32 %v14512_v21, 0.0 }
 0x823   :  { %v5291_v50 = vmax.f32 %v5283_v18, 0.0  ;;  %v5228_v20 = vmax.f32 %v5220_v26, 0.0  ;;  %v5213_v30 = vmax.f32 %v5205_v28, 0.0  ;;  %v5332_v2 = vmax.f32 %v5212_v51, %v5276_v33  ;;  %v14521_v33 = vld [vmem:[#allocation95_spill] sm:$0xff] }
 0x824   :  { %v5338_v61 = vmax.f32 %v5226_v22, %v5290_v10  ;;  %v12705_v4 = vpop.f32.mrf.mxu3  ;;  %v5229_v34 = vmax.f32 %v5221_v8, 0.0  ;;  %v5246_v28 = vadd.f32 %v12584_v17, %v14518_v47  ;;  %v14520_v6 = vmax.f32 %v14519_v57, 0.0  ;;  %v12739_v17 = vld [vmem:[%s13607_s6] sm:$0xff]  ;;  %v14536_v57 = vld [vmem:[#allocation85_spill] sm:$0xff] }
 0x825   :  { %v4986_v46 = vpop.f32.mrf.mxu0  ;;  %v5339_v1 = vmax.f32 %v5227_v49, %v5291_v50 }
 0x826   :  { %v5362_v27 = vmax.f32 %v5330_v25, %v5338_v61  ;;  %v5025_v7 = vadd.f32 %v12644_v14, %v4986_v46  ;;  %v5005_v0 = vpop.f32.mrf.mxu1  ;;  %v5277_v14 = vmax.f32 %v5269_v9, 0.0 }
 0x827   :  { %v5363_v58 = vmax.f32 %v5331_v42, %v5339_v1  ;;  %v5044_v41 = vadd.f32 %v12652_v3, %v5005_v0  ;;  %v5098_v44 = vpop.f32.mrf.mxu2 }
 0x828   :  { %v5284_v37 = vadd.f32 %v5025_v7, %v14511_v62  ;;  %v5333_v40 = vmax.f32 %v5213_v30, %v5277_v14  ;;  %v4584_v30 = vadd.f32 %v12509_v5, %v12564_v59 }
 0x829   :  { %v5285_v38 = vadd.f32 %v5044_v41, %v14513_v11  ;;  %v14524_v41 = vld [vmem:[#allocation29_spill] sm:$0xff] }
 0x82a   :  { %v5292_v31 = vmax.f32 %v5284_v37, 0.0 }
 0x82b   :  { %v5293_v35 = vmax.f32 %v5285_v38, 0.0 }
 0x82c   :  { %v5340_v19 = vmax.f32 %v5228_v20, %v5292_v31  ;;  %v5117_v25 = vpop.f32.mrf.mxu3  ;;  %v5254_v31 = vmax.f32 %v5246_v28, 0.0  ;;  %v14535_v28 = vld [vmem:[#allocation11_spill] sm:$0xff] }
 0x82d   :  { %v5055_v22 = vpop.f32.mrf.mxu0  ;;  %v5341_v3 = vmax.f32 %v5229_v34, %v5293_v35 }
 0x82e   :  { %v5364_v45 = vmax.f32 %v5332_v2, %v5340_v19  ;;  %v5074_v10 = vpop.f32.mrf.mxu1  ;;  %v5094_v26 = vadd.f32 %v12674_v15, %v5055_v22  ;;  %v14522_v15 = vmax.f32 %v14521_v33, 0.0  ;;  %v14540_v33 = vld [vmem:[#allocation87_spill] sm:$0xff] }
 0x82f   :  { %v5365_v63 = vmax.f32 %v5333_v40, %v5341_v3  ;;  %v12711_v61 = vpop.f32.mrf.mxu2  ;;  %v5113_v46 = vadd.f32 %v12679_v36, %v5074_v10  ;;  %v14523_v36 = vld [vmem:[#allocation32_spill] sm:$0xff] }
 0x830   :  { %v5380_v12 = vpack.c.bf16 %v5364_v45, %v5362_v27  ;;  %v5247_v32 = vadd.f32 %v12586_v43, %v14523_v36  ;;  %v14541_v36 = vld [vmem:[#allocation99_spill] sm:$0xff] }
 0x831   :  { %v5381_v18 = vpack.c.bf16 %v5365_v63, %v5363_v58  ;;  %v5295_v8 = vadd.f32 %v5113_v46, %v14520_v6  ;;  %v5231_v58 = vadd.f32 %v12554_v13, %v14522_v15  ;;  %v14525_v13 = vld [vmem:[#allocation42_spill] sm:$0xff]  ;;  %v14529_v46 = vld [vmem:[#allocation88_spill] sm:$0xff]  ;;  %v4589_v6 = vadd.f32 %v14536_v57, %v14535_v28 }
 0x832   :  { %5405 = vmatpush.bf16.msra.mxu0 %v5380_v12  ;;  %v5255_v2 = vmax.f32 %v5247_v32, 0.0  ;;  %v14526_v12 = vld [vmem:[#allocation83_spill] sm:$0xff]  ;;  %v14542_v32 = vmax.f32 %v14541_v36, 0.0 }
 0x833   :  { %5424 = vmatpush.bf16.msra.mxu1 %v5381_v18  ;;  %v5303_v21 = vmax.f32 %v5295_v8, 0.0  ;;  %v5239_v43 = vmax.f32 %v5231_v58, 0.0  ;;  %v14527_v18 = vmax.f32 %v14526_v12, 0.0  ;;  %v14537_v8 = vld [vmem:[#allocation10_spill] sm:$0xff]  ;;  %v14551_v12 = vld [vmem:[#allocation3_spill] sm:$0xff] }
 0x834   :  { %v12713_v53 = vpop.f32.mrf.mxu3 }
 0x835   :  { %v12707_v49 = vpop.f32.mrf.mxu0  ;;  %v12752_v45 = vmax.f32 %v5239_v43, %v5303_v21 }
 0x836   :  { %5406 = vmatpush.bf16.msra.mxu0 %v5378_v39  ;;  %v12709_v54 = vpop.f32.mrf.mxu1  ;;  %v14514_v39 = vld [vmem:[#allocation72_spill] sm:$0xff] }
 0x837   :  { %5425 = vmatpush.bf16.msra.mxu1 %v5379_v60  ;;  %v5169_v48 = vpop.f32.mrf.mxu2  ;;  %v14515_v55 = vmax.f32 %v14514_v39, 0.0  ;;  %v14516_v60 = vld [vmem:[#allocation103_spill] sm:$0xff]  ;;  %v14530_v39 = vmax.f32 %v14529_v46, 0.0  ;;  %v14553_v46 = vld [vmem:[#allocation2_spill] sm:$0xff] }
 0x838   :  { %v14517_v27 = vmax.f32 %v14516_v60, 0.0  ;;  %v14532_v60 = vld [vmem:[#allocation82_spill] sm:$0xff] }
 0x839   :  { %v5294_v9 = vadd.f32 %v5094_v26, %v14515_v55  ;;  %7315 = vmatmul.msk.bf16.vlgmr.msra.gmra.mxu0 %vm5392_vm7, %v12739_v17  ;;  %v14528_v26 = vld [vmem:[#allocation12_spill] sm:$0xff]  ;;  %v14531_v55 = vld [vmem:[#allocation9_spill] sm:$0xff] }
 0x83a   :  { %v5230_v1 = vadd.f32 %v12552_v23, %v14517_v27  ;;  %7317 = vmatmul.msk.bf16.vlgmr.msra.gmra.mxu1 %vm5392_vm7, %v12739_v17  ;;  %v14533_v27 = vmax.f32 %v14532_v60, 0.0 }
 0x83b   :  { %v5302_v37 = vmax.f32 %v5294_v9, 0.0  ;;  %v5234_v9 = vadd.f32 %v14531_v55, %v14530_v39  ;;  %v14554_v55 = vld [vmem:[#allocation56_spill] sm:$0xff] }
 0x83c   :  { %v5188_v42 = vpop.f32.mrf.mxu3  ;;  %v5238_v20 = vmax.f32 %v5230_v1, 0.0  ;;  %v14534_v1 = vld [vmem:[#allocation30_spill] sm:$0xff] }
 0x83d   :  { %v5060_v16 = vpop.f32.mrf.mxu0 }
 0x83e   :  { %v5079_v50 = vpop.f32.mrf.mxu1  ;;  %v12748_v19 = vmax.f32 %v5238_v20, %v5302_v37  ;;  %v5099_v5 = vadd.f32 %v5098_v44, %v5060_v16  ;;  %v14538_v44 = vld [vmem:[#allocation26_spill] sm:$0xff] }
 0x83f   :  { %v5171_v14 = vpop.f32.mrf.mxu2  ;;  %v5118_v47 = vadd.f32 %v5117_v25, %v5079_v50  ;;  %v4608_v16 = vadd.f32 %v14538_v44, %v14537_v8  ;;  %v14543_v37 = vld [vmem:[#allocation102_spill] sm:$0xff]  ;;  %v5242_v25 = vmax.f32 %v5234_v9, 0.0  ;;  %v14555_v9 = vld [vmem:[#allocation20_spill] sm:$0xff] }
 0x840   :  { %v4679_v60 = vadd.f32 %v14555_v9, %v14554_v55  ;;  %v14558_v8 = vld [vmem:[#allocation18_spill] sm:$0xff] }
 0x844   :  { %v5190_v34 = vpop.f32.mrf.mxu3 }
 0x845   :  { %v12715_v52 = vpop.f32.mrf.mxu0 }
 0x846   :  { %v12717_v24 = vpop.f32.mrf.mxu1 }
 0x847   :  { %v5174_v58 = vpop.f32.mrf.mxu2 }
 0x84c   :  { %v5193_v21 = vpop.f32.mrf.mxu3 }
 0x84d   :  { %v5131_v7 = vpop.f32.mrf.mxu0 }
 0x84e   :  { %v5170_v0 = vadd.f32 %v5169_v48, %v5131_v7  ;;  %v5150_v62 = vpop.f32.mrf.mxu1  ;;  %v12760_v48 = vadd.f32 %v4584_v30, %v14527_v18  ;;  %v5235_v7 = vadd.f32 %v14534_v1, %v14533_v27  ;;  %v14549_v30 = vld [vmem:[#allocation101_spill] sm:$0xff]  ;;  %v14556_v27 = vld [vmem:[#allocation27_spill] sm:$0xff]  ;;  %v14557_v1 = vld [vmem:[#allocation4_spill] sm:$0xff] }
 0x84f   :  { %v5189_v23 = vadd.f32 %v5188_v42, %v5150_v62  ;;  %v4603_v42 = vadd.f32 %v14528_v26, %v12566_v56  ;;  %v5298_v62 = vadd.f32 %v5099_v5, %v14542_v32  ;;  %v14552_v18 = vld [vmem:[#allocation21_spill] sm:$0xff]  ;;  %v5120_v32 = vadd.f32 %v12713_v53, %v12717_v24  ;;  %v5176_v55 = vpop.f32.mrf.mxu2 }
 0x850   :  { %v5310_v51 = vadd.f32 %v5170_v0, %v14524_v41  ;;  %v14539_v0 = vld [vmem:[#allocation58_spill] sm:$0xff]  ;;  %v5240_v56 = vmax.f32 %v12760_v48, 0.0  ;;  %v14544_v41 = vmax.f32 %v14543_v37, 0.0  ;;  %v5243_v50 = vmax.f32 %v5235_v7, 0.0 }
 0x851   :  { %v5311_v38 = vadd.f32 %v5189_v23, %v14525_v13  ;;  %v4660_v15 = vadd.f32 %v14540_v33, %v14539_v0  ;;  %v14545_v23 = vld [vmem:[#allocation92_spill] sm:$0xff]  ;;  %v5250_v5 = vadd.f32 %v14552_v18, %v14551_v12  ;;  %v5251_v7 = vadd.f32 %v14557_v1, %v14556_v27  ;;  %v14559_v0 = vld [vmem:[#allocation73_spill] sm:$0xff]  ;;  %v14560_v33 = vld [vmem:[#allocation74_spill] sm:$0xff] }
 0x852   :  { %v5318_v11 = vmax.f32 %v5310_v51, 0.0  ;;  %v12783_v51 = vadd.f32 %v4603_v42, %v14544_v41  ;;  %v14546_v20 = vmax.f32 %v14545_v23, 0.0  ;;  %v14547_v13 = vld [vmem:[#allocation96_spill] sm:$0xff]  ;;  %v12800_v42 = vld [vmem:[%s13607_s6 + $0x8] sm:$0xff]  ;;  %v5306_v57 = vmax.f32 %v5298_v62, 0.0 }
 0x853   :  { %v5319_v22 = vmax.f32 %v5311_v38, 0.0  ;;  %v14548_v38 = vmax.f32 %v14547_v13, 0.0  ;;  %v5248_v39 = vadd.f32 %v4660_v15, %v14553_v46  ;;  %v5096_v15 = vadd.f32 %v12701_v29, %v12707_v49  ;;  %7316 = vmatmul.msk.bf16.gmra.mxu0 %vm5392_vm7, %v12800_v42  ;;  %7318 = vmatmul.msk.bf16.gmra.mxu1 %vm5392_vm7, %v12800_v42  ;;  %v14563_v62 = vld [vmem:[#allocation55_spill] sm:$0xff]  ;;  %v14564_v49 = vld [vmem:[#allocation104_spill] sm:$0xff]  ;;  %v14567_v13 = vld [vmem:[#allocation25_spill] sm:$0xff] }
 0x854   :  { %v12750_v35 = vmax.f32 %v5254_v31, %v5318_v11  ;;  %v5299_v31 = vadd.f32 %v5118_v47, %v14546_v20  ;;  %v5101_v47 = vadd.f32 %v12711_v61, %v12715_v52  ;;  %v5258_v37 = vmax.f32 %v5250_v5, 0.0  ;;  %v14561_v61 = vld [vmem:[#allocation17_spill] sm:$0xff]  ;;  %v14570_v5 = vld [vmem:[#allocation39_spill] sm:$0xff] }
 0x855   :  { %v5133_v40 = vpop.f32.mrf.mxu0  ;;  %v12754_v3 = vmax.f32 %v5255_v2, %v5319_v22  ;;  %v12789_v43 = vadd.f32 %v4589_v6, %v14548_v38  ;;  %v14550_v2 = vmax.f32 %v14549_v30, 0.0  ;;  %v5115_v29 = vadd.f32 %v12705_v4, %v12709_v54  ;;  %v14568_v30 = vld [vmem:[#allocation47_spill] sm:$0xff]  ;;  %v14572_v4 = vld [vmem:[#allocation60_spill] sm:$0xff] }
 0x856   :  { %v5366_v10 = vmax.f32 %v12748_v19, %v12750_v35  ;;  %v5152_v63 = vpop.f32.mrf.mxu1  ;;  %v5172_v6 = vadd.f32 %v5171_v14, %v5133_v40  ;;  %v5307_v36 = vmax.f32 %v5299_v31, 0.0  ;;  %v5259_v14 = vmax.f32 %v5251_v7, 0.0  ;;  %v14562_v40 = vld [vmem:[#allocation31_spill] sm:$0xff] }
 0x857   :  { %v5367_v59 = vmax.f32 %v12752_v45, %v12754_v3  ;;  %v12793_v22 = vadd.f32 %v4608_v16, %v14550_v2  ;;  %v5191_v41 = vadd.f32 %v5190_v34, %v5152_v63  ;;  %v4684_v20 = vadd.f32 %v14563_v62, %v14562_v40  ;;  %v14566_v63 = vld [vmem:[#allocation13_spill] sm:$0xff]  ;;  %v14573_v7 = vld [vmem:[#allocation7_spill] sm:$0xff]  ;;  %v14578_v40 = vld [vmem:[#allocation8_spill] sm:$0xff] }
 0x858   :  { %v14565_v53 = vmax.f32 %v14564_v49, 0.0  ;;  %v5346_v34 = vmax.f32 %v5242_v25, %v5306_v57  ;;  %v5312_v31 = vadd.f32 %v5172_v6, %v14566_v63  ;;  %v14569_v2 = vmax.f32 %v14568_v30, 0.0  ;;  %v14575_v6 = vld [vmem:[#allocation94_spill] sm:$0xff] }
 0x859   :  { %v5347_v18 = vmax.f32 %v5243_v50, %v5307_v36  ;;  %v5313_v54 = vadd.f32 %v5191_v41, %v14572_v4  ;;  %v5256_v41 = vmax.f32 %v5248_v39, 0.0 }
 0x85a   :  { %v5300_v24 = vadd.f32 %v5101_v47, %v14565_v53  ;;  %v5296_v12 = vadd.f32 %v5096_v15, %v14569_v2  ;;  %v5249_v47 = vadd.f32 %v4679_v60, %v14573_v7  ;;  %v14577_v15 = vld [vmem:[#allocation24_spill] sm:$0xff] }
 0x85b   :  { %v5321_v60 = vmax.f32 %v5313_v54, 0.0 }
 0x85d   :  { %v5136_v11 = vpop.f32.mrf.mxu0 }
 0x85e   :  { %v5175_v26 = vadd.f32 %v5174_v58, %v5136_v11  ;;  %v5155_v28 = vpop.f32.mrf.mxu1  ;;  %v4665_v58 = vadd.f32 %v14560_v33, %v14559_v0  ;;  %v5195_v0 = vpop.f32.mrf.mxu3  ;;  %v5320_v33 = vmax.f32 %v5312_v31, 0.0 }
 0x85f   :  { %v5194_v16 = vadd.f32 %v5193_v21, %v5155_v28  ;;  %v14574_v28 = vld [vmem:[#allocation6_spill] sm:$0xff] }
 0x860   :  { %v5314_v44 = vadd.f32 %v5175_v26, %v14558_v8  ;;  %v5252_v38 = vadd.f32 %v4665_v58, %v14567_v13  ;;  %v14571_v26 = vmax.f32 %v14570_v5, 0.0  ;;  %v5253_v57 = vadd.f32 %v4684_v20, %v14574_v28 }
 0x861   :  { %v5315_v52 = vadd.f32 %v5194_v16, %v14561_v61  ;;  %v14576_v8 = vmax.f32 %v14575_v6, 0.0  ;;  %v5308_v16 = vmax.f32 %v5300_v24, 0.0  ;;  %v5304_v61 = vmax.f32 %v5296_v12, 0.0 }
 0x862   :  { %v5322_v23 = vmax.f32 %v5314_v44, 0.0  ;;  %v5301_v46 = vadd.f32 %v5120_v32, %v14571_v26  ;;  %v5245_v20 = vmax.f32 %v12793_v22, 0.0  ;;  %v5261_v49 = vmax.f32 %v5253_v57, 0.0 }
 0x863   :  { %v5323_v11 = vmax.f32 %v5315_v52, 0.0  ;;  %v5297_v44 = vadd.f32 %v5115_v29, %v14576_v8  ;;  %v5257_v29 = vmax.f32 %v5249_v47, 0.0 }
 0x864   :  { %v5354_v21 = vmax.f32 %v5258_v37, %v5322_v23  ;;  %v5244_v37 = vmax.f32 %v12789_v43, 0.0  ;;  %v5260_v23 = vmax.f32 %v5252_v38, 0.0  ;;  %v5309_v52 = vmax.f32 %v5301_v46, 0.0 }
 0x865   :  { %v5138_v9 = vpop.f32.mrf.mxu0  ;;  %v5355_v1 = vmax.f32 %v5259_v14, %v5323_v11  ;;  %v5305_v53 = vmax.f32 %v5297_v44, 0.0  ;;  %v5344_v43 = vmax.f32 %v5240_v56, %v5304_v61  ;;  %v5353_v11 = vmax.f32 %v5257_v29, %v5321_v60 }
 0x866   :  { %v5370_v27 = vmax.f32 %v5346_v34, %v5354_v21  ;;  %v5177_v25 = vadd.f32 %v5176_v55, %v5138_v9  ;;  %v5157_v50 = vpop.f32.mrf.mxu1  ;;  %v5348_v24 = vmax.f32 %v5244_v37, %v5308_v16  ;;  %v5352_v34 = vmax.f32 %v5256_v41, %v5320_v33 }
 0x867   :  { %v5371_v58 = vmax.f32 %v5347_v18, %v5355_v1  ;;  %v5196_v32 = vadd.f32 %v5195_v0, %v5157_v50  ;;  %v5241_v21 = vmax.f32 %v12783_v51, 0.0  ;;  %v5349_v39 = vmax.f32 %v5245_v20, %v5309_v52 }
 0x868   :  { %v5316_v36 = vadd.f32 %v5177_v25, %v14577_v15  ;;  %v5368_v22 = vmax.f32 %v5344_v43, %v5352_v34 }
 0x869   :  { %v5317_v62 = vadd.f32 %v5196_v32, %v14578_v40  ;;  %v5345_v30 = vmax.f32 %v5241_v21, %v5305_v53 }
 0x86a   :  { %v5324_v14 = vmax.f32 %v5316_v36, 0.0  ;;  %v5437_v26 = vpack.c.bf16 %v5368_v22, %v5366_v10 }
 0x86b   :  { %v5325_v31 = vmax.f32 %v5317_v62, 0.0  ;;  %v5369_v5 = vmax.f32 %v5345_v30, %v5353_v11 }
 0x86c   :  { %v5356_v63 = vmax.f32 %v5260_v23, %v5324_v14 }
 0x86d   :  { %v5357_v38 = vmax.f32 %v5261_v49, %v5325_v31  ;;  %v5438_v48 = vpack.c.bf16 %v5369_v5, %v5367_v59 }
 0x86e   :  { %v5372_v13 = vmax.f32 %v5348_v24, %v5356_v63 }
 0x86f   :  { %v5373_v2 = vmax.f32 %v5349_v39, %v5357_v38 }
 0x870   :  { %v5439_v12 = vpack.c.bf16 %v5372_v13, %v5370_v27 }
 0x871   :  { %v5440_v18 = vpack.c.bf16 %v5373_v2, %v5371_v58 }
 0x872   :  { %5447 = vmatpush.bf16.msra.mxu2 %v5439_v12 }
 0x873   :  { %5466 = vmatpush.bf16.msra.mxu3 %v5440_v18 }
 0x876   :  { %5448 = vmatpush.bf16.msra.mxu2 %v5437_v26 }
 0x877   :  { %5467 = vmatpush.bf16.msra.mxu3 %v5438_v48 }
 0x879   :  { %7319 = vmatmul.msk.bf16.vlgmr.msra.gmra.mxu2 %vm5392_vm7, %v12739_v17 }
 0x87a   :  { %7321 = vmatmul.msk.bf16.vlgmr.msra.gmra.mxu3 %vm5392_vm7, %v12739_v17 }
 0x889   :  { %7320 = vmatmul.msk.bf16.gmra.mxu2 %vm5392_vm7, %v12800_v42 }
 0x88a   :  { %7322 = vmatmul.msk.bf16.gmra.mxu3 %vm5392_vm7, %v12800_v42 }
 0x8b6   :  { %v12859_v19 = vpop.f32.mrf.mxu0 }
 0x8b7   :  { %v12861_v35 = vpop.f32.mrf.mxu1 }
 0x8b8   :  { %v5551_v60 = vpack.c.bf16 %v12861_v35, %v12859_v19 }
 0x8ba   :  { %v5583_v63 = vunpack.c.l.b16 %v5551_v60  ;;  %v5584_v43 = vunpack.c.h.b16 %v5551_v60 }
 0x8be   :  { %v12863_v10 = vpop.f32.mrf.mxu0 }
 0x8bf   :  { %v12865_v45 = vpop.f32.mrf.mxu1  ;;  %v7987_v61 = vpack.i.bf16 %v12863_v10, %v12859_v19 }
 0x8c0   :  { %v7997_v14 = vpack.i.bf16 %v12865_v45, %v12861_v35  ;;  %v5552_v62 = vpack.c.bf16 %v12865_v45, %v12863_v10 }
 0x8c2   :  { %v5585_v31 = vunpack.c.l.b16 %v5552_v62  ;;  %v5586_v39 = vunpack.c.h.b16 %v5552_v62 }
 0x8c4   :  { %v12949_v13 = vpack.c.b16 %v5585_v31, %v5583_v63  ;;  %v12951_v38 = vpack.c.b16 %v5586_v39, %v5584_v43  ;;  %v7533_v63 = vld [vmem:[%s13612_s11 + $0x38] sm:$0xff] }
 0x8c5   :  { %v7541_v43 = vld [vmem:[%s13612_s11 + $0x78] sm:$0xff] }
 0x8d0   :  { %v12867_v3 = vpop.f32.mrf.mxu0  ;;  %v12869_v59 = vpop.f32.mrf.mxu1 }
 0x8d1   :  { %v5553_v15 = vpack.c.bf16 %v12869_v59, %v12867_v3 }
 0x8d3   :  { %v5587_v20 = vunpack.c.l.b16 %v5553_v15  ;;  %v5588_v53 = vunpack.c.h.b16 %v5553_v15 }
 0x8d8   :  { %v12871_v56 = vpop.f32.mrf.mxu0  ;;  %v12873_v17 = vpop.f32.mrf.mxu1 }
 0x8d9   :  { %v7962_v51 = vpack.i.bf16 %v12871_v56, %v12867_v3  ;;  %v7967_v42 = vpack.i.bf16 %v12873_v17, %v12869_v59  ;;  %v5554_v32 = vpack.c.bf16 %v12873_v17, %v12871_v56 }
 0x8db   :  { %7963 = vrot.lane.b32.xlu2 %v7962_v51, %s8145_s19  ;;  %7968 = vrot.lane.b32.xlu0 %v7967_v42, %s8145_s19  ;;  %v5589_v29 = vunpack.c.l.b16 %v5554_v32  ;;  %v5590_v24 = vunpack.c.h.b16 %v5554_v32 }
 0x8dd   :  { %v12943_v21 = vpack.c.b16 %v5589_v29, %v5587_v20  ;;  %v12945_v11 = vpack.c.b16 %v5590_v24, %v5588_v53 }
 0x8fc   :  { %v12881_v46 = vpop.f32.mrf.mxu2 }
 0x8fd   :  { %v12883_v55 = vpop.f32.mrf.mxu3 }
 0x8fe   :  { %v5555_v16 = vpack.c.bf16 %v12883_v55, %v12881_v46 }
 0x900   :  { %v5603_v52 = vunpack.c.l.b16 %v5555_v16  ;;  %v5604_v40 = vunpack.c.h.b16 %v5555_v16 }
 0x904   :  { %v12885_v9 = vpop.f32.mrf.mxu2 }
 0x905   :  { %v7972_v4 = vpack.i.bf16 %v12885_v9, %v12881_v46  ;;  %v12889_v54 = vpop.f32.mrf.mxu3 }
 0x906   :  { %v7977_v27 = vpack.i.bf16 %v12889_v54, %v12883_v55  ;;  %v5556_v6 = vpack.c.bf16 %v12889_v54, %v12885_v9 }
 0x907   :  { %7973 = vrot.lane.b32.xlu1 %v7972_v4, %s8144_s0 }
 0x908   :  { %7978 = vrot.lane.b32.xlu2 %v7977_v27, %s8144_s0  ;;  %v5605_v36 = vunpack.c.l.b16 %v5556_v6  ;;  %v5606_v23 = vunpack.c.h.b16 %v5556_v6 }
 0x90a   :  { %v12935_v49 = vpack.c.b16 %v5605_v36, %v5603_v52  ;;  %v12938_v34 = vpack.c.b16 %v5606_v23, %v5604_v40 }
 0x90c   :  { %v12895_v1 = vpop.f32.mrf.mxu2 }
 0x90d   :  { %v12897_v25 = vpop.f32.mrf.mxu3 }
 0x90e   :  { %v5557_v47 = vpack.c.bf16 %v12897_v25, %v12895_v1 }
 0x910   :  { %v5607_v0 = vunpack.c.l.b16 %v5557_v47  ;;  %v5608_v50 = vunpack.c.h.b16 %v5557_v47 }
 0x914   :  { %v12899_v7 = vpop.f32.mrf.mxu2 }
 0x915   :  { %v7982_v28 = vpack.i.bf16 %v12899_v7, %v12895_v1  ;;  %v12905_v57 = vpop.f32.mrf.mxu3 }
 0x916   :  { %v7992_v8 = vpack.i.bf16 %v12905_v57, %v12897_v25  ;;  %v5558_v44 = vpack.c.bf16 %v12905_v57, %v12899_v7 }
 0x917   :  { %7983 = vrot.lane.b32.xlu0 %v7982_v28, %s8144_s0 }
 0x918   :  { %v5609_v33 = vunpack.c.l.b16 %v5558_v44  ;;  %v5610_v58 = vunpack.c.h.b16 %v5558_v44  ;;  %7993 = vrot.lane.b32.xlu1 %v7992_v8, %s8144_s0 }
 0x91a   :  { %v12921_v37 = vpack.c.b16 %v5609_v33, %v5607_v0  ;;  %v12923_v41 = vpack.c.b16 %v5610_v58, %v5608_v50 }
 0x91c   :  { %5661 = vmatpush.bf16.msrb.mxu0 %v12921_v37  ;;  %5680 = vmatpush.bf16.msrb.mxu1 %v12923_v41 }
 0x91f   :  { %7988 = vrot.lane.b32.xlu0 %v7987_v61, %s8145_s19 }
 0x920   :  { %7998 = vrot.lane.b32.xlu1 %v7997_v14, %s8145_s19  ;;  %5662 = vmatpush.bf16.msrb.mxu0 %v12935_v49 }
 0x921   :  { %5681 = vmatpush.bf16.msrb.mxu1 %v12938_v34 }
 0x924   :  { %5663 = vmatpush.bf16.msrb.mxu0 %v12943_v21 }
 0x925   :  { %5682 = vmatpush.bf16.msrb.mxu1 %v12945_v11 }
 0x928   :  { %5664 = vmatpush.bf16.msrb.mxu0 %v12949_v13 }
 0x929   :  { %5683 = vmatpush.bf16.msrb.mxu1 %v12951_v38 }
 0x935   :  { %v7964_v2 = vpop.permute.xlu2 %7963 }
 0x936   :  { %v7966_v12 = vunpack.i.h.bf16 %v7964_v2  ;;  %v7965_v22 = vunpack.i.l.bf16 %v7964_v2 }
 0x94d   :  { %v7969_v30 = vpop.permute.xlu0 %7968 }
 0x94e   :  { %v7971_v18 = vunpack.i.h.bf16 %v7969_v30  ;;  %v7970_v5 = vunpack.i.l.bf16 %v7969_v30 }
 0x950   :  { %v5533_v48 = vsel %vm253_vm4, %v7965_v22, %v7970_v5  ;;  %v5534_v51 = vsel %vm253_vm4, %v7966_v12, %v7971_v18  ;;  %v5537_v42 = vsel %vm253_vm4, %v7970_v5, %v7965_v22  ;;  %v5538_v4 = vsel %vm253_vm4, %v7971_v18, %v7966_v12 }
 0x951   :  { %v5543_v47 = vsel %vm8708_vm5, %v5533_v48, 0.0  ;;  %v5544_v6 = vsel %vm8714_vm6, %v5537_v42, 0.0  ;;  %v5545_v8 = vsel %vm8708_vm5, %v5534_v51, 0.0  ;;  %v5546_v44 = vsel %vm8714_vm6, %v5538_v4, 0.0 }
 0x952   :  { %v5621_v16 = vpack.c.bf16 %v5544_v6, %v5543_v47  ;;  %v5622_v0 = vpack.c.bf16 %v5546_v44, %v5545_v8 }
 0x954   :  { %v5631_v50 = vunpack.c.l.b16 %v5621_v16  ;;  %v5633_v33 = vunpack.c.l.b16 %v5622_v0  ;;  %v5632_v58 = vunpack.c.h.b16 %v5621_v16  ;;  %v5634_v15 = vunpack.c.h.b16 %v5622_v0 }
 0x956   :  { %v5637_v36 = vpack.c.b16 %v5633_v33, %v5631_v50  ;;  %v5638_v32 = vpack.c.b16 %v5634_v15, %v5632_v58 }
 0x958   :  { %5699 = vmatpush.bf16.msrb.mxu2 %v5637_v36  ;;  %5718 = vmatpush.bf16.msrb.mxu3 %v5638_v32 }
 0x962   :  { %v7979_v61 = vpop.permute.xlu2 %7978 }
 0x963   :  { %v7980_v60 = vunpack.i.l.bf16 %v7979_v61  ;;  %v7981_v40 = vunpack.i.h.bf16 %v7979_v61 }
 0x979   :  { %v7974_v23 = vpop.permute.xlu1 %7973 }
 0x97a   :  { %v7975_v52 = vunpack.i.l.bf16 %v7974_v23  ;;  %v7976_v14 = vunpack.i.h.bf16 %v7974_v23 }
 0x97c   :  { %v5499_v62 = vsel %vm216_vm1, %v7975_v52, %v7980_v60  ;;  %v5503_v20 = vsel %vm216_vm1, %v7980_v60, %v7975_v52  ;;  %v5500_v29 = vsel %vm216_vm1, %v7976_v14, %v7981_v40  ;;  %v5504_v53 = vsel %vm216_vm1, %v7981_v40, %v7976_v14 }
 0x97d   :  { %v5507_v31 = vsel %vm8626_vm2, %v5503_v20, 0.0  ;;  %v5508_v39 = vsel %vm8632_vm3, %v5499_v62, 0.0  ;;  %v5509_v5 = vsel %vm8626_vm2, %v5504_v53, 0.0  ;;  %v5510_v48 = vsel %vm8632_vm3, %v5500_v29, 0.0 }
 0x97e   :  { %v5547_v51 = vpack.c.bf16 %v5508_v39, %v5507_v31  ;;  %v5548_v58 = vpack.c.bf16 %v5510_v48, %v5509_v5 }
 0x980   :  { %v5563_v40 = vunpack.c.l.b16 %v5547_v51  ;;  %v5565_v53 = vunpack.c.l.b16 %v5548_v58  ;;  %v5564_v31 = vunpack.c.h.b16 %v5547_v51  ;;  %v5566_v39 = vunpack.c.h.b16 %v5548_v58 }
 0x989   :  { %v7984_v24 = vpop.permute.xlu0 %7983 }
 0x98a   :  { %v7986_v30 = vunpack.i.h.bf16 %v7984_v24  ;;  %v7985_v2 = vunpack.i.l.bf16 %v7984_v24  ;;  %v7994_v12 = vpop.permute.xlu1 %7993 }
 0x98b   :  { %v7996_v22 = vunpack.i.h.bf16 %v7994_v12  ;;  %v7995_v18 = vunpack.i.l.bf16 %v7994_v12 }
 0x98d   :  { %v5502_v42 = vsel %vm216_vm1, %v7986_v30, %v7996_v22  ;;  %v5506_v4 = vsel %vm216_vm1, %v7996_v22, %v7986_v30  ;;  %v5501_v47 = vsel %vm216_vm1, %v7985_v2, %v7995_v18  ;;  %v5505_v6 = vsel %vm216_vm1, %v7995_v18, %v7985_v2 }
 0x98e   :  { %v5513_v8 = vsel %vm8626_vm2, %v5506_v4, 0.0  ;;  %v5514_v44 = vsel %vm8632_vm3, %v5502_v42, 0.0  ;;  %v5511_v16 = vsel %vm8626_vm2, %v5505_v6, 0.0  ;;  %v5512_v0 = vsel %vm8632_vm3, %v5501_v47, 0.0 }
 0x98f   :  { %v5549_v50 = vpack.c.bf16 %v5512_v0, %v5511_v16  ;;  %v5550_v33 = vpack.c.bf16 %v5514_v44, %v5513_v8  ;;  %v5571_v42 = vpack.c.b16 %v5565_v53, %v5563_v40  ;;  %v5572_v6 = vpack.c.b16 %v5566_v39, %v5564_v31  ;;  %v7518_v8 = vld [vmem:[%s13608_s7] sm:$0xff] }
 0x991   :  { %v7989_v15 = vpop.permute.xlu0 %7988  ;;  %v5567_v23 = vunpack.c.l.b16 %v5549_v50  ;;  %v5569_v61 = vunpack.c.l.b16 %v5550_v33  ;;  %v5568_v60 = vunpack.c.h.b16 %v5549_v50  ;;  %v5570_v14 = vunpack.c.h.b16 %v5550_v33 }
 0x992   :  { %v7991_v36 = vunpack.i.h.bf16 %v7989_v15  ;;  %v7990_v32 = vunpack.i.l.bf16 %v7989_v15  ;;  %v7999_v52 = vpop.permute.xlu1 %7998  ;;  %v7519_v15 = vld [vmem:[%s13608_s7 + $0x8] sm:$0xff] }
 0x993   :  { %v8001_v62 = vunpack.i.h.bf16 %v7999_v52  ;;  %v8000_v20 = vunpack.i.l.bf16 %v7999_v52  ;;  %v5573_v29 = vpack.c.b16 %v5569_v61, %v5567_v23  ;;  %v5574_v24 = vpack.c.b16 %v5570_v14, %v5568_v60 }
 0x995   :  { %v5532_v30 = vsel %vm253_vm4, %v7991_v36, %v8001_v62  ;;  %v5536_v2 = vsel %vm253_vm4, %v8001_v62, %v7991_v36  ;;  %v5531_v12 = vsel %vm253_vm4, %v7990_v32, %v8000_v20  ;;  %v5535_v22 = vsel %vm253_vm4, %v8000_v20, %v7990_v32  ;;  %5665 = vmatpush.bf16.msrb.mxu0 %v5573_v29 }
 0x996   :  { %v5541_v18 = vsel %vm8708_vm5, %v5532_v30, 0.0  ;;  %v5542_v5 = vsel %vm8714_vm6, %v5536_v2, 0.0  ;;  %v5539_v48 = vsel %vm8708_vm5, %v5531_v12, 0.0  ;;  %v5540_v51 = vsel %vm8714_vm6, %v5535_v22, 0.0  ;;  %5684 = vmatpush.bf16.msrb.mxu1 %v5574_v24 }
 0x997   :  { %v5619_v4 = vpack.c.bf16 %v5540_v51, %v5539_v48  ;;  %v5620_v47 = vpack.c.bf16 %v5542_v5, %v5541_v18 }
 0x999   :  { %5666 = vmatpush.bf16.msrb.mxu0 %v5571_v42  ;;  %v5627_v44 = vunpack.c.l.b16 %v5619_v4  ;;  %v5629_v16 = vunpack.c.l.b16 %v5620_v47  ;;  %v5628_v0 = vunpack.c.h.b16 %v5619_v4  ;;  %v5630_v50 = vunpack.c.h.b16 %v5620_v47 }
 0x99a   :  { %5685 = vmatpush.bf16.msrb.mxu1 %v5572_v6 }
 0x99b   :  { %v5635_v33 = vpack.c.b16 %v5629_v16, %v5627_v44  ;;  %v5636_v58 = vpack.c.b16 %v5630_v50, %v5628_v0 }
 0x99c   :  { %7331 = vmatmul.msk.bf16.vlgmr.msrb.gmra.mxu0 %vm428_vm0, %v7518_v8 }
 0x99d   :  { %7333 = vmatmul.msk.bf16.vlgmr.msrb.gmra.mxu1 %vm428_vm0, %v7518_v8  ;;  %5700 = vmatpush.bf16.msrb.mxu2 %v5635_v33 }
 0x99e   :  { %5719 = vmatpush.bf16.msrb.mxu3 %v5636_v58 }
 0x9a1   :  { %5701 = vmatpush.bf16.msrb.mxu2 %v12921_v37 }
 0x9a2   :  { %5720 = vmatpush.bf16.msrb.mxu3 %v12923_v41 }
 0x9a5   :  { %5702 = vmatpush.bf16.msrb.mxu2 %v12935_v49 }
 0x9a6   :  { %5721 = vmatpush.bf16.msrb.mxu3 %v12938_v34 }
 0x9a9   :  { %5703 = vmatpush.bf16.msrb.mxu2 %v12943_v21 }
 0x9aa   :  { %5722 = vmatpush.bf16.msrb.mxu3 %v12945_v11 }
 0x9ac   :  { %7332 = vmatmul.msk.bf16.gmra.mxu0 %vm428_vm0, %v7519_v15 }
 0x9ad   :  { %7334 = vmatmul.msk.bf16.gmra.mxu1 %vm428_vm0, %v7519_v15  ;;  %5704 = vmatpush.bf16.msrb.mxu2 %v12949_v13 }
 0x9ae   :  { %5723 = vmatpush.bf16.msrb.mxu3 %v12951_v38 }
 0x9b0   :  { %7335 = vmatmul.msk.bf16.vlgmr.msrb.gmra.mxu2 %vm428_vm0, %v7518_v8 }
 0x9b1   :  { %7337 = vmatmul.msk.bf16.vlgmr.msrb.gmra.mxu3 %vm428_vm0, %v7518_v8 }
 0x9c0   :  { %7336 = vmatmul.msk.bf16.gmra.mxu2 %vm428_vm0, %v7519_v15 }
 0x9c1   :  { %7338 = vmatmul.msk.bf16.gmra.mxu3 %vm428_vm0, %v7519_v15 }
 0xa19   :  { %v5668_v37 = vpop.f32.mrf.mxu0 }
 0xa1a   :  { %v5687_v41 = vpop.f32.mrf.mxu1  ;;  %v5735_v49 = vmax.f32 %v5668_v37, 0.0 }
 0xa1b   :  { %v5736_v53 = vmax.f32 %v5687_v41, 0.0 }
 0xa21   :  { %v13041_v34 = vpop.f32.mrf.mxu0 }
 0xa22   :  { %v5737_v21 = vmax.f32 %v13041_v34, 0.0  ;;  %v5689_v11 = vpop.f32.mrf.mxu1 }
 0xa23   :  { %v5738_v24 = vmax.f32 %v5689_v11, 0.0 }
 0xa24   :  { %v8012_v36 = vpack.i.bf16 %v5737_v21, %v5735_v49 }
 0xa25   :  { %v8017_v39 = vpack.i.bf16 %v5738_v24, %v5736_v53 }
 0xa26   :  { %8013 = vrot.lane.b32.xlu1 %v8012_v36, %s8145_s19 }
 0xa29   :  { %v5673_v13 = vpop.f32.mrf.mxu0 }
 0xa2a   :  { %v5692_v38 = vpop.f32.mrf.mxu1  ;;  %v5739_v32 = vmax.f32 %v5673_v13, 0.0 }
 0xa2b   :  { %v5740_v23 = vmax.f32 %v5692_v38, 0.0 }
 0xa2d   :  { %v5825_v36 = vpack.c.bf16 %v5740_v23, %v5739_v32 }
 0xa31   :  { %v5675_v61 = vpop.f32.mrf.mxu0 }
 0xa32   :  { %v5741_v52 = vmax.f32 %v5675_v61, 0.0  ;;  %v5694_v60 = vpop.f32.mrf.mxu1 }
 0xa33   :  { %v5742_v14 = vmax.f32 %v5694_v60, 0.0  ;;  %v5706_v40 = vpop.f32.mrf.mxu2 }
 0xa34   :  { %v8002_v62 = vpack.i.bf16 %v5741_v52, %v5739_v32  ;;  %v5725_v20 = vpop.f32.mrf.mxu3  ;;  %v5743_v12 = vmax.f32 %v5706_v40, 0.0 }
 0xa35   :  { %v8007_v29 = vpack.i.bf16 %v5742_v14, %v5740_v23  ;;  %v5744_v47 = vmax.f32 %v5725_v20, 0.0  ;;  %v5826_v13 = vpack.c.bf16 %v5742_v14, %v5741_v52 }
 0xa36   :  { %8003 = vrot.lane.b32.xlu2 %v8002_v62, %s8145_s19  ;;  %v5823_v62 = vpack.c.bf16 %v5736_v53, %v5735_v49 }
 0xa37   :  { %8008 = vrot.lane.b32.xlu0 %v8007_v29, %s8145_s19  ;;  %v5827_v15 = vpack.c.bf16 %v5744_v47, %v5743_v12  ;;  %v5862_v32 = vunpack.c.h.b16 %v5826_v13 }
 0xa38   :  { %v5855_v49 = vunpack.c.l.b16 %v5823_v62  ;;  %v5856_v14 = vunpack.c.h.b16 %v5823_v62 }
 0xa39   :  { %v5875_v20 = vunpack.c.l.b16 %v5827_v15  ;;  %v5876_v29 = vunpack.c.h.b16 %v5827_v15 }
 0xa3b   :  { %v5708_v31 = vpop.f32.mrf.mxu2 }
 0xa3c   :  { %v5727_v30 = vpop.f32.mrf.mxu3  ;;  %v5745_v2 = vmax.f32 %v5708_v31, 0.0  ;;  %v5824_v31 = vpack.c.bf16 %v5738_v24, %v5737_v21 }
 0xa3d   :  { %v5746_v42 = vmax.f32 %v5727_v30, 0.0  ;;  %v5860_v30 = vunpack.c.h.b16 %v5825_v36 }
 0xa3e   :  { %8018 = vrot.lane.b32.xlu2 %v8017_v39, %s8145_s19  ;;  %v8032_v18 = vpack.i.bf16 %v5745_v2, %v5743_v12  ;;  %v5859_v39 = vunpack.c.l.b16 %v5825_v36  ;;  %v5861_v12 = vunpack.c.l.b16 %v5826_v13  ;;  %v5857_v53 = vunpack.c.l.b16 %v5824_v31 }
 0xa3f   :  { %v5828_v50 = vpack.c.bf16 %v5746_v42, %v5745_v2  ;;  %v8037_v2 = vpack.i.bf16 %v5746_v42, %v5744_v47  ;;  %v13066_v24 = vpack.c.b16 %v5862_v32, %v5860_v30 }
 0xa40   :  { %v13064_v21 = vpack.c.b16 %v5861_v12, %v5859_v39 }
 0xa41   :  { %v5877_v38 = vunpack.c.l.b16 %v5828_v50  ;;  %v5878_v61 = vunpack.c.h.b16 %v5828_v50 }
 0xa43   :  { %v5711_v22 = vpop.f32.mrf.mxu2  ;;  %v13057_v23 = vpack.c.b16 %v5877_v38, %v5875_v20  ;;  %v13059_v52 = vpack.c.b16 %v5878_v61, %v5876_v29 }
 0xa44   :  { %v5730_v5 = vpop.f32.mrf.mxu3  ;;  %v5747_v48 = vmax.f32 %v5711_v22, 0.0  ;;  %v5858_v22 = vunpack.c.h.b16 %v5824_v31 }
 0xa45   :  { %v5748_v51 = vmax.f32 %v5730_v5, 0.0 }
 0xa46   :  { %8033 = vrot.lane.b32.xlu2 %v8032_v18, %s8144_s0  ;;  %v13070_v18 = vpack.c.b16 %v5857_v53, %v5855_v49  ;;  %v13072_v5 = vpack.c.b16 %v5858_v22, %v5856_v14 }
 0xa47   :  { %v5829_v44 = vpack.c.bf16 %v5748_v51, %v5747_v48 }
 0xa49   :  { %v5879_v37 = vunpack.c.l.b16 %v5829_v44  ;;  %v5880_v41 = vunpack.c.h.b16 %v5829_v44 }
 0xa4b   :  { %v5713_v4 = vpop.f32.mrf.mxu2 }
 0xa4c   :  { %v5749_v6 = vmax.f32 %v5713_v4, 0.0  ;;  %v5732_v8 = vpop.f32.mrf.mxu3 }
 0xa4d   :  { %v5750_v16 = vmax.f32 %v5732_v8, 0.0 }
 0xa4e   :  { %v8022_v0 = vpack.i.bf16 %v5749_v6, %v5747_v48 }
 0xa4f   :  { %v8027_v33 = vpack.i.bf16 %v5750_v16, %v5748_v51  ;;  %v5830_v58 = vpack.c.bf16 %v5750_v16, %v5749_v6 }
 0xa50   :  { %8023 = vrot.lane.b32.xlu0 %v8022_v0, %s8144_s0 }
 0xa51   :  { %v5881_v34 = vunpack.c.l.b16 %v5830_v58  ;;  %v5882_v11 = vunpack.c.h.b16 %v5830_v58  ;;  %8028 = vrot.lane.b32.xlu1 %v8027_v33, %s8144_s0 }
 0xa53   :  { %v13051_v60 = vpack.c.b16 %v5881_v34, %v5879_v37  ;;  %v13053_v40 = vpack.c.b16 %v5882_v11, %v5880_v41 }
 0xa55   :  { %5933 = vmatpush.bf16.msra.mxu0 %v13051_v60  ;;  %5952 = vmatpush.bf16.msra.mxu1 %v13053_v40 }
 0xa58   :  { %8038 = vrot.lane.b32.xlu0 %v8037_v2, %s8144_s0 }
 0xa59   :  { %5934 = vmatpush.bf16.msra.mxu0 %v13057_v23  ;;  %5953 = vmatpush.bf16.msra.mxu1 %v13059_v52 }
 0xa5d   :  { %5935 = vmatpush.bf16.msra.mxu0 %v13064_v21  ;;  %5954 = vmatpush.bf16.msra.mxu1 %v13066_v24 }
 0xa61   :  { %5936 = vmatpush.bf16.msra.mxu0 %v13070_v18  ;;  %5955 = vmatpush.bf16.msra.mxu1 %v13072_v5 }
 0xa90   :  { %v8004_v48 = vpop.permute.xlu2 %8003 }
 0xa91   :  { %v8006_v33 = vunpack.i.h.bf16 %v8004_v48  ;;  %v8005_v58 = vunpack.i.l.bf16 %v8004_v48 }
 0xa98   :  { %v8014_v51 = vpop.permute.xlu1 %8013  ;;  %v8019_v42 = vpop.permute.xlu2 %8018 }
 0xa99   :  { %v8016_v4 = vunpack.i.h.bf16 %v8014_v51  ;;  %v8015_v47 = vunpack.i.l.bf16 %v8014_v51  ;;  %v8021_v6 = vunpack.i.h.bf16 %v8019_v42  ;;  %v8020_v8 = vunpack.i.l.bf16 %v8019_v42 }
 0xa9b   :  { %v5804_v44 = vsel %vm253_vm4, %v8016_v4, %v8021_v6  ;;  %v5808_v16 = vsel %vm253_vm4, %v8021_v6, %v8016_v4  ;;  %v5803_v0 = vsel %vm253_vm4, %v8015_v47, %v8020_v8  ;;  %v5807_v50 = vsel %vm253_vm4, %v8020_v8, %v8015_v47 }
 0xa9c   :  { %v5813_v15 = vsel %vm8708_vm5, %v5804_v44, 0.0  ;;  %v5814_v37 = vsel %vm8714_vm6, %v5808_v16, 0.0  ;;  %v5811_v41 = vsel %vm8708_vm5, %v5803_v0, 0.0  ;;  %v5812_v34 = vsel %vm8714_vm6, %v5807_v50, 0.0 }
 0xa9d   :  { %v5891_v38 = vpack.c.bf16 %v5812_v34, %v5811_v41  ;;  %v5892_v61 = vpack.c.bf16 %v5814_v37, %v5813_v15 }
 0xa9f   :  { %v5899_v51 = vunpack.c.l.b16 %v5891_v38  ;;  %v5901_v42 = vunpack.c.l.b16 %v5892_v61  ;;  %v5900_v6 = vunpack.c.h.b16 %v5891_v38  ;;  %v5902_v8 = vunpack.c.h.b16 %v5892_v61 }
 0xaa1   :  { %v5907_v44 = vpack.c.b16 %v5901_v42, %v5899_v51  ;;  %v5908_v16 = vpack.c.b16 %v5902_v8, %v5900_v6 }
 0xaa9   :  { %v8009_v11 = vpop.permute.xlu0 %8008 }
 0xaaa   :  { %v8011_v36 = vunpack.i.h.bf16 %v8009_v11  ;;  %v8010_v13 = vunpack.i.l.bf16 %v8009_v11  ;;  %v7520_v11 = vld [vmem:[%s13609_s8] sm:$0xff] }
 0xaac   :  { %v5805_v62 = vsel %vm253_vm4, %v8005_v58, %v8010_v13  ;;  %v5806_v20 = vsel %vm253_vm4, %v8006_v33, %v8011_v36  ;;  %v5809_v29 = vsel %vm253_vm4, %v8010_v13, %v8005_v58  ;;  %v5810_v31 = vsel %vm253_vm4, %v8011_v36, %v8006_v33  ;;  %v8034_v36 = vpop.permute.xlu2 %8033 }
 0xaad   :  { %v5815_v39 = vsel %vm8708_vm5, %v5805_v62, 0.0  ;;  %v5816_v30 = vsel %vm8714_vm6, %v5809_v29, 0.0  ;;  %v5817_v2 = vsel %vm8708_vm5, %v5806_v20, 0.0  ;;  %v5818_v12 = vsel %vm8714_vm6, %v5810_v31, 0.0 }
 0xaae   :  { %v5893_v32 = vpack.c.bf16 %v5816_v30, %v5815_v39  ;;  %v5894_v49 = vpack.c.bf16 %v5818_v12, %v5817_v2  ;;  %v8036_v39 = vunpack.i.h.bf16 %v8034_v36  ;;  %v8035_v30 = vunpack.i.l.bf16 %v8034_v36 }
 0xab0   :  { %v5903_v14 = vunpack.c.l.b16 %v5893_v32  ;;  %v5905_v53 = vunpack.c.l.b16 %v5894_v49  ;;  %v5904_v22 = vunpack.c.h.b16 %v5893_v32  ;;  %v5906_v48 = vunpack.c.h.b16 %v5894_v49 }
 0xab2   :  { %v5909_v4 = vpack.c.b16 %v5905_v53, %v5903_v14  ;;  %v5910_v47 = vpack.c.b16 %v5906_v48, %v5904_v22 }
 0xab4   :  { %5979 = vmatpush.bf16.msra.mxu2 %v5909_v4  ;;  %5998 = vmatpush.bf16.msra.mxu3 %v5910_v47 }
 0xab8   :  { %5980 = vmatpush.bf16.msra.mxu2 %v5907_v44  ;;  %5999 = vmatpush.bf16.msra.mxu3 %v5908_v16 }
 0xabc   :  { %5981 = vmatpush.bf16.msra.mxu2 %v13051_v60  ;;  %6000 = vmatpush.bf16.msra.mxu3 %v13053_v40 }
 0xac0   :  { %5982 = vmatpush.bf16.msra.mxu2 %v13057_v23  ;;  %6001 = vmatpush.bf16.msra.mxu3 %v13059_v52 }
 0xac2   :  { %v8024_v0 = vpop.permute.xlu0 %8023 }
 0xac3   :  { %v8026_v50 = vunpack.i.h.bf16 %v8024_v0  ;;  %v8025_v33 = vunpack.i.l.bf16 %v8024_v0  ;;  %v8029_v58 = vpop.permute.xlu1 %8028 }
 0xac4   :  { %5983 = vmatpush.bf16.msra.mxu2 %v13064_v21  ;;  %6002 = vmatpush.bf16.msra.mxu3 %v13066_v24  ;;  %v8031_v15 = vunpack.i.h.bf16 %v8029_v58  ;;  %v8030_v37 = vunpack.i.l.bf16 %v8029_v58 }
 0xac6   :  { %v5774_v41 = vsel %vm216_vm1, %v8026_v50, %v8031_v15  ;;  %v5778_v60 = vsel %vm216_vm1, %v8031_v15, %v8026_v50  ;;  %v5773_v40 = vsel %vm216_vm1, %v8025_v33, %v8030_v37  ;;  %v5777_v23 = vsel %vm216_vm1, %v8030_v37, %v8025_v33  ;;  %v7521_v33 = vld [vmem:[%s13609_s8 + $0x8] sm:$0xff] }
 0xac7   :  { %v5785_v52 = vsel %vm8626_vm2, %v5778_v60, 0.0  ;;  %v5786_v21 = vsel %vm8632_vm3, %v5774_v41, 0.0  ;;  %v5783_v24 = vsel %vm8626_vm2, %v5777_v23, 0.0  ;;  %v5784_v34 = vsel %vm8632_vm3, %v5773_v40, 0.0 }
 0xac8   :  { %5984 = vmatpush.bf16.msra.mxu2 %v13070_v18  ;;  %6003 = vmatpush.bf16.msra.mxu3 %v13072_v5  ;;  %v5821_v13 = vpack.c.bf16 %v5784_v34, %v5783_v24  ;;  %v5822_v38 = vpack.c.bf16 %v5786_v21, %v5785_v52 }
 0xaca   :  { %v8039_v61 = vpop.permute.xlu0 %8038  ;;  %v5839_v62 = vunpack.c.l.b16 %v5821_v13  ;;  %v5841_v20 = vunpack.c.l.b16 %v5822_v38  ;;  %v5840_v29 = vunpack.c.h.b16 %v5821_v13  ;;  %v5842_v31 = vunpack.c.h.b16 %v5822_v38 }
 0xacb   :  { %v8041_v2 = vunpack.i.h.bf16 %v8039_v61  ;;  %v8040_v12 = vunpack.i.l.bf16 %v8039_v61  ;;  %7351 = vmatmul.msk.bf16.vlgmr.msra.gmra.mxu2 %vm428_vm0, %v7520_v11  ;;  %7353 = vmatmul.msk.bf16.vlgmr.msra.gmra.mxu3 %vm428_vm0, %v7520_v11 }
 0xacc   :  { %v5845_v32 = vpack.c.b16 %v5841_v20, %v5839_v62  ;;  %v5846_v49 = vpack.c.b16 %v5842_v31, %v5840_v29 }
 0xacd   :  { %v5771_v18 = vsel %vm216_vm1, %v8035_v30, %v8040_v12  ;;  %v5772_v5 = vsel %vm216_vm1, %v8036_v39, %v8041_v2  ;;  %v5775_v14 = vsel %vm216_vm1, %v8040_v12, %v8035_v30  ;;  %v5776_v53 = vsel %vm216_vm1, %v8041_v2, %v8036_v39 }
 0xace   :  { %v5779_v22 = vsel %vm8626_vm2, %v5775_v14, 0.0  ;;  %v5780_v48 = vsel %vm8632_vm3, %v5771_v18, 0.0  ;;  %v5781_v51 = vsel %vm8626_vm2, %v5776_v53, 0.0  ;;  %v5782_v42 = vsel %vm8632_vm3, %v5772_v5, 0.0  ;;  %5937 = vmatpush.bf16.msra.mxu0 %v5845_v32  ;;  %5956 = vmatpush.bf16.msra.mxu1 %v5846_v49 }
 0xacf   :  { %v5819_v4 = vpack.c.bf16 %v5780_v48, %v5779_v22  ;;  %v5820_v47 = vpack.c.bf16 %v5782_v42, %v5781_v51 }
 0xad1   :  { %v5835_v6 = vunpack.c.l.b16 %v5819_v4  ;;  %v5837_v8 = vunpack.c.l.b16 %v5820_v47  ;;  %v5836_v44 = vunpack.c.h.b16 %v5819_v4  ;;  %v5838_v16 = vunpack.c.h.b16 %v5820_v47 }
 0xad3   :  { %v5843_v0 = vpack.c.b16 %v5837_v8, %v5835_v6  ;;  %v5844_v50 = vpack.c.b16 %v5838_v16, %v5836_v44 }
 0xad5   :  { %5938 = vmatpush.bf16.msra.mxu0 %v5843_v0  ;;  %5957 = vmatpush.bf16.msra.mxu1 %v5844_v50 }
 0xad8   :  { %7347 = vmatmul.msk.bf16.vlgmr.msra.gmra.mxu0 %vm428_vm0, %v7520_v11  ;;  %7349 = vmatmul.msk.bf16.vlgmr.msra.gmra.mxu1 %vm428_vm0, %v7520_v11 }
 0xadb   :  { %7352 = vmatmul.msk.bf16.gmra.mxu2 %vm428_vm0, %v7521_v33  ;;  %7354 = vmatmul.msk.bf16.gmra.mxu3 %vm428_vm0, %v7521_v33 }
 0xae8   :  { %7348 = vmatmul.msk.bf16.gmra.mxu0 %vm428_vm0, %v7521_v33  ;;  %7350 = vmatmul.msk.bf16.gmra.mxu1 %vm428_vm0, %v7521_v33 }
 0xb4e   :  { %v5986_v58 = vpop.f32.mrf.mxu2  ;;  %v6005_v15 = vpop.f32.mrf.mxu3 }
 0xb4f   :  { %v5987_v37 = vadd.f32 %v5986_v58, %v12881_v46  ;;  %v6006_v62 = vadd.f32 %v6005_v15, %v12883_v55 }
 0xb51   :  { %v13164_v21 = vmax.f32 %v5987_v37, 0.0  ;;  %v13179_v30 = vmax.f32 %v6006_v62, 0.0 }
 0xb53   :  { %v6099_v14 = vpack.c.bf16 %v13179_v30, %v13164_v21 }
 0xb55   :  { %v5940_v41 = vpop.f32.mrf.mxu0  ;;  %v5959_v60 = vpop.f32.mrf.mxu1 }
 0xb56   :  { %v5988_v40 = vpop.f32.mrf.mxu2  ;;  %v6007_v23 = vpop.f32.mrf.mxu3  ;;  %v5941_v22 = vadd.f32 %v5940_v41, %v12859_v19  ;;  %v5960_v48 = vadd.f32 %v5959_v60, %v12861_v35  ;;  %v6147_v60 = vunpack.c.l.b16 %v6099_v14 }
 0xb57   :  { %v5989_v52 = vadd.f32 %v5988_v40, %v12885_v9  ;;  %v6008_v9 = vadd.f32 %v6007_v23, %v12889_v54  ;;  %v6148_v40 = vunpack.c.h.b16 %v6099_v14 }
 0xb59   :  { %v13166_v24 = vmax.f32 %v5989_v52, 0.0  ;;  %v13181_v2 = vmax.f32 %v6008_v9, 0.0 }
 0xb5b   :  { %v8052_v34 = vpack.i.bf16 %v13166_v24, %v13164_v21  ;;  %v6100_v53 = vpack.c.bf16 %v13181_v2, %v13166_v24 }
 0xb5d   :  { %8053 = vrot.lane.b32.xlu2 %v8052_v34, %s8144_s0  ;;  %v5942_v11 = vpop.f32.mrf.mxu0  ;;  %v5961_v36 = vpop.f32.mrf.mxu1  ;;  %v6149_v0 = vunpack.c.l.b16 %v6100_v53  ;;  %v6150_v19 = vunpack.c.h.b16 %v6100_v53 }
 0xb5e   :  { %v5991_v13 = vpop.f32.mrf.mxu2  ;;  %v6010_v38 = vpop.f32.mrf.mxu3 }
 0xb5f   :  { %v5992_v46 = vadd.f32 %v5991_v13, %v12895_v1  ;;  %v6011_v61 = vadd.f32 %v6010_v38, %v12897_v25  ;;  %v13242_v13 = vpack.c.b16 %v6149_v0, %v6147_v60  ;;  %v13244_v38 = vpack.c.b16 %v6150_v19, %v6148_v40 }
 0xb61   :  { %v13175_v20 = vmax.f32 %v5992_v46, 0.0  ;;  %v13177_v29 = vmax.f32 %v6011_v61, 0.0 }
 0xb63   :  { %v6101_v49 = vpack.c.bf16 %v13177_v29, %v13175_v20 }
 0xb65   :  { %v5945_v31 = vpop.f32.mrf.mxu0  ;;  %v5964_v39 = vpop.f32.mrf.mxu1  ;;  %v6151_v4 = vunpack.c.l.b16 %v6101_v49  ;;  %v6152_v47 = vunpack.c.h.b16 %v6101_v49 }
 0xb66   :  { %v5993_v12 = vpop.f32.mrf.mxu2  ;;  %v6012_v32 = vpop.f32.mrf.mxu3  ;;  %v5946_v55 = vadd.f32 %v5945_v31, %v12867_v3  ;;  %v5965_v54 = vadd.f32 %v5964_v39, %v12869_v59 }
 0xb67   :  { %v5994_v1 = vadd.f32 %v5993_v12, %v12899_v7  ;;  %v6013_v25 = vadd.f32 %v6012_v32, %v12905_v57  ;;  %v5943_v7 = vadd.f32 %v5942_v11, %v12863_v10  ;;  %v5962_v57 = vadd.f32 %v5961_v36, %v12865_v45 }
 0xb68   :  { %v13205_v51 = vmax.f32 %v5946_v55, 0.0  ;;  %v13207_v42 = vmax.f32 %v5965_v54, 0.0  ;;  %v8057_v54 = vpack.i.bf16 %v13181_v2, %v13179_v30 }
 0xb69   :  { %v13189_v18 = vmax.f32 %v5994_v1, 0.0  ;;  %v13191_v5 = vmax.f32 %v6013_v25, 0.0  ;;  %v13212_v50 = vmax.f32 %v5943_v7, 0.0  ;;  %v13214_v35 = vmax.f32 %v5962_v57, 0.0 }
 0xb6a   :  { %v6097_v15 = vpack.c.bf16 %v13207_v42, %v13205_v51 }
 0xb6b   :  { %v6102_v3 = vpack.c.bf16 %v13191_v5, %v13189_v18  ;;  %v8072_v59 = vpack.i.bf16 %v13191_v5, %v13177_v29  ;;  %v6096_v11 = vpack.c.bf16 %v13214_v35, %v13212_v50  ;;  %v8062_v55 = vpack.i.bf16 %v13189_v18, %v13175_v20 }
 0xb6c   :  { %v6131_v46 = vunpack.c.l.b16 %v6097_v15  ;;  %v6132_v62 = vunpack.c.h.b16 %v6097_v15 }
 0xb6d   :  { %v6153_v6 = vunpack.c.l.b16 %v6102_v3  ;;  %v6154_v10 = vunpack.c.h.b16 %v6102_v3  ;;  %8073 = vrot.lane.b32.xlu2 %v8072_v59, %s8144_s0  ;;  %v5947_v45 = vpop.f32.mrf.mxu0  ;;  %v5966_v8 = vpop.f32.mrf.mxu1  ;;  %v6129_v32 = vunpack.c.l.b16 %v6096_v11  ;;  %v6130_v1 = vunpack.c.h.b16 %v6096_v11 }
 0xb6e   :  { %v5948_v44 = vadd.f32 %v5947_v45, %v12871_v56  ;;  %v5967_v16 = vadd.f32 %v5966_v8, %v12873_v17  ;;  %v13226_v56 = vmax.f32 %v5941_v22, 0.0  ;;  %v13228_v17 = vmax.f32 %v5960_v48, 0.0 }
 0xb6f   :  { %v13216_v33 = vpack.c.b16 %v6153_v6, %v6151_v4  ;;  %v13218_v58 = vpack.c.b16 %v6154_v10, %v6152_v47 }
 0xb70   :  { %v13222_v37 = vmax.f32 %v5948_v44, 0.0  ;;  %v13224_v41 = vmax.f32 %v5967_v16, 0.0  ;;  %v8077_v36 = vpack.i.bf16 %v13214_v35, %v13228_v17  ;;  %v6095_v31 = vpack.c.bf16 %v13228_v17, %v13226_v56 }
 0xb71   :  { %6205 = vmatpush.bf16.msrb.mxu0 %v13216_v33  ;;  %6224 = vmatpush.bf16.msrb.mxu1 %v13218_v58  ;;  %v8067_v7 = vpack.i.bf16 %v13212_v50, %v13226_v56 }
 0xb72   :  { %v6098_v23 = vpack.c.bf16 %v13224_v41, %v13222_v37  ;;  %v8047_v52 = vpack.i.bf16 %v13224_v41, %v13207_v42  ;;  %v8042_v34 = vpack.i.bf16 %v13222_v37, %v13205_v51  ;;  %v6127_v25 = vunpack.c.l.b16 %v6095_v31 }
 0xb73   :  { %v6128_v49 = vunpack.c.h.b16 %v6095_v31 }
 0xb74   :  { %8048 = vrot.lane.b32.xlu1 %v8047_v52, %s8145_s19  ;;  %8043 = vrot.lane.b32.xlu0 %v8042_v34, %s8145_s19  ;;  %v6133_v61 = vunpack.c.l.b16 %v6098_v23  ;;  %v6134_v9 = vunpack.c.h.b16 %v6098_v23  ;;  %v13263_v14 = vpack.c.b16 %v6129_v32, %v6127_v25 }
 0xb75   :  { %8078 = vrot.lane.b32.xlu2 %v8077_v36, %s8145_s19  ;;  %6206 = vmatpush.bf16.msrb.mxu0 %v13242_v13  ;;  %v13267_v53 = vpack.c.b16 %v6130_v1, %v6128_v49 }
 0xb76   :  { %6225 = vmatpush.bf16.msrb.mxu1 %v13244_v38  ;;  %v13253_v39 = vpack.c.b16 %v6133_v61, %v6131_v46  ;;  %v13255_v12 = vpack.c.b16 %v6134_v9, %v6132_v62 }
 0xb79   :  { %6207 = vmatpush.bf16.msrb.mxu0 %v13253_v39 }
 0xb7a   :  { %6226 = vmatpush.bf16.msrb.mxu1 %v13255_v12 }
 0xb7c   :  { %8063 = vrot.lane.b32.xlu1 %v8062_v55, %s8144_s0  ;;  %8058 = vrot.lane.b32.xlu0 %v8057_v54, %s8144_s0 }
 0xb7d   :  { %6208 = vmatpush.bf16.msrb.mxu0 %v13263_v14 }
 0xb7e   :  { %6227 = vmatpush.bf16.msrb.mxu1 %v13267_v53 }
 0xb84   :  { %8068 = vrot.lane.b32.xlu1 %v8067_v7, %s8145_s19 }
 0xbb7   :  { %v8054_v57 = vpop.permute.xlu2 %8053 }
 0xbb8   :  { %v8056_v25 = vunpack.i.h.bf16 %v8054_v57  ;;  %v8055_v55 = vunpack.i.l.bf16 %v8054_v57 }
 0xbc7   :  { %v8074_v6 = vpop.permute.xlu2 %8073 }
 0xbc8   :  { %v8076_v36 = vunpack.i.h.bf16 %v8074_v6  ;;  %v8075_v46 = vunpack.i.l.bf16 %v8074_v6 }
 0xbcf   :  { %v8079_v6 = vpop.permute.xlu2 %8078 }
 0xbe6   :  { %v8049_v3 = vpop.permute.xlu1 %8048  ;;  %v8044_v59 = vpop.permute.xlu0 %8043 }
 0xbe7   :  { %v8051_v22 = vunpack.i.h.bf16 %v8049_v3  ;;  %v8050_v48 = vunpack.i.l.bf16 %v8049_v3  ;;  %v8046_v4 = vunpack.i.h.bf16 %v8044_v59  ;;  %v8045_v47 = vunpack.i.l.bf16 %v8044_v59 }
 0xbe9   :  { %v6078_v10 = vsel %vm253_vm4, %v8046_v4, %v8051_v22  ;;  %v6082_v45 = vsel %vm253_vm4, %v8051_v22, %v8046_v4  ;;  %v6077_v8 = vsel %vm253_vm4, %v8045_v47, %v8050_v48  ;;  %v6081_v44 = vsel %vm253_vm4, %v8050_v48, %v8045_v47 }
 0xbea   :  { %v6089_v16 = vsel %vm8708_vm5, %v6078_v10, 0.0  ;;  %v6090_v0 = vsel %vm8714_vm6, %v6082_v45, 0.0  ;;  %v6087_v19 = vsel %vm8708_vm5, %v6077_v8, 0.0  ;;  %v6088_v15 = vsel %vm8714_vm6, %v6081_v44, 0.0 }
 0xbeb   :  { %v6166_v60 = vpack.c.bf16 %v6090_v0, %v6089_v16  ;;  %v6165_v40 = vpack.c.bf16 %v6088_v15, %v6087_v19 }
 0xbed   :  { %v6175_v23 = vunpack.c.l.b16 %v6165_v40  ;;  %v6177_v52 = vunpack.c.l.b16 %v6166_v60  ;;  %v6176_v34 = vunpack.c.h.b16 %v6165_v40  ;;  %v6178_v11 = vunpack.c.h.b16 %v6166_v60 }
 0xbee   :  { %v8064_v61 = vpop.permute.xlu1 %8063  ;;  %v8059_v62 = vpop.permute.xlu0 %8058 }
 0xbef   :  { %v8066_v9 = vunpack.i.h.bf16 %v8064_v61  ;;  %v8065_v31 = vunpack.i.l.bf16 %v8064_v61  ;;  %v8061_v32 = vunpack.i.h.bf16 %v8059_v62  ;;  %v8060_v1 = vunpack.i.l.bf16 %v8059_v62 }
 0xbf0   :  { %v6181_v54 = vpack.c.b16 %v6177_v52, %v6175_v23  ;;  %v6182_v49 = vpack.c.b16 %v6178_v11, %v6176_v34  ;;  %v8081_v52 = vunpack.i.h.bf16 %v8079_v6  ;;  %v8080_v34 = vunpack.i.l.bf16 %v8079_v6 }
 0xbf1   :  { %v6045_v7 = vsel %vm216_vm1, %v8065_v31, %v8075_v46  ;;  %v6046_v3 = vsel %vm216_vm1, %v8066_v9, %v8076_v36  ;;  %v6049_v59 = vsel %vm216_vm1, %v8075_v46, %v8065_v31  ;;  %v6050_v22 = vsel %vm216_vm1, %v8076_v36, %v8066_v9 }
 0xbf2   :  { %v6055_v48 = vsel %vm8626_vm2, %v6049_v59, 0.0  ;;  %v6056_v57 = vsel %vm8632_vm3, %v6045_v7, 0.0  ;;  %v6057_v4 = vsel %vm8626_vm2, %v6050_v22, 0.0  ;;  %v6058_v47 = vsel %vm8632_vm3, %v6046_v3, 0.0  ;;  %6243 = vmatpush.bf16.msrb.mxu2 %v6181_v54  ;;  %6262 = vmatpush.bf16.msrb.mxu3 %v6182_v49 }
 0xbf3   :  { %v6044_v10 = vsel %vm216_vm1, %v8056_v25, %v8061_v32  ;;  %v6048_v45 = vsel %vm216_vm1, %v8061_v32, %v8056_v25  ;;  %v6043_v8 = vsel %vm216_vm1, %v8055_v55, %v8060_v1  ;;  %v6047_v44 = vsel %vm216_vm1, %v8060_v1, %v8055_v55 }
 0xbf4   :  { %v6053_v16 = vsel %vm8626_vm2, %v6048_v45, 0.0  ;;  %v6054_v0 = vsel %vm8632_vm3, %v6044_v10, 0.0  ;;  %v6051_v19 = vsel %vm8626_vm2, %v6047_v44, 0.0  ;;  %v6052_v15 = vsel %vm8632_vm3, %v6043_v8, 0.0 }
 0xbf5   :  { %v6093_v60 = vpack.c.bf16 %v6056_v57, %v6055_v48  ;;  %v6094_v40 = vpack.c.bf16 %v6058_v47, %v6057_v4  ;;  %v6091_v23 = vpack.c.bf16 %v6052_v15, %v6051_v19  ;;  %v6092_v36 = vpack.c.bf16 %v6054_v0, %v6053_v16 }
 0xbf6   :  { %v8069_v11 = vpop.permute.xlu1 %8068 }
 0xbf7   :  { %v8071_v46 = vunpack.i.h.bf16 %v8069_v11  ;;  %v8070_v61 = vunpack.i.l.bf16 %v8069_v11  ;;  %v6111_v62 = vunpack.c.l.b16 %v6093_v60  ;;  %v6113_v9 = vunpack.c.l.b16 %v6094_v40 }
 0xbf8   :  { %v6112_v31 = vunpack.c.h.b16 %v6093_v60  ;;  %v6114_v32 = vunpack.c.h.b16 %v6094_v40  ;;  %v6107_v1 = vunpack.c.l.b16 %v6091_v23  ;;  %v6109_v4 = vunpack.c.l.b16 %v6092_v36  ;;  %v7522_v60 = vld [vmem:[%s13610_s9] sm:$0xff] }
 0xbf9   :  { %v6076_v25 = vsel %vm253_vm4, %v8071_v46, %v8081_v52  ;;  %v6080_v55 = vsel %vm253_vm4, %v8081_v52, %v8071_v46  ;;  %v6075_v54 = vsel %vm253_vm4, %v8070_v61, %v8080_v34  ;;  %v6079_v49 = vsel %vm253_vm4, %v8080_v34, %v8070_v61 }
 0xbfa   :  { %v6085_v7 = vsel %vm8708_vm5, %v6076_v25, 0.0  ;;  %v6086_v3 = vsel %vm8714_vm6, %v6080_v55, 0.0  ;;  %v6083_v59 = vsel %vm8708_vm5, %v6075_v54, 0.0  ;;  %v6084_v22 = vsel %vm8714_vm6, %v6079_v49, 0.0 }
 0xbfb   :  { %v6117_v48 = vpack.c.b16 %v6113_v9, %v6111_v62  ;;  %v6118_v57 = vpack.c.b16 %v6114_v32, %v6112_v31  ;;  %v6108_v47 = vunpack.c.h.b16 %v6091_v23  ;;  %v6110_v6 = vunpack.c.h.b16 %v6092_v36  ;;  %v7523_v23 = vld [vmem:[%s13610_s9 + $0x8] sm:$0xff] }
 0xbfc   :  { %v6163_v10 = vpack.c.bf16 %v6084_v22, %v6083_v59  ;;  %v6164_v45 = vpack.c.bf16 %v6086_v3, %v6085_v7  ;;  %v6115_v0 = vpack.c.b16 %v6109_v4, %v6107_v1 }
 0xbfd   :  { %6209 = vmatpush.bf16.msrb.mxu0 %v6117_v48  ;;  %6228 = vmatpush.bf16.msrb.mxu1 %v6118_v57  ;;  %v6116_v19 = vpack.c.b16 %v6110_v6, %v6108_v47 }
 0xbfe   :  { %v6171_v8 = vunpack.c.l.b16 %v6163_v10  ;;  %v6173_v44 = vunpack.c.l.b16 %v6164_v45  ;;  %v6172_v16 = vunpack.c.h.b16 %v6163_v10  ;;  %v6174_v15 = vunpack.c.h.b16 %v6164_v45 }
 0xc00   :  { %v6179_v40 = vpack.c.b16 %v6173_v44, %v6171_v8  ;;  %v6180_v52 = vpack.c.b16 %v6174_v15, %v6172_v16 }
 0xc01   :  { %6210 = vmatpush.bf16.msrb.mxu0 %v6115_v0  ;;  %6229 = vmatpush.bf16.msrb.mxu1 %v6116_v19 }
 0xc02   :  { %6244 = vmatpush.bf16.msrb.mxu2 %v6179_v40  ;;  %6263 = vmatpush.bf16.msrb.mxu3 %v6180_v52 }
 0xc04   :  { %7363 = vmatmul.msk.bf16.vlgmr.msrb.gmra.mxu0 %vm428_vm0, %v7522_v60  ;;  %7365 = vmatmul.msk.bf16.vlgmr.msrb.gmra.mxu1 %vm428_vm0, %v7522_v60 }
 0xc06   :  { %6245 = vmatpush.bf16.msrb.mxu2 %v13216_v33  ;;  %6264 = vmatpush.bf16.msrb.mxu3 %v13218_v58 }
 0xc0a   :  { %6246 = vmatpush.bf16.msrb.mxu2 %v13242_v13  ;;  %6265 = vmatpush.bf16.msrb.mxu3 %v13244_v38 }
 0xc0e   :  { %6247 = vmatpush.bf16.msrb.mxu2 %v13253_v39  ;;  %6266 = vmatpush.bf16.msrb.mxu3 %v13255_v12 }
 0xc12   :  { %6248 = vmatpush.bf16.msrb.mxu2 %v13263_v14  ;;  %6267 = vmatpush.bf16.msrb.mxu3 %v13267_v53 }
 0xc14   :  { %7364 = vmatmul.msk.bf16.gmra.mxu0 %vm428_vm0, %v7523_v23  ;;  %7366 = vmatmul.msk.bf16.gmra.mxu1 %vm428_vm0, %v7523_v23 }
 0xc15   :  { %7367 = vmatmul.msk.bf16.vlgmr.msrb.gmra.mxu2 %vm428_vm0, %v7522_v60  ;;  %7369 = vmatmul.msk.bf16.vlgmr.msrb.gmra.mxu3 %vm428_vm0, %v7522_v60 }
 0xc25   :  { %7368 = vmatmul.msk.bf16.gmra.mxu2 %vm428_vm0, %v7523_v23  ;;  %7370 = vmatmul.msk.bf16.gmra.mxu3 %vm428_vm0, %v7523_v23 }
 0xc81   :  { %v13360_v33 = vpop.f32.mrf.mxu0  ;;  %v13362_v58 = vpop.f32.mrf.mxu1 }
 0xc82   :  { %v6279_v39 = vmax.f32 %v13360_v33, 0.0  ;;  %v6280_v7 = vmax.f32 %v13362_v58, 0.0 }
 0xc89   :  { %v13364_v13 = vpop.f32.mrf.mxu0  ;;  %v6233_v38 = vpop.f32.mrf.mxu1 }
 0xc8a   :  { %v6281_v12 = vmax.f32 %v13364_v13, 0.0  ;;  %v6282_v55 = vmax.f32 %v6233_v38, 0.0 }
 0xc8c   :  { %v8092_v14 = vpack.i.bf16 %v6281_v12, %v6279_v39  ;;  %v8097_v3 = vpack.i.bf16 %v6282_v55, %v6280_v7 }
 0xc8e   :  { %8093 = vrot.lane.b32.xlu2 %v8092_v14, %s8145_s19 }
 0xc91   :  { %v6217_v53 = vpop.f32.mrf.mxu0  ;;  %v6236_v34 = vpop.f32.mrf.mxu1 }
 0xc92   :  { %v6283_v61 = vmax.f32 %v6217_v53, 0.0  ;;  %v6284_v31 = vmax.f32 %v6236_v34, 0.0 }
 0xc98   :  { %v6250_v11 = vpop.f32.mrf.mxu2  ;;  %v6269_v46 = vpop.f32.mrf.mxu3 }
 0xc99   :  { %v6219_v36 = vpop.f32.mrf.mxu0  ;;  %v6238_v9 = vpop.f32.mrf.mxu1  ;;  %v6287_v57 = vmax.f32 %v6250_v11, 0.0  ;;  %v6288_v8 = vmax.f32 %v6269_v46, 0.0 }
 0xc9a   :  { %v6285_v62 = vmax.f32 %v6219_v36, 0.0  ;;  %v6286_v32 = vmax.f32 %v6238_v9, 0.0  ;;  %v6369_v9 = vpack.c.bf16 %v6284_v31, %v6283_v61 }
 0xc9b   :  { %v6371_v23 = vpack.c.bf16 %v6288_v8, %v6287_v57 }
 0xc9c   :  { %v8082_v1 = vpack.i.bf16 %v6285_v62, %v6283_v61  ;;  %v8087_v25 = vpack.i.bf16 %v6286_v32, %v6284_v31  ;;  %v6370_v53 = vpack.c.bf16 %v6286_v32, %v6285_v62  ;;  %v6367_v32 = vpack.c.bf16 %v6280_v7, %v6279_v39 }
 0xc9d   :  { %v6403_v61 = vunpack.c.l.b16 %v6369_v9  ;;  %v6404_v31 = vunpack.c.h.b16 %v6369_v9 }
 0xc9e   :  { %8083 = vrot.lane.b32.xlu0 %v8082_v1, %s8145_s19  ;;  %8088 = vrot.lane.b32.xlu1 %v8087_v25, %s8145_s19  ;;  %v6419_v1 = vunpack.c.l.b16 %v6371_v23  ;;  %v6420_v25 = vunpack.c.h.b16 %v6371_v23 }
 0xca0   :  { %v6252_v54 = vpop.f32.mrf.mxu2  ;;  %v6271_v49 = vpop.f32.mrf.mxu3 }
 0xca1   :  { %v6289_v59 = vmax.f32 %v6252_v54, 0.0  ;;  %v6290_v10 = vmax.f32 %v6271_v49, 0.0  ;;  %v6368_v54 = vpack.c.bf16 %v6282_v55, %v6281_v12 }
 0xca3   :  { %v8112_v4 = vpack.i.bf16 %v6289_v59, %v6287_v57  ;;  %v6372_v60 = vpack.c.bf16 %v6290_v10, %v6289_v59  ;;  %v8117_v49 = vpack.i.bf16 %v6290_v10, %v6288_v8  ;;  %v6406_v59 = vunpack.c.h.b16 %v6370_v53 }
 0xca4   :  { %v6402_v12 = vunpack.c.h.b16 %v6368_v54 }
 0xca5   :  { %v6421_v34 = vunpack.c.l.b16 %v6372_v60  ;;  %v6422_v11 = vunpack.c.h.b16 %v6372_v60  ;;  %v13395_v57 = vpack.c.b16 %v6406_v59, %v6404_v31 }
 0xca6   :  { %8098 = vrot.lane.b32.xlu0 %v8097_v3, %s8145_s19  ;;  %v6405_v3 = vunpack.c.l.b16 %v6370_v53 }
 0xca7   :  { %v13386_v62 = vpack.c.b16 %v6422_v11, %v6420_v25 }
 0xca8   :  { %v6255_v22 = vpop.f32.mrf.mxu2  ;;  %v6274_v48 = vpop.f32.mrf.mxu3  ;;  %v13393_v55 = vpack.c.b16 %v6405_v3, %v6403_v61 }
 0xca9   :  { %v6291_v47 = vmax.f32 %v6255_v22, 0.0  ;;  %v6292_v6 = vmax.f32 %v6274_v48, 0.0  ;;  %v13384_v22 = vpack.c.b16 %v6421_v34, %v6419_v1  ;;  %v6401_v48 = vunpack.c.l.b16 %v6368_v54 }
 0xcab   :  { %v6373_v0 = vpack.c.bf16 %v6292_v6, %v6291_v47 }
 0xcad   :  { %v6423_v58 = vunpack.c.l.b16 %v6373_v0  ;;  %v6424_v13 = vunpack.c.h.b16 %v6373_v0 }
 0xcae   :  { %8113 = vrot.lane.b32.xlu0 %v8112_v4, %s8144_s0  ;;  %v6399_v4 = vunpack.c.l.b16 %v6367_v32 }
 0xcb0   :  { %v6257_v45 = vpop.f32.mrf.mxu2  ;;  %v6276_v16 = vpop.f32.mrf.mxu3  ;;  %v13399_v33 = vpack.c.b16 %v6401_v48, %v6399_v4 }
 0xcb1   :  { %v6293_v44 = vmax.f32 %v6257_v45, 0.0  ;;  %v6294_v19 = vmax.f32 %v6276_v16, 0.0 }
 0xcb3   :  { %v8102_v15 = vpack.i.bf16 %v6293_v44, %v6291_v47  ;;  %v8107_v40 = vpack.i.bf16 %v6294_v19, %v6292_v6  ;;  %v6374_v52 = vpack.c.bf16 %v6294_v19, %v6293_v44  ;;  %v6400_v47 = vunpack.c.h.b16 %v6367_v32 }
 0xcb5   :  { %8103 = vrot.lane.b32.xlu1 %v8102_v15, %s8144_s0  ;;  %v6425_v38 = vunpack.c.l.b16 %v6374_v52  ;;  %v6426_v14 = vunpack.c.h.b16 %v6374_v52  ;;  %8108 = vrot.lane.b32.xlu2 %v8107_v40, %s8144_s0  ;;  %v13401_v39 = vpack.c.b16 %v6402_v12, %v6400_v47 }
 0xcb7   :  { %v13378_v36 = vpack.c.b16 %v6425_v38, %v6423_v58  ;;  %v13380_v46 = vpack.c.b16 %v6426_v14, %v6424_v13 }
 0xcb9   :  { %6477 = vmatpush.bf16.msra.mxu0 %v13378_v36  ;;  %6496 = vmatpush.bf16.msra.mxu1 %v13380_v46 }
 0xcbd   :  { %8118 = vrot.lane.b32.xlu1 %v8117_v49, %s8144_s0  ;;  %6478 = vmatpush.bf16.msra.mxu0 %v13384_v22 }
 0xcbe   :  { %6497 = vmatpush.bf16.msra.mxu1 %v13386_v62 }
 0xcc1   :  { %6479 = vmatpush.bf16.msra.mxu0 %v13393_v55 }
 0xcc2   :  { %6498 = vmatpush.bf16.msra.mxu1 %v13395_v57 }
 0xcc5   :  { %6480 = vmatpush.bf16.msra.mxu0 %v13399_v33 }
 0xcc6   :  { %6499 = vmatpush.bf16.msra.mxu1 %v13401_v39 }
 0xce8   :  { %v8094_v58 = vpop.permute.xlu2 %8093 }
 0xce9   :  { %v8096_v1 = vunpack.i.h.bf16 %v8094_v58  ;;  %v8095_v25 = vunpack.i.l.bf16 %v8094_v58 }
 0xd10   :  { %v8084_v7 = vpop.permute.xlu0 %8083  ;;  %v8089_v45 = vpop.permute.xlu1 %8088 }
 0xd11   :  { %v8086_v6 = vunpack.i.h.bf16 %v8084_v7  ;;  %v8085_v10 = vunpack.i.l.bf16 %v8084_v7  ;;  %v8091_v8 = vunpack.i.h.bf16 %v8089_v45  ;;  %v8090_v44 = vunpack.i.l.bf16 %v8089_v45 }
 0xd13   :  { %v6349_v16 = vsel %vm253_vm4, %v8085_v10, %v8090_v44  ;;  %v6350_v0 = vsel %vm253_vm4, %v8086_v6, %v8091_v8  ;;  %v6353_v19 = vsel %vm253_vm4, %v8090_v44, %v8085_v10  ;;  %v6354_v15 = vsel %vm253_vm4, %v8091_v8, %v8086_v6 }
 0xd14   :  { %v6359_v60 = vsel %vm8708_vm5, %v6349_v16, 0.0  ;;  %v6360_v40 = vsel %vm8714_vm6, %v6353_v19, 0.0  ;;  %v6361_v52 = vsel %vm8708_vm5, %v6350_v0, 0.0  ;;  %v6362_v23 = vsel %vm8714_vm6, %v6354_v15, 0.0  ;;  %v8109_v15 = vpop.permute.xlu2 %8108 }
 0xd15   :  { %v6437_v13 = vpack.c.bf16 %v6360_v40, %v6359_v60  ;;  %v6438_v38 = vpack.c.bf16 %v6362_v23, %v6361_v52  ;;  %v8111_v40 = vunpack.i.h.bf16 %v8109_v15  ;;  %v8110_v52 = vunpack.i.l.bf16 %v8109_v15  ;;  %v7540_v15 = vld [vmem:[%s13612_s11 + $0x70] sm:$0xff] }
 0xd17   :  { %v6447_v53 = vunpack.c.l.b16 %v6437_v13  ;;  %v6449_v34 = vunpack.c.l.b16 %v6438_v38  ;;  %v6448_v11 = vunpack.c.h.b16 %v6437_v13  ;;  %v6450_v9 = vunpack.c.h.b16 %v6438_v38 }
 0xd18   :  { %v8099_v14 = vpop.permute.xlu0 %8098 }
 0xd19   :  { %v8101_v54 = vunpack.i.h.bf16 %v8099_v14  ;;  %v8100_v49 = vunpack.i.l.bf16 %v8099_v14  ;;  %v6453_v3 = vpack.c.b16 %v6449_v34, %v6447_v53  ;;  %v6454_v59 = vpack.c.b16 %v6450_v9, %v6448_v11 }
 0xd1b   :  { %v6348_v32 = vsel %vm253_vm4, %v8096_v1, %v8101_v54  ;;  %v6352_v61 = vsel %vm253_vm4, %v8101_v54, %v8096_v1  ;;  %v6347_v31 = vsel %vm253_vm4, %v8095_v25, %v8100_v49  ;;  %v6351_v48 = vsel %vm253_vm4, %v8100_v49, %v8095_v25  ;;  %6523 = vmatpush.bf16.msra.mxu2 %v6453_v3 }
 0xd1c   :  { %v6357_v12 = vsel %vm8708_vm5, %v6348_v32, 0.0  ;;  %v6358_v4 = vsel %vm8714_vm6, %v6352_v61, 0.0  ;;  %v6355_v47 = vsel %vm8708_vm5, %v6347_v31, 0.0  ;;  %v6356_v7 = vsel %vm8714_vm6, %v6351_v48, 0.0  ;;  %6542 = vmatpush.bf16.msra.mxu3 %v6454_v59 }
 0xd1d   :  { %v6435_v6 = vpack.c.bf16 %v6356_v7, %v6355_v47  ;;  %v6436_v10 = vpack.c.bf16 %v6358_v4, %v6357_v12 }
 0xd1f   :  { %v6443_v45 = vunpack.c.l.b16 %v6435_v6  ;;  %v6445_v8 = vunpack.c.l.b16 %v6436_v10  ;;  %v6444_v44 = vunpack.c.h.b16 %v6435_v6  ;;  %v6446_v16 = vunpack.c.h.b16 %v6436_v10 }
 0xd20   :  { %v8114_v34 = vpop.permute.xlu0 %8113 }
 0xd21   :  { %v6451_v0 = vpack.c.b16 %v6445_v8, %v6443_v45  ;;  %v6452_v19 = vpack.c.b16 %v6446_v16, %v6444_v44  ;;  %v8115_v49 = vunpack.i.l.bf16 %v8114_v34 }
 0xd23   :  { %6524 = vmatpush.bf16.msra.mxu2 %v6451_v0  ;;  %6543 = vmatpush.bf16.msra.mxu3 %v6452_v19  ;;  %v7532_v19 = vld [vmem:[%s13612_s11 + $0x30] sm:$0xff] }
 0xd27   :  { %6525 = vmatpush.bf16.msra.mxu2 %v13378_v36  ;;  %6544 = vmatpush.bf16.msra.mxu3 %v13380_v46  ;;  %v8104_v27 = vpop.permute.xlu1 %8103 }
 0xd28   :  { %v8106_v28 = vunpack.i.h.bf16 %v8104_v27  ;;  %v8105_v60 = vunpack.i.l.bf16 %v8104_v27  ;;  %v7531_v27 = vld [vmem:[%s13612_s11 + $0x28] sm:$0xff] }
 0xd2a   :  { %v6318_v23 = vsel %vm216_vm1, %v8106_v28, %v8111_v40  ;;  %v6322_v58 = vsel %vm216_vm1, %v8111_v40, %v8106_v28  ;;  %v6317_v13 = vsel %vm216_vm1, %v8105_v60, %v8110_v52  ;;  %v6321_v38 = vsel %vm216_vm1, %v8110_v52, %v8105_v60  ;;  %v7539_v28 = vld [vmem:[%s13612_s11 + $0x68] sm:$0xff]  ;;  %v7530_v40 = vld [vmem:[%s13612_s11 + $0x20] sm:$0xff] }
 0xd2b   :  { %6526 = vmatpush.bf16.msra.mxu2 %v13384_v22  ;;  %6545 = vmatpush.bf16.msra.mxu3 %v13386_v62  ;;  %v6329_v36 = vsel %vm8626_vm2, %v6322_v58, 0.0  ;;  %v6330_v46 = vsel %vm8632_vm3, %v6318_v23, 0.0  ;;  %v6327_v14 = vsel %vm8626_vm2, %v6321_v38, 0.0  ;;  %v6328_v53 = vsel %vm8632_vm3, %v6317_v13, 0.0  ;;  %v7525_v60 = vld [vmem:[%s13611_s10 + $0x8] sm:$0xff]  ;;  %v7538_v52 = vld [vmem:[%s13612_s11 + $0x60] sm:$0xff] }
 0xd2c   :  { %v6365_v11 = vpack.c.bf16 %v6328_v53, %v6327_v14  ;;  %v6366_v9 = vpack.c.bf16 %v6330_v46, %v6329_v36  ;;  %v8116_v62 = vunpack.i.h.bf16 %v8114_v34  ;;  %v7529_v23 = vld [vmem:[%s13612_s11 + $0x18] sm:$0xff]  ;;  %v7528_v13 = vld [vmem:[%s13612_s11 + $0x10] sm:$0xff]  ;;  %v7527_v36 = vld [vmem:[%s13612_s11 + $0x8] sm:$0xff] }
 0xd2d   :  { %v7537_v58 = vld [vmem:[%s13612_s11 + $0x58] sm:$0xff]  ;;  %v7536_v38 = vld [vmem:[%s13612_s11 + $0x50] sm:$0xff]  ;;  %v7535_v46 = vld [vmem:[%s13612_s11 + $0x48] sm:$0xff] }
 0xd2e   :  { %v6383_v1 = vunpack.c.l.b16 %v6365_v11  ;;  %v6385_v25 = vunpack.c.l.b16 %v6366_v9  ;;  %v6384_v22 = vunpack.c.h.b16 %v6365_v11  ;;  %v6386_v54 = vunpack.c.h.b16 %v6366_v9  ;;  %v7526_v14 = vld [vmem:[%s13612_s11] sm:$0xff] }
 0xd2f   :  { %6527 = vmatpush.bf16.msra.mxu2 %v13393_v55  ;;  %6546 = vmatpush.bf16.msra.mxu3 %v13395_v57  ;;  %v8119_v3 = vpop.permute.xlu1 %8118  ;;  %v7524_v55 = vld [vmem:[%s13611_s10] sm:$0xff] }
 0xd30   :  { %v8121_v59 = vunpack.i.h.bf16 %v8119_v3  ;;  %v8120_v32 = vunpack.i.l.bf16 %v8119_v3  ;;  %v6389_v61 = vpack.c.b16 %v6385_v25, %v6383_v1  ;;  %v6390_v31 = vpack.c.b16 %v6386_v54, %v6384_v22  ;;  %v7534_v53 = vld [vmem:[%s13612_s11 + $0x40] sm:$0xff]  ;;  %s8146_s11 = smov 120  }
 0xd32   :  { %v6315_v48 = vsel %vm216_vm1, %v8115_v49, %v8120_v32  ;;  %v6316_v12 = vsel %vm216_vm1, %v8116_v62, %v8121_v59  ;;  %v6319_v4 = vsel %vm216_vm1, %v8120_v32, %v8115_v49  ;;  %v6320_v47 = vsel %vm216_vm1, %v8121_v59, %v8116_v62  ;;  %6481 = vmatpush.bf16.msra.mxu0 %v6389_v61 }
 0xd33   :  { %v6323_v57 = vsel %vm8626_vm2, %v6319_v4, 0.0  ;;  %v6324_v7 = vsel %vm8632_vm3, %v6315_v48, 0.0  ;;  %v6325_v6 = vsel %vm8626_vm2, %v6320_v47, 0.0  ;;  %v6326_v10 = vsel %vm8632_vm3, %v6316_v12, 0.0  ;;  %6528 = vmatpush.bf16.msra.mxu2 %v13399_v33  ;;  %6547 = vmatpush.bf16.msra.mxu3 %v13401_v39 }
 0xd34   :  { %6500 = vmatpush.bf16.msra.mxu1 %v6390_v31  ;;  %v6363_v26 = vpack.c.bf16 %v6324_v7, %v6323_v57  ;;  %v6364_v45 = vpack.c.bf16 %v6326_v10, %v6325_v6 }
 0xd36   :  { %7383 = vmatmul.msk.bf16.vlgmr.msra.gmra.mxu2 %vm428_vm0, %v7524_v55  ;;  %7385 = vmatmul.msk.bf16.vlgmr.msra.gmra.mxu3 %vm428_vm0, %v7524_v55  ;;  %v6379_v8 = vunpack.c.l.b16 %v6363_v26  ;;  %v6381_v44 = vunpack.c.l.b16 %v6364_v45  ;;  %v6380_v16 = vunpack.c.h.b16 %v6363_v26  ;;  %v6382_v0 = vunpack.c.h.b16 %v6364_v45 }
 0xd38   :  { %v6387_v33 = vpack.c.b16 %v6381_v44, %v6379_v8  ;;  %v6388_v39 = vpack.c.b16 %v6382_v0, %v6380_v16 }
 0xd3a   :  { %6482 = vmatpush.bf16.msra.mxu0 %v6387_v33  ;;  %6501 = vmatpush.bf16.msra.mxu1 %v6388_v39 }
 0xd3d   :  { %7379 = vmatmul.msk.bf16.vlgmr.msra.gmra.mxu0 %vm428_vm0, %v7524_v55  ;;  %7381 = vmatmul.msk.bf16.vlgmr.msra.gmra.mxu1 %vm428_vm0, %v7524_v55 }
 0xd3e   :  { %6707 = vmatpush.bf16.msrb.mxu0 %v7533_v63  ;;  %6726 = vmatpush.bf16.msrb.mxu1 %v7541_v43 }
 0xd42   :  { %6708 = vmatpush.bf16.msrb.mxu0 %v7532_v19  ;;  %6727 = vmatpush.bf16.msrb.mxu1 %v7540_v15 }
 0xd46   :  { %6709 = vmatpush.bf16.msrb.mxu0 %v7531_v27  ;;  %6728 = vmatpush.bf16.msrb.mxu1 %v7539_v28 }
 0xd47   :  { %7384 = vmatmul.msk.bf16.gmra.mxu2 %vm428_vm0, %v7525_v60  ;;  %7386 = vmatmul.msk.bf16.gmra.mxu3 %vm428_vm0, %v7525_v60 }
 0xd4a   :  { %6710 = vmatpush.bf16.msrb.mxu0 %v7530_v40  ;;  %6729 = vmatpush.bf16.msrb.mxu1 %v7538_v52 }
 0xd4d   :  { %7380 = vmatmul.msk.bf16.gmra.mxu0 %vm428_vm0, %v7525_v60  ;;  %7382 = vmatmul.msk.bf16.gmra.mxu1 %vm428_vm0, %v7525_v60 }
 0xd4e   :  { %6711 = vmatpush.bf16.msrb.mxu0 %v7529_v23  ;;  %6730 = vmatpush.bf16.msrb.mxu1 %v7537_v58 }
 0xd52   :  { %6712 = vmatpush.bf16.msrb.mxu0 %v7528_v13  ;;  %6731 = vmatpush.bf16.msrb.mxu1 %v7536_v38 }
 0xd56   :  { %6713 = vmatpush.bf16.msrb.mxu0 %v7527_v36  ;;  %6732 = vmatpush.bf16.msrb.mxu1 %v7535_v46 }
 0xd5a   :  { %6714 = vmatpush.bf16.msrb.mxu0 %v7526_v14  ;;  %6733 = vmatpush.bf16.msrb.mxu1 %v7534_v53 }
 0xdb9   :  { %v6530_v34 = vpop.f32.mrf.mxu2  ;;  %v6549_v11 = vpop.f32.mrf.mxu3 }
 0xdba   :  { %v6484_v9 = vpop.f32.mrf.mxu0  ;;  %v6503_v1 = vpop.f32.mrf.mxu1  ;;  %v6531_v54 = vadd.f32 %v6530_v34, %v13164_v21  ;;  %v6550_v62 = vadd.f32 %v6549_v11, %v13179_v30 }
 0xdbb   :  { %v6485_v25 = vadd.f32 %v6484_v9, %v13226_v56  ;;  %v6504_v22 = vadd.f32 %v6503_v1, %v13228_v17 }
 0xdbc   :  { %v6559_v47 = vmax.f32 %v6531_v54, 0.0  ;;  %v6560_v17 = vmax.f32 %v6550_v62, 0.0 }
 0xdbd   :  { %v6513_v48 = vmax.f32 %v6485_v25, 0.0  ;;  %v6514_v12 = vmax.f32 %v6504_v22, 0.0 }
 0xdbf   :  { %v6567_v7 = vmax.f32 %v6513_v48, %v6559_v47  ;;  %v6568_v6 = vmax.f32 %v6514_v12, %v6560_v17  ;;  %v7543_v47 = vld [vmem:[%s13613_s12 + $0x8] sm:$0xff] }
 0xdc1   :  { %v6532_v49 = vpop.f32.mrf.mxu2  ;;  %v6551_v3 = vpop.f32.mrf.mxu3 }
 0xdc2   :  { %v6533_v59 = vadd.f32 %v6532_v49, %v13166_v24  ;;  %v6552_v32 = vadd.f32 %v6551_v3, %v13181_v2  ;;  %v6486_v61 = vpop.f32.mrf.mxu0  ;;  %v6505_v31 = vpop.f32.mrf.mxu1 }
 0xdc3   :  { %v6487_v4 = vadd.f32 %v6486_v61, %v13212_v50  ;;  %v6506_v56 = vadd.f32 %v6505_v31, %v13214_v35 }
 0xdc4   :  { %v6561_v55 = vmax.f32 %v6533_v59, 0.0  ;;  %v6562_v21 = vmax.f32 %v6552_v32, 0.0 }
 0xdc5   :  { %v6515_v57 = vmax.f32 %v6487_v4, 0.0  ;;  %v6516_v30 = vmax.f32 %v6506_v56, 0.0  ;;  %v7545_v4 = vld [vmem:[%s13613_s12 + $0x18] sm:$0xff]  ;;  %v7544_v56 = vld [vmem:[%s13613_s12 + $0x10] sm:$0xff] }
 0xdc6   :  { %6875 = vmatpush.bf16.msrb.mxu2 %v7545_v4 }
 0xdc7   :  { %v6569_v10 = vmax.f32 %v6515_v57, %v6561_v55  ;;  %v6570_v24 = vmax.f32 %v6516_v30, %v6562_v21  ;;  %v7542_v55 = vld [vmem:[%s13613_s12] sm:$0xff]  ;;  %v7553_v21 = vld [vmem:[%s13615_s14 + $0x38] sm:$0xff]  ;;  %v7552_v57 = vld [vmem:[%s13615_s14 + $0x30] sm:$0xff] }
 0xdc8   :  { %6953 = vmatpush.bf16.msrb.mxu3 %v7553_v21  ;;  %v7551_v30 = vld [vmem:[%s13615_s14 + $0x28] sm:$0xff] }
 0xdc9   :  { %v6575_v26 = vpack.c.bf16 %v6569_v10, %v6567_v7  ;;  %v6576_v2 = vpack.c.bf16 %v6570_v24, %v6568_v6  ;;  %v7550_v7 = vld [vmem:[%s13615_s14 + $0x20] sm:$0xff]  ;;  %v7549_v6 = vld [vmem:[%s13615_s14 + $0x18] sm:$0xff]  ;;  %v7548_v10 = vld [vmem:[%s13615_s14 + $0x10] sm:$0xff] }
 0xdca   :  { %v6535_v45 = vpop.f32.mrf.mxu2  ;;  %v6554_v8 = vpop.f32.mrf.mxu3  ;;  %6876 = vmatpush.bf16.msrb.mxu2 %v7544_v56  ;;  %v7547_v24 = vld [vmem:[%s13615_s14 + $0x8] sm:$0xff] }
 0xdcb   :  { %v6489_v44 = vpop.f32.mrf.mxu0  ;;  %v6508_v16 = vpop.f32.mrf.mxu1  ;;  %6715 = vmatmul.bf16.vlgmr.msrb.gmra.mxu0 %v6575_v26  ;;  %6734 = vmatmul.bf16.vlgmr.msrb.gmra.mxu1 %v6576_v2  ;;  %v6536_v0 = vadd.f32 %v6535_v45, %v13175_v20  ;;  %v6555_v63 = vadd.f32 %v6554_v8, %v13177_v29 }
 0xdcc   :  { %v6490_v50 = vadd.f32 %v6489_v44, %v13205_v51  ;;  %v6509_v35 = vadd.f32 %v6508_v16, %v13207_v42  ;;  %6954 = vmatpush.bf16.msrb.mxu3 %v7552_v57  ;;  %v7546_v44 = vld [vmem:[%s13615_s14] sm:$0xff] }
 0xdcd   :  { %v6563_v52 = vmax.f32 %v6536_v0, 0.0  ;;  %v6564_v42 = vmax.f32 %v6555_v63, 0.0  ;;  %v8132_v16 = vld [vmem:[%s13614_s13] ss:$0 sm:$0xff] }
 0xdce   :  { %v6517_v28 = vmax.f32 %v6490_v50, 0.0  ;;  %v6518_v60 = vmax.f32 %v6509_v35, 0.0  ;;  %6877 = vmatpush.bf16.msrb.mxu2 %v7543_v47 }
 0xdd0   :  { %v6571_v13 = vmax.f32 %v6517_v28, %v6563_v52  ;;  %v6572_v38 = vmax.f32 %v6518_v60, %v6564_v42  ;;  %6955 = vmatpush.bf16.msrb.mxu3 %v7551_v30 }
 0xdd2   :  { %v6537_v43 = vpop.f32.mrf.mxu2  ;;  %v6556_v33 = vpop.f32.mrf.mxu3  ;;  %6878 = vmatpush.bf16.msrb.mxu2 %v7542_v55 }
 0xdd3   :  { %v6538_v39 = vadd.f32 %v6537_v43, %v13189_v18  ;;  %v6557_v19 = vadd.f32 %v6556_v33, %v13191_v5  ;;  %v6491_v15 = vpop.f32.mrf.mxu0  ;;  %v6510_v27 = vpop.f32.mrf.mxu1  ;;  %v8133_v43 = vld [vmem:[%s13616_s15] ss:$0 sm:$0xff] }
 0xdd4   :  { %v6492_v40 = vadd.f32 %v6491_v15, %v13222_v37  ;;  %v6511_v51 = vadd.f32 %v6510_v27, %v13224_v41  ;;  %6956 = vmatpush.bf16.msrb.mxu3 %v7550_v7 }
 0xdd5   :  { %v6565_v23 = vmax.f32 %v6538_v39, 0.0  ;;  %v6566_v20 = vmax.f32 %v6557_v19, 0.0 }
 0xdd6   :  { %v6519_v58 = vmax.f32 %v6492_v40, 0.0  ;;  %v6520_v29 = vmax.f32 %v6511_v51, 0.0 }
 0xdd8   :  { %v6573_v36 = vmax.f32 %v6519_v58, %v6565_v23  ;;  %v6574_v18 = vmax.f32 %v6520_v29, %v6566_v20  ;;  %6957 = vmatpush.bf16.msrb.mxu3 %v7549_v6 }
 0xdda   :  { %v6577_v46 = vpack.c.bf16 %v6573_v36, %v6571_v13  ;;  %v6578_v5 = vpack.c.bf16 %v6574_v18, %v6572_v38 }
 0xddc   :  { %6720 = vmatmul.bf16.gmra.mxu0 %v6577_v46  ;;  %6739 = vmatmul.bf16.gmra.mxu1 %v6578_v5 }
 0xddd   :  { %6958 = vmatpush.bf16.msrb.mxu3 %v7548_v10 }
 0xde1   :  { %6959 = vmatpush.bf16.msrb.mxu3 %v7547_v24 }
 0xde5   :  { %6960 = vmatpush.bf16.msrb.mxu3 %v7546_v44 }
 0xe48   :  { %v6716_v14 = vpop.f32.mrf.mxu0  ;;  %v6735_v53 = vpop.f32.mrf.mxu1 }
 0xe49   :  { %v6736_v11 = vadd.f32 %v6735_v53, %v6716_v14 }
 0xe50   :  { %v6718_v34 = vpop.f32.mrf.mxu0  ;;  %v6737_v37 = vpop.f32.mrf.mxu1 }
 0xe51   :  { %v6738_v41 = vadd.f32 %v6737_v37, %v6718_v34 }
 0xe53   :  { %v8122_v9 = vpack.i.bf16 %v6738_v41, %v6736_v11 }
 0xe55   :  { %8123 = vrot.lane.b32.xlu2 %v8122_v9, %s8146_s11 }
 0xe59   :  { %v6721_v1 = vpop.f32.mrf.mxu0  ;;  %v6740_v25 = vpop.f32.mrf.mxu1 }
 0xe5a   :  { %v6741_v62 = vadd.f32 %v6740_v25, %v6721_v1 }
 0xe61   :  { %v6723_v22 = vpop.f32.mrf.mxu0  ;;  %v6742_v54 = vpop.f32.mrf.mxu1 }
 0xe62   :  { %v6743_v49 = vadd.f32 %v6742_v54, %v6723_v22 }
 0xe64   :  { %v8127_v3 = vpack.i.bf16 %v6743_v49, %v6741_v62 }
 0xe66   :  { %8128 = vrot.lane.b32.xlu0 %v8127_v3, %s8146_s11 }
 0xe88   :  { %6745 = vxpose.xlu0.b32.start [1/4] (short) (narrow) %v6736_v11, 8 }
 0xe90   :  { %6746 = vxpose.xlu0.b32.cont [2/4] (short) (narrow) %v6738_v41, 8 }
 0xe98   :  { %6747 = vxpose.xlu0.b32.cont [3/4] (short) (narrow) %v6741_v62, 8 }
 0xea0   :  { %6748 = vxpose.xlu0.b32.end [4/4] (short) (narrow) %v6743_v49, 8 }
 0xeaf   :  { %v8124_v59 = vpop.permute.xlu2 %8123 }
 0xeb0   :  { %v8125_v32 = vunpack.i.l.bf16 %v8124_v59  ;;  %v8126_v61 = vunpack.i.h.bf16 %v8124_v59 }
 0xeb2   :  { %6793 = vxpose.xlu1.b32.start [1/4] (short) (narrow) %v8125_v32, 8 }
 0xeba   :  { %6794 = vxpose.xlu1.b32.cont [2/4] (short) (narrow) %v8126_v61, 8 }
 0xed8   :  { %v8129_v31 = vpop.permute.xlu0 %8128 }
 0xed9   :  { %v8130_v48 = vunpack.i.l.bf16 %v8129_v31  ;;  %v8131_v12 = vunpack.i.h.bf16 %v8129_v31 }
 0xedb   :  { %6795 = vxpose.xlu1.b32.cont [3/4] (short) (narrow) %v8130_v48, 8 }
 0xee3   :  { %6796 = vxpose.xlu1.b32.end [4/4] (short) (narrow) %v8131_v12, 8 }
 0xf2c   :  { %v6761_v26 = vpop.trf.xlu0 }
 0xf6f   :  { %v6809_v17 = vpop.trf.xlu1 }
 0xf70   :  { %6826 = vrot.lane.b32.xlu2 %v6809_v17, %s8147_s27 }
 0xfca   :  { %v6827_v2 = vpop.permute.xlu2 %6826 }
 0xfcb   :  { %v6829_v45 = vsel %vm5392_vm7, %v6761_v26, %v6827_v2 }
 0xfcc   :  { %v6830_v8 = vpack.c.bf16 %v6829_v45, %v6829_v45 }
 0xfce   :  { %7467 = vmatmul.msk.bf16.vlgmr.msrb.gmra.mxu2 %vm6867_vm8, %v6830_v8 }
0x1051   :  { %v6880_v50 = vpop.f32.mrf.mxu2 }
0x1052   :  { %v6881_v35 = vadd.f32 %v8132_v16, %v6880_v50 }
0x1054   :  { %v6884_v0 = vpack.c.bf16 %v6881_v35, %v6881_v35 }
0x1056   :  { %6961 = vmatmul.bf16.vlgmr.msrb.gmra.mxu3 %v6884_v0 }
0x1059   :  { %v6882_v63 = vpop.f32.mrf.mxu2 }
0x10d9   :  { %v6962_v33 = vpop.f32.mrf.mxu3 }
0x10da   :  { %v6963_v39 = vadd.f32 %v8133_v43, %v6962_v33 }
0x10dc   :  { %6966 = vst [vmem:[%s13617_s16] sm:$0xff] %v6963_v39 }
0x10e1   :  { %v6964_v19 = vpop.f32.mrf.mxu3 }

</bundles_post_ra>
